<compile_context>
chip_gen: v7x
topology: tpu7x:2x2x1
jax: 0.10.0
libtpu: 0.0.40
codegen_flags: <defaults>
</compile_context>

<pallas_src>
import jax
import jax.numpy as jnp
from jax import lax
from jax.experimental import pallas as pl
from jax.experimental.pallas import tpu as pltpu

BN_EPS = 1e-5            # nn.BatchNorm2d default
CP = 128                 # every channel / output axis padded to 128 lanes
CH = 128                 # rows per in-kernel matmul chunk

# Layer geometry: 28x28 input, k=5, pad=2, pool 2 -> 14x14 -> pool 2 -> 7x7.
H1 = W1 = 28
R1 = 896                 # 784 conv-output rows (row = i*28+j) padded to 7*128
K1 = 32                  # 25 taps (Cin=1) padded to 32 K-lanes
H2 = W2 = 14
R2 = 256                 # 196 conv-output rows (row = i*14+j) padded to 2*128
K2 = 512                 # 25 taps * 16 ch = 400 padded to 512 K-lanes
ROWS_FC = 64             # 49 pooled positions padded to 64 rows per image
K_FC = 2048              # 49 * 32 = 1568 padded to 2048


# ----------------------------- Pallas kernels ------------------------------

def _conv_stats_kernel(x_ref, w_ref, y_ref, s_ref, ss_ref):
    """conv (single K-packed dot per chunk) + raw bf16 output + BN sums."""
    rows = y_ref.shape[0]
    s = jnp.zeros((1, CP), jnp.float32)
    ss = jnp.zeros((1, CP), jnp.float32)
    for c0 in range(0, rows, CH):                       # rows % CH == 0
        x = x_ref[pl.ds(c0, CH), :]                     # (CH, K) bf16
        y = jnp.dot(x, w_ref[...], preferred_element_type=jnp.float32)
        y_ref[pl.ds(c0, CH), :] = y.astype(y_ref.dtype)
        s = s + jnp.sum(y, axis=0, keepdims=True)
        ss = ss + jnp.sum(y * y, axis=0, keepdims=True)
    s_ref[...] = s.reshape(1, 1, CP)
    ss_ref[...] = ss.reshape(1, 1, CP)


def _bn_pool_kernel_l1(y_ref, scale_ref, shift_ref, out_ref, vbuf):
    """BN affine + ReLU + 2x2 maxpool; emits pooled (14,14,128) per image."""
    b = out_ref.shape[0] // 14
    scale = scale_ref[...]
    shift = shift_ref[...]
    for im in range(b):
        for i2 in range(14):
            base = im * R1 + (2 * i2) * W1
            a = y_ref[pl.ds(base, W1), :]               # spatial row 2*i2
            c = y_ref[pl.ds(base + W1, W1), :]          # spatial row 2*i2+1
            ya = jnp.maximum(a * scale + shift, 0.0)
            yc = jnp.maximum(c * scale + shift, 0.0)
            vbuf[0:W1, :] = jnp.maximum(ya, yc)         # vertical max (28,128)
            ev = vbuf[pl.ds(0, 14, stride=2), :]
            od = vbuf[pl.ds(1, 14, stride=2), :]
            out_ref[im * 14 + i2, :, :] = jnp.maximum(ev, od).astype(out_ref.dtype)


def _bn_pool_pack_kernel_l2(y_ref, scale_ref, shift_ref, out_ref, vbuf):
    """BN affine + ReLU + 2x2 maxpool; emits FC rows (row p=h*7+w, lanes=ch)."""
    b = out_ref.shape[0] // ROWS_FC
    scale = scale_ref[...]
    shift = shift_ref[...]
    for im in range(b):
        for i2 in range(7):
            base = im * R2 + (2 * i2) * W2
            a = y_ref[pl.ds(base, W2), :]
            c = y_ref[pl.ds(base + W2, W2), :]
            ya = jnp.maximum(a * scale + shift, 0.0)
            yc = jnp.maximum(c * scale + shift, 0.0)
            vbuf[0:W2, :] = jnp.maximum(ya, yc)         # vertical max (14,128)
            ev = vbuf[pl.ds(0, 7, stride=2), :]
            od = vbuf[pl.ds(1, 7, stride=2), :]
            out_ref[pl.ds(im * ROWS_FC + i2 * 7, 7), :] = (
                jnp.maximum(ev, od).astype(out_ref.dtype))


def _fc_kernel(x_ref, w_ref, b_ref, o_ref):
    o_ref[...] = (jnp.dot(x_ref[...], w_ref[...],
                          preferred_element_type=jnp.float32) + b_ref[...])


# ------------------------------- wrappers -----------------------------------

_CPARAMS = pltpu.CompilerParams(dimension_semantics=("parallel",),
                                vmem_limit_bytes=32 * 1024 * 1024)


def _pick_block(n, cap=8):
    """Largest divisor of n that is <= min(cap, n//2): >=2 grid steps for v7x."""
    b = min(cap, max(1, n // 2))
    while n % b:
        b -= 1
    return b


def _conv_stats(x2d, w_p, *, n, rows_per_img):
    b = _pick_block(n)
    nb = n // b
    r = b * rows_per_img
    return pl.pallas_call(
        _conv_stats_kernel,
        out_shape=(jax.ShapeDtypeStruct((n * rows_per_img, CP), jnp.bfloat16),
                   jax.ShapeDtypeStruct((nb, 1, CP), jnp.float32),
                   jax.ShapeDtypeStruct((nb, 1, CP), jnp.float32)),
        grid=(nb,),
        in_specs=[pl.BlockSpec((r, x2d.shape[1]), lambda i: (i, 0)),
                  pl.BlockSpec(w_p.shape, lambda i: (0, 0))],
        out_specs=(pl.BlockSpec((r, CP), lambda i: (i, 0)),
                   pl.BlockSpec((1, 1, CP), lambda i: (i, 0, 0)),
                   pl.BlockSpec((1, 1, CP), lambda i: (i, 0, 0))),
        compiler_params=_CPARAMS,
    )(x2d, w_p)


def _bn_affine(s, ss, count, gamma_p, beta_p):
    mean = jnp.sum(s[:, 0, :], axis=0) / count
    var = jnp.maximum(jnp.sum(ss[:, 0, :], axis=0) / count - mean * mean, 0.0)
    inv = lax.rsqrt(var + BN_EPS)
    scale = gamma_p * inv
    shift = beta_p - mean * scale
    return (scale.reshape(1, CP).astype(jnp.float32),
            shift.reshape(1, CP).astype(jnp.float32))


def _bn_pool_l1(y1, scale, shift, n):
    b = _pick_block(n)
    return pl.pallas_call(
        _bn_pool_kernel_l1,
        out_shape=jax.ShapeDtypeStruct((n * 14, 14, CP), jnp.bfloat16),
        grid=(n // b,),
        in_specs=[pl.BlockSpec((b * R1, CP), lambda i: (i, 0)),
                  pl.BlockSpec((1, CP), lambda i: (0, 0)),
                  pl.BlockSpec((1, CP), lambda i: (0, 0))],
        out_specs=pl.BlockSpec((b * 14, 14, CP), lambda i: (i, 0, 0)),
        scratch_shapes=[pltpu.VMEM((32, CP), jnp.float32)],
        compiler_params=_CPARAMS,
    )(y1, scale, shift)


def _bn_pool_pack_l2(y2, scale, shift, n):
    b = _pick_block(n)
    return pl.pallas_call(
        _bn_pool_pack_kernel_l2,
        out_shape=jax.ShapeDtypeStruct((n * ROWS_FC, CP), jnp.bfloat16),
        grid=(n // b,),
        in_specs=[pl.BlockSpec((b * R2, CP), lambda i: (i, 0)),
                  pl.BlockSpec((1, CP), lambda i: (0, 0)),
                  pl.BlockSpec((1, CP), lambda i: (0, 0))],
        out_specs=pl.BlockSpec((b * ROWS_FC, CP), lambda i: (i, 0)),
        scratch_shapes=[pltpu.VMEM((16, CP), jnp.float32)],
        compiler_params=_CPARAMS,
    )(y2, scale, shift)


def _fc_block_size(n):
    if n <= 512:
        return n
    for bm in range(512, 7, -1):
        if n % bm == 0 and bm % 8 == 0:
            return bm
    return n


def _linear(x2d, w_p, b_p):
    n, k = x2d.shape
    bm = _fc_block_size(n)
    return pl.pallas_call(
        _fc_kernel,
        out_shape=jax.ShapeDtypeStruct((n, CP), jnp.float32),
        grid=(n // bm,),
        in_specs=[pl.BlockSpec((bm, k), lambda i: (i, 0)),
                  pl.BlockSpec((k, CP), lambda i: (0, 0)),
                  pl.BlockSpec((1, CP), lambda i: (0, 0))],
        out_specs=pl.BlockSpec((bm, CP), lambda i: (i, 0)),
        compiler_params=_CPARAMS,
    )(x2d, w_p, b_p)


def cnn_forward(x, p):
    n = x.shape[0]
    f32, bf16 = jnp.float32, jnp.bfloat16

    # ---- layer-1 im2col (Cin=1): (N,1,28,28) -> (N*896, 32) bf16 ----------
    xs = x.reshape(n, H1, W1).astype(f32)
    xp = jnp.pad(xs, ((0, 0), (2, 2), (2, 2)))                     # (N,32,32)
    pats = [xp[:, di:di + H1, dj:dj + W1] for di in range(5) for dj in range(5)]
    x1 = jnp.stack(pats, axis=-1).reshape(n, H1 * W1, 25)
    x1 = jnp.pad(x1, ((0, 0), (0, R1 - H1 * W1), (0, K1 - 25))).astype(bf16)
    x1 = x1.reshape(n * R1, K1)

    # ---- layer 1: conv + stats, then fused BN/ReLU/maxpool ----------------
    y1, s1, ss1 = _conv_stats(x1, p['w1p'], n=n, rows_per_img=R1)
    sc1, sh1 = _bn_affine(s1, ss1, float(n * H1 * W1), p['g16p'], p['be16p'])
    p1 = _bn_pool_l1(y1, sc1, sh1, n).reshape(n, 14, 14, CP)       # ch 0..15

    # ---- layer-2 K-packing: (N,14,14,16) -> (N*256, 512) bf16 -------------
    p1v = p1[..., :16]
    p1pad = jnp.pad(p1v, ((0, 0), (2, 2), (2, 2), (0, 0)))         # (N,18,18,16)
    cols = [p1pad[:, di:di + H2, dj:dj + W2, :]
            for di in range(5) for dj in range(5)]
    x2 = jnp.concatenate(cols, axis=-1).reshape(n, H2 * W2, 400)
    x2 = jnp.pad(x2, ((0, 0), (0, R2 - H2 * W2), (0, K2 - 400)))
    x2 = x2.reshape(n * R2, K2)

    # ---- layer 2 -----------------------------------------------------------
    y2, s2, ss2 = _conv_stats(x2, p['w2p'], n=n, rows_per_img=R2)
    sc2, sh2 = _bn_affine(s2, ss2, float(n * H2 * W2), p['g32p'], p['be32p'])
    a2 = _bn_pool_pack_l2(y2, sc2, sh2, n)                         # (N*64,128)

    # ---- FC (K shrunk to 2048: flat index = (h*7+w)*32 + c) ---------------
    a2 = a2.reshape(n, ROWS_FC, CP)[:, :49, :32].reshape(n, 49 * 32)
    a2 = jnp.pad(a2, ((0, 0), (0, K_FC - 49 * 32)))
    logits = _linear(a2, p['wfc_p'], p['bfc_p'])
    return logits[:, :10]


# ------------------------------ parameters ----------------------------------

def _pad_vec(v):
    return jnp.pad(v, (0, CP - v.shape[0])).astype(jnp.float32)


def prepare_params(raw):
    # conv1: (O=16, I=1, 5, 5) -> rows t = di*5+dj, cols o   -> (32, 128)
    w1p = jnp.transpose(raw['w1'], (2, 3, 1, 0)).reshape(25, 16)
    w1p = jnp.pad(w1p, ((0, K1 - 25), (0, CP - 16))).astype(jnp.bfloat16)
    # conv2: (O=32, I=16, 5, 5) -> rows t*16+c, cols o       -> (512, 128)
    w2p = jnp.transpose(raw['w2'], (2, 3, 1, 0)).reshape(400, 32)
    w2p = jnp.pad(w2p, ((0, K2 - 400), (0, CP - 32))).astype(jnp.bfloat16)
    # fc: torch flatten order is (c, h, w); our packing is row p*32+c, p=h*7+w.
    wf = raw['wfc'].reshape(10, 32, 49)                            # (o, c, p)
    wf = jnp.transpose(wf, (2, 1, 0)).reshape(49 * 32, 10)         # (p*32+c, o)
    wf = jnp.pad(wf, ((0, K_FC - 49 * 32), (0, CP - 10))).astype(jnp.bfloat16)
    return {
        'w1p': w1p, 'w2p': w2p, 'wfc_p': wf,
        'g16p': _pad_vec(raw['g16']), 'be16p': _pad_vec(raw['be16']),
        'g32p': _pad_vec(raw['g32']), 'be32p': _pad_vec(raw['be32']),
        'bfc_p': jnp.pad(raw['bfc'], (0, CP - 10)).reshape(1, CP).astype(jnp.float32),
    }


def init_params(key):
    ks = jax.random.split(key, 8)
    return {
        'w1': 0.1 * jax.random.normal(ks[0], (16, 1, 5, 5), jnp.float32),
        'b1': 0.1 * jax.random.normal(ks[1], (16,), jnp.float32),   # cancelled by BN
        'w2': 0.05 * jax.random.normal(ks[2], (32, 16, 5, 5), jnp.float32),
        'b2': 0.1 * jax.random.normal(ks[3], (32,), jnp.float32),   # cancelled by BN
        'wfc': 0.02 * jax.random.normal(ks[4], (10, 32 * 7 * 7), jnp.float32),
        'bfc': 0.1 * jax.random.normal(ks[5], (10,), jnp.float32),
        'g16': 1.0 + 0.1 * jax.random.normal(ks[6], (16,), jnp.float32),
        'be16': jnp.zeros((16,), jnp.float32),
        'g32': 1.0 + 0.1 * jax.random.normal(ks[7], (32,), jnp.float32),
        'be32': jnp.zeros((32,), jnp.float32),
    }


if __name__ == "__main__":
    key = jax.random.PRNGKey(0)
    pkey, xkey = jax.random.split(key)
    params = prepare_params(init_params(pkey))
    # fc = Linear(7*7*32, 10) implies 28x28 single-channel input (28 -> 14 -> 7).
    x = jax.random.normal(xkey, (2, 1, 28, 28), jnp.float32)
    out = jax.block_until_ready(jax.jit(cnn_forward)(x, params))
    assert out.shape == (2, 10) and out.dtype == jnp.float32
    print("KERNEL_OK")
</pallas_src>

<mosaic_0001>
module attributes {stable_mosaic.version = 11 : i64} {
  func.func @_conv_stats_kernel(%arg0: i32, %arg1: memref<896x32xbf16, #tpu.memory_space<vmem>>, %arg2: memref<32x128xbf16, #tpu.memory_space<vmem>>, %arg3: memref<896x128xbf16, #tpu.memory_space<vmem>>, %arg4: memref<1x1x128xf32, #tpu.memory_space<vmem>>, %arg5: memref<1x1x128xf32, #tpu.memory_space<vmem>>) attributes {dimension_semantics = [#tpu.dimension_semantics<parallel>], iteration_bounds = array<i64: 2>, scalar_prefetch = 0 : i64, scratch_operands = 0 : i64, tpu.core_type = #tpu.core_type<tc>, window_params = [{transform_indices = @transform_0, window_bounds = array<i64: 896, 32>}, {pipeline_mode = #tpu.pipeline_mode<synchronous>, transform_indices = @transform_1, window_bounds = array<i64: 32, 128>}, {transform_indices = @transform_2, window_bounds = array<i64: 896, 128>}, {transform_indices = @transform_3, window_bounds = array<i64: 1, 1, 128>}, {transform_indices = @transform_4, window_bounds = array<i64: 1, 1, 128>}]} {
    %cst = arith.constant 0.000000e+00 : f32
    %0 = vector.broadcast %cst : f32 to vector<1x128xf32>
    %cst_0 = arith.constant 0.000000e+00 : f32
    %1 = vector.broadcast %cst_0 : f32 to vector<1x128xf32>
    %c0 = arith.constant 0 : index
    %c0_1 = arith.constant 0 : index
    %2 = vector.load %arg1[%c0, %c0_1] : memref<896x32xbf16, #tpu.memory_space<vmem>>, vector<128x32xbf16>
    %c0_2 = arith.constant 0 : index
    %c0_3 = arith.constant 0 : index
    %3 = vector.load %arg2[%c0_2, %c0_3] : memref<32x128xbf16, #tpu.memory_space<vmem>>, vector<32x128xbf16>
    %cst_4 = arith.constant dense<0.000000e+00> : vector<128x128xf32>
    %4 = tpu.matmul %2, %3, %cst_4 {dimension_numbers = #tpu.dot_dimension_numbers<[1], [0], [0], [1], [0, 0, 1, 1], [], []>} : vector<128x32xbf16>, vector<32x128xbf16>, vector<128x128xf32> -> vector<128x128xf32>
    %5 = arith.truncf %4 : vector<128x128xf32> to vector<128x128xbf16>
    %c0_5 = arith.constant 0 : index
    %c0_6 = arith.constant 0 : index
    %6 = vector.load %arg3[%c0_5, %c0_6] : memref<896x128xbf16, #tpu.memory_space<vmem>>, vector<128x128xbf16>
    tpu.vector_store %arg3[%c0_5, %c0_6], %5 {strides = array<i32>} : memref<896x128xbf16, #tpu.memory_space<vmem>>, vector<128x128xbf16>,
    %cst_7 = arith.constant dense<0.000000e+00> : vector<128xf32>
    %7 = vector.multi_reduction <add>, %4, %cst_7 [0] : vector<128x128xf32> to vector<128xf32>
    %8 = vector.shape_cast %7 : vector<128xf32> to vector<1x128xf32>
    %9 = arith.addf %0, %8 : vector<1x128xf32>
    %10 = arith.mulf %4, %4 : vector<128x128xf32>
    %cst_8 = arith.constant dense<0.000000e+00> : vector<128xf32>
    %11 = vector.multi_reduction <add>, %10, %cst_8 [0] : vector<128x128xf32> to vector<128xf32>
    %12 = vector.shape_cast %11 : vector<128xf32> to vector<1x128xf32>
    %13 = arith.addf %1, %12 : vector<1x128xf32>
    %c128 = arith.constant 128 : index
    %c0_9 = arith.constant 0 : index
    %14 = vector.load %arg1[%c128, %c0_9] : memref<896x32xbf16, #tpu.memory_space<vmem>>, vector<128x32xbf16>
    %c0_10 = arith.constant 0 : index
    %c0_11 = arith.constant 0 : index
    %15 = vector.load %arg2[%c0_10, %c0_11] : memref<32x128xbf16, #tpu.memory_space<vmem>>, vector<32x128xbf16>
    %cst_12 = arith.constant dense<0.000000e+00> : vector<128x128xf32>
    %16 = tpu.matmul %14, %15, %cst_12 {dimension_numbers = #tpu.dot_dimension_numbers<[1], [0], [0], [1], [0, 0, 1, 1], [], []>} : vector<128x32xbf16>, vector<32x128xbf16>, vector<128x128xf32> -> vector<128x128xf32>
    %17 = arith.truncf %16 : vector<128x128xf32> to vector<128x128xbf16>
    %c128_13 = arith.constant 128 : index
    %c0_14 = arith.constant 0 : index
    %18 = vector.load %arg3[%c128_13, %c0_14] : memref<896x128xbf16, #tpu.memory_space<vmem>>, vector<128x128xbf16>
    tpu.vector_store %arg3[%c128_13, %c0_14], %17 {strides = array<i32>} : memref<896x128xbf16, #tpu.memory_space<vmem>>, vector<128x128xbf16>,
    %cst_15 = arith.constant dense<0.000000e+00> : vector<128xf32>
    %19 = vector.multi_reduction <add>, %16, %cst_15 [0] : vector<128x128xf32> to vector<128xf32>
    %20 = vector.shape_cast %19 : vector<128xf32> to vector<1x128xf32>
    %21 = arith.addf %9, %20 : vector<1x128xf32>
    %22 = arith.mulf %16, %16 : vector<128x128xf32>
    %cst_16 = arith.constant dense<0.000000e+00> : vector<128xf32>
    %23 = vector.multi_reduction <add>, %22, %cst_16 [0] : vector<128x128xf32> to vector<128xf32>
    %24 = vector.shape_cast %23 : vector<128xf32> to vector<1x128xf32>
    %25 = arith.addf %13, %24 : vector<1x128xf32>
    %c256 = arith.constant 256 : index
    %c0_17 = arith.constant 0 : index
    %26 = vector.load %arg1[%c256, %c0_17] : memref<896x32xbf16, #tpu.memory_space<vmem>>, vector<128x32xbf16>
    %c0_18 = arith.constant 0 : index
    %c0_19 = arith.constant 0 : index
    %27 = vector.load %arg2[%c0_18, %c0_19] : memref<32x128xbf16, #tpu.memory_space<vmem>>, vector<32x128xbf16>
    %cst_20 = arith.constant dense<0.000000e+00> : vector<128x128xf32>
    %28 = tpu.matmul %26, %27, %cst_20 {dimension_numbers = #tpu.dot_dimension_numbers<[1], [0], [0], [1], [0, 0, 1, 1], [], []>} : vector<128x32xbf16>, vector<32x128xbf16>, vector<128x128xf32> -> vector<128x128xf32>
    %29 = arith.truncf %28 : vector<128x128xf32> to vector<128x128xbf16>
    %c256_21 = arith.constant 256 : index
    %c0_22 = arith.constant 0 : index
    %30 = vector.load %arg3[%c256_21, %c0_22] : memref<896x128xbf16, #tpu.memory_space<vmem>>, vector<128x128xbf16>
    tpu.vector_store %arg3[%c256_21, %c0_22], %29 {strides = array<i32>} : memref<896x128xbf16, #tpu.memory_space<vmem>>, vector<128x128xbf16>,
    %cst_23 = arith.constant dense<0.000000e+00> : vector<128xf32>
    %31 = vector.multi_reduction <add>, %28, %cst_23 [0] : vector<128x128xf32> to vector<128xf32>
    %32 = vector.shape_cast %31 : vector<128xf32> to vector<1x128xf32>
    %33 = arith.addf %21, %32 : vector<1x128xf32>
    %34 = arith.mulf %28, %28 : vector<128x128xf32>
    %cst_24 = arith.constant dense<0.000000e+00> : vector<128xf32>
    %35 = vector.multi_reduction <add>, %34, %cst_24 [0] : vector<128x128xf32> to vector<128xf32>
    %36 = vector.shape_cast %35 : vector<128xf32> to vector<1x128xf32>
    %37 = arith.addf %25, %36 : vector<1x128xf32>
    %c384 = arith.constant 384 : index
    %c0_25 = arith.constant 0 : index
    %38 = vector.load %arg1[%c384, %c0_25] : memref<896x32xbf16, #tpu.memory_space<vmem>>, vector<128x32xbf16>
    %c0_26 = arith.constant 0 : index
    %c0_27 = arith.constant 0 : index
    %39 = vector.load %arg2[%c0_26, %c0_27] : memref<32x128xbf16, #tpu.memory_space<vmem>>, vector<32x128xbf16>
    %cst_28 = arith.constant dense<0.000000e+00> : vector<128x128xf32>
    %40 = tpu.matmul %38, %39, %cst_28 {dimension_numbers = #tpu.dot_dimension_numbers<[1], [0], [0], [1], [0, 0, 1, 1], [], []>} : vector<128x32xbf16>, vector<32x128xbf16>, vector<128x128xf32> -> vector<128x128xf32>
    %41 = arith.truncf %40 : vector<128x128xf32> to vector<128x128xbf16>
    %c384_29 = arith.constant 384 : index
    %c0_30 = arith.constant 0 : index
    %42 = vector.load %arg3[%c384_29, %c0_30] : memref<896x128xbf16, #tpu.memory_space<vmem>>, vector<128x128xbf16>
    tpu.vector_store %arg3[%c384_29, %c0_30], %41 {strides = array<i32>} : memref<896x128xbf16, #tpu.memory_space<vmem>>, vector<128x128xbf16>,
    %cst_31 = arith.constant dense<0.000000e+00> : vector<128xf32>
    %43 = vector.multi_reduction <add>, %40, %cst_31 [0] : vector<128x128xf32> to vector<128xf32>
    %44 = vector.shape_cast %43 : vector<128xf32> to vector<1x128xf32>
    %45 = arith.addf %33, %44 : vector<1x128xf32>
    %46 = arith.mulf %40, %40 : vector<128x128xf32>
    %cst_32 = arith.constant dense<0.000000e+00> : vector<128xf32>
    %47 = vector.multi_reduction <add>, %46, %cst_32 [0] : vector<128x128xf32> to vector<128xf32>
    %48 = vector.shape_cast %47 : vector<128xf32> to vector<1x128xf32>
    %49 = arith.addf %37, %48 : vector<1x128xf32>
    %c512 = arith.constant 512 : index
    %c0_33 = arith.constant 0 : index
    %50 = vector.load %arg1[%c512, %c0_33] : memref<896x32xbf16, #tpu.memory_space<vmem>>, vector<128x32xbf16>
    %c0_34 = arith.constant 0 : index
    %c0_35 = arith.constant 0 : index
    %51 = vector.load %arg2[%c0_34, %c0_35] : memref<32x128xbf16, #tpu.memory_space<vmem>>, vector<32x128xbf16>
    %cst_36 = arith.constant dense<0.000000e+00> : vector<128x128xf32>
    %52 = tpu.matmul %50, %51, %cst_36 {dimension_numbers = #tpu.dot_dimension_numbers<[1], [0], [0], [1], [0, 0, 1, 1], [], []>} : vector<128x32xbf16>, vector<32x128xbf16>, vector<128x128xf32> -> vector<128x128xf32>
    %53 = arith.truncf %52 : vector<128x128xf32> to vector<128x128xbf16>
    %c512_37 = arith.constant 512 : index
    %c0_38 = arith.constant 0 : index
    %54 = vector.load %arg3[%c512_37, %c0_38] : memref<896x128xbf16, #tpu.memory_space<vmem>>, vector<128x128xbf16>
    tpu.vector_store %arg3[%c512_37, %c0_38], %53 {strides = array<i32>} : memref<896x128xbf16, #tpu.memory_space<vmem>>, vector<128x128xbf16>,
    %cst_39 = arith.constant dense<0.000000e+00> : vector<128xf32>
    %55 = vector.multi_reduction <add>, %52, %cst_39 [0] : vector<128x128xf32> to vector<128xf32>
    %56 = vector.shape_cast %55 : vector<128xf32> to vector<1x128xf32>
    %57 = arith.addf %45, %56 : vector<1x128xf32>
    %58 = arith.mulf %52, %52 : vector<128x128xf32>
    %cst_40 = arith.constant dense<0.000000e+00> : vector<128xf32>
    %59 = vector.multi_reduction <add>, %58, %cst_40 [0] : vector<128x128xf32> to vector<128xf32>
    %60 = vector.shape_cast %59 : vector<128xf32> to vector<1x128xf32>
    %61 = arith.addf %49, %60 : vector<1x128xf32>
    %c640 = arith.constant 640 : index
    %c0_41 = arith.constant 0 : index
    %62 = vector.load %arg1[%c640, %c0_41] : memref<896x32xbf16, #tpu.memory_space<vmem>>, vector<128x32xbf16>
    %c0_42 = arith.constant 0 : index
    %c0_43 = arith.constant 0 : index
    %63 = vector.load %arg2[%c0_42, %c0_43] : memref<32x128xbf16, #tpu.memory_space<vmem>>, vector<32x128xbf16>
    %cst_44 = arith.constant dense<0.000000e+00> : vector<128x128xf32>
    %64 = tpu.matmul %62, %63, %cst_44 {dimension_numbers = #tpu.dot_dimension_numbers<[1], [0], [0], [1], [0, 0, 1, 1], [], []>} : vector<128x32xbf16>, vector<32x128xbf16>, vector<128x128xf32> -> vector<128x128xf32>
    %65 = arith.truncf %64 : vector<128x128xf32> to vector<128x128xbf16>
    %c640_45 = arith.constant 640 : index
    %c0_46 = arith.constant 0 : index
    %66 = vector.load %arg3[%c640_45, %c0_46] : memref<896x128xbf16, #tpu.memory_space<vmem>>, vector<128x128xbf16>
    tpu.vector_store %arg3[%c640_45, %c0_46], %65 {strides = array<i32>} : memref<896x128xbf16, #tpu.memory_space<vmem>>, vector<128x128xbf16>,
    %cst_47 = arith.constant dense<0.000000e+00> : vector<128xf32>
    %67 = vector.multi_reduction <add>, %64, %cst_47 [0] : vector<128x128xf32> to vector<128xf32>
    %68 = vector.shape_cast %67 : vector<128xf32> to vector<1x128xf32>
    %69 = arith.addf %57, %68 : vector<1x128xf32>
    %70 = arith.mulf %64, %64 : vector<128x128xf32>
    %cst_48 = arith.constant dense<0.000000e+00> : vector<128xf32>
    %71 = vector.multi_reduction <add>, %70, %cst_48 [0] : vector<128x128xf32> to vector<128xf32>
    %72 = vector.shape_cast %71 : vector<128xf32> to vector<1x128xf32>
    %73 = arith.addf %61, %72 : vector<1x128xf32>
    %c768 = arith.constant 768 : index
    %c0_49 = arith.constant 0 : index
    %74 = vector.load %arg1[%c768, %c0_49] : memref<896x32xbf16, #tpu.memory_space<vmem>>, vector<128x32xbf16>
    %c0_50 = arith.constant 0 : index
    %c0_51 = arith.constant 0 : index
    %75 = vector.load %arg2[%c0_50, %c0_51] : memref<32x128xbf16, #tpu.memory_space<vmem>>, vector<32x128xbf16>
    %cst_52 = arith.constant dense<0.000000e+00> : vector<128x128xf32>
    %76 = tpu.matmul %74, %75, %cst_52 {dimension_numbers = #tpu.dot_dimension_numbers<[1], [0], [0], [1], [0, 0, 1, 1], [], []>} : vector<128x32xbf16>, vector<32x128xbf16>, vector<128x128xf32> -> vector<128x128xf32>
    %77 = arith.truncf %76 : vector<128x128xf32> to vector<128x128xbf16>
    %c768_53 = arith.constant 768 : index
    %c0_54 = arith.constant 0 : index
    %78 = vector.load %arg3[%c768_53, %c0_54] : memref<896x128xbf16, #tpu.memory_space<vmem>>, vector<128x128xbf16>
    tpu.vector_store %arg3[%c768_53, %c0_54], %77 {strides = array<i32>} : memref<896x128xbf16, #tpu.memory_space<vmem>>, vector<128x128xbf16>,
    %cst_55 = arith.constant dense<0.000000e+00> : vector<128xf32>
    %79 = vector.multi_reduction <add>, %76, %cst_55 [0] : vector<128x128xf32> to vector<128xf32>
    %80 = vector.shape_cast %79 : vector<128xf32> to vector<1x128xf32>
    %81 = arith.addf %69, %80 : vector<1x128xf32>
    %82 = arith.mulf %76, %76 : vector<128x128xf32>
    %cst_56 = arith.constant dense<0.000000e+00> : vector<128xf32>
    %83 = vector.multi_reduction <add>, %82, %cst_56 [0] : vector<128x128xf32> to vector<128xf32>
    %84 = vector.shape_cast %83 : vector<128xf32> to vector<1x128xf32>
    %85 = arith.addf %73, %84 : vector<1x128xf32>
    %86 = vector.shape_cast %81 : vector<1x128xf32> to vector<1x1x128xf32>
    %c0_57 = arith.constant 0 : index
    %c0_58 = arith.constant 0 : index
    %c0_59 = arith.constant 0 : index
    %87 = vector.load %arg4[%c0_57, %c0_58, %c0_59] : memref<1x1x128xf32, #tpu.memory_space<vmem>>, vector<1x1x128xf32>
    tpu.vector_store %arg4[%c0_57, %c0_58, %c0_59], %86 {strides = array<i32>} : memref<1x1x128xf32, #tpu.memory_space<vmem>>, vector<1x1x128xf32>,
    %88 = vector.shape_cast %85 : vector<1x128xf32> to vector<1x1x128xf32>
    %c0_60 = arith.constant 0 : index
    %c0_61 = arith.constant 0 : index
    %c0_62 = arith.constant 0 : index
    %89 = vector.load %arg5[%c0_60, %c0_61, %c0_62] : memref<1x1x128xf32, #tpu.memory_space<vmem>>, vector<1x1x128xf32>
    tpu.vector_store %arg5[%c0_60, %c0_61, %c0_62], %88 {strides = array<i32>} : memref<1x1x128xf32, #tpu.memory_space<vmem>>, vector<1x1x128xf32>,
    return
  }
  func.func @transform_0(%arg0: i32) -> (i32, i32) {
    %c0_i32 = arith.constant 0 : i32
    %c0_i32_0 = arith.constant 0 : i32
    return %arg0, %c0_i32 : i32, i32
  }
  func.func @transform_1(%arg0: i32) -> (i32, i32) {
    %c0_i32 = arith.constant 0 : i32
    %c0_i32_0 = arith.constant 0 : i32
    %c0_i32_1 = arith.constant 0 : i32
    return %c0_i32, %c0_i32_0 : i32, i32
  }
  func.func @transform_2(%arg0: i32) -> (i32, i32) {
    %c0_i32 = arith.constant 0 : i32
    %c0_i32_0 = arith.constant 0 : i32
    return %arg0, %c0_i32 : i32, i32
  }
  func.func @transform_3(%arg0: i32) -> (i32, i32, i32) {
    %c0_i32 = arith.constant 0 : i32
    %c0_i32_0 = arith.constant 0 : i32
    %c0_i32_1 = arith.constant 0 : i32
    return %arg0, %c0_i32, %c0_i32_0 : i32, i32, i32
  }
  func.func @transform_4(%arg0: i32) -> (i32, i32, i32) {
    %c0_i32 = arith.constant 0 : i32
    %c0_i32_0 = arith.constant 0 : i32
    %c0_i32_1 = arith.constant 0 : i32
    return %arg0, %c0_i32, %c0_i32_0 : i32, i32, i32
  }
}

module attributes {stable_mosaic.version = 11 : i64} {
  func.func @_bn_pool_kernel_l1(%arg0: i32, %arg1: memref<896x128xbf16, #tpu.memory_space<vmem>>, %arg2: memref<1x128xf32, #tpu.memory_space<vmem>>, %arg3: memref<1x128xf32, #tpu.memory_space<vmem>>, %arg4: memref<14x14x128xbf16, #tpu.memory_space<vmem>>, %arg5: memref<32x128xf32, #tpu.memory_space<vmem>>) attributes {dimension_semantics = [#tpu.dimension_semantics<parallel>], iteration_bounds = array<i64: 2>, scalar_prefetch = 0 : i64, scratch_operands = 1 : i64, tpu.core_type = #tpu.core_type<tc>, window_params = [{transform_indices = @transform_0, window_bounds = array<i64: 896, 128>}, {pipeline_mode = #tpu.pipeline_mode<synchronous>, transform_indices = @transform_1, window_bounds = array<i64: 1, 128>}, {pipeline_mode = #tpu.pipeline_mode<synchronous>, transform_indices = @transform_2, window_bounds = array<i64: 1, 128>}, {transform_indices = @transform_3, window_bounds = array<i64: 14, 14, 128>}]} {
    %c0 = arith.constant 0 : index
    %c0_0 = arith.constant 0 : index
    %0 = vector.load %arg2[%c0, %c0_0] : memref<1x128xf32, #tpu.memory_space<vmem>>, vector<1x128xf32>
    %c0_1 = arith.constant 0 : index
    %c0_2 = arith.constant 0 : index
    %1 = vector.load %arg3[%c0_1, %c0_2] : memref<1x128xf32, #tpu.memory_space<vmem>>, vector<1x128xf32>
    %c0_3 = arith.constant 0 : index
    %c0_4 = arith.constant 0 : index
    %2 = vector.load %arg1[%c0_3, %c0_4] : memref<896x128xbf16, #tpu.memory_space<vmem>>, vector<28x128xbf16>
    %c28 = arith.constant 28 : index
    %c0_5 = arith.constant 0 : index
    %3 = vector.load %arg1[%c28, %c0_5] : memref<896x128xbf16, #tpu.memory_space<vmem>>, vector<28x128xbf16>
    %4 = arith.extf %2 : vector<28x128xbf16> to vector<28x128xf32>
    %5 = vector.broadcast %0 : vector<1x128xf32> to vector<28x128xf32>
    %6 = arith.mulf %4, %5 : vector<28x128xf32>
    %7 = vector.broadcast %1 : vector<1x128xf32> to vector<28x128xf32>
    %8 = arith.addf %6, %7 : vector<28x128xf32>
    %cst = arith.constant 0.000000e+00 : f32
    %9 = vector.broadcast %cst : f32 to vector<28x128xf32>
    %10 = arith.maximumf %8, %9 : vector<28x128xf32>
    %11 = arith.extf %3 : vector<28x128xbf16> to vector<28x128xf32>
    %12 = vector.broadcast %0 : vector<1x128xf32> to vector<28x128xf32>
    %13 = arith.mulf %11, %12 : vector<28x128xf32>
    %14 = vector.broadcast %1 : vector<1x128xf32> to vector<28x128xf32>
    %15 = arith.addf %13, %14 : vector<28x128xf32>
    %cst_6 = arith.constant 0.000000e+00 : f32
    %16 = vector.broadcast %cst_6 : f32 to vector<28x128xf32>
    %17 = arith.maximumf %15, %16 : vector<28x128xf32>
    %18 = arith.maximumf %10, %17 : vector<28x128xf32>
    %c0_7 = arith.constant 0 : index
    %c0_8 = arith.constant 0 : index
    %19 = vector.load %arg5[%c0_7, %c0_8] : memref<32x128xf32, #tpu.memory_space<vmem>>, vector<28x128xf32>
    tpu.vector_store %arg5[%c0_7, %c0_8], %18 {strides = array<i32>} : memref<32x128xf32, #tpu.memory_space<vmem>>, vector<28x128xf32>,
    %c0_9 = arith.constant 0 : index
    %c0_10 = arith.constant 0 : index
    %20 = tpu.strided_load %arg5[%c0_9, %c0_10] {strides = array<i32: 2, 1>} : memref<32x128xf32, #tpu.memory_space<vmem>>, vector<14x128xf32>
    %c1 = arith.constant 1 : index
    %c0_11 = arith.constant 0 : index
    %21 = tpu.strided_load %arg5[%c1, %c0_11] {strides = array<i32: 2, 1>} : memref<32x128xf32, #tpu.memory_space<vmem>>, vector<14x128xf32>
    %22 = arith.maximumf %20, %21 : vector<14x128xf32>
    %23 = arith.truncf %22 : vector<14x128xf32> to vector<14x128xbf16>
    %c0_12 = arith.constant 0 : index
    %c0_13 = arith.constant 0 : index
    %c0_14 = arith.constant 0 : index
    %24 = vector.load %arg4[%c0_12, %c0_13, %c0_14] : memref<14x14x128xbf16, #tpu.memory_space<vmem>>, vector<1x14x128xbf16>
    %25 = vector.shape_cast %24 : vector<1x14x128xbf16> to vector<14x128xbf16>
    %26 = vector.shape_cast %23 : vector<14x128xbf16> to vector<1x14x128xbf16>
    tpu.vector_store %arg4[%c0_12, %c0_13, %c0_14], %26 {strides = array<i32>} : memref<14x14x128xbf16, #tpu.memory_space<vmem>>, vector<1x14x128xbf16>,
    %c56 = arith.constant 56 : index
    %c0_15 = arith.constant 0 : index
    %27 = vector.load %arg1[%c56, %c0_15] : memref<896x128xbf16, #tpu.memory_space<vmem>>, vector<28x128xbf16>
    %c84 = arith.constant 84 : index
    %c0_16 = arith.constant 0 : index
    %28 = vector.load %arg1[%c84, %c0_16] : memref<896x128xbf16, #tpu.memory_space<vmem>>, vector<28x128xbf16>
    %29 = arith.extf %27 : vector<28x128xbf16> to vector<28x128xf32>
    %30 = vector.broadcast %0 : vector<1x128xf32> to vector<28x128xf32>
    %31 = arith.mulf %29, %30 : vector<28x128xf32>
    %32 = vector.broadcast %1 : vector<1x128xf32> to vector<28x128xf32>
    %33 = arith.addf %31, %32 : vector<28x128xf32>
    %cst_17 = arith.constant 0.000000e+00 : f32
    %34 = vector.broadcast %cst_17 : f32 to vector<28x128xf32>
    %35 = arith.maximumf %33, %34 : vector<28x128xf32>
    %36 = arith.extf %28 : vector<28x128xbf16> to vector<28x128xf32>
    %37 = vector.broadcast %0 : vector<1x128xf32> to vector<28x128xf32>
    %38 = arith.mulf %36, %37 : vector<28x128xf32>
    %39 = vector.broadcast %1 : vector<1x128xf32> to vector<28x128xf32>
    %40 = arith.addf %38, %39 : vector<28x128xf32>
    %cst_18 = arith.constant 0.000000e+00 : f32
    %41 = vector.broadcast %cst_18 : f32 to vector<28x128xf32>
    %42 = arith.maximumf %40, %41 : vector<28x128xf32>
    %43 = arith.maximumf %35, %42 : vector<28x128xf32>
    %c0_19 = arith.constant 0 : index
    %c0_20 = arith.constant 0 : index
    %44 = vector.load %arg5[%c0_19, %c0_20] : memref<32x128xf32, #tpu.memory_space<vmem>>, vector<28x128xf32>
    tpu.vector_store %arg5[%c0_19, %c0_20], %43 {strides = array<i32>} : memref<32x128xf32, #tpu.memory_space<vmem>>, vector<28x128xf32>,
    %c0_21 = arith.constant 0 : index
    %c0_22 = arith.constant 0 : index
    %45 = tpu.strided_load %arg5[%c0_21, %c0_22] {strides = array<i32: 2, 1>} : memref<32x128xf32, #tpu.memory_space<vmem>>, vector<14x128xf32>
    %c1_23 = arith.constant 1 : index
    %c0_24 = arith.constant 0 : index
    %46 = tpu.strided_load %arg5[%c1_23, %c0_24] {strides = array<i32: 2, 1>} : memref<32x128xf32, #tpu.memory_space<vmem>>, vector<14x128xf32>
    %47 = arith.maximumf %45, %46 : vector<14x128xf32>
    %48 = arith.truncf %47 : vector<14x128xf32> to vector<14x128xbf16>
    %c1_25 = arith.constant 1 : index
    %c0_26 = arith.constant 0 : index
    %c0_27 = arith.constant 0 : index
    %49 = vector.load %arg4[%c1_25, %c0_26, %c0_27] : memref<14x14x128xbf16, #tpu.memory_space<vmem>>, vector<1x14x128xbf16>
    %50 = vector.shape_cast %49 : vector<1x14x128xbf16> to vector<14x128xbf16>
    %51 = vector.shape_cast %48 : vector<14x128xbf16> to vector<1x14x128xbf16>
    tpu.vector_store %arg4[%c1_25, %c0_26, %c0_27], %51 {strides = array<i32>} : memref<14x14x128xbf16, #tpu.memory_space<vmem>>, vector<1x14x128xbf16>,
    %c112 = arith.constant 112 : index
    %c0_28 = arith.constant 0 : index
    %52 = vector.load %arg1[%c112, %c0_28] : memref<896x128xbf16, #tpu.memory_space<vmem>>, vector<28x128xbf16>
    %c140 = arith.constant 140 : index
    %c0_29 = arith.constant 0 : index
    %53 = vector.load %arg1[%c140, %c0_29] : memref<896x128xbf16, #tpu.memory_space<vmem>>, vector<28x128xbf16>
    %54 = arith.extf %52 : vector<28x128xbf16> to vector<28x128xf32>
    %55 = vector.broadcast %0 : vector<1x128xf32> to vector<28x128xf32>
    %56 = arith.mulf %54, %55 : vector<28x128xf32>
    %57 = vector.broadcast %1 : vector<1x128xf32> to vector<28x128xf32>
    %58 = arith.addf %56, %57 : vector<28x128xf32>
    %cst_30 = arith.constant 0.000000e+00 : f32
    %59 = vector.broadcast %cst_30 : f32 to vector<28x128xf32>
    %60 = arith.maximumf %58, %59 : vector<28x128xf32>
    %61 = arith.extf %53 : vector<28x128xbf16> to vector<28x128xf32>
    %62 = vector.broadcast %0 : vector<1x128xf32> to vector<28x128xf32>
    %63 = arith.mulf %61, %62 : vector<28x128xf32>
    %64 = vector.broadcast %1 : vector<1x128xf32> to vector<28x128xf32>
    %65 = arith.addf %63, %64 : vector<28x128xf32>
    %cst_31 = arith.constant 0.000000e+00 : f32
    %66 = vector.broadcast %cst_31 : f32 to vector<28x128xf32>
    %67 = arith.maximumf %65, %66 : vector<28x128xf32>
    %68 = arith.maximumf %60, %67 : vector<28x128xf32>
    %c0_32 = arith.constant 0 : index
    %c0_33 = arith.constant 0 : index
    %69 = vector.load %arg5[%c0_32, %c0_33] : memref<32x128xf32, #tpu.memory_space<vmem>>, vector<28x128xf32>
    tpu.vector_store %arg5[%c0_32, %c0_33], %68 {strides = array<i32>} : memref<32x128xf32, #tpu.memory_space<vmem>>, vector<28x128xf32>,
    %c0_34 = arith.constant 0 : index
    %c0_35 = arith.constant 0 : index
    %70 = tpu.strided_load %arg5[%c0_34, %c0_35] {strides = array<i32: 2, 1>} : memref<32x128xf32, #tpu.memory_space<vmem>>, vector<14x128xf32>
    %c1_36 = arith.constant 1 : index
    %c0_37 = arith.constant 0 : index
    %71 = tpu.strided_load %arg5[%c1_36, %c0_37] {strides = array<i32: 2, 1>} : memref<32x128xf32, #tpu.memory_space<vmem>>, vector<14x128xf32>
    %72 = arith.maximumf %70, %71 : vector<14x128xf32>
    %73 = arith.truncf %72 : vector<14x128xf32> to vector<14x128xbf16>
    %c2 = arith.constant 2 : index
    %c0_38 = arith.constant 0 : index
    %c0_39 = arith.constant 0 : index
    %74 = vector.load %arg4[%c2, %c0_38, %c0_39] : memref<14x14x128xbf16, #tpu.memory_space<vmem>>, vector<1x14x128xbf16>
    %75 = vector.shape_cast %74 : vector<1x14x128xbf16> to vector<14x128xbf16>
    %76 = vector.shape_cast %73 : vector<14x128xbf16> to vector<1x14x128xbf16>
    tpu.vector_store %arg4[%c2, %c0_38, %c0_39], %76 {strides = array<i32>} : memref<14x14x128xbf16, #tpu.memory_space<vmem>>, vector<1x14x128xbf16>,
    %c168 = arith.constant 168 : index
    %c0_40 = arith.constant 0 : index
    %77 = vector.load %arg1[%c168, %c0_40] : memref<896x128xbf16, #tpu.memory_space<vmem>>, vector<28x128xbf16>
    %c196 = arith.constant 196 : index
    %c0_41 = arith.constant 0 : index
    %78 = vector.load %arg1[%c196, %c0_41] : memref<896x128xbf16, #tpu.memory_space<vmem>>, vector<28x128xbf16>
    %79 = arith.extf %77 : vector<28x128xbf16> to vector<28x128xf32>
    %80 = vector.broadcast %0 : vector<1x128xf32> to vector<28x128xf32>
    %81 = arith.mulf %79, %80 : vector<28x128xf32>
    %82 = vector.broadcast %1 : vector<1x128xf32> to vector<28x128xf32>
    %83 = arith.addf %81, %82 : vector<28x128xf32>
    %cst_42 = arith.constant 0.000000e+00 : f32
    %84 = vector.broadcast %cst_42 : f32 to vector<28x128xf32>
    %85 = arith.maximumf %83, %84 : vector<28x128xf32>
    %86 = arith.extf %78 : vector<28x128xbf16> to vector<28x128xf32>
    %87 = vector.broadcast %0 : vector<1x128xf32> to vector<28x128xf32>
    %88 = arith.mulf %86, %87 : vector<28x128xf32>
    %89 = vector.broadcast %1 : vector<1x128xf32> to vector<28x128xf32>
    %90 = arith.addf %88, %89 : vector<28x128xf32>
    %cst_43 = arith.constant 0.000000e+00 : f32
    %91 = vector.broadcast %cst_43 : f32 to vector<28x128xf32>
    %92 = arith.maximumf %90, %91 : vector<28x128xf32>
    %93 = arith.maximumf %85, %92 : vector<28x128xf32>
    %c0_44 = arith.constant 0 : index
    %c0_45 = arith.constant 0 : index
    %94 = vector.load %arg5[%c0_44, %c0_45] : memref<32x128xf32, #tpu.memory_space<vmem>>, vector<28x128xf32>
    tpu.vector_store %arg5[%c0_44, %c0_45], %93 {strides = array<i32>} : memref<32x128xf32, #tpu.memory_space<vmem>>, vector<28x128xf32>,
    %c0_46 = arith.constant 0 : index
    %c0_47 = arith.constant 0 : index
    %95 = tpu.strided_load %arg5[%c0_46, %c0_47] {strides = array<i32: 2, 1>} : memref<32x128xf32, #tpu.memory_space<vmem>>, vector<14x128xf32>
    %c1_48 = arith.constant 1 : index
    %c0_49 = arith.constant 0 : index
    %96 = tpu.strided_load %arg5[%c1_48, %c0_49] {strides = array<i32: 2, 1>} : memref<32x128xf32, #tpu.memory_space<vmem>>, vector<14x128xf32>
    %97 = arith.maximumf %95, %96 : vector<14x128xf32>
    %98 = arith.truncf %97 : vector<14x128xf32> to vector<14x128xbf16>
    %c3 = arith.constant 3 : index
    %c0_50 = arith.constant 0 : index
    %c0_51 = arith.constant 0 : index
    %99 = vector.load %arg4[%c3, %c0_50, %c0_51] : memref<14x14x128xbf16, #tpu.memory_space<vmem>>, vector<1x14x128xbf16>
    %100 = vector.shape_cast %99 : vector<1x14x128xbf16> to vector<14x128xbf16>
    %101 = vector.shape_cast %98 : vector<14x128xbf16> to vector<1x14x128xbf16>
    tpu.vector_store %arg4[%c3, %c0_50, %c0_51], %101 {strides = array<i32>} : memref<14x14x128xbf16, #tpu.memory_space<vmem>>, vector<1x14x128xbf16>,
    %c224 = arith.constant 224 : index
    %c0_52 = arith.constant 0 : index
    %102 = vector.load %arg1[%c224, %c0_52] : memref<896x128xbf16, #tpu.memory_space<vmem>>, vector<28x128xbf16>
    %c252 = arith.constant 252 : index
    %c0_53 = arith.constant 0 : index
    %103 = vector.load %arg1[%c252, %c0_53] : memref<896x128xbf16, #tpu.memory_space<vmem>>, vector<28x128xbf16>
    %104 = arith.extf %102 : vector<28x128xbf16> to vector<28x128xf32>
    %105 = vector.broadcast %0 : vector<1x128xf32> to vector<28x128xf32>
    %106 = arith.mulf %104, %105 : vector<28x128xf32>
    %107 = vector.broadcast %1 : vector<1x128xf32> to vector<28x128xf32>
    %108 = arith.addf %106, %107 : vector<28x128xf32>
    %cst_54 = arith.constant 0.000000e+00 : f32
    %109 = vector.broadcast %cst_54 : f32 to vector<28x128xf32>
    %110 = arith.maximumf %108, %109 : vector<28x128xf32>
    %111 = arith.extf %103 : vector<28x128xbf16> to vector<28x128xf32>
    %112 = vector.broadcast %0 : vector<1x128xf32> to vector<28x128xf32>
    %113 = arith.mulf %111, %112 : vector<28x128xf32>
    %114 = vector.broadcast %1 : vector<1x128xf32> to vector<28x128xf32>
    %115 = arith.addf %113, %114 : vector<28x128xf32>
    %cst_55 = arith.constant 0.000000e+00 : f32
    %116 = vector.broadcast %cst_55 : f32 to vector<28x128xf32>
    %117 = arith.maximumf %115, %116 : vector<28x128xf32>
    %118 = arith.maximumf %110, %117 : vector<28x128xf32>
    %c0_56 = arith.constant 0 : index
    %c0_57 = arith.constant 0 : index
    %119 = vector.load %arg5[%c0_56, %c0_57] : memref<32x128xf32, #tpu.memory_space<vmem>>, vector<28x128xf32>
    tpu.vector_store %arg5[%c0_56, %c0_57], %118 {strides = array<i32>} : memref<32x128xf32, #tpu.memory_space<vmem>>, vector<28x128xf32>,
    %c0_58 = arith.constant 0 : index
    %c0_59 = arith.constant 0 : index
    %120 = tpu.strided_load %arg5[%c0_58, %c0_59] {strides = array<i32: 2, 1>} : memref<32x128xf32, #tpu.memory_space<vmem>>, vector<14x128xf32>
    %c1_60 = arith.constant 1 : index
    %c0_61 = arith.constant 0 : index
    %121 = tpu.strided_load %arg5[%c1_60, %c0_61] {strides = array<i32: 2, 1>} : memref<32x128xf32, #tpu.memory_space<vmem>>, vector<14x128xf32>
    %122 = arith.maximumf %120, %121 : vector<14x128xf32>
    %123 = arith.truncf %122 : vector<14x128xf32> to vector<14x128xbf16>
    %c4 = arith.constant 4 : index
    %c0_62 = arith.constant 0 : index
    %c0_63 = arith.constant 0 : index
    %124 = vector.load %arg4[%c4, %c0_62, %c0_63] : memref<14x14x128xbf16, #tpu.memory_space<vmem>>, vector<1x14x128xbf16>
    %125 = vector.shape_cast %124 : vector<1x14x128xbf16> to vector<14x128xbf16>
    %126 = vector.shape_cast %123 : vector<14x128xbf16> to vector<1x14x128xbf16>
    tpu.vector_store %arg4[%c4, %c0_62, %c0_63], %126 {strides = array<i32>} : memref<14x14x128xbf16, #tpu.memory_space<vmem>>, vector<1x14x128xbf16>,
    %c280 = arith.constant 280 : index
    %c0_64 = arith.constant 0 : index
    %127 = vector.load %arg1[%c280, %c0_64] : memref<896x128xbf16, #tpu.memory_space<vmem>>, vector<28x128xbf16>
    %c308 = arith.constant 308 : index
    %c0_65 = arith.constant 0 : index
    %128 = vector.load %arg1[%c308, %c0_65] : memref<896x128xbf16, #tpu.memory_space<vmem>>, vector<28x128xbf16>
    %129 = arith.extf %127 : vector<28x128xbf16> to vector<28x128xf32>
    %130 = vector.broadcast %0 : vector<1x128xf32> to vector<28x128xf32>
    %131 = arith.mulf %129, %130 : vector<28x128xf32>
    %132 = vector.broadcast %1 : vector<1x128xf32> to vector<28x128xf32>
    %133 = arith.addf %131, %132 : vector<28x128xf32>
    %cst_66 = arith.constant 0.000000e+00 : f32
    %134 = vector.broadcast %cst_66 : f32 to vector<28x128xf32>
    %135 = arith.maximumf %133, %134 : vector<28x128xf32>
    %136 = arith.extf %128 : vector<28x128xbf16> to vector<28x128xf32>
    %137 = vector.broadcast %0 : vector<1x128xf32> to vector<28x128xf32>
    %138 = arith.mulf %136, %137 : vector<28x128xf32>
    %139 = vector.broadcast %1 : vector<1x128xf32> to vector<28x128xf32>
    %140 = arith.addf %138, %139 : vector<28x128xf32>
    %cst_67 = arith.constant 0.000000e+00 : f32
    %141 = vector.broadcast %cst_67 : f32 to vector<28x128xf32>
    %142 = arith.maximumf %140, %141 : vector<28x128xf32>
    %143 = arith.maximumf %135, %142 : vector<28x128xf32>
    %c0_68 = arith.constant 0 : index
    %c0_69 = arith.constant 0 : index
    %144 = vector.load %arg5[%c0_68, %c0_69] : memref<32x128xf32, #tpu.memory_space<vmem>>, vector<28x128xf32>
    tpu.vector_store %arg5[%c0_68, %c0_69], %143 {strides = array<i32>} : memref<32x128xf32, #tpu.memory_space<vmem>>, vector<28x128xf32>,
    %c0_70 = arith.constant 0 : index
    %c0_71 = arith.constant 0 : index
    %145 = tpu.strided_load %arg5[%c0_70, %c0_71] {strides = array<i32: 2, 1>} : memref<32x128xf32, #tpu.memory_space<vmem>>, vector<14x128xf32>
    %c1_72 = arith.constant 1 : index
    %c0_73 = arith.constant 0 : index
    %146 = tpu.strided_load %arg5[%c1_72, %c0_73] {strides = array<i32: 2, 1>} : memref<32x128xf32, #tpu.memory_space<vmem>>, vector<14x128xf32>
    %147 = arith.maximumf %145, %146 : vector<14x128xf32>
    %148 = arith.truncf %147 : vector<14x128xf32> to vector<14x128xbf16>
    %c5 = arith.constant 5 : index
    %c0_74 = arith.constant 0 : index
    %c0_75 = arith.constant 0 : index
    %149 = vector.load %arg4[%c5, %c0_74, %c0_75] : memref<14x14x128xbf16, #tpu.memory_space<vmem>>, vector<1x14x128xbf16>
    %150 = vector.shape_cast %149 : vector<1x14x128xbf16> to vector<14x128xbf16>
    %151 = vector.shape_cast %148 : vector<14x128xbf16> to vector<1x14x128xbf16>
    tpu.vector_store %arg4[%c5, %c0_74, %c0_75], %151 {strides = array<i32>} : memref<14x14x128xbf16, #tpu.memory_space<vmem>>, vector<1x14x128xbf16>,
    %c336 = arith.constant 336 : index
    %c0_76 = arith.constant 0 : index
    %152 = vector.load %arg1[%c336, %c0_76] : memref<896x128xbf16, #tpu.memory_space<vmem>>, vector<28x128xbf16>
    %c364 = arith.constant 364 : index
    %c0_77 = arith.constant 0 : index
    %153 = vector.load %arg1[%c364, %c0_77] : memref<896x128xbf16, #tpu.memory_space<vmem>>, vector<28x128xbf16>
    %154 = arith.extf %152 : vector<28x128xbf16> to vector<28x128xf32>
    %155 = vector.broadcast %0 : vector<1x128xf32> to vector<28x128xf32>
    %156 = arith.mulf %154, %155 : vector<28x128xf32>
    %157 = vector.broadcast %1 : vector<1x128xf32> to vector<28x128xf32>
    %158 = arith.addf %156, %157 : vector<28x128xf32>
    %cst_78 = arith.constant 0.000000e+00 : f32
    %159 = vector.broadcast %cst_78 : f32 to vector<28x128xf32>
    %160 = arith.maximumf %158, %159 : vector<28x128xf32>
    %161 = arith.extf %153 : vector<28x128xbf16> to vector<28x128xf32>
    %162 = vector.broadcast %0 : vector<1x128xf32> to vector<28x128xf32>
    %163 = arith.mulf %161, %162 : vector<28x128xf32>
    %164 = vector.broadcast %1 : vector<1x128xf32> to vector<28x128xf32>
    %165 = arith.addf %163, %164 : vector<28x128xf32>
    %cst_79 = arith.constant 0.000000e+00 : f32
    %166 = vector.broadcast %cst_79 : f32 to vector<28x128xf32>
    %167 = arith.maximumf %165, %166 : vector<28x128xf32>
    %168 = arith.maximumf %160, %167 : vector<28x128xf32>
    %c0_80 = arith.constant 0 : index
    %c0_81 = arith.constant 0 : index
    %169 = vector.load %arg5[%c0_80, %c0_81] : memref<32x128xf32, #tpu.memory_space<vmem>>, vector<28x128xf32>
    tpu.vector_store %arg5[%c0_80, %c0_81], %168 {strides = array<i32>} : memref<32x128xf32, #tpu.memory_space<vmem>>, vector<28x128xf32>,
    %c0_82 = arith.constant 0 : index
    %c0_83 = arith.constant 0 : index
    %170 = tpu.strided_load %arg5[%c0_82, %c0_83] {strides = array<i32: 2, 1>} : memref<32x128xf32, #tpu.memory_space<vmem>>, vector<14x128xf32>
    %c1_84 = arith.constant 1 : index
    %c0_85 = arith.constant 0 : index
    %171 = tpu.strided_load %arg5[%c1_84, %c0_85] {strides = array<i32: 2, 1>} : memref<32x128xf32, #tpu.memory_space<vmem>>, vector<14x128xf32>
    %172 = arith.maximumf %170, %171 : vector<14x128xf32>
    %173 = arith.truncf %172 : vector<14x128xf32> to vector<14x128xbf16>
    %c6 = arith.constant 6 : index
    %c0_86 = arith.constant 0 : index
    %c0_87 = arith.constant 0 : index
    %174 = vector.load %arg4[%c6, %c0_86, %c0_87] : memref<14x14x128xbf16, #tpu.memory_space<vmem>>, vector<1x14x128xbf16>
    %175 = vector.shape_cast %174 : vector<1x14x128xbf16> to vector<14x128xbf16>
    %176 = vector.shape_cast %173 : vector<14x128xbf16> to vector<1x14x128xbf16>
    tpu.vector_store %arg4[%c6, %c0_86, %c0_87], %176 {strides = array<i32>} : memref<14x14x128xbf16, #tpu.memory_space<vmem>>, vector<1x14x128xbf16>,
    %c392 = arith.constant 392 : index
    %c0_88 = arith.constant 0 : index
    %177 = vector.load %arg1[%c392, %c0_88] : memref<896x128xbf16, #tpu.memory_space<vmem>>, vector<28x128xbf16>
    %c420 = arith.constant 420 : index
    %c0_89 = arith.constant 0 : index
    %178 = vector.load %arg1[%c420, %c0_89] : memref<896x128xbf16, #tpu.memory_space<vmem>>, vector<28x128xbf16>
    %179 = arith.extf %177 : vector<28x128xbf16> to vector<28x128xf32>
    %180 = vector.broadcast %0 : vector<1x128xf32> to vector<28x128xf32>
    %181 = arith.mulf %179, %180 : vector<28x128xf32>
    %182 = vector.broadcast %1 : vector<1x128xf32> to vector<28x128xf32>
    %183 = arith.addf %181, %182 : vector<28x128xf32>
    %cst_90 = arith.constant 0.000000e+00 : f32
    %184 = vector.broadcast %cst_90 : f32 to vector<28x128xf32>
    %185 = arith.maximumf %183, %184 : vector<28x128xf32>
    %186 = arith.extf %178 : vector<28x128xbf16> to vector<28x128xf32>
    %187 = vector.broadcast %0 : vector<1x128xf32> to vector<28x128xf32>
    %188 = arith.mulf %186, %187 : vector<28x128xf32>
    %189 = vector.broadcast %1 : vector<1x128xf32> to vector<28x128xf32>
    %190 = arith.addf %188, %189 : vector<28x128xf32>
    %cst_91 = arith.constant 0.000000e+00 : f32
    %191 = vector.broadcast %cst_91 : f32 to vector<28x128xf32>
    %192 = arith.maximumf %190, %191 : vector<28x128xf32>
    %193 = arith.maximumf %185, %192 : vector<28x128xf32>
    %c0_92 = arith.constant 0 : index
    %c0_93 = arith.constant 0 : index
    %194 = vector.load %arg5[%c0_92, %c0_93] : memref<32x128xf32, #tpu.memory_space<vmem>>, vector<28x128xf32>
    tpu.vector_store %arg5[%c0_92, %c0_93], %193 {strides = array<i32>} : memref<32x128xf32, #tpu.memory_space<vmem>>, vector<28x128xf32>,
    %c0_94 = arith.constant 0 : index
    %c0_95 = arith.constant 0 : index
    %195 = tpu.strided_load %arg5[%c0_94, %c0_95] {strides = array<i32: 2, 1>} : memref<32x128xf32, #tpu.memory_space<vmem>>, vector<14x128xf32>
    %c1_96 = arith.constant 1 : index
    %c0_97 = arith.constant 0 : index
    %196 = tpu.strided_load %arg5[%c1_96, %c0_97] {strides = array<i32: 2, 1>} : memref<32x128xf32, #tpu.memory_space<vmem>>, vector<14x128xf32>
    %197 = arith.maximumf %195, %196 : vector<14x128xf32>
    %198 = arith.truncf %197 : vector<14x128xf32> to vector<14x128xbf16>
    %c7 = arith.constant 7 : index
    %c0_98 = arith.constant 0 : index
    %c0_99 = arith.constant 0 : index
    %199 = vector.load %arg4[%c7, %c0_98, %c0_99] : memref<14x14x128xbf16, #tpu.memory_space<vmem>>, vector<1x14x128xbf16>
    %200 = vector.shape_cast %199 : vector<1x14x128xbf16> to vector<14x128xbf16>
    %201 = vector.shape_cast %198 : vector<14x128xbf16> to vector<1x14x128xbf16>
    tpu.vector_store %arg4[%c7, %c0_98, %c0_99], %201 {strides = array<i32>} : memref<14x14x128xbf16, #tpu.memory_space<vmem>>, vector<1x14x128xbf16>,
    %c448 = arith.constant 448 : index
    %c0_100 = arith.constant 0 : index
    %202 = vector.load %arg1[%c448, %c0_100] : memref<896x128xbf16, #tpu.memory_space<vmem>>, vector<28x128xbf16>
    %c476 = arith.constant 476 : index
    %c0_101 = arith.constant 0 : index
    %203 = vector.load %arg1[%c476, %c0_101] : memref<896x128xbf16, #tpu.memory_space<vmem>>, vector<28x128xbf16>
    %204 = arith.extf %202 : vector<28x128xbf16> to vector<28x128xf32>
    %205 = vector.broadcast %0 : vector<1x128xf32> to vector<28x128xf32>
    %206 = arith.mulf %204, %205 : vector<28x128xf32>
    %207 = vector.broadcast %1 : vector<1x128xf32> to vector<28x128xf32>
    %208 = arith.addf %206, %207 : vector<28x128xf32>
    %cst_102 = arith.constant 0.000000e+00 : f32
    %209 = vector.broadcast %cst_102 : f32 to vector<28x128xf32>
    %210 = arith.maximumf %208, %209 : vector<28x128xf32>
    %211 = arith.extf %203 : vector<28x128xbf16> to vector<28x128xf32>
    %212 = vector.broadcast %0 : vector<1x128xf32> to vector<28x128xf32>
    %213 = arith.mulf %211, %212 : vector<28x128xf32>
    %214 = vector.broadcast %1 : vector<1x128xf32> to vector<28x128xf32>
    %215 = arith.addf %213, %214 : vector<28x128xf32>
    %cst_103 = arith.constant 0.000000e+00 : f32
    %216 = vector.broadcast %cst_103 : f32 to vector<28x128xf32>
    %217 = arith.maximumf %215, %216 : vector<28x128xf32>
    %218 = arith.maximumf %210, %217 : vector<28x128xf32>
    %c0_104 = arith.constant 0 : index
    %c0_105 = arith.constant 0 : index
    %219 = vector.load %arg5[%c0_104, %c0_105] : memref<32x128xf32, #tpu.memory_space<vmem>>, vector<28x128xf32>
    tpu.vector_store %arg5[%c0_104, %c0_105], %218 {strides = array<i32>} : memref<32x128xf32, #tpu.memory_space<vmem>>, vector<28x128xf32>,
    %c0_106 = arith.constant 0 : index
    %c0_107 = arith.constant 0 : index
    %220 = tpu.strided_load %arg5[%c0_106, %c0_107] {strides = array<i32: 2, 1>} : memref<32x128xf32, #tpu.memory_space<vmem>>, vector<14x128xf32>
    %c1_108 = arith.constant 1 : index
    %c0_109 = arith.constant 0 : index
    %221 = tpu.strided_load %arg5[%c1_108, %c0_109] {strides = array<i32: 2, 1>} : memref<32x128xf32, #tpu.memory_space<vmem>>, vector<14x128xf32>
    %222 = arith.maximumf %220, %221 : vector<14x128xf32>
    %223 = arith.truncf %222 : vector<14x128xf32> to vector<14x128xbf16>
    %c8 = arith.constant 8 : index
    %c0_110 = arith.constant 0 : index
    %c0_111 = arith.constant 0 : index
    %224 = vector.load %arg4[%c8, %c0_110, %c0_111] : memref<14x14x128xbf16, #tpu.memory_space<vmem>>, vector<1x14x128xbf16>
    %225 = vector.shape_cast %224 : vector<1x14x128xbf16> to vector<14x128xbf16>
    %226 = vector.shape_cast %223 : vector<14x128xbf16> to vector<1x14x128xbf16>
    tpu.vector_store %arg4[%c8, %c0_110, %c0_111], %226 {strides = array<i32>} : memref<14x14x128xbf16, #tpu.memory_space<vmem>>, vector<1x14x128xbf16>,
    %c504 = arith.constant 504 : index
    %c0_112 = arith.constant 0 : index
    %227 = vector.load %arg1[%c504, %c0_112] : memref<896x128xbf16, #tpu.memory_space<vmem>>, vector<28x128xbf16>
    %c532 = arith.constant 532 : index
    %c0_113 = arith.constant 0 : index
    %228 = vector.load %arg1[%c532, %c0_113] : memref<896x128xbf16, #tpu.memory_space<vmem>>, vector<28x128xbf16>
    %229 = arith.extf %227 : vector<28x128xbf16> to vector<28x128xf32>
    %230 = vector.broadcast %0 : vector<1x128xf32> to vector<28x128xf32>
    %231 = arith.mulf %229, %230 : vector<28x128xf32>
    %232 = vector.broadcast %1 : vector<1x128xf32> to vector<28x128xf32>
    %233 = arith.addf %231, %232 : vector<28x128xf32>
    %cst_114 = arith.constant 0.000000e+00 : f32
    %234 = vector.broadcast %cst_114 : f32 to vector<28x128xf32>
    %235 = arith.maximumf %233, %234 : vector<28x128xf32>
    %236 = arith.extf %228 : vector<28x128xbf16> to vector<28x128xf32>
    %237 = vector.broadcast %0 : vector<1x128xf32> to vector<28x128xf32>
    %238 = arith.mulf %236, %237 : vector<28x128xf32>
    %239 = vector.broadcast %1 : vector<1x128xf32> to vector<28x128xf32>
    %240 = arith.addf %238, %239 : vector<28x128xf32>
    %cst_115 = arith.constant 0.000000e+00 : f32
    %241 = vector.broadcast %cst_115 : f32 to vector<28x128xf32>
    %242 = arith.maximumf %240, %241 : vector<28x128xf32>
    %243 = arith.maximumf %235, %242 : vector<28x128xf32>
    %c0_116 = arith.constant 0 : index
    %c0_117 = arith.constant 0 : index
    %244 = vector.load %arg5[%c0_116, %c0_117] : memref<32x128xf32, #tpu.memory_space<vmem>>, vector<28x128xf32>
    tpu.vector_store %arg5[%c0_116, %c0_117], %243 {strides = array<i32>} : memref<32x128xf32, #tpu.memory_space<vmem>>, vector<28x128xf32>,
    %c0_118 = arith.constant 0 : index
    %c0_119 = arith.constant 0 : index
    %245 = tpu.strided_load %arg5[%c0_118, %c0_119] {strides = array<i32: 2, 1>} : memref<32x128xf32, #tpu.memory_space<vmem>>, vector<14x128xf32>
    %c1_120 = arith.constant 1 : index
    %c0_121 = arith.constant 0 : index
    %246 = tpu.strided_load %arg5[%c1_120, %c0_121] {strides = array<i32: 2, 1>} : memref<32x128xf32, #tpu.memory_space<vmem>>, vector<14x128xf32>
    %247 = arith.maximumf %245, %246 : vector<14x128xf32>
    %248 = arith.truncf %247 : vector<14x128xf32> to vector<14x128xbf16>
    %c9 = arith.constant 9 : index
    %c0_122 = arith.constant 0 : index
    %c0_123 = arith.constant 0 : index
    %249 = vector.load %arg4[%c9, %c0_122, %c0_123] : memref<14x14x128xbf16, #tpu.memory_space<vmem>>, vector<1x14x128xbf16>
    %250 = vector.shape_cast %249 : vector<1x14x128xbf16> to vector<14x128xbf16>
    %251 = vector.shape_cast %248 : vector<14x128xbf16> to vector<1x14x128xbf16>
    tpu.vector_store %arg4[%c9, %c0_122, %c0_123], %251 {strides = array<i32>} : memref<14x14x128xbf16, #tpu.memory_space<vmem>>, vector<1x14x128xbf16>,
    %c560 = arith.constant 560 : index
    %c0_124 = arith.constant 0 : index
    %252 = vector.load %arg1[%c560, %c0_124] : memref<896x128xbf16, #tpu.memory_space<vmem>>, vector<28x128xbf16>
    %c588 = arith.constant 588 : index
    %c0_125 = arith.constant 0 : index
    %253 = vector.load %arg1[%c588, %c0_125] : memref<896x128xbf16, #tpu.memory_space<vmem>>, vector<28x128xbf16>
    %254 = arith.extf %252 : vector<28x128xbf16> to vector<28x128xf32>
    %255 = vector.broadcast %0 : vector<1x128xf32> to vector<28x128xf32>
    %256 = arith.mulf %254, %255 : vector<28x128xf32>
    %257 = vector.broadcast %1 : vector<1x128xf32> to vector<28x128xf32>
    %258 = arith.addf %256, %257 : vector<28x128xf32>
    %cst_126 = arith.constant 0.000000e+00 : f32
    %259 = vector.broadcast %cst_126 : f32 to vector<28x128xf32>
    %260 = arith.maximumf %258, %259 : vector<28x128xf32>
    %261 = arith.extf %253 : vector<28x128xbf16> to vector<28x128xf32>
    %262 = vector.broadcast %0 : vector<1x128xf32> to vector<28x128xf32>
    %263 = arith.mulf %261, %262 : vector<28x128xf32>
    %264 = vector.broadcast %1 : vector<1x128xf32> to vector<28x128xf32>
    %265 = arith.addf %263, %264 : vector<28x128xf32>
    %cst_127 = arith.constant 0.000000e+00 : f32
    %266 = vector.broadcast %cst_127 : f32 to vector<28x128xf32>
    %267 = arith.maximumf %265, %266 : vector<28x128xf32>
    %268 = arith.maximumf %260, %267 : vector<28x128xf32>
    %c0_128 = arith.constant 0 : index
    %c0_129 = arith.constant 0 : index
    %269 = vector.load %arg5[%c0_128, %c0_129] : memref<32x128xf32, #tpu.memory_space<vmem>>, vector<28x128xf32>
    tpu.vector_store %arg5[%c0_128, %c0_129], %268 {strides = array<i32>} : memref<32x128xf32, #tpu.memory_space<vmem>>, vector<28x128xf32>,
    %c0_130 = arith.constant 0 : index
    %c0_131 = arith.constant 0 : index
    %270 = tpu.strided_load %arg5[%c0_130, %c0_131] {strides = array<i32: 2, 1>} : memref<32x128xf32, #tpu.memory_space<vmem>>, vector<14x128xf32>
    %c1_132 = arith.constant 1 : index
    %c0_133 = arith.constant 0 : index
    %271 = tpu.strided_load %arg5[%c1_132, %c0_133] {strides = array<i32: 2, 1>} : memref<32x128xf32, #tpu.memory_space<vmem>>, vector<14x128xf32>
    %272 = arith.maximumf %270, %271 : vector<14x128xf32>
    %273 = arith.truncf %272 : vector<14x128xf32> to vector<14x128xbf16>
    %c10 = arith.constant 10 : index
    %c0_134 = arith.constant 0 : index
    %c0_135 = arith.constant 0 : index
    %274 = vector.load %arg4[%c10, %c0_134, %c0_135] : memref<14x14x128xbf16, #tpu.memory_space<vmem>>, vector<1x14x128xbf16>
    %275 = vector.shape_cast %274 : vector<1x14x128xbf16> to vector<14x128xbf16>
    %276 = vector.shape_cast %273 : vector<14x128xbf16> to vector<1x14x128xbf16>
    tpu.vector_store %arg4[%c10, %c0_134, %c0_135], %276 {strides = array<i32>} : memref<14x14x128xbf16, #tpu.memory_space<vmem>>, vector<1x14x128xbf16>,
    %c616 = arith.constant 616 : index
    %c0_136 = arith.constant 0 : index
    %277 = vector.load %arg1[%c616, %c0_136] : memref<896x128xbf16, #tpu.memory_space<vmem>>, vector<28x128xbf16>
    %c644 = arith.constant 644 : index
    %c0_137 = arith.constant 0 : index
    %278 = vector.load %arg1[%c644, %c0_137] : memref<896x128xbf16, #tpu.memory_space<vmem>>, vector<28x128xbf16>
    %279 = arith.extf %277 : vector<28x128xbf16> to vector<28x128xf32>
    %280 = vector.broadcast %0 : vector<1x128xf32> to vector<28x128xf32>
    %281 = arith.mulf %279, %280 : vector<28x128xf32>
    %282 = vector.broadcast %1 : vector<1x128xf32> to vector<28x128xf32>
    %283 = arith.addf %281, %282 : vector<28x128xf32>
    %cst_138 = arith.constant 0.000000e+00 : f32
    %284 = vector.broadcast %cst_138 : f32 to vector<28x128xf32>
    %285 = arith.maximumf %283, %284 : vector<28x128xf32>
    %286 = arith.extf %278 : vector<28x128xbf16> to vector<28x128xf32>
    %287 = vector.broadcast %0 : vector<1x128xf32> to vector<28x128xf32>
    %288 = arith.mulf %286, %287 : vector<28x128xf32>
    %289 = vector.broadcast %1 : vector<1x128xf32> to vector<28x128xf32>
    %290 = arith.addf %288, %289 : vector<28x128xf32>
    %cst_139 = arith.constant 0.000000e+00 : f32
    %291 = vector.broadcast %cst_139 : f32 to vector<28x128xf32>
    %292 = arith.maximumf %290, %291 : vector<28x128xf32>
    %293 = arith.maximumf %285, %292 : vector<28x128xf32>
    %c0_140 = arith.constant 0 : index
    %c0_141 = arith.constant 0 : index
    %294 = vector.load %arg5[%c0_140, %c0_141] : memref<32x128xf32, #tpu.memory_space<vmem>>, vector<28x128xf32>
    tpu.vector_store %arg5[%c0_140, %c0_141], %293 {strides = array<i32>} : memref<32x128xf32, #tpu.memory_space<vmem>>, vector<28x128xf32>,
    %c0_142 = arith.constant 0 : index
    %c0_143 = arith.constant 0 : index
    %295 = tpu.strided_load %arg5[%c0_142, %c0_143] {strides = array<i32: 2, 1>} : memref<32x128xf32, #tpu.memory_space<vmem>>, vector<14x128xf32>
    %c1_144 = arith.constant 1 : index
    %c0_145 = arith.constant 0 : index
    %296 = tpu.strided_load %arg5[%c1_144, %c0_145] {strides = array<i32: 2, 1>} : memref<32x128xf32, #tpu.memory_space<vmem>>, vector<14x128xf32>
    %297 = arith.maximumf %295, %296 : vector<14x128xf32>
    %298 = arith.truncf %297 : vector<14x128xf32> to vector<14x128xbf16>
    %c11 = arith.constant 11 : index
    %c0_146 = arith.constant 0 : index
    %c0_147 = arith.constant 0 : index
    %299 = vector.load %arg4[%c11, %c0_146, %c0_147] : memref<14x14x128xbf16, #tpu.memory_space<vmem>>, vector<1x14x128xbf16>
    %300 = vector.shape_cast %299 : vector<1x14x128xbf16> to vector<14x128xbf16>
    %301 = vector.shape_cast %298 : vector<14x128xbf16> to vector<1x14x128xbf16>
    tpu.vector_store %arg4[%c11, %c0_146, %c0_147], %301 {strides = array<i32>} : memref<14x14x128xbf16, #tpu.memory_space<vmem>>, vector<1x14x128xbf16>,
    %c672 = arith.constant 672 : index
    %c0_148 = arith.constant 0 : index
    %302 = vector.load %arg1[%c672, %c0_148] : memref<896x128xbf16, #tpu.memory_space<vmem>>, vector<28x128xbf16>
    %c700 = arith.constant 700 : index
    %c0_149 = arith.constant 0 : index
    %303 = vector.load %arg1[%c700, %c0_149] : memref<896x128xbf16, #tpu.memory_space<vmem>>, vector<28x128xbf16>
    %304 = arith.extf %302 : vector<28x128xbf16> to vector<28x128xf32>
    %305 = vector.broadcast %0 : vector<1x128xf32> to vector<28x128xf32>
    %306 = arith.mulf %304, %305 : vector<28x128xf32>
    %307 = vector.broadcast %1 : vector<1x128xf32> to vector<28x128xf32>
    %308 = arith.addf %306, %307 : vector<28x128xf32>
    %cst_150 = arith.constant 0.000000e+00 : f32
    %309 = vector.broadcast %cst_150 : f32 to vector<28x128xf32>
    %310 = arith.maximumf %308, %309 : vector<28x128xf32>
    %311 = arith.extf %303 : vector<28x128xbf16> to vector<28x128xf32>
    %312 = vector.broadcast %0 : vector<1x128xf32> to vector<28x128xf32>
    %313 = arith.mulf %311, %312 : vector<28x128xf32>
    %314 = vector.broadcast %1 : vector<1x128xf32> to vector<28x128xf32>
    %315 = arith.addf %313, %314 : vector<28x128xf32>
    %cst_151 = arith.constant 0.000000e+00 : f32
    %316 = vector.broadcast %cst_151 : f32 to vector<28x128xf32>
    %317 = arith.maximumf %315, %316 : vector<28x128xf32>
    %318 = arith.maximumf %310, %317 : vector<28x128xf32>
    %c0_152 = arith.constant 0 : index
    %c0_153 = arith.constant 0 : index
    %319 = vector.load %arg5[%c0_152, %c0_153] : memref<32x128xf32, #tpu.memory_space<vmem>>, vector<28x128xf32>
    tpu.vector_store %arg5[%c0_152, %c0_153], %318 {strides = array<i32>} : memref<32x128xf32, #tpu.memory_space<vmem>>, vector<28x128xf32>,
    %c0_154 = arith.constant 0 : index
    %c0_155 = arith.constant 0 : index
    %320 = tpu.strided_load %arg5[%c0_154, %c0_155] {strides = array<i32: 2, 1>} : memref<32x128xf32, #tpu.memory_space<vmem>>, vector<14x128xf32>
    %c1_156 = arith.constant 1 : index
    %c0_157 = arith.constant 0 : index
    %321 = tpu.strided_load %arg5[%c1_156, %c0_157] {strides = array<i32: 2, 1>} : memref<32x128xf32, #tpu.memory_space<vmem>>, vector<14x128xf32>
    %322 = arith.maximumf %320, %321 : vector<14x128xf32>
    %323 = arith.truncf %322 : vector<14x128xf32> to vector<14x128xbf16>
    %c12 = arith.constant 12 : index
    %c0_158 = arith.constant 0 : index
    %c0_159 = arith.constant 0 : index
    %324 = vector.load %arg4[%c12, %c0_158, %c0_159] : memref<14x14x128xbf16, #tpu.memory_space<vmem>>, vector<1x14x128xbf16>
    %325 = vector.shape_cast %324 : vector<1x14x128xbf16> to vector<14x128xbf16>
    %326 = vector.shape_cast %323 : vector<14x128xbf16> to vector<1x14x128xbf16>
    tpu.vector_store %arg4[%c12, %c0_158, %c0_159], %326 {strides = array<i32>} : memref<14x14x128xbf16, #tpu.memory_space<vmem>>, vector<1x14x128xbf16>,
    %c728 = arith.constant 728 : index
    %c0_160 = arith.constant 0 : index
    %327 = vector.load %arg1[%c728, %c0_160] : memref<896x128xbf16, #tpu.memory_space<vmem>>, vector<28x128xbf16>
    %c756 = arith.constant 756 : index
    %c0_161 = arith.constant 0 : index
    %328 = vector.load %arg1[%c756, %c0_161] : memref<896x128xbf16, #tpu.memory_space<vmem>>, vector<28x128xbf16>
    %329 = arith.extf %327 : vector<28x128xbf16> to vector<28x128xf32>
    %330 = vector.broadcast %0 : vector<1x128xf32> to vector<28x128xf32>
    %331 = arith.mulf %329, %330 : vector<28x128xf32>
    %332 = vector.broadcast %1 : vector<1x128xf32> to vector<28x128xf32>
    %333 = arith.addf %331, %332 : vector<28x128xf32>
    %cst_162 = arith.constant 0.000000e+00 : f32
    %334 = vector.broadcast %cst_162 : f32 to vector<28x128xf32>
    %335 = arith.maximumf %333, %334 : vector<28x128xf32>
    %336 = arith.extf %328 : vector<28x128xbf16> to vector<28x128xf32>
    %337 = vector.broadcast %0 : vector<1x128xf32> to vector<28x128xf32>
    %338 = arith.mulf %336, %337 : vector<28x128xf32>
    %339 = vector.broadcast %1 : vector<1x128xf32> to vector<28x128xf32>
    %340 = arith.addf %338, %339 : vector<28x128xf32>
    %cst_163 = arith.constant 0.000000e+00 : f32
    %341 = vector.broadcast %cst_163 : f32 to vector<28x128xf32>
    %342 = arith.maximumf %340, %341 : vector<28x128xf32>
    %343 = arith.maximumf %335, %342 : vector<28x128xf32>
    %c0_164 = arith.constant 0 : index
    %c0_165 = arith.constant 0 : index
    %344 = vector.load %arg5[%c0_164, %c0_165] : memref<32x128xf32, #tpu.memory_space<vmem>>, vector<28x128xf32>
    tpu.vector_store %arg5[%c0_164, %c0_165], %343 {strides = array<i32>} : memref<32x128xf32, #tpu.memory_space<vmem>>, vector<28x128xf32>,
    %c0_166 = arith.constant 0 : index
    %c0_167 = arith.constant 0 : index
    %345 = tpu.strided_load %arg5[%c0_166, %c0_167] {strides = array<i32: 2, 1>} : memref<32x128xf32, #tpu.memory_space<vmem>>, vector<14x128xf32>
    %c1_168 = arith.constant 1 : index
    %c0_169 = arith.constant 0 : index
    %346 = tpu.strided_load %arg5[%c1_168, %c0_169] {strides = array<i32: 2, 1>} : memref<32x128xf32, #tpu.memory_space<vmem>>, vector<14x128xf32>
    %347 = arith.maximumf %345, %346 : vector<14x128xf32>
    %348 = arith.truncf %347 : vector<14x128xf32> to vector<14x128xbf16>
    %c13 = arith.constant 13 : index
    %c0_170 = arith.constant 0 : index
    %c0_171 = arith.constant 0 : index
    %349 = vector.load %arg4[%c13, %c0_170, %c0_171] : memref<14x14x128xbf16, #tpu.memory_space<vmem>>, vector<1x14x128xbf16>
    %350 = vector.shape_cast %349 : vector<1x14x128xbf16> to vector<14x128xbf16>
    %351 = vector.shape_cast %348 : vector<14x128xbf16> to vector<1x14x128xbf16>
    tpu.vector_store %arg4[%c13, %c0_170, %c0_171], %351 {strides = array<i32>} : memref<14x14x128xbf16, #tpu.memory_space<vmem>>, vector<1x14x128xbf16>,
    return
  }
  func.func @transform_0(%arg0: i32) -> (i32, i32) {
    %c0_i32 = arith.constant 0 : i32
    %c0_i32_0 = arith.constant 0 : i32
    return %arg0, %c0_i32 : i32, i32
  }
  func.func @transform_1(%arg0: i32) -> (i32, i32) {
    %c0_i32 = arith.constant 0 : i32
    %c0_i32_0 = arith.constant 0 : i32
    %c0_i32_1 = arith.constant 0 : i32
    return %c0_i32, %c0_i32_0 : i32, i32
  }
  func.func @transform_2(%arg0: i32) -> (i32, i32) {
    %c0_i32 = arith.constant 0 : i32
    %c0_i32_0 = arith.constant 0 : i32
    %c0_i32_1 = arith.constant 0 : i32
    return %c0_i32, %c0_i32_0 : i32, i32
  }
  func.func @transform_3(%arg0: i32) -> (i32, i32, i32) {
    %c0_i32 = arith.constant 0 : i32
    %c0_i32_0 = arith.constant 0 : i32
    %c0_i32_1 = arith.constant 0 : i32
    return %arg0, %c0_i32, %c0_i32_0 : i32, i32, i32
  }
}

module attributes {stable_mosaic.version = 11 : i64} {
  func.func @_conv_stats_kernel(%arg0: i32, %arg1: memref<256x512xbf16, #tpu.memory_space<vmem>>, %arg2: memref<512x128xbf16, #tpu.memory_space<vmem>>, %arg3: memref<256x128xbf16, #tpu.memory_space<vmem>>, %arg4: memref<1x1x128xf32, #tpu.memory_space<vmem>>, %arg5: memref<1x1x128xf32, #tpu.memory_space<vmem>>) attributes {dimension_semantics = [#tpu.dimension_semantics<parallel>], iteration_bounds = array<i64: 2>, scalar_prefetch = 0 : i64, scratch_operands = 0 : i64, tpu.core_type = #tpu.core_type<tc>, window_params = [{transform_indices = @transform_0, window_bounds = array<i64: 256, 512>}, {pipeline_mode = #tpu.pipeline_mode<synchronous>, transform_indices = @transform_1, window_bounds = array<i64: 512, 128>}, {transform_indices = @transform_2, window_bounds = array<i64: 256, 128>}, {transform_indices = @transform_3, window_bounds = array<i64: 1, 1, 128>}, {transform_indices = @transform_4, window_bounds = array<i64: 1, 1, 128>}]} {
    %cst = arith.constant 0.000000e+00 : f32
    %0 = vector.broadcast %cst : f32 to vector<1x128xf32>
    %cst_0 = arith.constant 0.000000e+00 : f32
    %1 = vector.broadcast %cst_0 : f32 to vector<1x128xf32>
    %c0 = arith.constant 0 : index
    %c0_1 = arith.constant 0 : index
    %2 = vector.load %arg1[%c0, %c0_1] : memref<256x512xbf16, #tpu.memory_space<vmem>>, vector<128x512xbf16>
    %c0_2 = arith.constant 0 : index
    %c0_3 = arith.constant 0 : index
    %3 = vector.load %arg2[%c0_2, %c0_3] : memref<512x128xbf16, #tpu.memory_space<vmem>>, vector<512x128xbf16>
    %cst_4 = arith.constant dense<0.000000e+00> : vector<128x128xf32>
    %4 = tpu.matmul %2, %3, %cst_4 {dimension_numbers = #tpu.dot_dimension_numbers<[1], [0], [0], [1], [0, 0, 1, 1], [], []>} : vector<128x512xbf16>, vector<512x128xbf16>, vector<128x128xf32> -> vector<128x128xf32>
    %5 = arith.truncf %4 : vector<128x128xf32> to vector<128x128xbf16>
    %c0_5 = arith.constant 0 : index
    %c0_6 = arith.constant 0 : index
    %6 = vector.load %arg3[%c0_5, %c0_6] : memref<256x128xbf16, #tpu.memory_space<vmem>>, vector<128x128xbf16>
    tpu.vector_store %arg3[%c0_5, %c0_6], %5 {strides = array<i32>} : memref<256x128xbf16, #tpu.memory_space<vmem>>, vector<128x128xbf16>,
    %cst_7 = arith.constant dense<0.000000e+00> : vector<128xf32>
    %7 = vector.multi_reduction <add>, %4, %cst_7 [0] : vector<128x128xf32> to vector<128xf32>
    %8 = vector.shape_cast %7 : vector<128xf32> to vector<1x128xf32>
    %9 = arith.addf %0, %8 : vector<1x128xf32>
    %10 = arith.mulf %4, %4 : vector<128x128xf32>
    %cst_8 = arith.constant dense<0.000000e+00> : vector<128xf32>
    %11 = vector.multi_reduction <add>, %10, %cst_8 [0] : vector<128x128xf32> to vector<128xf32>
    %12 = vector.shape_cast %11 : vector<128xf32> to vector<1x128xf32>
    %13 = arith.addf %1, %12 : vector<1x128xf32>
    %c128 = arith.constant 128 : index
    %c0_9 = arith.constant 0 : index
    %14 = vector.load %arg1[%c128, %c0_9] : memref<256x512xbf16, #tpu.memory_space<vmem>>, vector<128x512xbf16>
    %c0_10 = arith.constant 0 : index
    %c0_11 = arith.constant 0 : index
    %15 = vector.load %arg2[%c0_10, %c0_11] : memref<512x128xbf16, #tpu.memory_space<vmem>>, vector<512x128xbf16>
    %cst_12 = arith.constant dense<0.000000e+00> : vector<128x128xf32>
    %16 = tpu.matmul %14, %15, %cst_12 {dimension_numbers = #tpu.dot_dimension_numbers<[1], [0], [0], [1], [0, 0, 1, 1], [], []>} : vector<128x512xbf16>, vector<512x128xbf16>, vector<128x128xf32> -> vector<128x128xf32>
    %17 = arith.truncf %16 : vector<128x128xf32> to vector<128x128xbf16>
    %c128_13 = arith.constant 128 : index
    %c0_14 = arith.constant 0 : index
    %18 = vector.load %arg3[%c128_13, %c0_14] : memref<256x128xbf16, #tpu.memory_space<vmem>>, vector<128x128xbf16>
    tpu.vector_store %arg3[%c128_13, %c0_14], %17 {strides = array<i32>} : memref<256x128xbf16, #tpu.memory_space<vmem>>, vector<128x128xbf16>,
    %cst_15 = arith.constant dense<0.000000e+00> : vector<128xf32>
    %19 = vector.multi_reduction <add>, %16, %cst_15 [0] : vector<128x128xf32> to vector<128xf32>
    %20 = vector.shape_cast %19 : vector<128xf32> to vector<1x128xf32>
    %21 = arith.addf %9, %20 : vector<1x128xf32>
    %22 = arith.mulf %16, %16 : vector<128x128xf32>
    %cst_16 = arith.constant dense<0.000000e+00> : vector<128xf32>
    %23 = vector.multi_reduction <add>, %22, %cst_16 [0] : vector<128x128xf32> to vector<128xf32>
    %24 = vector.shape_cast %23 : vector<128xf32> to vector<1x128xf32>
    %25 = arith.addf %13, %24 : vector<1x128xf32>
    %26 = vector.shape_cast %21 : vector<1x128xf32> to vector<1x1x128xf32>
    %c0_17 = arith.constant 0 : index
    %c0_18 = arith.constant 0 : index
    %c0_19 = arith.constant 0 : index
    %27 = vector.load %arg4[%c0_17, %c0_18, %c0_19] : memref<1x1x128xf32, #tpu.memory_space<vmem>>, vector<1x1x128xf32>
    tpu.vector_store %arg4[%c0_17, %c0_18, %c0_19], %26 {strides = array<i32>} : memref<1x1x128xf32, #tpu.memory_space<vmem>>, vector<1x1x128xf32>,
    %28 = vector.shape_cast %25 : vector<1x128xf32> to vector<1x1x128xf32>
    %c0_20 = arith.constant 0 : index
    %c0_21 = arith.constant 0 : index
    %c0_22 = arith.constant 0 : index
    %29 = vector.load %arg5[%c0_20, %c0_21, %c0_22] : memref<1x1x128xf32, #tpu.memory_space<vmem>>, vector<1x1x128xf32>
    tpu.vector_store %arg5[%c0_20, %c0_21, %c0_22], %28 {strides = array<i32>} : memref<1x1x128xf32, #tpu.memory_space<vmem>>, vector<1x1x128xf32>,
    return
  }
  func.func @transform_0(%arg0: i32) -> (i32, i32) {
    %c0_i32 = arith.constant 0 : i32
    %c0_i32_0 = arith.constant 0 : i32
    return %arg0, %c0_i32 : i32, i32
  }
  func.func @transform_1(%arg0: i32) -> (i32, i32) {
    %c0_i32 = arith.constant 0 : i32
    %c0_i32_0 = arith.constant 0 : i32
    %c0_i32_1 = arith.constant 0 : i32
    return %c0_i32, %c0_i32_0 : i32, i32
  }
  func.func @transform_2(%arg0: i32) -> (i32, i32) {
    %c0_i32 = arith.constant 0 : i32
    %c0_i32_0 = arith.constant 0 : i32
    return %arg0, %c0_i32 : i32, i32
  }
  func.func @transform_3(%arg0: i32) -> (i32, i32, i32) {
    %c0_i32 = arith.constant 0 : i32
    %c0_i32_0 = arith.constant 0 : i32
    %c0_i32_1 = arith.constant 0 : i32
    return %arg0, %c0_i32, %c0_i32_0 : i32, i32, i32
  }
  func.func @transform_4(%arg0: i32) -> (i32, i32, i32) {
    %c0_i32 = arith.constant 0 : i32
    %c0_i32_0 = arith.constant 0 : i32
    %c0_i32_1 = arith.constant 0 : i32
    return %arg0, %c0_i32, %c0_i32_0 : i32, i32, i32
  }
}

module attributes {stable_mosaic.version = 11 : i64} {
  func.func @_bn_pool_pack_kernel_l2(%arg0: i32, %arg1: memref<256x128xbf16, #tpu.memory_space<vmem>>, %arg2: memref<1x128xf32, #tpu.memory_space<vmem>>, %arg3: memref<1x128xf32, #tpu.memory_space<vmem>>, %arg4: memref<64x128xbf16, #tpu.memory_space<vmem>>, %arg5: memref<16x128xf32, #tpu.memory_space<vmem>>) attributes {dimension_semantics = [#tpu.dimension_semantics<parallel>], iteration_bounds = array<i64: 2>, scalar_prefetch = 0 : i64, scratch_operands = 1 : i64, tpu.core_type = #tpu.core_type<tc>, window_params = [{transform_indices = @transform_0, window_bounds = array<i64: 256, 128>}, {pipeline_mode = #tpu.pipeline_mode<synchronous>, transform_indices = @transform_1, window_bounds = array<i64: 1, 128>}, {pipeline_mode = #tpu.pipeline_mode<synchronous>, transform_indices = @transform_2, window_bounds = array<i64: 1, 128>}, {transform_indices = @transform_3, window_bounds = array<i64: 64, 128>}]} {
    %c0 = arith.constant 0 : index
    %c0_0 = arith.constant 0 : index
    %0 = vector.load %arg2[%c0, %c0_0] : memref<1x128xf32, #tpu.memory_space<vmem>>, vector<1x128xf32>
    %c0_1 = arith.constant 0 : index
    %c0_2 = arith.constant 0 : index
    %1 = vector.load %arg3[%c0_1, %c0_2] : memref<1x128xf32, #tpu.memory_space<vmem>>, vector<1x128xf32>
    %c0_3 = arith.constant 0 : index
    %c0_4 = arith.constant 0 : index
    %2 = vector.load %arg1[%c0_3, %c0_4] : memref<256x128xbf16, #tpu.memory_space<vmem>>, vector<14x128xbf16>
    %c14 = arith.constant 14 : index
    %c0_5 = arith.constant 0 : index
    %3 = vector.load %arg1[%c14, %c0_5] : memref<256x128xbf16, #tpu.memory_space<vmem>>, vector<14x128xbf16>
    %4 = arith.extf %2 : vector<14x128xbf16> to vector<14x128xf32>
    %5 = vector.broadcast %0 : vector<1x128xf32> to vector<14x128xf32>
    %6 = arith.mulf %4, %5 : vector<14x128xf32>
    %7 = vector.broadcast %1 : vector<1x128xf32> to vector<14x128xf32>
    %8 = arith.addf %6, %7 : vector<14x128xf32>
    %cst = arith.constant 0.000000e+00 : f32
    %9 = vector.broadcast %cst : f32 to vector<14x128xf32>
    %10 = arith.maximumf %8, %9 : vector<14x128xf32>
    %11 = arith.extf %3 : vector<14x128xbf16> to vector<14x128xf32>
    %12 = vector.broadcast %0 : vector<1x128xf32> to vector<14x128xf32>
    %13 = arith.mulf %11, %12 : vector<14x128xf32>
    %14 = vector.broadcast %1 : vector<1x128xf32> to vector<14x128xf32>
    %15 = arith.addf %13, %14 : vector<14x128xf32>
    %cst_6 = arith.constant 0.000000e+00 : f32
    %16 = vector.broadcast %cst_6 : f32 to vector<14x128xf32>
    %17 = arith.maximumf %15, %16 : vector<14x128xf32>
    %18 = arith.maximumf %10, %17 : vector<14x128xf32>
    %c0_7 = arith.constant 0 : index
    %c0_8 = arith.constant 0 : index
    %19 = vector.load %arg5[%c0_7, %c0_8] : memref<16x128xf32, #tpu.memory_space<vmem>>, vector<14x128xf32>
    tpu.vector_store %arg5[%c0_7, %c0_8], %18 {strides = array<i32>} : memref<16x128xf32, #tpu.memory_space<vmem>>, vector<14x128xf32>,
    %c0_9 = arith.constant 0 : index
    %c0_10 = arith.constant 0 : index
    %20 = tpu.strided_load %arg5[%c0_9, %c0_10] {strides = array<i32: 2, 1>} : memref<16x128xf32, #tpu.memory_space<vmem>>, vector<7x128xf32>
    %c1 = arith.constant 1 : index
    %c0_11 = arith.constant 0 : index
    %21 = tpu.strided_load %arg5[%c1, %c0_11] {strides = array<i32: 2, 1>} : memref<16x128xf32, #tpu.memory_space<vmem>>, vector<7x128xf32>
    %22 = arith.maximumf %20, %21 : vector<7x128xf32>
    %23 = arith.truncf %22 : vector<7x128xf32> to vector<7x128xbf16>
    %c0_12 = arith.constant 0 : index
    %c0_13 = arith.constant 0 : index
    %24 = vector.load %arg4[%c0_12, %c0_13] : memref<64x128xbf16, #tpu.memory_space<vmem>>, vector<7x128xbf16>
    tpu.vector_store %arg4[%c0_12, %c0_13], %23 {strides = array<i32>} : memref<64x128xbf16, #tpu.memory_space<vmem>>, vector<7x128xbf16>,
    %c28 = arith.constant 28 : index
    %c0_14 = arith.constant 0 : index
    %25 = vector.load %arg1[%c28, %c0_14] : memref<256x128xbf16, #tpu.memory_space<vmem>>, vector<14x128xbf16>
    %c42 = arith.constant 42 : index
    %c0_15 = arith.constant 0 : index
    %26 = vector.load %arg1[%c42, %c0_15] : memref<256x128xbf16, #tpu.memory_space<vmem>>, vector<14x128xbf16>
    %27 = arith.extf %25 : vector<14x128xbf16> to vector<14x128xf32>
    %28 = vector.broadcast %0 : vector<1x128xf32> to vector<14x128xf32>
    %29 = arith.mulf %27, %28 : vector<14x128xf32>
    %30 = vector.broadcast %1 : vector<1x128xf32> to vector<14x128xf32>
    %31 = arith.addf %29, %30 : vector<14x128xf32>
    %cst_16 = arith.constant 0.000000e+00 : f32
    %32 = vector.broadcast %cst_16 : f32 to vector<14x128xf32>
    %33 = arith.maximumf %31, %32 : vector<14x128xf32>
    %34 = arith.extf %26 : vector<14x128xbf16> to vector<14x128xf32>
    %35 = vector.broadcast %0 : vector<1x128xf32> to vector<14x128xf32>
    %36 = arith.mulf %34, %35 : vector<14x128xf32>
    %37 = vector.broadcast %1 : vector<1x128xf32> to vector<14x128xf32>
    %38 = arith.addf %36, %37 : vector<14x128xf32>
    %cst_17 = arith.constant 0.000000e+00 : f32
    %39 = vector.broadcast %cst_17 : f32 to vector<14x128xf32>
    %40 = arith.maximumf %38, %39 : vector<14x128xf32>
    %41 = arith.maximumf %33, %40 : vector<14x128xf32>
    %c0_18 = arith.constant 0 : index
    %c0_19 = arith.constant 0 : index
    %42 = vector.load %arg5[%c0_18, %c0_19] : memref<16x128xf32, #tpu.memory_space<vmem>>, vector<14x128xf32>
    tpu.vector_store %arg5[%c0_18, %c0_19], %41 {strides = array<i32>} : memref<16x128xf32, #tpu.memory_space<vmem>>, vector<14x128xf32>,
    %c0_20 = arith.constant 0 : index
    %c0_21 = arith.constant 0 : index
    %43 = tpu.strided_load %arg5[%c0_20, %c0_21] {strides = array<i32: 2, 1>} : memref<16x128xf32, #tpu.memory_space<vmem>>, vector<7x128xf32>
    %c1_22 = arith.constant 1 : index
    %c0_23 = arith.constant 0 : index
    %44 = tpu.strided_load %arg5[%c1_22, %c0_23] {strides = array<i32: 2, 1>} : memref<16x128xf32, #tpu.memory_space<vmem>>, vector<7x128xf32>
    %45 = arith.maximumf %43, %44 : vector<7x128xf32>
    %46 = arith.truncf %45 : vector<7x128xf32> to vector<7x128xbf16>
    %c7 = arith.constant 7 : index
    %c0_24 = arith.constant 0 : index
    %47 = vector.load %arg4[%c7, %c0_24] : memref<64x128xbf16, #tpu.memory_space<vmem>>, vector<7x128xbf16>
    tpu.vector_store %arg4[%c7, %c0_24], %46 {strides = array<i32>} : memref<64x128xbf16, #tpu.memory_space<vmem>>, vector<7x128xbf16>,
    %c56 = arith.constant 56 : index
    %c0_25 = arith.constant 0 : index
    %48 = vector.load %arg1[%c56, %c0_25] : memref<256x128xbf16, #tpu.memory_space<vmem>>, vector<14x128xbf16>
    %c70 = arith.constant 70 : index
    %c0_26 = arith.constant 0 : index
    %49 = vector.load %arg1[%c70, %c0_26] : memref<256x128xbf16, #tpu.memory_space<vmem>>, vector<14x128xbf16>
    %50 = arith.extf %48 : vector<14x128xbf16> to vector<14x128xf32>
    %51 = vector.broadcast %0 : vector<1x128xf32> to vector<14x128xf32>
    %52 = arith.mulf %50, %51 : vector<14x128xf32>
    %53 = vector.broadcast %1 : vector<1x128xf32> to vector<14x128xf32>
    %54 = arith.addf %52, %53 : vector<14x128xf32>
    %cst_27 = arith.constant 0.000000e+00 : f32
    %55 = vector.broadcast %cst_27 : f32 to vector<14x128xf32>
    %56 = arith.maximumf %54, %55 : vector<14x128xf32>
    %57 = arith.extf %49 : vector<14x128xbf16> to vector<14x128xf32>
    %58 = vector.broadcast %0 : vector<1x128xf32> to vector<14x128xf32>
    %59 = arith.mulf %57, %58 : vector<14x128xf32>
    %60 = vector.broadcast %1 : vector<1x128xf32> to vector<14x128xf32>
    %61 = arith.addf %59, %60 : vector<14x128xf32>
    %cst_28 = arith.constant 0.000000e+00 : f32
    %62 = vector.broadcast %cst_28 : f32 to vector<14x128xf32>
    %63 = arith.maximumf %61, %62 : vector<14x128xf32>
    %64 = arith.maximumf %56, %63 : vector<14x128xf32>
    %c0_29 = arith.constant 0 : index
    %c0_30 = arith.constant 0 : index
    %65 = vector.load %arg5[%c0_29, %c0_30] : memref<16x128xf32, #tpu.memory_space<vmem>>, vector<14x128xf32>
    tpu.vector_store %arg5[%c0_29, %c0_30], %64 {strides = array<i32>} : memref<16x128xf32, #tpu.memory_space<vmem>>, vector<14x128xf32>,
    %c0_31 = arith.constant 0 : index
    %c0_32 = arith.constant 0 : index
    %66 = tpu.strided_load %arg5[%c0_31, %c0_32] {strides = array<i32: 2, 1>} : memref<16x128xf32, #tpu.memory_space<vmem>>, vector<7x128xf32>
    %c1_33 = arith.constant 1 : index
    %c0_34 = arith.constant 0 : index
    %67 = tpu.strided_load %arg5[%c1_33, %c0_34] {strides = array<i32: 2, 1>} : memref<16x128xf32, #tpu.memory_space<vmem>>, vector<7x128xf32>
    %68 = arith.maximumf %66, %67 : vector<7x128xf32>
    %69 = arith.truncf %68 : vector<7x128xf32> to vector<7x128xbf16>
    %c14_35 = arith.constant 14 : index
    %c0_36 = arith.constant 0 : index
    %70 = vector.load %arg4[%c14_35, %c0_36] : memref<64x128xbf16, #tpu.memory_space<vmem>>, vector<7x128xbf16>
    tpu.vector_store %arg4[%c14_35, %c0_36], %69 {strides = array<i32>} : memref<64x128xbf16, #tpu.memory_space<vmem>>, vector<7x128xbf16>,
    %c84 = arith.constant 84 : index
    %c0_37 = arith.constant 0 : index
    %71 = vector.load %arg1[%c84, %c0_37] : memref<256x128xbf16, #tpu.memory_space<vmem>>, vector<14x128xbf16>
    %c98 = arith.constant 98 : index
    %c0_38 = arith.constant 0 : index
    %72 = vector.load %arg1[%c98, %c0_38] : memref<256x128xbf16, #tpu.memory_space<vmem>>, vector<14x128xbf16>
    %73 = arith.extf %71 : vector<14x128xbf16> to vector<14x128xf32>
    %74 = vector.broadcast %0 : vector<1x128xf32> to vector<14x128xf32>
    %75 = arith.mulf %73, %74 : vector<14x128xf32>
    %76 = vector.broadcast %1 : vector<1x128xf32> to vector<14x128xf32>
    %77 = arith.addf %75, %76 : vector<14x128xf32>
    %cst_39 = arith.constant 0.000000e+00 : f32
    %78 = vector.broadcast %cst_39 : f32 to vector<14x128xf32>
    %79 = arith.maximumf %77, %78 : vector<14x128xf32>
    %80 = arith.extf %72 : vector<14x128xbf16> to vector<14x128xf32>
    %81 = vector.broadcast %0 : vector<1x128xf32> to vector<14x128xf32>
    %82 = arith.mulf %80, %81 : vector<14x128xf32>
    %83 = vector.broadcast %1 : vector<1x128xf32> to vector<14x128xf32>
    %84 = arith.addf %82, %83 : vector<14x128xf32>
    %cst_40 = arith.constant 0.000000e+00 : f32
    %85 = vector.broadcast %cst_40 : f32 to vector<14x128xf32>
    %86 = arith.maximumf %84, %85 : vector<14x128xf32>
    %87 = arith.maximumf %79, %86 : vector<14x128xf32>
    %c0_41 = arith.constant 0 : index
    %c0_42 = arith.constant 0 : index
    %88 = vector.load %arg5[%c0_41, %c0_42] : memref<16x128xf32, #tpu.memory_space<vmem>>, vector<14x128xf32>
    tpu.vector_store %arg5[%c0_41, %c0_42], %87 {strides = array<i32>} : memref<16x128xf32, #tpu.memory_space<vmem>>, vector<14x128xf32>,
    %c0_43 = arith.constant 0 : index
    %c0_44 = arith.constant 0 : index
    %89 = tpu.strided_load %arg5[%c0_43, %c0_44] {strides = array<i32: 2, 1>} : memref<16x128xf32, #tpu.memory_space<vmem>>, vector<7x128xf32>
    %c1_45 = arith.constant 1 : index
    %c0_46 = arith.constant 0 : index
    %90 = tpu.strided_load %arg5[%c1_45, %c0_46] {strides = array<i32: 2, 1>} : memref<16x128xf32, #tpu.memory_space<vmem>>, vector<7x128xf32>
    %91 = arith.maximumf %89, %90 : vector<7x128xf32>
    %92 = arith.truncf %91 : vector<7x128xf32> to vector<7x128xbf16>
    %c21 = arith.constant 21 : index
    %c0_47 = arith.constant 0 : index
    %93 = vector.load %arg4[%c21, %c0_47] : memref<64x128xbf16, #tpu.memory_space<vmem>>, vector<7x128xbf16>
    tpu.vector_store %arg4[%c21, %c0_47], %92 {strides = array<i32>} : memref<64x128xbf16, #tpu.memory_space<vmem>>, vector<7x128xbf16>,
    %c112 = arith.constant 112 : index
    %c0_48 = arith.constant 0 : index
    %94 = vector.load %arg1[%c112, %c0_48] : memref<256x128xbf16, #tpu.memory_space<vmem>>, vector<14x128xbf16>
    %c126 = arith.constant 126 : index
    %c0_49 = arith.constant 0 : index
    %95 = vector.load %arg1[%c126, %c0_49] : memref<256x128xbf16, #tpu.memory_space<vmem>>, vector<14x128xbf16>
    %96 = arith.extf %94 : vector<14x128xbf16> to vector<14x128xf32>
    %97 = vector.broadcast %0 : vector<1x128xf32> to vector<14x128xf32>
    %98 = arith.mulf %96, %97 : vector<14x128xf32>
    %99 = vector.broadcast %1 : vector<1x128xf32> to vector<14x128xf32>
    %100 = arith.addf %98, %99 : vector<14x128xf32>
    %cst_50 = arith.constant 0.000000e+00 : f32
    %101 = vector.broadcast %cst_50 : f32 to vector<14x128xf32>
    %102 = arith.maximumf %100, %101 : vector<14x128xf32>
    %103 = arith.extf %95 : vector<14x128xbf16> to vector<14x128xf32>
    %104 = vector.broadcast %0 : vector<1x128xf32> to vector<14x128xf32>
    %105 = arith.mulf %103, %104 : vector<14x128xf32>
    %106 = vector.broadcast %1 : vector<1x128xf32> to vector<14x128xf32>
    %107 = arith.addf %105, %106 : vector<14x128xf32>
    %cst_51 = arith.constant 0.000000e+00 : f32
    %108 = vector.broadcast %cst_51 : f32 to vector<14x128xf32>
    %109 = arith.maximumf %107, %108 : vector<14x128xf32>
    %110 = arith.maximumf %102, %109 : vector<14x128xf32>
    %c0_52 = arith.constant 0 : index
    %c0_53 = arith.constant 0 : index
    %111 = vector.load %arg5[%c0_52, %c0_53] : memref<16x128xf32, #tpu.memory_space<vmem>>, vector<14x128xf32>
    tpu.vector_store %arg5[%c0_52, %c0_53], %110 {strides = array<i32>} : memref<16x128xf32, #tpu.memory_space<vmem>>, vector<14x128xf32>,
    %c0_54 = arith.constant 0 : index
    %c0_55 = arith.constant 0 : index
    %112 = tpu.strided_load %arg5[%c0_54, %c0_55] {strides = array<i32: 2, 1>} : memref<16x128xf32, #tpu.memory_space<vmem>>, vector<7x128xf32>
    %c1_56 = arith.constant 1 : index
    %c0_57 = arith.constant 0 : index
    %113 = tpu.strided_load %arg5[%c1_56, %c0_57] {strides = array<i32: 2, 1>} : memref<16x128xf32, #tpu.memory_space<vmem>>, vector<7x128xf32>
    %114 = arith.maximumf %112, %113 : vector<7x128xf32>
    %115 = arith.truncf %114 : vector<7x128xf32> to vector<7x128xbf16>
    %c28_58 = arith.constant 28 : index
    %c0_59 = arith.constant 0 : index
    %116 = vector.load %arg4[%c28_58, %c0_59] : memref<64x128xbf16, #tpu.memory_space<vmem>>, vector<7x128xbf16>
    tpu.vector_store %arg4[%c28_58, %c0_59], %115 {strides = array<i32>} : memref<64x128xbf16, #tpu.memory_space<vmem>>, vector<7x128xbf16>,
    %c140 = arith.constant 140 : index
    %c0_60 = arith.constant 0 : index
    %117 = vector.load %arg1[%c140, %c0_60] : memref<256x128xbf16, #tpu.memory_space<vmem>>, vector<14x128xbf16>
    %c154 = arith.constant 154 : index
    %c0_61 = arith.constant 0 : index
    %118 = vector.load %arg1[%c154, %c0_61] : memref<256x128xbf16, #tpu.memory_space<vmem>>, vector<14x128xbf16>
    %119 = arith.extf %117 : vector<14x128xbf16> to vector<14x128xf32>
    %120 = vector.broadcast %0 : vector<1x128xf32> to vector<14x128xf32>
    %121 = arith.mulf %119, %120 : vector<14x128xf32>
    %122 = vector.broadcast %1 : vector<1x128xf32> to vector<14x128xf32>
    %123 = arith.addf %121, %122 : vector<14x128xf32>
    %cst_62 = arith.constant 0.000000e+00 : f32
    %124 = vector.broadcast %cst_62 : f32 to vector<14x128xf32>
    %125 = arith.maximumf %123, %124 : vector<14x128xf32>
    %126 = arith.extf %118 : vector<14x128xbf16> to vector<14x128xf32>
    %127 = vector.broadcast %0 : vector<1x128xf32> to vector<14x128xf32>
    %128 = arith.mulf %126, %127 : vector<14x128xf32>
    %129 = vector.broadcast %1 : vector<1x128xf32> to vector<14x128xf32>
    %130 = arith.addf %128, %129 : vector<14x128xf32>
    %cst_63 = arith.constant 0.000000e+00 : f32
    %131 = vector.broadcast %cst_63 : f32 to vector<14x128xf32>
    %132 = arith.maximumf %130, %131 : vector<14x128xf32>
    %133 = arith.maximumf %125, %132 : vector<14x128xf32>
    %c0_64 = arith.constant 0 : index
    %c0_65 = arith.constant 0 : index
    %134 = vector.load %arg5[%c0_64, %c0_65] : memref<16x128xf32, #tpu.memory_space<vmem>>, vector<14x128xf32>
    tpu.vector_store %arg5[%c0_64, %c0_65], %133 {strides = array<i32>} : memref<16x128xf32, #tpu.memory_space<vmem>>, vector<14x128xf32>,
    %c0_66 = arith.constant 0 : index
    %c0_67 = arith.constant 0 : index
    %135 = tpu.strided_load %arg5[%c0_66, %c0_67] {strides = array<i32: 2, 1>} : memref<16x128xf32, #tpu.memory_space<vmem>>, vector<7x128xf32>
    %c1_68 = arith.constant 1 : index
    %c0_69 = arith.constant 0 : index
    %136 = tpu.strided_load %arg5[%c1_68, %c0_69] {strides = array<i32: 2, 1>} : memref<16x128xf32, #tpu.memory_space<vmem>>, vector<7x128xf32>
    %137 = arith.maximumf %135, %136 : vector<7x128xf32>
    %138 = arith.truncf %137 : vector<7x128xf32> to vector<7x128xbf16>
    %c35 = arith.constant 35 : index
    %c0_70 = arith.constant 0 : index
    %139 = vector.load %arg4[%c35, %c0_70] : memref<64x128xbf16, #tpu.memory_space<vmem>>, vector<7x128xbf16>
    tpu.vector_store %arg4[%c35, %c0_70], %138 {strides = array<i32>} : memref<64x128xbf16, #tpu.memory_space<vmem>>, vector<7x128xbf16>,
    %c168 = arith.constant 168 : index
    %c0_71 = arith.constant 0 : index
    %140 = vector.load %arg1[%c168, %c0_71] : memref<256x128xbf16, #tpu.memory_space<vmem>>, vector<14x128xbf16>
    %c182 = arith.constant 182 : index
    %c0_72 = arith.constant 0 : index
    %141 = vector.load %arg1[%c182, %c0_72] : memref<256x128xbf16, #tpu.memory_space<vmem>>, vector<14x128xbf16>
    %142 = arith.extf %140 : vector<14x128xbf16> to vector<14x128xf32>
    %143 = vector.broadcast %0 : vector<1x128xf32> to vector<14x128xf32>
    %144 = arith.mulf %142, %143 : vector<14x128xf32>
    %145 = vector.broadcast %1 : vector<1x128xf32> to vector<14x128xf32>
    %146 = arith.addf %144, %145 : vector<14x128xf32>
    %cst_73 = arith.constant 0.000000e+00 : f32
    %147 = vector.broadcast %cst_73 : f32 to vector<14x128xf32>
    %148 = arith.maximumf %146, %147 : vector<14x128xf32>
    %149 = arith.extf %141 : vector<14x128xbf16> to vector<14x128xf32>
    %150 = vector.broadcast %0 : vector<1x128xf32> to vector<14x128xf32>
    %151 = arith.mulf %149, %150 : vector<14x128xf32>
    %152 = vector.broadcast %1 : vector<1x128xf32> to vector<14x128xf32>
    %153 = arith.addf %151, %152 : vector<14x128xf32>
    %cst_74 = arith.constant 0.000000e+00 : f32
    %154 = vector.broadcast %cst_74 : f32 to vector<14x128xf32>
    %155 = arith.maximumf %153, %154 : vector<14x128xf32>
    %156 = arith.maximumf %148, %155 : vector<14x128xf32>
    %c0_75 = arith.constant 0 : index
    %c0_76 = arith.constant 0 : index
    %157 = vector.load %arg5[%c0_75, %c0_76] : memref<16x128xf32, #tpu.memory_space<vmem>>, vector<14x128xf32>
    tpu.vector_store %arg5[%c0_75, %c0_76], %156 {strides = array<i32>} : memref<16x128xf32, #tpu.memory_space<vmem>>, vector<14x128xf32>,
    %c0_77 = arith.constant 0 : index
    %c0_78 = arith.constant 0 : index
    %158 = tpu.strided_load %arg5[%c0_77, %c0_78] {strides = array<i32: 2, 1>} : memref<16x128xf32, #tpu.memory_space<vmem>>, vector<7x128xf32>
    %c1_79 = arith.constant 1 : index
    %c0_80 = arith.constant 0 : index
    %159 = tpu.strided_load %arg5[%c1_79, %c0_80] {strides = array<i32: 2, 1>} : memref<16x128xf32, #tpu.memory_space<vmem>>, vector<7x128xf32>
    %160 = arith.maximumf %158, %159 : vector<7x128xf32>
    %161 = arith.truncf %160 : vector<7x128xf32> to vector<7x128xbf16>
    %c42_81 = arith.constant 42 : index
    %c0_82 = arith.constant 0 : index
    %162 = vector.load %arg4[%c42_81, %c0_82] : memref<64x128xbf16, #tpu.memory_space<vmem>>, vector<7x128xbf16>
    tpu.vector_store %arg4[%c42_81, %c0_82], %161 {strides = array<i32>} : memref<64x128xbf16, #tpu.memory_space<vmem>>, vector<7x128xbf16>,
    return
  }
  func.func @transform_0(%arg0: i32) -> (i32, i32) {
    %c0_i32 = arith.constant 0 : i32
    %c0_i32_0 = arith.constant 0 : i32
    return %arg0, %c0_i32 : i32, i32
  }
  func.func @transform_1(%arg0: i32) -> (i32, i32) {
    %c0_i32 = arith.constant 0 : i32
    %c0_i32_0 = arith.constant 0 : i32
    %c0_i32_1 = arith.constant 0 : i32
    return %c0_i32, %c0_i32_0 : i32, i32
  }
  func.func @transform_2(%arg0: i32) -> (i32, i32) {
    %c0_i32 = arith.constant 0 : i32
    %c0_i32_0 = arith.constant 0 : i32
    %c0_i32_1 = arith.constant 0 : i32
    return %c0_i32, %c0_i32_0 : i32, i32
  }
  func.func @transform_3(%arg0: i32) -> (i32, i32) {
    %c0_i32 = arith.constant 0 : i32
    %c0_i32_0 = arith.constant 0 : i32
    return %arg0, %c0_i32 : i32, i32
  }
}

module attributes {stable_mosaic.version = 11 : i64} {
  func.func @_fc_kernel(%arg0: i32, %arg1: memref<2x2048xbf16, #tpu.memory_space<vmem>>, %arg2: memref<2048x128xbf16, #tpu.memory_space<vmem>>, %arg3: memref<1x128xf32, #tpu.memory_space<vmem>>, %arg4: memref<2x128xf32, #tpu.memory_space<vmem>>) attributes {dimension_semantics = [#tpu.dimension_semantics<parallel>], iteration_bounds = array<i64: 1>, scalar_prefetch = 0 : i64, scratch_operands = 0 : i64, tpu.core_type = #tpu.core_type<tc>, window_params = [{transform_indices = @transform_0, window_bounds = array<i64: 2, 2048>}, {pipeline_mode = #tpu.pipeline_mode<synchronous>, transform_indices = @transform_1, window_bounds = array<i64: 2048, 128>}, {pipeline_mode = #tpu.pipeline_mode<synchronous>, transform_indices = @transform_2, window_bounds = array<i64: 1, 128>}, {transform_indices = @transform_3, window_bounds = array<i64: 2, 128>}]} {
    %c0 = arith.constant 0 : index
    %c0_0 = arith.constant 0 : index
    %0 = vector.load %arg1[%c0, %c0_0] : memref<2x2048xbf16, #tpu.memory_space<vmem>>, vector<2x2048xbf16>
    %c0_1 = arith.constant 0 : index
    %c0_2 = arith.constant 0 : index
    %1 = vector.load %arg2[%c0_1, %c0_2] : memref<2048x128xbf16, #tpu.memory_space<vmem>>, vector<2048x128xbf16>
    %cst = arith.constant dense<0.000000e+00> : vector<2x128xf32>
    %2 = tpu.matmul %0, %1, %cst {dimension_numbers = #tpu.dot_dimension_numbers<[1], [0], [0], [1], [0, 0, 1, 1], [], []>} : vector<2x2048xbf16>, vector<2048x128xbf16>, vector<2x128xf32> -> vector<2x128xf32>
    %c0_3 = arith.constant 0 : index
    %c0_4 = arith.constant 0 : index
    %3 = vector.load %arg3[%c0_3, %c0_4] : memref<1x128xf32, #tpu.memory_space<vmem>>, vector<1x128xf32>
    %4 = vector.broadcast %3 : vector<1x128xf32> to vector<2x128xf32>
    %5 = arith.addf %2, %4 : vector<2x128xf32>
    %c0_5 = arith.constant 0 : index
    %c0_6 = arith.constant 0 : index
    %6 = vector.load %arg4[%c0_5, %c0_6] : memref<2x128xf32, #tpu.memory_space<vmem>>, vector<2x128xf32>
    tpu.vector_store %arg4[%c0_5, %c0_6], %5 {strides = array<i32>} : memref<2x128xf32, #tpu.memory_space<vmem>>, vector<2x128xf32>,
    return
  }
  func.func @transform_0(%arg0: i32) -> (i32, i32) {
    %c0_i32 = arith.constant 0 : i32
    %c0_i32_0 = arith.constant 0 : i32
    return %arg0, %c0_i32 : i32, i32
  }
  func.func @transform_1(%arg0: i32) -> (i32, i32) {
    %c0_i32 = arith.constant 0 : i32
    %c0_i32_0 = arith.constant 0 : i32
    %c0_i32_1 = arith.constant 0 : i32
    return %c0_i32, %c0_i32_0 : i32, i32
  }
  func.func @transform_2(%arg0: i32) -> (i32, i32) {
    %c0_i32 = arith.constant 0 : i32
    %c0_i32_0 = arith.constant 0 : i32
    %c0_i32_1 = arith.constant 0 : i32
    return %c0_i32, %c0_i32_0 : i32, i32
  }
  func.func @transform_3(%arg0: i32) -> (i32, i32) {
    %c0_i32 = arith.constant 0 : i32
    %c0_i32_0 = arith.constant 0 : i32
    return %arg0, %c0_i32 : i32, i32
  }
}

</mosaic_0001>

<bundles_post_ra>
// kernel: cnn_forward.5
= control target key start
LH: loop header
LB: loop body
LE: loop exit
PB: predicated region body
PF: predicated region fallthrough
CT: control target
= control target key end

     0   :  { %s3678_s15 = smov 0   ;;  %s4182_s0 = inlined_call_operand.vmem [shape: bf16[1792,32], index: 0, kind: input, shape index: {}]   ;;  %s4183_s1 = inlined_call_operand.vmem [shape: bf16[32,128], index: 1, kind: input, shape index: {}]   ;;  %s4184_s2 = inlined_call_operand.vmem [shape: bf16[1792,128], index: 2, kind: output, shape index: {0}]   ;;  %s4185_s3 = inlined_call_operand.vmem [shape: f32[2,1,128], index: 3, kind: output, shape index: {1}]   ;;  %s4186_s4 = inlined_call_operand.vmem [shape: f32[2,1,128], index: 4, kind: output, shape index: {2}]  }
   0x1 LB: > { %s3684_s16 = sadd.s32 4294967295, %s3651_s15   ;;  %p2663_p0 = scmp.ge.s32.totalorder %s3651_s15, 1  ;;  %s3651_s15 = sphi %s3678_s15, %s15_s15  }
   0x2   : > { %p168_p1 = scmp.lt.s32.totalorder %s3651_s15, 3 }
   0x4   : > { %p169_p2 = pnand %p2663_p0, %p168_p1 }
   0x5   : > { %v3575_v0 = vld [vmem:[%s4183_s1] sm:$0xff] (!%p169_p2)   ;;  %s200_s19 = smul.u32 (!%p169_p2), 112, %s3684_s16  ;;  %v3576_v1 = vld [vmem:[%s4183_s1 + $0x8] sm:$0xff] (!%p169_p2)   ;;  %vm291_vm0 = vcmask (!%p169_p2), 261120   ;;  %p212_p4 = scmp.lt.s32.totalorder (!%p169_p2), %s3684_s16, 1 }
   0x6   : > { %172 = sbr.rel (%p169_p2) target bundleno = 372 (0x174), region = 28  ;;  %3563 = vmatprep.subr.bf16.mxu1 (!%p169_p2), %v3575_v0  ;;  %3423 = vmatprep.subr.bf16.mxu0 (!%p169_p2), %v3575_v0  ;;  %v3579_v2 = vld [vmem:[%s4183_s1] sm:$0xff] (!%p169_p2)   ;;  %v3585_v6 = vld [vmem:[%s4183_s1 + $0x8] sm:$0xff] (!%p169_p2)  }
   0x7   : > { %p201_p3 = scmp.lt.s32.totalorder (!%p169_p2), %s200_s19, 223  ;;  %3565 = vmatpush3.bf16.msra.mxu1 (!%p169_p2), %v3575_v0  ;;  %3424 = vmatpush3.bf16.msra.mxu0 (!%p169_p2), %v3575_v0  ;;  %v3582_v3 = vld [vmem:[%s4183_s1] sm:$0xff] (!%p169_p2)   ;;  %v3588_v8 = vld [vmem:[%s4183_s1 + $0x8] sm:$0xff] (!%p169_p2)  }
   0x8   : > { %3564 = vmatprep.subr.bf16.mxu1 (!%p169_p2), %v3576_v1  ;;  %3425 = vmatprep.subr.bf16.mxu0 (!%p169_p2), %v3576_v1  ;;  %v3591_v12 = vld [vmem:[%s4183_s1] sm:$0xff] (!%p169_p2)   ;;  %v3601_v22 = vld [vmem:[%s4183_s1 + $0x8] sm:$0xff] (!%p169_p2)  }
   0x9   : > { %v3594_v13 = vld [vmem:[%s4183_s1] sm:$0xff] (!%p169_p2)   ;;  %v3604_v23 = vld [vmem:[%s4183_s1 + $0x8] sm:$0xff] (!%p169_p2)  }
   0xa   : > { %v3611_v28 = vld [vmem:[%s4183_s1] sm:$0xff] (!%p169_p2)   ;;  %v3621_v42 = vld [vmem:[%s4183_s1 + $0x8] sm:$0xff] (!%p169_p2)  }
   0xb   : > { %3566 = vmatpush3.bf16.msra.mxu1 (!%p169_p2), %v3576_v1  ;;  %3426 = vmatpush3.bf16.msra.mxu0 (!%p169_p2), %v3576_v1  ;;  %v3614_v30 = vld [vmem:[%s4183_s1] sm:$0xff] (!%p169_p2)   ;;  %v3624_v43 = vld [vmem:[%s4183_s1 + $0x8] sm:$0xff] (!%p169_p2)  }
   0xc   : > { %3443 = vmatprep.subr.bf16.mxu1 (!%p169_p2), %v3579_v2  ;;  %3463 = vmatprep.subr.bf16.mxu0 (!%p169_p2), %v3582_v3 }
   0xd   : > { %s4188_s19 = smov (!%p201_p3, %s200_s19), 223  ;;  %s4190_s16 = smov (!%p212_p4, %s3684_s16), 1 }
   0xe   : > { %s2664_s26 = sshll.u32 %s4188_s19, 2  ;;  %s217_s8 = scalar_lea.vmem %s4186_s4, %s4190_s16 }
   0xf   : > { %s3709_s29 = scalar_lea.vmem %s4182_s0, %s2664_s26  ;;  %s3860_s5 = scalar_lea.vmem %s4184_s2, %s2664_s26 }
  0x10   : > { %v3577_v4 = vld [vmem:[%s3709_s29] sm:$0xff]   ;;  %v3580_v7 = vld [vmem:[%s3709_s29 + $0x8] sm:$0xff]   ;;  %v3583_v10 = vld [vmem:[%s3709_s29 + $0x10] sm:$0xff]  }
  0x11   : > { %v3578_v5 = vld [vmem:[%s3709_s29 + $0x20] sm:$0xff]   ;;  %3427 = vmatprep.mubr.msk.bf16.mxu0 %vm291_vm0, %v3577_v4  ;;  %v3581_v9 = vld [vmem:[%s3709_s29 + $0x28] sm:$0xff]   ;;  %v3584_v11 = vld [vmem:[%s3709_s29 + $0x30] sm:$0xff]  }
  0x12   : > { %3435 = vmatprep.mubr.msk.bf16.mxu1 %vm291_vm0, %v3578_v5  ;;  %3428 = vmatmul.mubr.msk.bf16.vlgmr.msra.gmra.mrb[0].mxu0 %vm291_vm0, %v3580_v7  ;;  %v3586_v14 = vld [vmem:[%s3709_s29 + $0x18] sm:$0xff]   ;;  %v3590_v16 = vld [vmem:[%s3709_s29 + $0x80] sm:$0xff]   ;;  %v3592_v18 = vld [vmem:[%s3709_s29 + $0x48] sm:$0xff]  }
  0x13   : > { %3436 = vmatmul.mubr.msk.bf16.vlgmr.msra.gmra.mrb[0].mxu1 %vm291_vm0, %v3581_v9  ;;  %3464 = vmatpush3.bf16.msra.mxu0 %v3582_v3  ;;  %v3587_v15 = vld [vmem:[%s3709_s29 + $0x38] sm:$0xff]   ;;  %v3589_v17 = vld [vmem:[%s3709_s29 + $0x40] sm:$0xff]   ;;  %v3593_v19 = vld [vmem:[%s3709_s29 + $0x88] sm:$0xff]  }
  0x14   : > { %3444 = vmatpush3.bf16.msra.mxu1 %v3579_v2  ;;  %3431 = vmatprep.mubr.msk.bf16.mxu0 %vm291_vm0, %v3583_v10  ;;  %v3595_v20 = vld [vmem:[%s3709_s29 + $0x50] sm:$0xff]   ;;  %v3597_v24 = vld [vmem:[%s3709_s29 + $0x58] sm:$0xff]   ;;  %v3600_v26 = vld [vmem:[%s3709_s29 + $0xa0] sm:$0xff]  }
  0x15   : > { %3439 = vmatprep.mubr.msk.bf16.mxu1 %vm291_vm0, %v3584_v11  ;;  %3445 = vmatprep.subr.bf16.mxu1 %v3585_v6  ;;  %v3596_v21 = vld [vmem:[%s3709_s29 + $0x90] sm:$0xff]   ;;  %v3598_v25 = vld [vmem:[%s3709_s29 + $0x98] sm:$0xff]   ;;  %v3599_v27 = vld [vmem:[%s3709_s29 + $0x60] sm:$0xff]  }
  0x16   : > { %3465 = vmatprep.subr.bf16.mxu0 %v3588_v8  ;;  %v3602_v29 = vld [vmem:[%s3709_s29 + $0x68] sm:$0xff]   ;;  %v3606_v32 = vld [vmem:[%s3709_s29 + $0xb0] sm:$0xff]   ;;  %v3607_v34 = vld [vmem:[%s3709_s29 + $0x78] sm:$0xff]  }
  0x17   : > { %3466 = vmatpush3.bf16.msra.mxu0 %v3588_v8  ;;  %v3603_v31 = vld [vmem:[%s3709_s29 + $0xa8] sm:$0xff]   ;;  %v3605_v33 = vld [vmem:[%s3709_s29 + $0x70] sm:$0xff]   ;;  %v3608_v35 = vld [vmem:[%s3709_s29 + $0xb8] sm:$0xff]  }
  0x18   : > { %3446 = vmatpush3.bf16.msra.mxu1 %v3585_v6  ;;  %3503 = vmatprep.subr.bf16.mxu0 %v3594_v13  ;;  %v3610_v36 = vld [vmem:[%s3709_s29 + $0x100] sm:$0xff]   ;;  %v3612_v38 = vld [vmem:[%s3709_s29 + $0xc8] sm:$0xff]   ;;  %v3615_v40 = vld [vmem:[%s3709_s29 + $0xd0] sm:$0xff]  }
  0x19   : > { %3483 = vmatprep.subr.bf16.mxu1 %v3591_v12  ;;  %v3609_v37 = vld [vmem:[%s3709_s29 + $0xc0] sm:$0xff]   ;;  %v3613_v39 = vld [vmem:[%s3709_s29 + $0x108] sm:$0xff]   ;;  %v3616_v41 = vld [vmem:[%s3709_s29 + $0x110] sm:$0xff]  }
  0x1a   : > { %3432 = vmatmul.mubr.msk.bf16.gmra.mrb[4].mxu0 %vm291_vm0, %v3586_v14  ;;  %v3617_v44 = vld [vmem:[%s3709_s29 + $0xd8] sm:$0xff]   ;;  %v3620_v46 = vld [vmem:[%s3709_s29 + $0x120] sm:$0xff]   ;;  %v3623_v48 = vld [vmem:[%s3709_s29 + $0x128] sm:$0xff]  }
  0x1b   : > { %3440 = vmatmul.mubr.msk.bf16.gmra.mrb[4].mxu1 %vm291_vm0, %v3587_v15  ;;  %3467 = vmatprep.mubr.msk.bf16.mxu0 %vm291_vm0, %v3590_v16  ;;  %v3618_v45 = vld [vmem:[%s3709_s29 + $0x118] sm:$0xff]   ;;  %v3619_v47 = vld [vmem:[%s3709_s29 + $0xe0] sm:$0xff]   ;;  %v3622_v49 = vld [vmem:[%s3709_s29 + $0xe8] sm:$0xff]  }
  0x1c   : > { %3447 = vmatprep.mubr.msk.bf16.mxu1 %vm291_vm0, %v3589_v17  ;;  %v3626_v50 = vld [vmem:[%s3709_s29 + $0x130] sm:$0xff]   ;;  %v3628_v52 = vld [vmem:[%s3709_s29 + $0x138] sm:$0xff]   ;;  %v3630_v54 = vld [vmem:[%s3709_s29 + $0x180] sm:$0xff]  }
  0x1d   : > { %v3625_v51 = vld [vmem:[%s3709_s29 + $0xf0] sm:$0xff]   ;;  %v3627_v53 = vld [vmem:[%s3709_s29 + $0xf8] sm:$0xff]   ;;  %v3629_v55 = vld [vmem:[%s3709_s29 + $0x140] sm:$0xff]  }
  0x1e   : > { %v3632_v56 = vld [vmem:[%s3709_s29 + $0x188] sm:$0xff]   ;;  %v3634_v58 = vld [vmem:[%s3709_s29 + $0x190] sm:$0xff]   ;;  %v3636_v60 = vld [vmem:[%s3709_s29 + $0x198] sm:$0xff]  }
  0x1f   : > { %v3631_v57 = vld [vmem:[%s3709_s29 + $0x148] sm:$0xff]   ;;  %v3633_v59 = vld [vmem:[%s3709_s29 + $0x150] sm:$0xff]   ;;  %v3635_v61 = vld [vmem:[%s3709_s29 + $0x158] sm:$0xff]  }
  0x20   : > { %v3638_v62 = vld [vmem:[%s3709_s29 + $0x1a0] sm:$0xff]   ;;  %v3640_v0 = vld [vmem:[%s3709_s29 + $0x1a8] sm:$0xff]   ;;  %v3642_v2 = vld [vmem:[%s3709_s29 + $0x1b0] sm:$0xff]  }
  0x21   : > { %v3637_v63 = vld [vmem:[%s3709_s29 + $0x160] sm:$0xff]   ;;  %v3639_v1 = vld [vmem:[%s3709_s29 + $0x168] sm:$0xff]   ;;  %v3641_v3 = vld [vmem:[%s3709_s29 + $0x170] sm:$0xff]  }
  0x22   : > { %3468 = vmatmul.mubr.msk.bf16.vlgmr.msra.gmra.mrb[8].mxu0 %vm291_vm0, %v3593_v19  ;;  %v3644_v4 = vld [vmem:[%s3709_s29 + $0x1b8] sm:$0xff]  }
  0x23   : > { %3448 = vmatmul.mubr.msk.bf16.vlgmr.msra.gmra.mrb[8].mxu1 %vm291_vm0, %v3592_v18  ;;  %3504 = vmatpush3.bf16.msra.mxu0 %v3594_v13  ;;  %v3643_v5 = vld [vmem:[%s3709_s29 + $0x178] sm:$0xff]   ;;  %s214_s29 = scalar_lea.vmem %s4185_s3, %s4190_s16 }
  0x24   : > { %3484 = vmatpush3.bf16.msra.mxu1 %v3591_v12  ;;  %3451 = vmatprep.mubr.msk.bf16.mxu1 %vm291_vm0, %v3595_v20 }
  0x25   : > { %3471 = vmatprep.mubr.msk.bf16.mxu0 %vm291_vm0, %v3596_v21  ;;  %3485 = vmatprep.subr.bf16.mxu1 %v3601_v22 }
  0x26   : > { %3505 = vmatprep.subr.bf16.mxu0 %v3604_v23 }
  0x27   : > { %3506 = vmatpush3.bf16.msra.mxu0 %v3604_v23 }
  0x28   : > { %3486 = vmatpush3.bf16.msra.mxu1 %v3601_v22  ;;  %3543 = vmatprep.subr.bf16.mxu0 %v3614_v30 }
  0x29   : > { %3523 = vmatprep.subr.bf16.mxu1 %v3611_v28 }
  0x2a   : > { %3472 = vmatmul.mubr.msk.bf16.gmra.mrb[12].mxu0 %vm291_vm0, %v3598_v25 }
  0x2b   : > { %3452 = vmatmul.mubr.msk.bf16.gmra.mrb[12].mxu1 %vm291_vm0, %v3597_v24  ;;  %3475 = vmatprep.mubr.msk.bf16.mxu0 %vm291_vm0, %v3600_v26 }
  0x2c   : > { %3455 = vmatprep.mubr.msk.bf16.mxu1 %vm291_vm0, %v3599_v27 }
  0x32   : > { %3476 = vmatmul.mubr.msk.bf16.gmra.mrb[16].mxu0 %vm291_vm0, %v3603_v31 }
  0x33   : > { %3456 = vmatmul.mubr.msk.bf16.gmra.mrb[16].mxu1 %vm291_vm0, %v3602_v29  ;;  %3479 = vmatprep.mubr.msk.bf16.mxu0 %vm291_vm0, %v3606_v32 }
  0x34   : > { %3459 = vmatprep.mubr.msk.bf16.mxu1 %vm291_vm0, %v3605_v33 }
  0x3a   : > { %3480 = vmatmul.mubr.msk.bf16.gmra.mrb[20].mxu0 %vm291_vm0, %v3608_v35 }
  0x3b   : > { %3460 = vmatmul.mubr.msk.bf16.gmra.mrb[20].mxu1 %vm291_vm0, %v3607_v34  ;;  %3507 = vmatprep.mubr.msk.bf16.mxu0 %vm291_vm0, %v3610_v36 }
  0x3c   : > { %3487 = vmatprep.mubr.msk.bf16.mxu1 %vm291_vm0, %v3609_v37 }
  0x42   : > { %3508 = vmatmul.mubr.msk.bf16.vlgmr.msra.gmra.mrb[24].mxu0 %vm291_vm0, %v3613_v39 }
  0x43   : > { %3488 = vmatmul.mubr.msk.bf16.vlgmr.msra.gmra.mrb[24].mxu1 %vm291_vm0, %v3612_v38  ;;  %3544 = vmatpush3.bf16.msra.mxu0 %v3614_v30 }
  0x44   : > { %3524 = vmatpush3.bf16.msra.mxu1 %v3611_v28  ;;  %3491 = vmatprep.mubr.msk.bf16.mxu1 %vm291_vm0, %v3615_v40 }
  0x45   : > { %3511 = vmatprep.mubr.msk.bf16.mxu0 %vm291_vm0, %v3616_v41  ;;  %3525 = vmatprep.subr.bf16.mxu1 %v3621_v42 }
  0x46   : > { %3545 = vmatprep.subr.bf16.mxu0 %v3624_v43 }
  0x47   : > { %3546 = vmatpush3.bf16.msra.mxu0 %v3624_v43 }
  0x48   : > { %3526 = vmatpush3.bf16.msra.mxu1 %v3621_v42 }
  0x4a   : > { %3512 = vmatmul.mubr.msk.bf16.gmra.mrb[28].mxu0 %vm291_vm0, %v3618_v45 }
  0x4b   : > { %3492 = vmatmul.mubr.msk.bf16.gmra.mrb[28].mxu1 %vm291_vm0, %v3617_v44  ;;  %3515 = vmatprep.mubr.msk.bf16.mxu0 %vm291_vm0, %v3620_v46 }
  0x4c   : > { %3495 = vmatprep.mubr.msk.bf16.mxu1 %vm291_vm0, %v3619_v47 }
  0x52   : > { %3516 = vmatmul.mubr.msk.bf16.gmra.mrb[32].mxu0 %vm291_vm0, %v3623_v48 }
  0x53   : > { %3496 = vmatmul.mubr.msk.bf16.gmra.mrb[32].mxu1 %vm291_vm0, %v3622_v49  ;;  %3519 = vmatprep.mubr.msk.bf16.mxu0 %vm291_vm0, %v3626_v50 }
  0x54   : > { %3499 = vmatprep.mubr.msk.bf16.mxu1 %vm291_vm0, %v3625_v51 }
  0x5a   : > { %3520 = vmatmul.mubr.msk.bf16.gmra.mrb[36].mxu0 %vm291_vm0, %v3628_v52 }
  0x5b   : > { %3500 = vmatmul.mubr.msk.bf16.gmra.mrb[36].mxu1 %vm291_vm0, %v3627_v53  ;;  %3547 = vmatprep.mubr.msk.bf16.mxu0 %vm291_vm0, %v3630_v54 }
  0x5c   : > { %3527 = vmatprep.mubr.msk.bf16.mxu1 %vm291_vm0, %v3629_v55 }
  0x62   : > { %3548 = vmatmul.mubr.msk.bf16.vlgmr.msra.gmra.mrb[40].mxu0 %vm291_vm0, %v3632_v56 }
  0x63   : > { %3528 = vmatmul.mubr.msk.bf16.vlgmr.msra.gmra.mrb[40].mxu1 %vm291_vm0, %v3631_v57  ;;  %3551 = vmatprep.mubr.msk.bf16.mxu0 %vm291_vm0, %v3634_v58 }
  0x64   : > { %3531 = vmatprep.mubr.msk.bf16.mxu1 %vm291_vm0, %v3633_v59 }
  0x6a   : > { %3552 = vmatmul.mubr.msk.bf16.gmra.mrb[44].mxu0 %vm291_vm0, %v3636_v60 }
  0x6b   : > { %3532 = vmatmul.mubr.msk.bf16.gmra.mrb[44].mxu1 %vm291_vm0, %v3635_v61  ;;  %3555 = vmatprep.mubr.msk.bf16.mxu0 %vm291_vm0, %v3638_v62 }
  0x6c   : > { %3535 = vmatprep.mubr.msk.bf16.mxu1 %vm291_vm0, %v3637_v63 }
  0x72   : > { %3556 = vmatmul.mubr.msk.bf16.gmra.mrb[48].mxu0 %vm291_vm0, %v3640_v0 }
  0x73   : > { %3536 = vmatmul.mubr.msk.bf16.gmra.mrb[48].mxu1 %vm291_vm0, %v3639_v1  ;;  %3559 = vmatprep.mubr.msk.bf16.mxu0 %vm291_vm0, %v3642_v2 }
  0x74   : > { %3539 = vmatprep.mubr.msk.bf16.mxu1 %vm291_vm0, %v3641_v3 }
  0x7a   : > { %3560 = vmatmul.mubr.msk.bf16.gmra.mrb[52].mxu0 %vm291_vm0, %v3644_v4 }
  0x7b   : > { %3540 = vmatmul.mubr.msk.bf16.gmra.mrb[52].mxu1 %vm291_vm0, %v3643_v5 }
  0xe5   : > { %v3429_v6 = vpop.f32.mrb[0].mxu0 }
  0xe6   : > { %v3853_v7 = vpop.f32.mrb[0].mxu1  ;;  %v350_v8 = vpop.f32.mrb[1].mxu0  ;;  %v517_v22 = vmul.f32 %v3429_v6, %v3429_v6 }
  0xe7   : > { %v382_v9 = vpop.f32.mrb[1].mxu1  ;;  %v3430_v10 = vpop.f32.mrb[2].mxu0  ;;  %v515_v11 = vmul.f32 %v350_v8, %v350_v8  ;;  %v525_v48 = vmul.f32 %v3853_v7, %v3853_v7 }
  0xe8   : > { %v3026_v12 = vpack.c.bf16 %v3430_v10, %v3429_v6  ;;  %v3862_v13 = vpop.f32.mrb[2].mxu1  ;;  %v353_v14 = vpop.f32.mrb[3].mxu0  ;;  %v518_v26 = vmul.f32 %v3430_v10, %v3430_v10  ;;  %v523_v51 = vmul.f32 %v382_v9, %v382_v9 }
  0xe9   : > { %v3046_v15 = vpack.c.bf16 %v3862_v13, %v3853_v7  ;;  %v3021_v16 = vpack.c.bf16 %v353_v14, %v350_v8  ;;  %v493_v17 = vadd.f32 %v353_v14, %v350_v8  ;;  %v385_v18 = vpop.f32.mrb[3].mxu1  ;;  %v516_v19 = vmul.f32 %v353_v14, %v353_v14 }
  0xea   : > { %3298 = vst [vmem:[%s3860_s5 + $0x8] sm:$0xff] %v3026_v12   ;;  %v3041_v20 = vpack.c.bf16 %v385_v18, %v382_v9  ;;  %v526_v52 = vmul.f32 %v3862_v13, %v3862_v13  ;;  %v524_v57 = vmul.f32 %v385_v18, %v385_v18 }
  0xeb   : > { %3302 = vst [vmem:[%s3860_s5 + $0x28] sm:$0xff] %v3046_v15   ;;  %3022 = vst [vmem:[%s3860_s5] sm:$0xff] %v3021_v16   ;;  %v494_v21 = vadd.f32 %v3429_v6, %v493_v17  ;;  %v531_v23 = vadd.f32 %v516_v19, %v515_v11 }
  0xec   : > { %3301 = vst [vmem:[%s3860_s5 + $0x20] sm:$0xff] %v3041_v20  }
  0xed   : > { %v3433_v24 = vpop.f32.mrb[4].mxu0  ;;  %v495_v25 = vadd.f32 %v3430_v10, %v494_v21  ;;  %v532_v27 = vadd.f32 %v531_v23, %v517_v22 }
  0xee   : > { %v3870_v28 = vpop.f32.mrb[4].mxu1  ;;  %v366_v29 = vpop.f32.mrb[5].mxu0  ;;  %v521_v46 = vmul.f32 %v3433_v24, %v3433_v24 }
  0xef   : > { %v496_v30 = vadd.f32 %v495_v25, %v366_v29  ;;  %v519_v31 = vmul.f32 %v366_v29, %v366_v29  ;;  %v3872_v32 = vpop.f32.mrb[5].mxu1  ;;  %v3434_v33 = vpop.f32.mrb[6].mxu0  ;;  %v533_v34 = vadd.f32 %v532_v27, %v518_v26  ;;  %v3892_v58 = vmul.f32 %v3870_v28, %v3870_v28 }
  0xf0   : > { %v3036_v35 = vpack.c.bf16 %v3434_v33, %v3433_v24  ;;  %v3874_v36 = vpop.f32.mrb[6].mxu1  ;;  %v369_v37 = vpop.f32.mrb[7].mxu0  ;;  %v522_v53 = vmul.f32 %v3434_v33, %v3434_v33  ;;  %v527_v59 = vmul.f32 %v3872_v32, %v3872_v32 }
  0xf1   : > { %v3056_v38 = vpack.c.bf16 %v3874_v36, %v3870_v28  ;;  %v3031_v39 = vpack.c.bf16 %v369_v37, %v366_v29  ;;  %v497_v40 = vadd.f32 %v496_v30, %v369_v37  ;;  %v3878_v41 = vpop.f32.mrb[7].mxu1  ;;  %v534_v42 = vadd.f32 %v533_v34, %v519_v31 }
  0xf2   : > { %3300 = vst [vmem:[%s3860_s5 + $0x18] sm:$0xff] %v3036_v35   ;;  %v520_v43 = vmul.f32 %v369_v37, %v369_v37  ;;  %v3051_v44 = vpack.c.bf16 %v3878_v41, %v3872_v32  ;;  %v3898_v63 = vmul.f32 %v3874_v36, %v3874_v36  ;;  %v528_v17 = vmul.f32 %v3878_v41, %v3878_v41 }
  0xf3   : > { %3304 = vst [vmem:[%s3860_s5 + $0x38] sm:$0xff] %v3056_v38   ;;  %3299 = vst [vmem:[%s3860_s5 + $0x10] sm:$0xff] %v3031_v39   ;;  %v498_v45 = vadd.f32 %v3433_v24, %v497_v40 }
  0xf4   : > { %v535_v47 = vadd.f32 %v534_v42, %v520_v43  ;;  %3303 = vst [vmem:[%s3860_s5 + $0x30] sm:$0xff] %v3051_v44  }
  0xf5   : > { %v499_v49 = vadd.f32 %v3434_v33, %v498_v45  ;;  %v3469_v50 = vpop.f32.mrb[8].mxu0 }
  0xf6   : > { %v536_v54 = vadd.f32 %v535_v47, %v521_v46  ;;  %v3449_v55 = vpop.f32.mrb[8].mxu1  ;;  %v1016_v56 = vpop.f32.mrb[9].mxu0  ;;  %v1183_v25 = vmul.f32 %v3469_v50, %v3469_v50 }
  0xf7   : > { %v500_v60 = vadd.f32 %v499_v49, %v382_v9  ;;  %v683_v61 = vpop.f32.mrb[9].mxu1  ;;  %v3470_v62 = vpop.f32.mrb[10].mxu0  ;;  %v1181_v1 = vmul.f32 %v1016_v56, %v1016_v56  ;;  %v850_v21 = vmul.f32 %v3449_v55, %v3449_v55 }
  0xf8   : > { %v537_v0 = vadd.f32 %v536_v54, %v522_v53  ;;  %v3450_v2 = vpop.f32.mrb[10].mxu1  ;;  %v3106_v3 = vpack.c.bf16 %v3470_v62, %v3469_v50  ;;  %v1019_v4 = vpop.f32.mrb[11].mxu0  ;;  %v848_v6 = vmul.f32 %v683_v61, %v683_v61  ;;  %v1184_v38 = vmul.f32 %v3470_v62, %v3470_v62 }
  0xf9   : > { %v501_v5 = vadd.f32 %v500_v60, %v385_v18  ;;  %v3066_v8 = vpack.c.bf16 %v3450_v2, %v3449_v55  ;;  %v686_v10 = vpop.f32.mrb[11].mxu1  ;;  %v3101_v11 = vpack.c.bf16 %v1019_v4, %v1016_v56  ;;  %v1159_v19 = vadd.f32 %v1019_v4, %v1016_v56 }
  0xfa   : > { %v538_v9 = vadd.f32 %v537_v0, %v523_v51  ;;  %3314 = vst [vmem:[%s3860_s5 + $0x88] sm:$0xff] %v3106_v3   ;;  %v3061_v12 = vpack.c.bf16 %v686_v10, %v683_v61  ;;  %v826_v14 = vadd.f32 %v686_v10, %v683_v61  ;;  %v849_v15 = vmul.f32 %v686_v10, %v686_v10 }
  0xfb   : > { %v502_v16 = vadd.f32 %v3853_v7, %v501_v5  ;;  %3306 = vst [vmem:[%s3860_s5 + $0x48] sm:$0xff] %v3066_v8   ;;  %3313 = vst [vmem:[%s3860_s5 + $0x80] sm:$0xff] %v3101_v11   ;;  %v1182_v20 = vmul.f32 %v1019_v4, %v1019_v4  ;;  %v1160_v26 = vadd.f32 %v3469_v50, %v1159_v19 }
  0xfc   : > { %v539_v18 = vadd.f32 %v538_v9, %v524_v57  ;;  %3305 = vst [vmem:[%s3860_s5 + $0x40] sm:$0xff] %v3061_v12   ;;  %v827_v22 = vadd.f32 %v3449_v55, %v826_v14  ;;  %v864_v23 = vadd.f32 %v849_v15, %v848_v6  ;;  %v851_v7 = vmul.f32 %v3450_v2, %v3450_v2 }
  0xfd   : > { %v503_v24 = vadd.f32 %v3862_v13, %v502_v16  ;;  %v1197_v27 = vadd.f32 %v1182_v20, %v1181_v1  ;;  %v3473_v29 = vpop.f32.mrb[12].mxu0  ;;  %v1161_v42 = vadd.f32 %v3470_v62, %v1160_v26 }
  0xfe   : > { %v540_v30 = vadd.f32 %v539_v18, %v525_v48  ;;  %v865_v31 = vadd.f32 %v864_v23, %v850_v21  ;;  %v3453_v33 = vpop.f32.mrb[12].mxu1  ;;  %v828_v34 = vadd.f32 %v3450_v2, %v827_v22  ;;  %v1032_v35 = vpop.f32.mrb[13].mxu0  ;;  %v1187_v55 = vmul.f32 %v3473_v29, %v3473_v29 }
  0xff   : > { %v504_v37 = vadd.f32 %v503_v24, %v3872_v32  ;;  %v1198_v39 = vadd.f32 %v1197_v27, %v1183_v25  ;;  %v699_v40 = vpop.f32.mrb[13].mxu1  ;;  %v3474_v43 = vpop.f32.mrb[14].mxu0  ;;  %v1162_v50 = vadd.f32 %v1161_v42, %v1032_v35  ;;  %v1185_v51 = vmul.f32 %v1032_v35, %v1032_v35 }
 0x100   : > { %v541_v44 = vadd.f32 %v540_v30, %v526_v52  ;;  %v829_v45 = vadd.f32 %v828_v34, %v699_v40  ;;  %v852_v13 = vmul.f32 %v699_v40, %v699_v40  ;;  %v866_v46 = vadd.f32 %v865_v31, %v851_v7  ;;  %v3454_v47 = vpop.f32.mrb[14].mxu1  ;;  %v1035_v49 = vpop.f32.mrb[15].mxu0 }
 0x101   : > { %v505_v48 = vadd.f32 %v504_v37, %v3878_v41  ;;  %v1199_v53 = vadd.f32 %v1198_v39, %v1184_v38  ;;  %v702_v54 = vpop.f32.mrb[15].mxu1  ;;  %v3076_v57 = vpack.c.bf16 %v3454_v47, %v3453_v33  ;;  %v854_v52 = vmul.f32 %v3453_v33, %v3453_v33 }
 0x102   : > { %v542_v32 = vadd.f32 %v541_v44, %v527_v59  ;;  %v867_v56 = vadd.f32 %v866_v46, %v852_v13  ;;  %v3116_v62 = vpack.c.bf16 %v3474_v43, %v3473_v29  ;;  %v3071_v1 = vpack.c.bf16 %v702_v54, %v699_v40 }
 0x103   : > { %v506_v60 = vadd.f32 %v3870_v28, %v505_v48  ;;  %v1200_v61 = vadd.f32 %v1199_v53, %v1185_v51  ;;  %3308 = vst [vmem:[%s3860_s5 + $0x58] sm:$0xff] %v3076_v57   ;;  %v830_v2 = vadd.f32 %v829_v45, %v702_v54  ;;  %v853_v41 = vmul.f32 %v702_v54, %v702_v54 }
 0x104   : > { %v543_v0 = vadd.f32 %v542_v32, %v528_v17  ;;  %3316 = vst [vmem:[%s3860_s5 + $0x98] sm:$0xff] %v3116_v62   ;;  %v3111_v4 = vpack.c.bf16 %v1035_v49, %v1032_v35  ;;  %v1163_v59 = vadd.f32 %v1162_v50, %v1035_v49  ;;  %v1186_v5 = vmul.f32 %v1035_v49, %v1035_v49 }
 0x105   : > { %v507_v3 = vadd.f32 %v3874_v36, %v506_v60  ;;  %v3477_v6 = vpop.f32.mrb[16].mxu0  ;;  %v855_v28 = vmul.f32 %v3454_v47, %v3454_v47  ;;  %3307 = vst [vmem:[%s3860_s5 + $0x50] sm:$0xff] %v3071_v1   ;;  %v831_v10 = vadd.f32 %v3453_v33, %v830_v2  ;;  %v868_v11 = vadd.f32 %v867_v56, %v853_v41 }
 0x106   : > { %v544_v8 = vadd.f32 %v543_v0, %v3892_v58  ;;  %v3457_v9 = vpop.f32.mrb[16].mxu1  ;;  %v1048_v12 = vpop.f32.mrb[17].mxu0  ;;  %v1188_v15 = vmul.f32 %v3474_v43, %v3474_v43  ;;  %3315 = vst [vmem:[%s3860_s5 + $0x90] sm:$0xff] %v3111_v4   ;;  %v1164_v16 = vadd.f32 %v3473_v29, %v1163_v59  ;;  %v1201_v17 = vadd.f32 %v1200_v61, %v1186_v5 }
 0x107   : > { %v508_v14 = vrot.slane %v507_v3, 4  ;;  %v715_v19 = vpop.f32.mrb[17].mxu1  ;;  %v3478_v36 = vpop.f32.mrb[18].mxu0  ;;  %v869_v18 = vadd.f32 %v868_v11, %v854_v52  ;;  %v832_v21 = vadd.f32 %v3454_v47, %v831_v10  ;;  %v1189_v27 = vmul.f32 %v1048_v12, %v1048_v12 }
 0x108   : > { %v545_v20 = vadd.f32 %v544_v8, %v3898_v63  ;;  %v856_v22 = vmul.f32 %v715_v19, %v715_v19  ;;  %v3458_v23 = vpop.f32.mrb[18].mxu1  ;;  %v1051_v58 = vpop.f32.mrb[19].mxu0  ;;  %v1202_v25 = vadd.f32 %v1201_v17, %v1187_v55  ;;  %v1165_v26 = vadd.f32 %v3474_v43, %v1164_v16 }
 0x109   : > { %v509_v24 = vadd.f32 %v508_v14, %v507_v3  ;;  %v718_v30 = vpop.f32.mrb[19].mxu1  ;;  %v833_v31 = vadd.f32 %v832_v21, %v715_v19  ;;  %v870_v33 = vadd.f32 %v869_v18, %v855_v28  ;;  %v3086_v29 = vpack.c.bf16 %v3458_v23, %v3457_v9 }
 0x10a   : > { %v546_v7 = vrot.slane %v545_v20, 4  ;;  %v1191_v35 = vmul.f32 %v3477_v6, %v3477_v6  ;;  %v1166_v37 = vadd.f32 %v1165_v26, %v1048_v12  ;;  %v1203_v63 = vadd.f32 %v1202_v25, %v1188_v15 }
 0x10b   : > { %v510_v34 = vrot.slane %v509_v24, 2  ;;  %v858_v39 = vmul.f32 %v3457_v9, %v3457_v9  ;;  %v871_v40 = vadd.f32 %v870_v33, %v856_v22  ;;  %3310 = vst [vmem:[%s3860_s5 + $0x68] sm:$0xff] %v3086_v29   ;;  %v3126_v42 = vpack.c.bf16 %v3478_v36, %v3477_v6 }
 0x10c   : > { %v547_v38 = vadd.f32 %v546_v7, %v545_v20  ;;  %v1204_v45 = vadd.f32 %v1203_v63, %v1189_v27  ;;  %v3081_v43 = vpack.c.bf16 %v718_v30, %v715_v19  ;;  %v834_v13 = vadd.f32 %v833_v31, %v718_v30 }
 0x10d   : > { %v511_v44 = vadd.f32 %v510_v34, %v509_v24  ;;  %v3481_v46 = vpop.f32.mrb[20].mxu0  ;;  %3318 = vst [vmem:[%s3860_s5 + $0xa8] sm:$0xff] %v3126_v42   ;;  %v857_v49 = vmul.f32 %v718_v30, %v718_v30  ;;  %v3121_v48 = vpack.c.bf16 %v1051_v58, %v1048_v12  ;;  %v1167_v50 = vadd.f32 %v1166_v37, %v1051_v58 }
 0x10e   : > { %v548_v47 = vrot.slane %v547_v38, 2  ;;  %v3461_v51 = vpop.f32.mrb[20].mxu1  ;;  %v1064_v53 = vpop.f32.mrb[21].mxu0  ;;  %v859_v54 = vmul.f32 %v3458_v23, %v3458_v23  ;;  %v1192_v32 = vmul.f32 %v3478_v36, %v3478_v36  ;;  %3309 = vst [vmem:[%s3860_s5 + $0x60] sm:$0xff] %v3081_v43   ;;  %v835_v55 = vadd.f32 %v3457_v9, %v834_v13 }
 0x10f   : > { %v1190_v56 = vmul.f32 %v1051_v58, %v1051_v58  ;;  %v731_v57 = vpop.f32.mrb[21].mxu1  ;;  %v3482_v60 = vpop.f32.mrb[22].mxu0  ;;  %v512_v52 = vrot.slane %v511_v44, 1  ;;  %v872_v62 = vadd.f32 %v871_v40, %v857_v49  ;;  %3317 = vst [vmem:[%s3860_s5 + $0xa0] sm:$0xff] %v3121_v48   ;;  %v1168_v0 = vadd.f32 %v3477_v6, %v1167_v50 }
 0x110   : > { %v549_v61 = vadd.f32 %v548_v47, %v547_v38  ;;  %v3462_v1 = vpop.f32.mrb[22].mxu1  ;;  %v1067_v2 = vpop.f32.mrb[23].mxu0  ;;  %v862_v3 = vmul.f32 %v3461_v51, %v3461_v51  ;;  %v1195_v4 = vmul.f32 %v3481_v46, %v3481_v46  ;;  %v836_v59 = vadd.f32 %v3458_v23, %v835_v55 }
 0x111   : > { %v1205_v41 = vadd.f32 %v1204_v45, %v1190_v56  ;;  %v734_v5 = vpop.f32.mrb[23].mxu1  ;;  %v873_v28 = vadd.f32 %v872_v62, %v858_v39  ;;  %v860_v10 = vmul.f32 %v731_v57, %v731_v57  ;;  %v1169_v11 = vadd.f32 %v3478_v36, %v1168_v0 }
 0x112   : > { %v550_v8 = vrot.slane %v549_v61, 1  ;;  %v837_v12 = vadd.f32 %v836_v59, %v731_v57  ;;  %v1193_v14 = vmul.f32 %v1064_v53, %v1064_v53  ;;  %v3096_v15 = vpack.c.bf16 %v3462_v1, %v3461_v51 }
 0x113   : > { %v1206_v9 = vadd.f32 %v1205_v41, %v1191_v35  ;;  %v3922_v16 = vadd.f32 %v512_v52, %v511_v44  ;;  %v874_v6 = vadd.f32 %v873_v28, %v859_v54  ;;  %v1170_v17 = vadd.f32 %v1169_v11, %v1064_v53 }
 0x114   : > { %v3136_v19 = vpack.c.bf16 %v3482_v60, %v3481_v46  ;;  %3312 = vst [vmem:[%s3860_s5 + $0x78] sm:$0xff] %v3096_v15   ;;  %v863_v18 = vmul.f32 %v3462_v1, %v3462_v1  ;;  %v3091_v21 = vpack.c.bf16 %v734_v5, %v731_v57  ;;  %v838_v22 = vadd.f32 %v837_v12, %v734_v5 }
 0x115   : > { %v1207_v20 = vadd.f32 %v1206_v9, %v1192_v32  ;;  %v3509_v23 = vpop.f32.mrb[24].mxu0  ;;  %v875_v58 = vadd.f32 %v874_v6, %v860_v10  ;;  %v861_v36 = vmul.f32 %v734_v5, %v734_v5  ;;  %v3131_v24 = vpack.c.bf16 %v1067_v2, %v1064_v53 }
 0x116   : > { %3320 = vst [vmem:[%s3860_s5 + $0xb8] sm:$0xff] %v3136_v19   ;;  %v1171_v25 = vadd.f32 %v1170_v17, %v1067_v2  ;;  %v3489_v26 = vpop.f32.mrb[24].mxu1  ;;  %v1682_v27 = vpop.f32.mrb[25].mxu0  ;;  %v3926_v30 = vadd.f32 %v550_v8, %v549_v61  ;;  %3311 = vst [vmem:[%s3860_s5 + $0x70] sm:$0xff] %v3091_v21   ;;  %v839_v31 = vadd.f32 %v3461_v51, %v838_v22 }
 0x117   : > { %v1208_v7 = vadd.f32 %v1207_v20, %v1193_v14  ;;  %v1194_v33 = vmul.f32 %v1067_v2, %v1067_v2  ;;  %v1349_v29 = vpop.f32.mrb[25].mxu1  ;;  %v3929_v34 = vpop.f32.mrb[26].mxu0  ;;  %v1196_v35 = vmul.f32 %v3482_v60, %v3482_v60  ;;  %v876_v37 = vadd.f32 %v875_v58, %v861_v36  ;;  %3319 = vst [vmem:[%s3860_s5 + $0xb0] sm:$0xff] %v3131_v24  }
 0x118   : > { %v1172_v63 = vadd.f32 %v3481_v46, %v1171_v25  ;;  %v1516_v38 = vmul.f32 %v3489_v26, %v3489_v26  ;;  %v3490_v39 = vpop.f32.mrb[26].mxu1  ;;  %v1685_v40 = vpop.f32.mrb[27].mxu0  ;;  %v840_v42 = vadd.f32 %v3462_v1, %v839_v31  ;;  %v1849_v45 = vmul.f32 %v3509_v23, %v3509_v23 }
 0x119   : > { %v1209_v44 = vadd.f32 %v1208_v7, %v1194_v33  ;;  %v3146_v43 = vpack.c.bf16 %v3490_v39, %v3489_v26  ;;  %v1352_v13 = vpop.f32.mrb[27].mxu1  ;;  %v877_v47 = vadd.f32 %v876_v37, %v862_v3  ;;  %v1514_v48 = vmul.f32 %v1349_v29, %v1349_v29 }
 0x11a   : > { %v1173_v49 = vadd.f32 %v3482_v60, %v1172_v63  ;;  %v3186_v50 = vpack.c.bf16 %v3929_v34, %v3509_v23  ;;  %v841_v51 = vrot.slane %v840_v42, 4  ;;  %v1847_v54 = vmul.f32 %v1682_v27, %v1682_v27 }
 0x11b   : > { %v1210_v53 = vadd.f32 %v1209_v44, %v1195_v4  ;;  %3322 = vst [vmem:[%s3860_s5 + $0xc8] sm:$0xff] %v3146_v43   ;;  %v3141_v46 = vpack.c.bf16 %v1352_v13, %v1349_v29  ;;  %v878_v32 = vadd.f32 %v877_v47, %v863_v18  ;;  %v1492_v56 = vadd.f32 %v1352_v13, %v1349_v29 }
 0x11c   : > { %v1174_v55 = vrot.slane %v1173_v49, 4  ;;  %3330 = vst [vmem:[%s3860_s5 + $0x108] sm:$0xff] %v3186_v50   ;;  %v1515_v57 = vmul.f32 %v1352_v13, %v1352_v13  ;;  %v842_v52 = vadd.f32 %v841_v51, %v840_v42  ;;  %v3181_v62 = vpack.c.bf16 %v1685_v40, %v1682_v27 }
 0x11d   : > { %v1211_v61 = vadd.f32 %v1210_v53, %v1196_v35  ;;  %3321 = vst [vmem:[%s3860_s5 + $0xc0] sm:$0xff] %v3141_v46   ;;  %v1825_v0 = vadd.f32 %v1685_v40, %v1682_v27  ;;  %v3936_v60 = vpop.f32.mrb[28].mxu0  ;;  %v879_v1 = vrot.slane %v878_v32, 4  ;;  %v1493_v41 = vadd.f32 %v3489_v26, %v1492_v56 }
 0x11e   : > { %v1175_v2 = vadd.f32 %v1174_v55, %v1173_v49  ;;  %v1530_v3 = vadd.f32 %v1515_v57, %v1514_v48  ;;  %v3938_v4 = vpop.f32.mrb[28].mxu1  ;;  %v3940_v59 = vpop.f32.mrb[29].mxu0  ;;  %v843_v5 = vrot.slane %v842_v52, 2  ;;  %3329 = vst [vmem:[%s3860_s5 + $0x100] sm:$0xff] %v3181_v62   ;;  %v1848_v10 = vmul.f32 %v1685_v40, %v1685_v40 }
 0x11f   : > { %v1212_v8 = vrot.slane %v1211_v61, 4  ;;  %v1826_v28 = vadd.f32 %v3509_v23, %v1825_v0  ;;  %v1365_v11 = vpop.f32.mrb[29].mxu1  ;;  %v3943_v9 = vpop.f32.mrb[30].mxu0  ;;  %v880_v12 = vadd.f32 %v879_v1, %v878_v32  ;;  %v1517_v15 = vmul.f32 %v3490_v39, %v3490_v39 }
 0x120   : > { %v1176_v14 = vrot.slane %v1175_v2, 2  ;;  %v1531_v6 = vadd.f32 %v1530_v3, %v1516_v38  ;;  %v3945_v17 = vpop.f32.mrb[30].mxu1  ;;  %v1701_v19 = vpop.f32.mrb[31].mxu0  ;;  %v844_v20 = vadd.f32 %v843_v5, %v842_v52  ;;  %v1850_v21 = vmul.f32 %v3929_v34, %v3929_v34 }
 0x121   : > { %v1213_v18 = vadd.f32 %v1212_v8, %v1211_v61  ;;  %v1863_v22 = vadd.f32 %v1848_v10, %v1847_v54  ;;  %v1368_v58 = vpop.f32.mrb[31].mxu1  ;;  %v881_v36 = vrot.slane %v880_v12, 2  ;;  %v1494_v24 = vadd.f32 %v3490_v39, %v1493_v41 }
 0x122   : > { %v1177_v23 = vadd.f32 %v1176_v14, %v1175_v2  ;;  %v1518_v25 = vmul.f32 %v1365_v11, %v1365_v11  ;;  %v845_v26 = vrot.slane %v844_v20, 1  ;;  %v1532_v31 = vadd.f32 %v1531_v6, %v1517_v15 }
 0x123   : > { %v1214_v27 = vrot.slane %v1213_v18, 2  ;;  %v1864_v7 = vadd.f32 %v1863_v22, %v1849_v45  ;;  %v882_v33 = vadd.f32 %v881_v36, %v880_v12  ;;  %v1495_v35 = vadd.f32 %v1494_v24, %v1365_v11 }
 0x124   : > { %v1178_v29 = vrot.slane %v1177_v23, 1  ;;  %v1827_v37 = vadd.f32 %v3929_v34, %v1826_v28  ;;  %v846_v63 = vadd.f32 %v845_v26, %v844_v20  ;;  %v1533_v40 = vadd.f32 %v1532_v31, %v1518_v25 }
 0x125   : > { %v1215_v38 = vadd.f32 %v1214_v27, %v1213_v18  ;;  %v1851_v42 = vmul.f32 %v3940_v59, %v3940_v59  ;;  %v3952_v44 = vpop.f32.mrb[32].mxu0  ;;  %v883_v43 = vrot.slane %v882_v33, 1  ;;  %v1520_v39 = vmul.f32 %v3938_v4, %v3938_v4 }
 0x126   : > { %v1828_v45 = vadd.f32 %v1827_v37, %v3940_v59  ;;  %v1865_v13 = vadd.f32 %v1864_v7, %v1850_v21  ;;  %v3957_v47 = vpop.f32.mrb[32].mxu1  ;;  %v3959_v49 = vpop.f32.mrb[33].mxu0  ;;  %v847_v34 = vadd.f32 %v846_v63, %v3922_v16  ;;  %v1179_v48 = vadd.f32 %v1178_v29, %v1177_v23 }
 0x127   : > { %v1216_v50 = vrot.slane %v1215_v38, 1  ;;  %v3156_v51 = vpack.c.bf16 %v3945_v17, %v3938_v4  ;;  %v1381_v53 = vpop.f32.mrb[33].mxu1  ;;  %v3964_v54 = vpop.f32.mrb[34].mxu0  ;;  %v884_v46 = vadd.f32 %v883_v43, %v882_v33  ;;  %v1853_v32 = vmul.f32 %v3936_v60, %v3936_v60 }
 0x128   : > { %v1866_v55 = vadd.f32 %v1865_v13, %v1851_v42  ;;  %v3196_v56 = vpack.c.bf16 %v3943_v9, %v3936_v60  ;;  %v3970_v57 = vpop.f32.mrb[34].mxu1  ;;  %v1717_v16 = vpop.f32.mrb[35].mxu0  ;;  %v3972_v52 = vadd.f32 %v1179_v48, %v847_v34  ;;  %v3151_v62 = vpack.c.bf16 %v1368_v58, %v1365_v11 }
 0x129   : > { %v1217_v61 = vadd.f32 %v1216_v50, %v1215_v38  ;;  %3324 = vst [vmem:[%s3860_s5 + $0xd8] sm:$0xff] %v3156_v51   ;;  %v1496_v0 = vadd.f32 %v1495_v35, %v1368_v58  ;;  %v1384_v1 = vpop.f32.mrb[35].mxu1  ;;  %v885_v2 = vadd.f32 %v884_v46, %v3926_v30  ;;  %v1519_v41 = vmul.f32 %v1368_v58, %v1368_v58 }
 0x12a   : > { %3332 = vst [vmem:[%s3860_s5 + $0x118] sm:$0xff] %v3196_v56   ;;  %v3191_v3 = vpack.c.bf16 %v1701_v19, %v3940_v59  ;;  %v1829_v5 = vadd.f32 %v1828_v45, %v1701_v19  ;;  %v1521_v8 = vmul.f32 %v3945_v17, %v3945_v17  ;;  %v1854_v28 = vmul.f32 %v3943_v9, %v3943_v9 }
 0x12b   : > { %3323 = vst [vmem:[%s3860_s5 + $0xd0] sm:$0xff] %v3151_v62   ;;  %v1497_v10 = vadd.f32 %v3938_v4, %v1496_v0  ;;  %v1852_v12 = vmul.f32 %v1701_v19, %v1701_v19  ;;  %v3984_v11 = vadd.f32 %v1217_v61, %v885_v2  ;;  %v1534_v14 = vadd.f32 %v1533_v40, %v1519_v41 }
 0x12c   : > { %3331 = vst [vmem:[%s3860_s5 + $0x110] sm:$0xff] %v3191_v3   ;;  %v1830_v30 = vadd.f32 %v3936_v60, %v1829_v5  ;;  %v1524_v59 = vmul.f32 %v3957_v47, %v3957_v47  ;;  %v1857_v6 = vmul.f32 %v3952_v44, %v3952_v44  ;;  %v3166_v4 = vpack.c.bf16 %v3970_v57, %v3957_v47 }
 0x12d   : > { %v1867_v15 = vadd.f32 %v1866_v55, %v1852_v12  ;;  %v1498_v20 = vadd.f32 %v3945_v17, %v1497_v10  ;;  %v3995_v19 = vpop.f32.mrb[36].mxu0  ;;  %v1535_v18 = vadd.f32 %v1534_v14, %v1520_v39  ;;  %v1522_v21 = vmul.f32 %v1381_v53, %v1381_v53 }
 0x12e   : > { %v1831_v60 = vadd.f32 %v3943_v9, %v1830_v30  ;;  %v3206_v22 = vpack.c.bf16 %v3964_v54, %v3952_v44  ;;  %v4000_v58 = vpop.f32.mrb[36].mxu1  ;;  %v1730_v36 = vpop.f32.mrb[37].mxu0  ;;  %v1855_v17 = vmul.f32 %v3959_v49, %v3959_v49  ;;  %3326 = vst [vmem:[%s3860_s5 + $0xe8] sm:$0xff] %v3166_v4   ;;  %v3161_v25 = vpack.c.bf16 %v1384_v1, %v1381_v53 }
 0x12f   : > { %v1868_v23 = vadd.f32 %v1867_v15, %v1853_v32  ;;  %v1499_v24 = vadd.f32 %v1498_v20, %v1381_v53  ;;  %v1397_v26 = vpop.f32.mrb[37].mxu1  ;;  %v4005_v27 = vpop.f32.mrb[38].mxu0  ;;  %v1536_v7 = vadd.f32 %v1535_v18, %v1521_v8  ;;  %v1523_v31 = vmul.f32 %v1384_v1, %v1384_v1 }
 0x130   : > { %v1832_v9 = vadd.f32 %v1831_v60, %v3959_v49  ;;  %3334 = vst [vmem:[%s3860_s5 + $0x128] sm:$0xff] %v3206_v22   ;;  %v3201_v33 = vpack.c.bf16 %v1717_v16, %v3959_v49  ;;  %v4010_v29 = vpop.f32.mrb[38].mxu1  ;;  %v1733_v35 = vpop.f32.mrb[39].mxu0  ;;  %v1525_v63 = vmul.f32 %v3970_v57, %v3970_v57  ;;  %3325 = vst [vmem:[%s3860_s5 + $0xe0] sm:$0xff] %v3161_v25  }
 0x131   : > { %v1869_v37 = vadd.f32 %v1868_v23, %v1854_v28  ;;  %v1500_v38 = vadd.f32 %v1499_v24, %v1384_v1  ;;  %v1856_v40 = vmul.f32 %v1717_v16, %v1717_v16  ;;  %v1400_v42 = vpop.f32.mrb[39].mxu1  ;;  %v1537_v43 = vadd.f32 %v1536_v7, %v1522_v21 }
 0x132   : > { %v1858_v39 = vmul.f32 %v3964_v54, %v3964_v54  ;;  %3333 = vst [vmem:[%s3860_s5 + $0x120] sm:$0xff] %v3201_v33   ;;  %v1833_v45 = vadd.f32 %v1832_v9, %v1717_v16  ;;  %v1528_v13 = vmul.f32 %v4000_v58, %v4000_v58  ;;  %v4023_v48 = vmul.f32 %v3995_v19, %v3995_v19 }
 0x133   : > { %v1870_v49 = vadd.f32 %v1869_v37, %v1855_v17  ;;  %v1501_v34 = vadd.f32 %v3957_v47, %v1500_v38  ;;  %v3176_v50 = vpack.c.bf16 %v4010_v29, %v4000_v58  ;;  %v1538_v51 = vadd.f32 %v1537_v43, %v1523_v31 }
 0x134   : > { %v1834_v53 = vadd.f32 %v3952_v44, %v1833_v45  ;;  %v1526_v46 = vmul.f32 %v1397_v26, %v1397_v26  ;;  %v3216_v32 = vpack.c.bf16 %v4005_v27, %v3995_v19  ;;  %v1859_v47 = vmul.f32 %v1730_v36, %v1730_v36 }
 0x135   : > { %v1871_v55 = vadd.f32 %v1870_v49, %v1856_v40  ;;  %v1502_v56 = vadd.f32 %v3970_v57, %v1501_v34  ;;  %3328 = vst [vmem:[%s3860_s5 + $0xf8] sm:$0xff] %v3176_v50   ;;  %v3171_v16 = vpack.c.bf16 %v1400_v42, %v1397_v26  ;;  %v3549_v61 = vpop.f32.mrb[40].mxu0  ;;  %v1539_v62 = vadd.f32 %v1538_v51, %v1524_v59 }
 0x136   : > { %v1835_v0 = vadd.f32 %v3964_v54, %v1834_v53  ;;  %v1529_v1 = vmul.f32 %v4010_v29, %v4010_v29  ;;  %3336 = vst [vmem:[%s3860_s5 + $0x138] sm:$0xff] %v3216_v32   ;;  %v3211_v44 = vpack.c.bf16 %v1733_v35, %v1730_v36  ;;  %v3529_v2 = vpop.f32.mrb[40].mxu1  ;;  %v2348_v41 = vpop.f32.mrb[41].mxu0  ;;  %v1862_v57 = vmul.f32 %v4005_v27, %v4005_v27 }
 0x137   : > { %v1872_v3 = vadd.f32 %v1871_v55, %v1857_v6  ;;  %v1503_v5 = vadd.f32 %v1502_v56, %v1397_v26  ;;  %3327 = vst [vmem:[%s3860_s5 + $0xf0] sm:$0xff] %v3171_v16   ;;  %v1527_v8 = vmul.f32 %v1400_v42, %v1400_v42  ;;  %v2015_v28 = vpop.f32.mrb[41].mxu1  ;;  %v4039_v10 = vpop.f32.mrb[42].mxu0  ;;  %v1540_v12 = vadd.f32 %v1539_v62, %v1525_v63 }
 0x138   : > { %v1836_v14 = vadd.f32 %v1835_v0, %v1730_v36  ;;  %3335 = vst [vmem:[%s3860_s5 + $0x130] sm:$0xff] %v3211_v44   ;;  %v1860_v54 = vmul.f32 %v1733_v35, %v1733_v35  ;;  %v2182_v30 = vmul.f32 %v3529_v2, %v3529_v2  ;;  %v3530_v59 = vpop.f32.mrb[42].mxu1  ;;  %v2351_v15 = vpop.f32.mrb[43].mxu0  ;;  %v2515_v4 = vmul.f32 %v3549_v61, %v3549_v61 }
 0x139   : > { %v1873_v20 = vadd.f32 %v1872_v3, %v1858_v39  ;;  %v1504_v6 = vadd.f32 %v1503_v5, %v1400_v42  ;;  %v3226_v18 = vpack.c.bf16 %v3530_v59, %v3529_v2  ;;  %v2018_v21 = vpop.f32.mrb[43].mxu1  ;;  %v1541_v60 = vadd.f32 %v1540_v12, %v1526_v46 }
 0x13a   : > { %v1837_v22 = vadd.f32 %v1836_v14, %v1733_v35  ;;  %v2180_v23 = vmul.f32 %v2015_v28, %v2015_v28  ;;  %v3266_v24 = vpack.c.bf16 %v4039_v10, %v3549_v61  ;;  %v2513_v25 = vmul.f32 %v2348_v41, %v2348_v41 }
 0x13b   : > { %v1874_v17 = vadd.f32 %v1873_v20, %v1859_v47  ;;  %v1505_v36 = vadd.f32 %v4000_v58, %v1504_v6  ;;  %3338 = vst [vmem:[%s3860_s5 + $0x148] sm:$0xff] %v3226_v18   ;;  %v3221_v26 = vpack.c.bf16 %v2018_v21, %v2015_v28  ;;  %v1542_v7 = vadd.f32 %v1541_v60, %v1527_v8 }
 0x13c   : > { %v1838_v9 = vadd.f32 %v3995_v19, %v1837_v22  ;;  %3346 = vst [vmem:[%s3860_s5 + $0x188] sm:$0xff] %v3266_v24   ;;  %v2158_v31 = vadd.f32 %v2018_v21, %v2015_v28  ;;  %v2181_v33 = vmul.f32 %v2018_v21, %v2018_v21  ;;  %v3261_v35 = vpack.c.bf16 %v2351_v15, %v2348_v41 }
 0x13d   : > { %v1506_v37 = vadd.f32 %v4010_v29, %v1505_v36  ;;  %v1875_v63 = vadd.f32 %v1874_v17, %v1860_v54  ;;  %3337 = vst [vmem:[%s3860_s5 + $0x140] sm:$0xff] %v3221_v26   ;;  %v2491_v38 = vadd.f32 %v2351_v15, %v2348_v41  ;;  %v4049_v40 = vpop.f32.mrb[44].mxu0  ;;  %v1543_v42 = vadd.f32 %v1542_v7, %v1528_v13 }
 0x13e   : > { %v1839_v58 = vadd.f32 %v4005_v27, %v1838_v9  ;;  %v2159_v43 = vadd.f32 %v3529_v2, %v2158_v31  ;;  %v2196_v39 = vadd.f32 %v2181_v33, %v2180_v23  ;;  %v4052_v45 = vpop.f32.mrb[44].mxu1  ;;  %v4054_v19 = vpop.f32.mrb[45].mxu0  ;;  %3345 = vst [vmem:[%s3860_s5 + $0x180] sm:$0xff] %v3261_v35   ;;  %v2514_v50 = vmul.f32 %v2351_v15, %v2351_v15 }
 0x13f   : > { %v1507_v49 = vrot.slane %v1506_v37, 4  ;;  %v1876_v34 = vadd.f32 %v1875_v63, %v4023_v48  ;;  %v2492_v29 = vadd.f32 %v3549_v61, %v2491_v38  ;;  %v2031_v51 = vpop.f32.mrb[45].mxu1  ;;  %v4058_v53 = vpop.f32.mrb[46].mxu0  ;;  %v1544_v46 = vadd.f32 %v1543_v42, %v1529_v1 }
 0x140   : > { %v1840_v32 = vrot.slane %v1839_v58, 4  ;;  %v2183_v13 = vmul.f32 %v3530_v59, %v3530_v59  ;;  %v2197_v55 = vadd.f32 %v2196_v39, %v2182_v30  ;;  %v4060_v27 = vpop.f32.mrb[46].mxu1  ;;  %v4062_v56 = vpop.f32.mrb[47].mxu0  ;;  %v2516_v62 = vmul.f32 %v4039_v10, %v4039_v10 }
 0x141   : > { %v1508_v47 = vadd.f32 %v1507_v49, %v1506_v37  ;;  %v1877_v16 = vadd.f32 %v1876_v34, %v1862_v57  ;;  %v2529_v48 = vadd.f32 %v2514_v50, %v2513_v25  ;;  %v2034_v0 = vpop.f32.mrb[47].mxu1  ;;  %v1545_v61 = vrot.slane %v1544_v46, 4 }
 0x142   : > { %v1841_v44 = vadd.f32 %v1840_v32, %v1839_v58  ;;  %v2160_v2 = vadd.f32 %v3530_v59, %v2159_v43  ;;  %v2184_v41 = vmul.f32 %v2031_v51, %v2031_v51  ;;  %v2198_v8 = vadd.f32 %v2197_v55, %v2183_v13 }
 0x143   : > { %v1509_v3 = vrot.slane %v1508_v47, 2  ;;  %v1878_v1 = vrot.slane %v1877_v16, 4  ;;  %v2530_v5 = vadd.f32 %v2529_v48, %v2515_v4  ;;  %v1546_v28 = vadd.f32 %v1545_v61, %v1544_v46 }
 0x144   : > { %v1842_v12 = vrot.slane %v1841_v44, 2  ;;  %v2161_v14 = vadd.f32 %v2160_v2, %v2031_v51  ;;  %v2493_v54 = vadd.f32 %v4039_v10, %v2492_v29  ;;  %v2199_v15 = vadd.f32 %v2198_v8, %v2184_v41 }
 0x145   : > { %v1510_v30 = vadd.f32 %v1509_v3, %v1508_v47  ;;  %v1879_v57 = vadd.f32 %v1878_v1, %v1877_v16  ;;  %v2517_v20 = vmul.f32 %v4054_v19, %v4054_v19  ;;  %v4069_v6 = vpop.f32.mrb[48].mxu0  ;;  %v1547_v18 = vrot.slane %v1546_v28, 2 }
 0x146   : > { %v1843_v59 = vadd.f32 %v1842_v12, %v1841_v44  ;;  %v2494_v21 = vadd.f32 %v2493_v54, %v4054_v19  ;;  %v2531_v60 = vadd.f32 %v2530_v5, %v2516_v62  ;;  %v4072_v4 = vpop.f32.mrb[48].mxu1  ;;  %v4074_v22 = vpop.f32.mrb[49].mxu0  ;;  %v2186_v24 = vmul.f32 %v4052_v45, %v4052_v45 }
 0x147   : > { %v1511_v23 = vrot.slane %v1510_v30, 1  ;;  %v1880_v10 = vrot.slane %v1879_v57, 2  ;;  %v3236_v17 = vpack.c.bf16 %v4060_v27, %v4052_v45  ;;  %v4080_v36 = vpop.f32.mrb[49].mxu1  ;;  %v4082_v25 = vpop.f32.mrb[50].mxu0  ;;  %v1548_v26 = vadd.f32 %v1547_v18, %v1546_v28 }
 0x148   : > { %v1844_v7 = vrot.slane %v1843_v59, 1  ;;  %v2532_v9 = vadd.f32 %v2531_v60, %v2517_v20  ;;  %v3276_v31 = vpack.c.bf16 %v4058_v53, %v4049_v40  ;;  %v4086_v33 = vpop.f32.mrb[50].mxu1  ;;  %v4088_v37 = vpop.f32.mrb[51].mxu0  ;;  %v2519_v38 = vmul.f32 %v4049_v40, %v4049_v40 }
 0x149   : > { %v1512_v63 = vadd.f32 %v1511_v23, %v1510_v30  ;;  %v1881_v35 = vadd.f32 %v1880_v10, %v1879_v57  ;;  %3340 = vst [vmem:[%s3860_s5 + $0x158] sm:$0xff] %v3236_v17   ;;  %v3231_v42 = vpack.c.bf16 %v2034_v0, %v2031_v51  ;;  %v2050_v58 = vpop.f32.mrb[51].mxu1  ;;  %v1549_v43 = vrot.slane %v1548_v26, 1 }
 0x14a   : > { %v1845_v39 = vadd.f32 %v1844_v7, %v1843_v59  ;;  %3348 = vst [vmem:[%s3860_s5 + $0x198] sm:$0xff] %v3276_v31   ;;  %v2162_v49 = vadd.f32 %v2161_v14, %v2034_v0  ;;  %v2185_v34 = vmul.f32 %v2034_v0, %v2034_v0  ;;  %v3271_v46 = vpack.c.bf16 %v4062_v56, %v4054_v19 }
 0x14b   : > { %v1513_v29 = vadd.f32 %v1512_v63, %v3972_v52  ;;  %v1882_v50 = vrot.slane %v1881_v35, 1  ;;  %3339 = vst [vmem:[%s3860_s5 + $0x150] sm:$0xff] %v3231_v42   ;;  %v2495_v32 = vadd.f32 %v2494_v21, %v4062_v56  ;;  %v1550_v13 = vadd.f32 %v1549_v43, %v1548_v26 }
 0x14c   : > { %v2163_v55 = vadd.f32 %v4052_v45, %v2162_v49  ;;  %v2200_v51 = vadd.f32 %v2199_v15, %v2185_v34  ;;  %v2518_v47 = vmul.f32 %v4062_v56, %v4062_v56  ;;  %v2187_v62 = vmul.f32 %v4060_v27, %v4060_v27  ;;  %3347 = vst [vmem:[%s3860_s5 + $0x190] sm:$0xff] %v3271_v46  }
 0x14d   : > { %v4102_v16 = vadd.f32 %v1845_v39, %v1513_v29  ;;  %v2520_v52 = vmul.f32 %v4058_v53, %v4058_v53  ;;  %v2496_v19 = vadd.f32 %v4049_v40, %v2495_v32  ;;  %v4110_v48 = vpop.f32.mrb[52].mxu0  ;;  %v1551_v0 = vadd.f32 %v1550_v13, %v3984_v11 }
 0x14e   : > { %v1883_v45 = vadd.f32 %v1882_v50, %v1881_v35  ;;  %v2201_v61 = vadd.f32 %v2200_v51, %v2186_v24  ;;  %v2533_v44 = vadd.f32 %v2532_v9, %v2518_v47  ;;  %v4113_v2 = vpop.f32.mrb[52].mxu1  ;;  %v2396_v56 = vpop.f32.mrb[53].mxu0  ;;  %v2164_v41 = vadd.f32 %v4060_v27, %v2163_v55 }
 0x14f   : > { %v2188_v3 = vmul.f32 %v4080_v36, %v4080_v36  ;;  %v2497_v1 = vadd.f32 %v4058_v53, %v2496_v19  ;;  %v2521_v40 = vmul.f32 %v4074_v22, %v4074_v22  ;;  %v2063_v5 = vpop.f32.mrb[53].mxu1  ;;  %v4121_v11 = vpop.f32.mrb[54].mxu0  ;;  %v3246_v27 = vpack.c.bf16 %v4086_v33, %v4072_v4 }
 0x150   : > { %v4123_v8 = vadd.f32 %v1883_v45, %v1551_v0  ;;  %v2534_v28 = vadd.f32 %v2533_v44, %v2519_v38  ;;  %v2202_v12 = vadd.f32 %v2201_v61, %v2187_v62  ;;  %v3542_v14 = vpop.f32.mrb[54].mxu1  ;;  %v2399_v54 = vpop.f32.mrb[55].mxu0  ;;  %v2165_v30 = vadd.f32 %v2164_v41, %v4080_v36 }
 0x151   : > { %v2498_v53 = vadd.f32 %v2497_v1, %v4074_v22  ;;  %v3286_v57 = vpack.c.bf16 %v4082_v25, %v4069_v6  ;;  %v2066_v15 = vpop.f32.mrb[55].mxu1  ;;  %3342 = vst [vmem:[%s3860_s5 + $0x168] sm:$0xff] %v3246_v27   ;;  %v3241_v59 = vpack.c.bf16 %v2050_v58, %v4080_v36  ;;  %v2189_v60 = vmul.f32 %v2050_v58, %v2050_v58 }
 0x152   : > { %v2203_v20 = vadd.f32 %v2202_v12, %v2188_v3  ;;  %v2535_v18 = vadd.f32 %v2534_v28, %v2520_v52  ;;  %v2166_v21 = vadd.f32 %v2165_v30, %v2050_v58  ;;  %v3281_v23 = vpack.c.bf16 %v4088_v37, %v4074_v22 }
 0x153   : > { %3350 = vst [vmem:[%s3860_s5 + $0x1a8] sm:$0xff] %v3286_v57   ;;  %v2499_v10 = vadd.f32 %v2498_v53, %v4088_v37  ;;  %v2190_v24 = vmul.f32 %v4072_v4, %v4072_v4  ;;  %v2523_v17 = vmul.f32 %v4069_v6, %v4069_v6  ;;  %3341 = vst [vmem:[%s3860_s5 + $0x160] sm:$0xff] %v3241_v59  }
 0x154   : > { %v2536_v26 = vadd.f32 %v2535_v18, %v2521_v40  ;;  %v2522_v7 = vmul.f32 %v4088_v37, %v4088_v37  ;;  %v2191_v36 = vmul.f32 %v4086_v33, %v4086_v33  ;;  %v2167_v9 = vadd.f32 %v4072_v4, %v2166_v21  ;;  %3349 = vst [vmem:[%s3860_s5 + $0x1a0] sm:$0xff] %v3281_v23  }
 0x155   : > { %v2204_v22 = vadd.f32 %v2203_v20, %v2189_v60  ;;  %v2500_v31 = vadd.f32 %v4069_v6, %v2499_v10  ;;  %v2524_v63 = vmul.f32 %v4082_v25, %v4082_v25  ;;  %v2192_v38 = vmul.f32 %v2063_v5, %v2063_v5 }
 0x156   : > { %v2537_v35 = vadd.f32 %v2536_v26, %v2522_v7  ;;  %v3256_v42 = vpack.c.bf16 %v3542_v14, %v4113_v2  ;;  %v2168_v58 = vadd.f32 %v4086_v33, %v2167_v9  ;;  %v3296_v4 = vpack.c.bf16 %v4121_v11, %v4110_v48 }
 0x157   : > { %v2205_v37 = vadd.f32 %v2204_v22, %v2190_v24  ;;  %v2501_v43 = vadd.f32 %v4082_v25, %v2500_v31  ;;  %v2525_v6 = vmul.f32 %v2396_v56, %v2396_v56  ;;  %v3251_v49 = vpack.c.bf16 %v2066_v15, %v2063_v5 }
 0x158   : > { %v2538_v39 = vadd.f32 %v2537_v35, %v2523_v17  ;;  %3344 = vst [vmem:[%s3860_s5 + $0x178] sm:$0xff] %v3256_v42   ;;  %v2193_v34 = vmul.f32 %v2066_v15, %v2066_v15  ;;  %v2169_v29 = vadd.f32 %v2168_v58, %v2063_v5  ;;  %3352 = vst [vmem:[%s3860_s5 + $0x1b8] sm:$0xff] %v3296_v4  }
 0x159   : > { %v2206_v50 = vadd.f32 %v2205_v37, %v2191_v36  ;;  %v2502_v46 = vadd.f32 %v2501_v43, %v2396_v56  ;;  %v3291_v32 = vpack.c.bf16 %v2399_v54, %v2396_v56  ;;  %3343 = vst [vmem:[%s3860_s5 + $0x170] sm:$0xff] %v3251_v49   ;;  %v2526_v55 = vmul.f32 %v2399_v54, %v2399_v54 }
 0x15a   : > { %v2539_v13 = vadd.f32 %v2538_v39, %v2524_v63  ;;  %v2170_v51 = vadd.f32 %v2169_v29, %v2066_v15  ;;  %v2194_v62 = vmul.f32 %v4113_v2, %v4113_v2  ;;  %v2527_v45 = vmul.f32 %v4110_v48, %v4110_v48 }
 0x15b   : > { %v2207_v33 = vadd.f32 %v2206_v50, %v2192_v38  ;;  %3351 = vst [vmem:[%s3860_s5 + $0x1b0] sm:$0xff] %v3291_v32   ;;  %v2503_v25 = vadd.f32 %v2502_v46, %v2399_v54  ;;  %v2195_v44 = vmul.f32 %v3542_v14, %v3542_v14  ;;  %v2528_v1 = vmul.f32 %v4121_v11, %v4121_v11 }
 0x15c   : > { %v2540_v47 = vadd.f32 %v2539_v13, %v2525_v6  ;;  %v2171_v52 = vadd.f32 %v4113_v2, %v2170_v51 }
 0x15d   : > { %v2208_v19 = vadd.f32 %v2207_v33, %v2193_v34  ;;  %v2504_v0 = vadd.f32 %v4110_v48, %v2503_v25 }
 0x15e   : > { %v2541_v61 = vadd.f32 %v2540_v47, %v2526_v55  ;;  %v2172_v56 = vadd.f32 %v3542_v14, %v2171_v52 }
 0x15f   : > { %v2209_v41 = vadd.f32 %v2208_v19, %v2194_v62  ;;  %v2505_v3 = vadd.f32 %v4121_v11, %v2504_v0 }
 0x160   : > { %v2542_v40 = vadd.f32 %v2541_v61, %v2527_v45  ;;  %v2173_v5 = vrot.slane %v2172_v56, 4 }
 0x161   : > { %v2210_v28 = vadd.f32 %v2209_v41, %v2195_v44  ;;  %v2506_v2 = vrot.slane %v2505_v3, 4 }
 0x162   : > { %v2543_v12 = vadd.f32 %v2542_v40, %v2528_v1  ;;  %v2174_v27 = vadd.f32 %v2173_v5, %v2172_v56 }
 0x163   : > { %v2211_v54 = vrot.slane %v2210_v28, 4  ;;  %v2507_v30 = vadd.f32 %v2506_v2, %v2505_v3 }
 0x164   : > { %v2544_v48 = vrot.slane %v2543_v12, 4  ;;  %v2175_v53 = vrot.slane %v2174_v27, 2 }
 0x165   : > { %v2212_v57 = vadd.f32 %v2211_v54, %v2210_v28  ;;  %v2508_v14 = vrot.slane %v2507_v30, 2 }
 0x166   : > { %v2545_v15 = vadd.f32 %v2544_v48, %v2543_v12  ;;  %v2176_v20 = vadd.f32 %v2175_v53, %v2174_v27 }
 0x167   : > { %v2213_v18 = vrot.slane %v2212_v57, 2  ;;  %v2509_v59 = vadd.f32 %v2508_v14, %v2507_v30 }
 0x168   : > { %v2546_v21 = vrot.slane %v2545_v15, 2  ;;  %v2177_v11 = vrot.slane %v2176_v20, 1 }
 0x169   : > { %v2214_v60 = vadd.f32 %v2213_v18, %v2212_v57  ;;  %v2510_v23 = vrot.slane %v2509_v59, 1 }
 0x16a   : > { %v2547_v10 = vadd.f32 %v2546_v21, %v2545_v15  ;;  %v2178_v24 = vadd.f32 %v2177_v11, %v2176_v20 }
 0x16b   : > { %v2215_v17 = vrot.slane %v2214_v60, 1  ;;  %v2511_v9 = vadd.f32 %v2510_v23, %v2509_v59 }
 0x16c   : > { %v2548_v26 = vrot.slane %v2547_v10, 1  ;;  %v2179_v7 = vadd.f32 %v2178_v24, %v4102_v16 }
 0x16d   : > { %v2216_v36 = vadd.f32 %v2215_v17, %v2214_v60 }
 0x16e   : > { %v2512_v31 = vadd.f32 %v2511_v9, %v2179_v7  ;;  %v2549_v63 = vadd.f32 %v2548_v26, %v2547_v10 }
 0x16f   : > { %v2217_v22 = vadd.f32 %v2216_v36, %v4123_v8 }
 0x170   : > { %2551 = vst [vmem:[%s214_s29] sm:$0x1] %v2512_v31 }
 0x171   : > { %v2550_v35 = vadd.f32 %v2549_v63, %v2217_v22 }
 0x173   : > { %2552 = vst [vmem:[%s217_s8] sm:$0x1] %v2550_v35 }
 0x174 PF: > { %s15_s15 = sadd.s32 1, %s3651_s15  }
 0x175   : > { %p12_p5 = scmp.ge.s32.totalorder %s15_s15, 4  }
 0x177   :  { %14 = sbr.rel (!%p12_p5) target bundleno = 1 (0x1), region = 82 }

// kernel: cnn_forward.6
= control target key start
LH: loop header
LB: loop body
LE: loop exit
PB: predicated region body
PF: predicated region fallthrough
CT: control target
= control target key end

     0   :  { %s1643_s12 = smov 0   ;;  %s2077_s0 = inlined_call_operand.vmem [shape: bf16[1792,128], index: 0, kind: input, shape index: {}]   ;;  %s2078_s1 = inlined_call_operand.vmem [shape: f32[1,128], index: 1, kind: input, shape index: {}]   ;;  %s2079_s2 = inlined_call_operand.vmem [shape: f32[1,128], index: 2, kind: input, shape index: {}]   ;;  %s2080_s3 = inlined_call_operand.vmem [shape: bf16[28,14,128], index: 3, kind: output, shape index: {}]  }
   0x1 LB: > { %s1371_s13 = sadd.s32 4294967295, %s1621_s12   ;;  %p1375_p0 = scmp.ge.s32.totalorder %s1621_s12, 1  ;;  %s1621_s12 = sphi %s1643_s12, %s13_s12  }
   0x2   : > { %p138_p1 = scmp.lt.s32.totalorder %s1621_s12, 3 }
   0x4   : > { %p139_p2 = pnand %p1375_p0, %p138_p1 }
   0x5   : > { %s163_s14 = smul.u32 (!%p139_p2), 112, %s1371_s13  ;;  %v1661_v0 = vld [vmem:[%s2078_s1] ss:$0 sm:$0xff] (!%p139_p2)  ;;  %vm234_vm0 = vcmask (!%p139_p2), 1043456  }
   0x6   : > { %142 = sbr.rel (%p139_p2) target bundleno = 199 (0xc7), region = 32  ;;  %v1672_v11 = vld [vmem:[%s2079_s2] ss:$0 sm:$0xff] (!%p139_p2) }
   0x7   : > { %p164_p3 = scmp.lt.s32.totalorder (!%p139_p2), %s163_s14, 223  ;;  %s1695_s23 = smul.u32 (!%p139_p2), 14, %s1371_s13 }
   0x9   : > { %p170_p4 = scmp.lt.s32.totalorder (!%p139_p2), %s1695_s23, 27 }
   0xd   : > { %s2082_s14 = smov (!%p164_p3, %s163_s14), 223  ;;  %s2084_s23 = smov (!%p170_p4, %s1695_s23), 27 }
   0xe   : > { %s1376_s15 = sshll.u32 %s2082_s14, 2  ;;  %s1437_s24 = sshll.u32 %s2084_s23, 3 }
   0xf   : > { %s1656_s18 = scalar_lea.vmem %s2077_s0, %s1376_s15  ;;  %s1737_s27 = scalar_lea.vmem %s2080_s3, %s1437_s24 }
  0x10   : > { %v1467_v1 = vld [vmem:[%s1656_s18] sm:$0xff]   ;;  %v182_v2 = vld [vmem:[%s1656_s18 + $0xc] sm:$0xc]  ;;  %v1578_v3 = vld [vmem:[%s1656_s18 + $0x10] sm:$0xff]  }
  0x11   : > { %v1468_v4 = vunpack.c.l.bf16 %v1467_v1  ;;  %v1472_v5 = vunpack.c.l.bf16 %v1578_v3  ;;  %v214_v6 = vunpack.c.l.bf16 %v182_v2  ;;  %v1469_v7 = vunpack.c.h.bf16 %v1467_v1  ;;  %v180_v8 = vld [vmem:[%s1656_s18 + $0x8] ss:$36 sps:$4 sm:$0xff]   ;;  %v185_v9 = vld [vmem:[%s1656_s18 + $0x18] sm:$0xff]   ;;  %v1579_v37 = vld [vmem:[%s1656_s18 + $0x20] sm:$0xff]  }
  0x12   : > { %v181_v10 = vld [vmem:[%s1656_s18 + $0xc] sm:$0x3]  ;;  %v1473_v12 = vunpack.c.h.bf16 %v1578_v3  ;;  %v188_v13 = vunpack.c.l.bf16 %v180_v8  ;;  %v217_v14 = vunpack.c.l.bf16 %v185_v9  ;;  %v277_v32 = vld [vmem:[%s1656_s18 + $0x28] sm:$0xc]  ;;  %v1580_v42 = vld [vmem:[%s1656_s18 + $0x30] sm:$0xff]   ;;  %v281_v45 = vunpack.c.h.bf16 %v185_v9 }
  0x13   : > { %v189_v15 = vunpack.c.l.bf16 %v181_v10  ;;  %v196_v16 = vmul.f32 %v1468_v4, %v1661_v0  ;;  %v218_v17 = vmul.f32 %v1661_v0, %v214_v6  ;;  %v219_v18 = vmul.f32 %v1472_v5, %v1661_v0  ;;  %v276_v59 = vld [vmem:[%s1656_s18 + $0x28] sm:$0x3]  ;;  %v1581_v5 = vld [vmem:[%s1656_s18 + $0x38] sm:$0xff]  }
  0x14   : > { %v197_v19 = vmul.f32 %v1469_v7, %v1661_v0  ;;  %v220_v20 = vmul.f32 %v1473_v12, %v1661_v0  ;;  %v198_v21 = vmul.f32 %v1661_v0, %v188_v13  ;;  %v221_v22 = vmul.f32 %v1661_v0, %v217_v14 }
  0x15   : > { %v199_v23 = vmul.f32 %v1661_v0, %v189_v15  ;;  %v206_v24 = vadd.f32 %v1672_v11, %v196_v16  ;;  %v222_v25 = vadd.f32 %v1672_v11, %v218_v17  ;;  %v223_v26 = vadd.f32 %v1672_v11, %v219_v18  ;;  %v1582_v15 = vld [vmem:[%s1656_s18 + $0x48] sm:$0xff]  }
  0x16   : > { %v207_v27 = vadd.f32 %v1672_v11, %v197_v19  ;;  %v224_v28 = vadd.f32 %v1672_v11, %v220_v20  ;;  %v208_v29 = vadd.f32 %v1672_v11, %v198_v21  ;;  %v225_v30 = vadd.f32 %v1672_v11, %v221_v22  ;;  %v357_v20 = vld [vmem:[%s1656_s18 + $0x44] sm:$0xc] }
  0x17   : > { %v209_v31 = vadd.f32 %v1672_v11, %v199_v23  ;;  %v210_v33 = vmax.f32 %v206_v24, 0.0  ;;  %v226_v34 = vmax.f32 %v222_v25, 0.0  ;;  %v227_v35 = vmax.f32 %v223_v26, 0.0 }
  0x18   : > { %v211_v36 = vmax.f32 %v207_v27, 0.0  ;;  %v228_v38 = vmax.f32 %v224_v28, 0.0  ;;  %v212_v39 = vmax.f32 %v208_v29, 0.0  ;;  %v229_v40 = vmax.f32 %v225_v30, 0.0 }
  0x19   : > { %v213_v41 = vmax.f32 %v209_v31, 0.0  ;;  %v235_v43 = vrot.slane %v226_v34, 4  ;;  %v236_v44 = vrot.slane %v227_v35, 4  ;;  %v297_v46 = vunpack.c.l.bf16 %v277_v32 }
  0x1a   : > { %v238_v47 = vrot.slane %v228_v38, 4  ;;  %v240_v48 = vrot.slane %v229_v40, 4  ;;  %v298_v49 = vunpack.c.h.bf16 %v180_v8  ;;  %v1476_v50 = vunpack.c.l.bf16 %v1579_v37 }
  0x1b   : > { %v237_v51 = vsel %vm234_vm0, %v235_v43, %v236_v44  ;;  %v285_v52 = vmul.f32 %v1661_v0, %v281_v45  ;;  %v301_v53 = vmul.f32 %v1661_v0, %v297_v46  ;;  %v1480_v54 = vunpack.c.l.bf16 %v1580_v42 }
  0x1c   : > { %v246_v55 = vmax.f32 %v210_v33, %v237_v51  ;;  %v239_v56 = vsel %vm234_vm0, %v236_v44, %v238_v47  ;;  %v241_v57 = vsel %vm234_vm0, %v238_v47, %v240_v48  ;;  %v249_v58 = vmax.f32 %v213_v41, %v240_v48 }
  0x1d   : > { %v247_v60 = vmax.f32 %v211_v36, %v239_v56  ;;  %v248_v61 = vmax.f32 %v212_v39, %v241_v57  ;;  %v289_v62 = vadd.f32 %v1672_v11, %v285_v52  ;;  %v302_v63 = vmul.f32 %v1661_v0, %v298_v49  ;;  %v355_v57 = vld [vmem:[%s1656_s18 + $0x40] ss:$36 sps:$4 sm:$0xff]  }
  0x1e   : > { %250 = vst [vmem:[#allocation2] sm:$0xff] %v246_v55  ;;  %253 = vst [vmem:[#allocation2 + $0x18] sm:$0xf] %v249_v58  ;;  %v305_v1 = vadd.f32 %v1672_v11, %v301_v53  ;;  %v286_v2 = vmul.f32 %v1476_v50, %v1661_v0  ;;  %v303_v3 = vmul.f32 %v1480_v54, %v1661_v0  ;;  %v1477_v4 = vunpack.c.h.bf16 %v1579_v37  ;;  %v360_v58 = vld [vmem:[%s1656_s18 + $0x50] sm:$0xff]  }
  0x1f   : > { %251 = vst [vmem:[#allocation2 + $0x8] sm:$0xff] %v247_v60  ;;  %252 = vst [vmem:[#allocation2 + $0x10] sm:$0xff] %v248_v61  ;;  %v293_v6 = vmax.f32 %v289_v62, 0.0  ;;  %v306_v7 = vadd.f32 %v1672_v11, %v302_v63  ;;  %v1481_v8 = vunpack.c.h.bf16 %v1580_v42  ;;  %v284_v9 = vunpack.c.l.bf16 %v276_v59  ;;  %v356_v59 = vld [vmem:[%s1656_s18 + $0x44] sm:$0x3] }
  0x20   : > { %v309_v10 = vmax.f32 %v305_v1, 0.0  ;;  %v290_v12 = vadd.f32 %v1672_v11, %v286_v2  ;;  %v307_v13 = vadd.f32 %v1672_v11, %v303_v3  ;;  %v287_v14 = vmul.f32 %v1477_v4, %v1661_v0  ;;  %v437_v1 = vld [vmem:[%s1656_s18 + $0x60] sm:$0xc] }
  0x21   : > { %v310_v16 = vmax.f32 %v306_v7, 0.0  ;;  %v304_v17 = vmul.f32 %v1481_v8, %v1661_v0  ;;  %v288_v18 = vmul.f32 %v1661_v0, %v284_v9  ;;  %v1484_v19 = vunpack.c.l.bf16 %v1581_v5 }
  0x22   : > { %v317_v21 = vrot.slane %v309_v10, 4  ;;  %v294_v22 = vmax.f32 %v290_v12, 0.0  ;;  %v311_v23 = vmax.f32 %v307_v13, 0.0  ;;  %v291_v24 = vadd.f32 %v1672_v11, %v287_v14 }
  0x23   : > { %v318_v25 = vrot.slane %v310_v16, 4  ;;  %v308_v26 = vadd.f32 %v1672_v11, %v304_v17  ;;  %v292_v27 = vadd.f32 %v1672_v11, %v288_v18  ;;  %v1488_v28 = vunpack.c.l.bf16 %v1582_v15 }
  0x24   : > { %v320_v29 = vrot.slane %v311_v23, 4  ;;  %v295_v30 = vmax.f32 %v291_v24, 0.0  ;;  %v365_v31 = vmul.f32 %v1484_v19, %v1661_v0  ;;  %v377_v32 = vunpack.c.l.bf16 %v357_v20 }
  0x25   : > { %v319_v33 = vsel %vm234_vm0, %v317_v21, %v318_v25  ;;  %v312_v34 = vmax.f32 %v308_v26, 0.0  ;;  %v296_v35 = vmax.f32 %v292_v27, 0.0  ;;  %v382_v36 = vmul.f32 %v1488_v28, %v1661_v0 }
  0x26   : > { %v254_v37 = vld [vmem:[#allocation2] ss:$2 sm:$0xff]  ;;  %v258_v38 = vld [vmem:[#allocation2 + $0x1] ss:$2 sm:$0xff]  ;;  %v328_v39 = vmax.f32 %v293_v6, %v319_v33  ;;  %v321_v40 = vsel %vm234_vm0, %v318_v25, %v320_v29  ;;  %v369_v41 = vadd.f32 %v1672_v11, %v365_v31  ;;  %v381_v42 = vmul.f32 %v1661_v0, %v377_v32  ;;  %v1583_v33 = vld [vmem:[%s1656_s18 + $0x58] sm:$0xff]  }
  0x27   : > { %v256_v43 = vld [vmem:[#allocation2 + $0x10] ss:$2 sm:$0x3f]  ;;  %v260_v44 = vld [vmem:[#allocation2 + $0x11] ss:$2 sm:$0x3f]  ;;  %v329_v45 = vmax.f32 %v294_v22, %v321_v40  ;;  %v261_v46 = vmax.f32 %v254_v37, %v258_v38  ;;  %v386_v47 = vadd.f32 %v1672_v11, %v382_v36  ;;  %v1485_v48 = vunpack.c.h.bf16 %v1581_v5 }
  0x28   : > { %332 = vst [vmem:[#allocation2] sm:$0xff] %v328_v39  ;;  %v322_v49 = vrot.slane %v312_v34, 4  ;;  %v262_v50 = vmax.f32 %v256_v43, %v260_v44  ;;  %v373_v51 = vmax.f32 %v369_v41, 0.0  ;;  %v385_v52 = vadd.f32 %v1672_v11, %v381_v42  ;;  %v1584_v34 = vld [vmem:[%s1656_s18 + $0x68] sm:$0xff]  }
  0x29   : > { %333 = vst [vmem:[#allocation2 + $0x8] sm:$0xff] %v329_v45  ;;  %v1438_v53 = vpack.c.bf16 %v261_v46, %v261_v46  ;;  %v390_v54 = vmax.f32 %v386_v47, 0.0  ;;  %v1489_v55 = vunpack.c.h.bf16 %v1582_v15  ;;  %v366_v56 = vmul.f32 %v1485_v48, %v1661_v0 }
  0x2a   : > { %v323_v60 = vsel %vm234_vm0, %v320_v29, %v322_v49  ;;  %v331_v61 = vmax.f32 %v296_v35, %v322_v49  ;;  %v1439_v62 = vpack.c.bf16 %v262_v50, %v262_v50  ;;  %v389_v63 = vmax.f32 %v385_v52, 0.0 }
  0x2b   : > { %v330_v2 = vmax.f32 %v295_v30, %v323_v60  ;;  %271 = vst [vmem:[%s1737_s27] sm:$0xf] %v1438_v53  ;;  %v398_v3 = vrot.slane %v390_v54, 4  ;;  %v370_v4 = vadd.f32 %v1672_v11, %v366_v56  ;;  %v383_v5 = vmul.f32 %v1489_v55, %v1661_v0 }
  0x2c   : > { %335 = vst [vmem:[#allocation2 + $0x18] sm:$0xf] %v331_v61  ;;  %272 = vst [vmem:[%s1737_s27 + $0x4] sm:$0x7] %v1439_v62  ;;  %v397_v6 = vrot.slane %v389_v63, 4  ;;  %v363_v7 = vunpack.c.l.bf16 %v355_v57  ;;  %v380_v8 = vunpack.c.l.bf16 %v360_v58  ;;  %v364_v9 = vunpack.c.l.bf16 %v356_v59  ;;  %v1586_v63 = vld [vmem:[%s1656_s18 + $0x80] sm:$0xff]  }
  0x2d   : > { %334 = vst [vmem:[#allocation2 + $0x10] sm:$0xff] %v330_v2  ;;  %v374_v10 = vmax.f32 %v370_v4, 0.0  ;;  %v387_v12 = vadd.f32 %v1672_v11, %v383_v5  ;;  %v441_v13 = vunpack.c.h.bf16 %v360_v58  ;;  %v457_v14 = vunpack.c.l.bf16 %v437_v1  ;;  %v1585_v58 = vld [vmem:[%s1656_s18 + $0x70] sm:$0xff]  }
  0x2e   : > { %v399_v15 = vsel %vm234_vm0, %v397_v6, %v398_v3  ;;  %v367_v16 = vmul.f32 %v1661_v0, %v363_v7  ;;  %v384_v17 = vmul.f32 %v1661_v0, %v380_v8  ;;  %v368_v18 = vmul.f32 %v1661_v0, %v364_v9  ;;  %v517_v9 = vld [vmem:[%s1656_s18 + $0x7c] sm:$0xc] }
  0x2f   : > { %v408_v19 = vmax.f32 %v373_v51, %v399_v15  ;;  %v391_v20 = vmax.f32 %v387_v12, 0.0  ;;  %v445_v21 = vmul.f32 %v1661_v0, %v441_v13  ;;  %v458_v22 = vunpack.c.h.bf16 %v355_v57  ;;  %v436_v57 = vld [vmem:[%s1656_s18 + $0x60] sm:$0x3] }
  0x30   : > { %v336_v23 = vld [vmem:[#allocation2] ss:$2 sm:$0xff]  ;;  %v338_v24 = vld [vmem:[#allocation2 + $0x1] ss:$2 sm:$0xff]  ;;  %v371_v25 = vadd.f32 %v1672_v11, %v367_v16  ;;  %v388_v26 = vadd.f32 %v1672_v11, %v384_v17  ;;  %v372_v27 = vadd.f32 %v1672_v11, %v368_v18  ;;  %v461_v28 = vmul.f32 %v1661_v0, %v457_v14 }
  0x31   : > { %412 = vst [vmem:[#allocation2] sm:$0xff] %v408_v19  ;;  %v400_v29 = vrot.slane %v391_v20, 4  ;;  %v340_v30 = vmax.f32 %v336_v23, %v338_v24  ;;  %v449_v31 = vadd.f32 %v1672_v11, %v445_v21  ;;  %v462_v32 = vmul.f32 %v1661_v0, %v458_v22 }
  0x32   : > { %v375_v35 = vmax.f32 %v371_v25, 0.0  ;;  %v392_v36 = vmax.f32 %v388_v26, 0.0  ;;  %v376_v37 = vmax.f32 %v372_v27, 0.0  ;;  %v465_v38 = vadd.f32 %v1672_v11, %v461_v28 }
  0x33   : > { %v401_v39 = vsel %vm234_vm0, %v398_v3, %v400_v29  ;;  %v1440_v40 = vpack.c.bf16 %v340_v30, %v340_v30  ;;  %v453_v41 = vmax.f32 %v449_v31, 0.0  ;;  %v466_v42 = vadd.f32 %v1672_v11, %v462_v32 }
  0x34   : > { %v337_v43 = vld [vmem:[#allocation2 + $0x10] ss:$2 sm:$0x3f]  ;;  %v339_v44 = vld [vmem:[#allocation2 + $0x11] ss:$2 sm:$0x3f]  ;;  %v409_v45 = vmax.f32 %v374_v10, %v401_v39  ;;  %v1492_v46 = vunpack.c.l.bf16 %v1583_v33  ;;  %v1496_v47 = vunpack.c.l.bf16 %v1584_v34  ;;  %v1493_v48 = vunpack.c.h.bf16 %v1583_v33 }
  0x35   : > { %v402_v49 = vrot.slane %v392_v36, 4  ;;  %1385 = vst [vmem:[%s1737_s27 + $0x8] sm:$0xf] %v1440_v40  ;;  %v341_v50 = vmax.f32 %v337_v43, %v339_v44  ;;  %v469_v51 = vmax.f32 %v465_v38, 0.0  ;;  %v470_v52 = vmax.f32 %v466_v42, 0.0  ;;  %v520_v42 = vld [vmem:[%s1656_s18 + $0x88] sm:$0xff]  }
  0x36   : > { %413 = vst [vmem:[#allocation2 + $0x8] sm:$0xff] %v409_v45  ;;  %v446_v53 = vmul.f32 %v1492_v46, %v1661_v0  ;;  %v463_v54 = vmul.f32 %v1496_v47, %v1661_v0  ;;  %v1497_v55 = vunpack.c.h.bf16 %v1584_v34  ;;  %v447_v56 = vmul.f32 %v1493_v48, %v1661_v0  ;;  %v1791_v33 = vld [vmem:[%s1656_s18 + $0x78] ss:$36 sps:$4 sm:$0xff]  }
  0x37   : > { %v403_v59 = vsel %vm234_vm0, %v400_v29, %v402_v49  ;;  %v411_v60 = vmax.f32 %v376_v37, %v402_v49  ;;  %v1441_v61 = vpack.c.bf16 %v341_v50, %v341_v50  ;;  %v477_v62 = vrot.slane %v469_v51, 4  ;;  %v516_v43 = vld [vmem:[%s1656_s18 + $0x7c] sm:$0x3] }
  0x38   : > { %v410_v1 = vmax.f32 %v375_v35, %v403_v59  ;;  %v478_v2 = vrot.slane %v470_v52, 4  ;;  %v450_v3 = vadd.f32 %v1672_v11, %v446_v53  ;;  %v467_v4 = vadd.f32 %v1672_v11, %v463_v54 }
  0x39   : > { %415 = vst [vmem:[#allocation2 + $0x18] sm:$0xf] %v411_v60  ;;  %1386 = vst [vmem:[%s1737_s27 + $0xc] sm:$0x7] %v1441_v61  ;;  %v451_v5 = vadd.f32 %v1672_v11, %v447_v56  ;;  %v464_v6 = vmul.f32 %v1497_v55, %v1661_v0  ;;  %v444_v7 = vunpack.c.l.bf16 %v436_v57  ;;  %v1500_v8 = vunpack.c.l.bf16 %v1585_v58 }
  0x3a   : > { %414 = vst [vmem:[#allocation2 + $0x10] sm:$0xff] %v410_v1  ;;  %v479_v10 = vsel %vm234_vm0, %v477_v62, %v478_v2  ;;  %v454_v12 = vmax.f32 %v450_v3, 0.0  ;;  %v471_v13 = vmax.f32 %v467_v4, 0.0  ;;  %v1504_v14 = vunpack.c.l.bf16 %v1586_v63 }
  0x3b   : > { %v488_v15 = vmax.f32 %v453_v41, %v479_v10  ;;  %v455_v16 = vmax.f32 %v451_v5, 0.0  ;;  %v468_v17 = vadd.f32 %v1672_v11, %v464_v6  ;;  %v448_v18 = vmul.f32 %v1661_v0, %v444_v7 }
  0x3c   : > { %v480_v19 = vrot.slane %v471_v13, 4  ;;  %v525_v20 = vmul.f32 %v1500_v8, %v1661_v0  ;;  %v537_v21 = vunpack.c.l.bf16 %v517_v9  ;;  %v542_v22 = vmul.f32 %v1504_v14, %v1661_v0  ;;  %v1587_v8 = vld [vmem:[%s1656_s18 + $0x90] sm:$0xff]  }
  0x3d   : > { %v416_v23 = vld [vmem:[#allocation2] ss:$2 sm:$0xff]  ;;  %v418_v24 = vld [vmem:[#allocation2 + $0x1] ss:$2 sm:$0xff]  ;;  %v472_v25 = vmax.f32 %v468_v17, 0.0  ;;  %v452_v26 = vadd.f32 %v1672_v11, %v448_v18  ;;  %v1501_v27 = vunpack.c.h.bf16 %v1585_v58  ;;  %v1505_v28 = vunpack.c.h.bf16 %v1586_v63 }
  0x3e   : > { %492 = vst [vmem:[#allocation2] sm:$0xff] %v488_v15  ;;  %v481_v29 = vsel %vm234_vm0, %v478_v2, %v480_v19  ;;  %v420_v30 = vmax.f32 %v416_v23, %v418_v24  ;;  %v529_v31 = vadd.f32 %v1672_v11, %v525_v20  ;;  %v541_v32 = vmul.f32 %v1661_v0, %v537_v21  ;;  %v597_v58 = vld [vmem:[%s1656_s18 + $0x98] sm:$0xc]  ;;  %v1588_v20 = vld [vmem:[%s1656_s18 + $0xa0] sm:$0xff]  }
  0x3f   : > { %v489_v34 = vmax.f32 %v454_v12, %v481_v29  ;;  %v482_v35 = vrot.slane %v472_v25, 4  ;;  %v456_v36 = vmax.f32 %v452_v26, 0.0  ;;  %v546_v37 = vadd.f32 %v1672_v11, %v542_v22 }
  0x40   : > { %v1442_v38 = vpack.c.bf16 %v420_v30, %v420_v30  ;;  %v533_v39 = vmax.f32 %v529_v31, 0.0  ;;  %v545_v40 = vadd.f32 %v1672_v11, %v541_v32  ;;  %v526_v41 = vmul.f32 %v1501_v27, %v1661_v0 }
  0x41   : > { %v417_v44 = vld [vmem:[#allocation2 + $0x10] ss:$2 sm:$0x3f]  ;;  %v419_v45 = vld [vmem:[#allocation2 + $0x11] ss:$2 sm:$0x3f]  ;;  %v483_v46 = vsel %vm234_vm0, %v480_v19, %v482_v35  ;;  %v491_v47 = vmax.f32 %v456_v36, %v482_v35  ;;  %v543_v48 = vmul.f32 %v1505_v28, %v1661_v0  ;;  %v523_v49 = vunpack.c.l.bf16 %v1791_v33 }
  0x42   : > { %493 = vst [vmem:[#allocation2 + $0x8] sm:$0xff] %v489_v34  ;;  %v490_v50 = vmax.f32 %v455_v16, %v483_v46  ;;  %1389 = vst [vmem:[%s1737_s27 + $0x10] sm:$0xf] %v1442_v38  ;;  %v421_v51 = vmax.f32 %v417_v44, %v419_v45  ;;  %v549_v52 = vmax.f32 %v545_v40, 0.0  ;;  %v550_v53 = vmax.f32 %v546_v37, 0.0 }
  0x43   : > { %495 = vst [vmem:[#allocation2 + $0x18] sm:$0xf] %v491_v47  ;;  %v530_v54 = vadd.f32 %v1672_v11, %v526_v41  ;;  %v547_v55 = vadd.f32 %v1672_v11, %v543_v48  ;;  %v527_v56 = vmul.f32 %v1661_v0, %v523_v49  ;;  %v540_v57 = vunpack.c.l.bf16 %v520_v42  ;;  %v1589_v48 = vld [vmem:[%s1656_s18 + $0xa8] sm:$0xff]   ;;  %v677_v49 = vld [vmem:[%s1656_s18 + $0xb4] sm:$0xc] }
  0x44   : > { %494 = vst [vmem:[#allocation2 + $0x10] sm:$0xff] %v490_v50  ;;  %v1443_v59 = vpack.c.bf16 %v421_v51, %v421_v51  ;;  %v557_v60 = vrot.slane %v549_v52, 4  ;;  %v558_v61 = vrot.slane %v550_v53, 4  ;;  %v524_v62 = vunpack.c.l.bf16 %v516_v43  ;;  %v596_v43 = vld [vmem:[%s1656_s18 + $0x98] sm:$0x3] }
  0x45   : > { %v534_v63 = vmax.f32 %v530_v54, 0.0  ;;  %v551_v1 = vmax.f32 %v547_v55, 0.0  ;;  %v531_v2 = vadd.f32 %v1672_v11, %v527_v56  ;;  %v544_v3 = vmul.f32 %v1661_v0, %v540_v57  ;;  %v1590_v50 = vld [vmem:[%s1656_s18 + $0xb8] sm:$0xff]  }
  0x46   : > { %1390 = vst [vmem:[%s1737_s27 + $0x14] sm:$0x7] %v1443_v59  ;;  %v559_v4 = vsel %vm234_vm0, %v557_v60, %v558_v61  ;;  %v528_v5 = vmul.f32 %v1661_v0, %v524_v62  ;;  %v601_v6 = vunpack.c.h.bf16 %v520_v42  ;;  %v617_v7 = vunpack.c.l.bf16 %v597_v58 }
  0x47   : > { %v568_v9 = vmax.f32 %v533_v39, %v559_v4  ;;  %v560_v10 = vrot.slane %v551_v1, 4  ;;  %v535_v12 = vmax.f32 %v531_v2, 0.0  ;;  %v548_v13 = vadd.f32 %v1672_v11, %v544_v3 }
  0x48   : > { %v532_v16 = vadd.f32 %v1672_v11, %v528_v5  ;;  %v605_v17 = vmul.f32 %v1661_v0, %v601_v6  ;;  %v618_v18 = vunpack.c.h.bf16 %v1791_v33  ;;  %v621_v19 = vmul.f32 %v1661_v0, %v617_v7 }
  0x49   : > { %v496_v14 = vld [vmem:[#allocation2] ss:$2 sm:$0xff]  ;;  %v498_v15 = vld [vmem:[#allocation2 + $0x1] ss:$2 sm:$0xff]  ;;  %v561_v21 = vsel %vm234_vm0, %v558_v61, %v560_v10  ;;  %v552_v22 = vmax.f32 %v548_v13, 0.0  ;;  %v1508_v24 = vunpack.c.l.bf16 %v1587_v8  ;;  %v1512_v33 = vunpack.c.l.bf16 %v1588_v20 }
  0x4a   : > { %572 = vst [vmem:[#allocation2] sm:$0xff] %v568_v9  ;;  %v500_v23 = vmax.f32 %v496_v14, %v498_v15  ;;  %v569_v25 = vmax.f32 %v534_v63, %v561_v21  ;;  %v536_v26 = vmax.f32 %v532_v16, 0.0  ;;  %v609_v27 = vadd.f32 %v1672_v11, %v605_v17  ;;  %v676_v21 = vld [vmem:[%s1656_s18 + $0xb4] sm:$0x3] }
  0x4b   : > { %v622_v28 = vmul.f32 %v1661_v0, %v618_v18  ;;  %v497_v29 = vld [vmem:[#allocation2 + $0x10] ss:$2 sm:$0x3f]  ;;  %v499_v30 = vld [vmem:[#allocation2 + $0x11] ss:$2 sm:$0x3f]  ;;  %v625_v32 = vadd.f32 %v1672_v11, %v621_v19  ;;  %v606_v34 = vmul.f32 %v1508_v24, %v1661_v0  ;;  %v623_v41 = vmul.f32 %v1512_v33, %v1661_v0 }
  0x4c   : > { %v1444_v31 = vpack.c.bf16 %v500_v23, %v500_v23  ;;  %573 = vst [vmem:[#allocation2 + $0x8] sm:$0xff] %v569_v25  ;;  %v562_v35 = vrot.slane %v552_v22, 4  ;;  %v501_v36 = vmax.f32 %v497_v29, %v499_v30  ;;  %v613_v37 = vmax.f32 %v609_v27, 0.0  ;;  %v1848_v19 = vld [vmem:[%s1656_s18 + $0xb0] ss:$36 sps:$4 sm:$0xff]  }
  0x4d   : > { %v626_v38 = vadd.f32 %v1672_v11, %v622_v28  ;;  %v629_v39 = vmax.f32 %v625_v32, 0.0  ;;  %v610_v40 = vadd.f32 %v1672_v11, %v606_v34  ;;  %v1509_v42 = vunpack.c.h.bf16 %v1587_v8 }
  0x4e   : > { %1393 = vst [vmem:[%s1737_s27 + $0x18] sm:$0xf] %v1444_v31  ;;  %v563_v44 = vsel %vm234_vm0, %v560_v10, %v562_v35  ;;  %v571_v45 = vmax.f32 %v536_v26, %v562_v35  ;;  %v1445_v46 = vpack.c.bf16 %v501_v36, %v501_v36  ;;  %v627_v54 = vadd.f32 %v1672_v11, %v623_v41 }
  0x4f   : > { %v630_v47 = vmax.f32 %v626_v38, 0.0  ;;  %v570_v51 = vmax.f32 %v535_v12, %v563_v44  ;;  %v637_v52 = vrot.slane %v629_v39, 4  ;;  %v614_v53 = vmax.f32 %v610_v40, 0.0 }
  0x50   : > { %575 = vst [vmem:[#allocation2 + $0x18] sm:$0xf] %v571_v45  ;;  %1394 = vst [vmem:[%s1737_s27 + $0x1c] sm:$0x7] %v1445_v46  ;;  %v1513_v56 = vunpack.c.h.bf16 %v1588_v20  ;;  %v607_v57 = vmul.f32 %v1509_v42, %v1661_v0  ;;  %v604_v58 = vunpack.c.l.bf16 %v596_v43  ;;  %v631_v59 = vmax.f32 %v627_v54, 0.0  ;;  %v680_v20 = vld [vmem:[%s1656_s18 + $0xc0] sm:$0xff]  }
  0x51   : > { %v638_v55 = vrot.slane %v630_v47, 4  ;;  %574 = vst [vmem:[#allocation2 + $0x10] sm:$0xff] %v570_v51  ;;  %v1516_v60 = vunpack.c.l.bf16 %v1589_v48  ;;  %v1520_v61 = vunpack.c.l.bf16 %v1590_v50  ;;  %v697_v62 = vunpack.c.l.bf16 %v677_v49 }
  0x52   : > { %v611_v1 = vadd.f32 %v1672_v11, %v607_v57  ;;  %v624_v2 = vmul.f32 %v1513_v56, %v1661_v0  ;;  %v608_v3 = vmul.f32 %v1661_v0, %v604_v58  ;;  %v640_v7 = vrot.slane %v631_v59, 4  ;;  %v1591_v57 = vld [vmem:[%s1656_s18 + $0xc8] sm:$0xff]  }
  0x53   : > { %v639_v63 = vsel %vm234_vm0, %v637_v52, %v638_v55  ;;  %v576_v4 = vld [vmem:[#allocation2] ss:$2 sm:$0xff]  ;;  %v578_v5 = vld [vmem:[#allocation2 + $0x1] ss:$2 sm:$0xff]  ;;  %v685_v8 = vmul.f32 %v1516_v60, %v1661_v0  ;;  %v701_v9 = vmul.f32 %v1661_v0, %v697_v62  ;;  %v702_v17 = vmul.f32 %v1520_v61, %v1661_v0  ;;  %v757_v52 = vld [vmem:[%s1656_s18 + $0xd0] sm:$0xc] }
  0x54   : > { %v648_v6 = vmax.f32 %v613_v37, %v639_v63  ;;  %v615_v10 = vmax.f32 %v611_v1, 0.0  ;;  %v628_v12 = vadd.f32 %v1672_v11, %v624_v2  ;;  %v612_v13 = vadd.f32 %v1672_v11, %v608_v3 }
  0x55   : > { %v580_v14 = vmax.f32 %v576_v4, %v578_v5  ;;  %v641_v15 = vsel %vm234_vm0, %v638_v55, %v640_v7  ;;  %v689_v16 = vadd.f32 %v1672_v11, %v685_v8  ;;  %v705_v18 = vadd.f32 %v1672_v11, %v701_v9  ;;  %v1592_v5 = vld [vmem:[%s1656_s18 + $0xd8] sm:$0xff]  }
  0x56   : > { %652 = vst [vmem:[#allocation2] sm:$0xff] %v648_v6  ;;  %v649_v22 = vmax.f32 %v614_v53, %v641_v15  ;;  %v632_v23 = vmax.f32 %v628_v12, 0.0  ;;  %v616_v24 = vmax.f32 %v612_v13, 0.0  ;;  %v706_v27 = vadd.f32 %v1672_v11, %v702_v17 }
  0x57   : > { %v1446_v25 = vpack.c.bf16 %v580_v14, %v580_v14  ;;  %v693_v26 = vmax.f32 %v689_v16, 0.0  ;;  %v709_v28 = vmax.f32 %v705_v18, 0.0  ;;  %v1517_v29 = vunpack.c.h.bf16 %v1589_v48 }
  0x58   : > { %v577_v30 = vld [vmem:[#allocation2 + $0x10] ss:$2 sm:$0x3f]  ;;  %v579_v31 = vld [vmem:[#allocation2 + $0x11] ss:$2 sm:$0x3f]  ;;  %v1521_v32 = vunpack.c.h.bf16 %v1590_v50  ;;  %v683_v33 = vunpack.c.l.bf16 %v1848_v19  ;;  %v700_v34 = vunpack.c.l.bf16 %v680_v20  ;;  %v684_v35 = vunpack.c.l.bf16 %v676_v21 }
  0x59   : > { %653 = vst [vmem:[#allocation2 + $0x8] sm:$0xff] %v649_v22  ;;  %1397 = vst [vmem:[%s1737_s27 + $0x20] sm:$0xf] %v1446_v25  ;;  %v642_v36 = vrot.slane %v632_v23, 4  ;;  %v581_v37 = vmax.f32 %v577_v30, %v579_v31  ;;  %v710_v38 = vmax.f32 %v706_v27, 0.0  ;;  %v717_v39 = vrot.slane %v709_v28, 4 }
  0x5a   : > { %v686_v40 = vmul.f32 %v1517_v29, %v1661_v0  ;;  %v703_v41 = vmul.f32 %v1521_v32, %v1661_v0  ;;  %v687_v42 = vmul.f32 %v1661_v0, %v683_v33  ;;  %v704_v43 = vmul.f32 %v1661_v0, %v700_v34 }
  0x5b   : > { %v643_v44 = vsel %vm234_vm0, %v640_v7, %v642_v36  ;;  %v651_v45 = vmax.f32 %v616_v24, %v642_v36  ;;  %v1447_v46 = vpack.c.bf16 %v581_v37, %v581_v37  ;;  %v718_v47 = vrot.slane %v710_v38, 4 }
  0x5c   : > { %v650_v48 = vmax.f32 %v615_v10, %v643_v44  ;;  %v690_v49 = vadd.f32 %v1672_v11, %v686_v40  ;;  %v707_v50 = vadd.f32 %v1672_v11, %v703_v41  ;;  %v691_v51 = vadd.f32 %v1672_v11, %v687_v42  ;;  %v1593_v42 = vld [vmem:[%s1656_s18 + $0xe0] sm:$0xff]   ;;  %v1594_v44 = vld [vmem:[%s1656_s18 + $0xf0] sm:$0xff]  }
  0x5d   : > { %655 = vst [vmem:[#allocation2 + $0x18] sm:$0xf] %v651_v45  ;;  %1398 = vst [vmem:[%s1737_s27 + $0x24] sm:$0x7] %v1447_v46  ;;  %v719_v53 = vsel %vm234_vm0, %v717_v39, %v718_v47  ;;  %v708_v54 = vadd.f32 %v1672_v11, %v704_v43  ;;  %v688_v55 = vmul.f32 %v1661_v0, %v684_v35  ;;  %v761_v56 = vunpack.c.h.bf16 %v680_v20  ;;  %v756_v20 = vld [vmem:[%s1656_s18 + $0xd0] sm:$0x3] }
  0x5e   : > { %654 = vst [vmem:[#allocation2 + $0x10] sm:$0xff] %v650_v48  ;;  %v728_v58 = vmax.f32 %v693_v26, %v719_v53  ;;  %v694_v59 = vmax.f32 %v690_v49, 0.0  ;;  %v711_v60 = vmax.f32 %v707_v50, 0.0  ;;  %v695_v61 = vmax.f32 %v691_v51, 0.0  ;;  %v837_v43 = vld [vmem:[%s1656_s18 + $0xec] sm:$0xc] }
  0x5f   : > { %v712_v1 = vmax.f32 %v708_v54, 0.0  ;;  %v692_v2 = vadd.f32 %v1672_v11, %v688_v55  ;;  %v765_v3 = vmul.f32 %v1661_v0, %v761_v56  ;;  %v777_v4 = vunpack.c.l.bf16 %v757_v52 }
  0x60   : > { %v656_v62 = vld [vmem:[#allocation2] ss:$2 sm:$0xff]  ;;  %v658_v63 = vld [vmem:[#allocation2 + $0x1] ss:$2 sm:$0xff]  ;;  %v720_v6 = vrot.slane %v711_v60, 4  ;;  %v778_v8 = vunpack.c.h.bf16 %v1848_v19  ;;  %v1524_v9 = vunpack.c.l.bf16 %v1591_v57  ;;  %v1528_v18 = vunpack.c.l.bf16 %v1592_v5 }
  0x61   : > { %732 = vst [vmem:[#allocation2] sm:$0xff] %v728_v58  ;;  %v660_v7 = vmax.f32 %v656_v62, %v658_v63  ;;  %v722_v10 = vrot.slane %v712_v1, 4  ;;  %v696_v12 = vmax.f32 %v692_v2, 0.0  ;;  %v769_v13 = vadd.f32 %v1672_v11, %v765_v3 }
  0x62   : > { %v781_v14 = vmul.f32 %v1661_v0, %v777_v4  ;;  %v721_v15 = vsel %vm234_vm0, %v718_v47, %v720_v6  ;;  %v782_v17 = vmul.f32 %v1661_v0, %v778_v8  ;;  %v766_v27 = vmul.f32 %v1524_v9, %v1661_v0 }
  0x63   : > { %v1448_v16 = vpack.c.bf16 %v660_v7, %v660_v7  ;;  %v729_v21 = vmax.f32 %v694_v59, %v721_v15  ;;  %v723_v22 = vsel %vm234_vm0, %v720_v6, %v722_v10  ;;  %v731_v23 = vmax.f32 %v696_v12, %v722_v10 }
  0x64   : > { %v773_v19 = vmax.f32 %v769_v13, 0.0  ;;  %v730_v24 = vmax.f32 %v695_v61, %v723_v22  ;;  %v785_v25 = vadd.f32 %v1672_v11, %v781_v14  ;;  %v786_v26 = vadd.f32 %v1672_v11, %v782_v17  ;;  %v836_v22 = vld [vmem:[%s1656_s18 + $0xec] sm:$0x3] }
  0x65   : > { %1401 = vst [vmem:[%s1737_s27 + $0x28] sm:$0xf] %v1448_v16  ;;  %v657_v28 = vld [vmem:[#allocation2 + $0x10] ss:$2 sm:$0x3f]  ;;  %733 = vst [vmem:[#allocation2 + $0x8] sm:$0xff] %v729_v21  ;;  %v783_v30 = vmul.f32 %v1528_v18, %v1661_v0  ;;  %v1525_v31 = vunpack.c.h.bf16 %v1591_v57  ;;  %v1529_v32 = vunpack.c.h.bf16 %v1592_v5  ;;  %v764_v33 = vunpack.c.l.bf16 %v756_v20 }
  0x66   : > { %v659_v29 = vld [vmem:[#allocation2 + $0x11] ss:$2 sm:$0x3f]  ;;  %v789_v35 = vmax.f32 %v785_v25, 0.0  ;;  %v790_v36 = vmax.f32 %v786_v26, 0.0  ;;  %v770_v37 = vadd.f32 %v1672_v11, %v766_v27  ;;  %v1532_v54 = vunpack.c.l.bf16 %v1593_v42 }
  0x67   : > { %734 = vst [vmem:[#allocation2 + $0x10] sm:$0xff] %v730_v24  ;;  %735 = vst [vmem:[#allocation2 + $0x18] sm:$0xf] %v731_v23  ;;  %v661_v34 = vmax.f32 %v657_v28, %v659_v29  ;;  %v787_v38 = vadd.f32 %v1672_v11, %v783_v30  ;;  %v767_v39 = vmul.f32 %v1525_v31, %v1661_v0  ;;  %v1536_v55 = vunpack.c.l.bf16 %v1594_v44  ;;  %v835_v20 = vld [vmem:[%s1656_s18 + $0xe8] ss:$36 sps:$4 sm:$0xff]   ;;  %v840_v21 = vld [vmem:[%s1656_s18 + $0xf8] sm:$0xff]  }
  0x68   : > { %v784_v40 = vmul.f32 %v1529_v32, %v1661_v0  ;;  %v768_v41 = vmul.f32 %v1661_v0, %v764_v33  ;;  %v797_v46 = vrot.slane %v789_v35, 4  ;;  %v798_v47 = vrot.slane %v790_v36, 4 }
  0x69   : > { %v1449_v45 = vpack.c.bf16 %v661_v34, %v661_v34  ;;  %v774_v48 = vmax.f32 %v770_v37, 0.0  ;;  %v791_v49 = vmax.f32 %v787_v38, 0.0  ;;  %v771_v50 = vadd.f32 %v1672_v11, %v767_v39  ;;  %v917_v34 = vld [vmem:[%s1656_s18 + $0x108] sm:$0xc] }
  0x6a   : > { %v788_v51 = vadd.f32 %v1672_v11, %v784_v40  ;;  %v772_v52 = vadd.f32 %v1672_v11, %v768_v41  ;;  %v799_v53 = vsel %vm234_vm0, %v797_v46, %v798_v47  ;;  %v857_v56 = vunpack.c.l.bf16 %v837_v43 }
  0x6b   : > { %1402 = vst [vmem:[%s1737_s27 + $0x2c] sm:$0x7] %v1449_v45  ;;  %v808_v57 = vmax.f32 %v773_v19, %v799_v53  ;;  %v800_v58 = vrot.slane %v791_v49, 4  ;;  %v775_v59 = vmax.f32 %v771_v50, 0.0  ;;  %v845_v1 = vmul.f32 %v1532_v54, %v1661_v0 }
  0x6c   : > { %v792_v60 = vmax.f32 %v788_v51, 0.0  ;;  %v736_v61 = vld [vmem:[#allocation2] ss:$2 sm:$0xff]  ;;  %v738_v62 = vld [vmem:[#allocation2 + $0x1] ss:$2 sm:$0xff]  ;;  %v776_v63 = vmax.f32 %v772_v52, 0.0  ;;  %v861_v2 = vmul.f32 %v1661_v0, %v857_v56  ;;  %v862_v3 = vmul.f32 %v1536_v55, %v1661_v0 }
  0x6d   : > { %812 = vst [vmem:[#allocation2] sm:$0xff] %v808_v57  ;;  %v801_v6 = vsel %vm234_vm0, %v798_v47, %v800_v58  ;;  %v740_v7 = vmax.f32 %v736_v61, %v738_v62  ;;  %v1533_v8 = vunpack.c.h.bf16 %v1593_v42  ;;  %v1537_v9 = vunpack.c.h.bf16 %v1594_v44  ;;  %v1595_v51 = vld [vmem:[%s1656_s18 + $0x100] sm:$0xff]  }
  0x6e   : > { %v737_v4 = vld [vmem:[#allocation2 + $0x10] ss:$2 sm:$0x3f]  ;;  %v739_v5 = vld [vmem:[#allocation2 + $0x11] ss:$2 sm:$0x3f]  ;;  %v809_v10 = vmax.f32 %v774_v48, %v801_v6  ;;  %v849_v14 = vadd.f32 %v1672_v11, %v845_v1  ;;  %v865_v16 = vadd.f32 %v1672_v11, %v861_v2  ;;  %v866_v17 = vadd.f32 %v1672_v11, %v862_v3 }
  0x6f   : > { %v802_v12 = vrot.slane %v792_v60, 4  ;;  %v741_v13 = vmax.f32 %v737_v4, %v739_v5  ;;  %v1450_v15 = vpack.c.bf16 %v740_v7, %v740_v7  ;;  %v846_v18 = vmul.f32 %v1533_v8, %v1661_v0  ;;  %v1915_v0 = vld [vmem:[%s2078_s1] ss:$0 sm:$0xff] }
  0x70   : > { %813 = vst [vmem:[#allocation2 + $0x8] sm:$0xff] %v809_v10  ;;  %v853_v25 = vmax.f32 %v849_v14, 0.0  ;;  %v869_v27 = vmax.f32 %v865_v16, 0.0  ;;  %v870_v28 = vmax.f32 %v866_v17, 0.0  ;;  %v863_v30 = vmul.f32 %v1915_v0, %v1537_v9 }
  0x71   : > { %v803_v23 = vsel %vm234_vm0, %v800_v58, %v802_v12  ;;  %v811_v19 = vmax.f32 %v776_v63, %v802_v12  ;;  %v1451_v24 = vpack.c.bf16 %v741_v13, %v741_v13  ;;  %1405 = vst [vmem:[%s1737_s27 + $0x30] sm:$0xf] %v1450_v15  ;;  %v850_v29 = vadd.f32 %v1672_v11, %v846_v18  ;;  %v1922_v11 = vld [vmem:[%s2079_s2] ss:$0 sm:$0xff]  ;;  %v1596_v58 = vld [vmem:[%s1656_s18 + $0x110] sm:$0xff]  }
  0x72   : > { %v810_v26 = vmax.f32 %v775_v59, %v803_v23  ;;  %v843_v31 = vunpack.c.l.bf16 %v835_v20  ;;  %v860_v32 = vunpack.c.l.bf16 %v840_v21  ;;  %v844_v33 = vunpack.c.l.bf16 %v836_v22 }
  0x73   : > { %815 = vst [vmem:[#allocation2 + $0x18] sm:$0xf] %v811_v19  ;;  %1406 = vst [vmem:[%s1737_s27 + $0x34] sm:$0x7] %v1451_v24  ;;  %v877_v35 = vrot.slane %v869_v27, 4  ;;  %v878_v36 = vrot.slane %v870_v28, 4  ;;  %v921_v38 = vunpack.c.h.bf16 %v840_v21  ;;  %v867_v39 = vadd.f32 %v1922_v11, %v863_v30 }
  0x74   : > { %814 = vst [vmem:[#allocation2 + $0x10] sm:$0xff] %v810_v26  ;;  %v854_v37 = vmax.f32 %v850_v29, 0.0  ;;  %v847_v40 = vmul.f32 %v1915_v0, %v843_v31  ;;  %v864_v41 = vmul.f32 %v1915_v0, %v860_v32  ;;  %v848_v42 = vmul.f32 %v1915_v0, %v844_v33  ;;  %v1597_v21 = vld [vmem:[%s1656_s18 + $0x118] sm:$0xff]  }
  0x75   : > { %v879_v43 = vsel %vm234_vm0, %v877_v35, %v878_v36  ;;  %v925_v44 = vmul.f32 %v1915_v0, %v921_v38  ;;  %v937_v45 = vunpack.c.l.bf16 %v917_v34  ;;  %v938_v46 = vunpack.c.h.bf16 %v835_v20  ;;  %v916_v20 = vld [vmem:[%s1656_s18 + $0x108] sm:$0x3]  ;;  %v997_v34 = vld [vmem:[%s1656_s18 + $0x124] sm:$0xc] }
  0x76   : > { %v888_v47 = vmax.f32 %v853_v25, %v879_v43  ;;  %v871_v48 = vmax.f32 %v867_v39, 0.0  ;;  %v851_v49 = vadd.f32 %v1922_v11, %v847_v40  ;;  %v868_v50 = vadd.f32 %v1922_v11, %v864_v41  ;;  %v1598_v25 = vld [vmem:[%s1656_s18 + $0x128] sm:$0xff]  }
  0x77   : > { %v816_v52 = vld [vmem:[#allocation2] ss:$2 sm:$0xff]  ;;  %v818_v53 = vld [vmem:[#allocation2 + $0x1] ss:$2 sm:$0xff]  ;;  %v852_v54 = vadd.f32 %v1922_v11, %v848_v42  ;;  %v929_v55 = vadd.f32 %v1922_v11, %v925_v44  ;;  %v941_v56 = vmul.f32 %v1915_v0, %v937_v45  ;;  %v942_v57 = vmul.f32 %v1915_v0, %v938_v46 }
  0x78   : > { %892 = vst [vmem:[#allocation2] sm:$0xff] %v888_v47  ;;  %v880_v59 = vrot.slane %v871_v48, 4  ;;  %v855_v60 = vmax.f32 %v851_v49, 0.0  ;;  %v872_v61 = vmax.f32 %v868_v50, 0.0  ;;  %v820_v62 = vmax.f32 %v816_v52, %v818_v53 }
  0x79   : > { %v856_v63 = vmax.f32 %v852_v54, 0.0  ;;  %v933_v1 = vmax.f32 %v929_v55, 0.0  ;;  %v945_v2 = vadd.f32 %v1922_v11, %v941_v56  ;;  %v946_v3 = vadd.f32 %v1922_v11, %v942_v57 }
  0x7a   : > { %v881_v6 = vsel %vm234_vm0, %v878_v36, %v880_v59  ;;  %v1452_v7 = vpack.c.bf16 %v820_v62, %v820_v62  ;;  %v1540_v8 = vunpack.c.l.bf16 %v1595_v51  ;;  %v1544_v9 = vunpack.c.l.bf16 %v1596_v58 }
  0x7b   : > { %v817_v4 = vld [vmem:[#allocation2 + $0x10] ss:$2 sm:$0x3f]  ;;  %v819_v5 = vld [vmem:[#allocation2 + $0x11] ss:$2 sm:$0x3f]  ;;  %v889_v10 = vmax.f32 %v854_v37, %v881_v6  ;;  %v1541_v18 = vunpack.c.h.bf16 %v1595_v51  ;;  %v1545_v30 = vunpack.c.h.bf16 %v1596_v58  ;;  %v924_v32 = vunpack.c.l.bf16 %v916_v20 }
  0x7c   : > { %v882_v12 = vrot.slane %v872_v61, 4  ;;  %v821_v13 = vmax.f32 %v817_v4, %v819_v5  ;;  %v949_v14 = vmax.f32 %v945_v2, 0.0  ;;  %1409 = vst [vmem:[%s1737_s27 + $0x38] sm:$0xf] %v1452_v7  ;;  %v950_v15 = vmax.f32 %v946_v3, 0.0  ;;  %v1000_v58 = vld [vmem:[%s1656_s18 + $0x130] sm:$0xff]  }
  0x7d   : > { %v926_v16 = vmul.f32 %v1915_v0, %v1540_v8  ;;  %v943_v17 = vmul.f32 %v1915_v0, %v1544_v9  ;;  %893 = vst [vmem:[#allocation2 + $0x8] sm:$0xff] %v889_v10  ;;  %v927_v31 = vmul.f32 %v1915_v0, %v1541_v18  ;;  %v1548_v33 = vunpack.c.l.bf16 %v1597_v21  ;;  %v1962_v51 = vld [vmem:[%s1656_s18 + $0x120] ss:$36 sps:$4 sm:$0xff]  }
  0x7e   : > { %v883_v22 = vsel %vm234_vm0, %v880_v59, %v882_v12  ;;  %v891_v23 = vmax.f32 %v856_v63, %v882_v12  ;;  %v1453_v19 = vpack.c.bf16 %v821_v13, %v821_v13  ;;  %v957_v24 = vrot.slane %v949_v14, 4  ;;  %v996_v20 = vld [vmem:[%s1656_s18 + $0x124] sm:$0x3] }
  0x7f   : > { %v890_v26 = vmax.f32 %v855_v60, %v883_v22  ;;  %v958_v27 = vrot.slane %v950_v15, 4  ;;  %v930_v28 = vadd.f32 %v1922_v11, %v926_v16  ;;  %v947_v29 = vadd.f32 %v1922_v11, %v943_v17 }
  0x80   : > { %895 = vst [vmem:[#allocation2 + $0x18] sm:$0xf] %v891_v23  ;;  %1410 = vst [vmem:[%s1737_s27 + $0x3c] sm:$0x7] %v1453_v19  ;;  %v1552_v38 = vunpack.c.l.bf16 %v1598_v25  ;;  %v931_v40 = vadd.f32 %v1922_v11, %v927_v31  ;;  %v944_v41 = vmul.f32 %v1915_v0, %v1545_v30  ;;  %v928_v42 = vmul.f32 %v1915_v0, %v924_v32 }
  0x81   : > { %894 = vst [vmem:[#allocation2 + $0x10] sm:$0xff] %v890_v26  ;;  %v959_v35 = vsel %vm234_vm0, %v957_v24, %v958_v27  ;;  %v934_v36 = vmax.f32 %v930_v28, 0.0  ;;  %v951_v37 = vmax.f32 %v947_v29, 0.0  ;;  %v1005_v44 = vmul.f32 %v1915_v0, %v1548_v33  ;;  %v1077_v24 = vld [vmem:[%s1656_s18 + $0x140] sm:$0xc]  ;;  %v1599_v33 = vld [vmem:[%s1656_s18 + $0x138] sm:$0xff]  }
  0x82   : > { %v968_v39 = vmax.f32 %v933_v1, %v959_v35  ;;  %v1017_v45 = vunpack.c.l.bf16 %v997_v34  ;;  %v1022_v46 = vmul.f32 %v1915_v0, %v1552_v38  ;;  %v935_v47 = vmax.f32 %v931_v40, 0.0 }
  0x83   : > { %v960_v43 = vrot.slane %v951_v37, 4  ;;  %v948_v48 = vadd.f32 %v1922_v11, %v944_v41  ;;  %v932_v49 = vadd.f32 %v1922_v11, %v928_v42  ;;  %v1549_v50 = vunpack.c.h.bf16 %v1597_v21 }
  0x84   : > { %v896_v52 = vld [vmem:[#allocation2] ss:$2 sm:$0xff]  ;;  %v898_v53 = vld [vmem:[#allocation2 + $0x1] ss:$2 sm:$0xff]  ;;  %v1009_v55 = vadd.f32 %v1922_v11, %v1005_v44  ;;  %v1021_v56 = vmul.f32 %v1915_v0, %v1017_v45  ;;  %v1026_v57 = vadd.f32 %v1922_v11, %v1022_v46  ;;  %v1553_v3 = vunpack.c.h.bf16 %v1598_v25 }
  0x85   : > { %v961_v54 = vsel %vm234_vm0, %v958_v27, %v960_v43  ;;  %972 = vst [vmem:[#allocation2] sm:$0xff] %v968_v39  ;;  %v952_v60 = vmax.f32 %v948_v48, 0.0  ;;  %v936_v61 = vmax.f32 %v932_v49, 0.0  ;;  %v900_v62 = vmax.f32 %v896_v52, %v898_v53  ;;  %v1600_v44 = vld [vmem:[%s1656_s18 + $0x148] sm:$0xff]  }
  0x86   : > { %v969_v59 = vmax.f32 %v934_v36, %v961_v54  ;;  %v1013_v63 = vmax.f32 %v1009_v55, 0.0  ;;  %v1025_v1 = vadd.f32 %v1922_v11, %v1021_v56  ;;  %v1030_v2 = vmax.f32 %v1026_v57, 0.0 }
  0x87   : > { %v1454_v6 = vpack.c.bf16 %v900_v62, %v900_v62  ;;  %v1006_v7 = vmul.f32 %v1915_v0, %v1549_v50  ;;  %v1003_v8 = vunpack.c.l.bf16 %v1962_v51  ;;  %v1020_v9 = vunpack.c.l.bf16 %v1000_v58 }
  0x88   : > { %v897_v4 = vld [vmem:[#allocation2 + $0x10] ss:$2 sm:$0x3f]  ;;  %v899_v5 = vld [vmem:[#allocation2 + $0x11] ss:$2 sm:$0x3f]  ;;  %v1023_v16 = vmul.f32 %v1915_v0, %v1553_v3  ;;  %v1004_v31 = vunpack.c.l.bf16 %v996_v20  ;;  %v1081_v32 = vunpack.c.h.bf16 %v1000_v58  ;;  %v1097_v37 = vunpack.c.l.bf16 %v1077_v24 }
  0x89   : > { %973 = vst [vmem:[#allocation2 + $0x8] sm:$0xff] %v969_v59  ;;  %v962_v10 = vrot.slane %v952_v60, 4  ;;  %v901_v12 = vmax.f32 %v897_v4, %v899_v5  ;;  %v1029_v13 = vmax.f32 %v1025_v1, 0.0  ;;  %v1038_v14 = vrot.slane %v1030_v2, 4  ;;  %1413 = vst [vmem:[%s1737_s27 + $0x40] sm:$0xf] %v1454_v6 }
  0x8a   : > { %v1010_v15 = vadd.f32 %v1922_v11, %v1006_v7  ;;  %v1007_v17 = vmul.f32 %v1915_v0, %v1003_v8  ;;  %v1024_v18 = vmul.f32 %v1915_v0, %v1020_v9  ;;  %v1027_v27 = vadd.f32 %v1922_v11, %v1023_v16  ;;  %v1076_v2 = vld [vmem:[%s1656_s18 + $0x140] sm:$0x3]  ;;  %v2002_v3 = vld [vmem:[%s1656_s18 + $0x150] sm:$0xff]   ;;  %v1157_v20 = vld [vmem:[%s1656_s18 + $0x15c] sm:$0xc] }
  0x8b   : > { %v963_v21 = vsel %vm234_vm0, %v960_v43, %v962_v10  ;;  %v971_v22 = vmax.f32 %v936_v61, %v962_v10  ;;  %v1455_v23 = vpack.c.bf16 %v901_v12, %v901_v12  ;;  %v1037_v19 = vrot.slane %v1029_v13, 4 }
  0x8c   : > { %v970_v25 = vmax.f32 %v935_v47, %v963_v21  ;;  %v1014_v26 = vmax.f32 %v1010_v15, 0.0  ;;  %v1011_v28 = vadd.f32 %v1922_v11, %v1007_v17  ;;  %v1028_v30 = vadd.f32 %v1922_v11, %v1024_v18  ;;  %v1602_v21 = vld [vmem:[%s1656_s18 + $0x160] sm:$0xff]  }
  0x8d   : > { %975 = vst [vmem:[#allocation2 + $0x18] sm:$0xf] %v971_v22  ;;  %1414 = vst [vmem:[%s1737_s27 + $0x44] sm:$0x7] %v1455_v23  ;;  %v1039_v29 = vsel %vm234_vm0, %v1037_v19, %v1038_v14  ;;  %v1031_v35 = vmax.f32 %v1027_v27, 0.0  ;;  %v1008_v41 = vmul.f32 %v1915_v0, %v1004_v31  ;;  %v1085_v42 = vmul.f32 %v1915_v0, %v1081_v32 }
  0x8e   : > { %974 = vst [vmem:[#allocation2 + $0x10] sm:$0xff] %v970_v25  ;;  %v1048_v34 = vmax.f32 %v1013_v63, %v1039_v29  ;;  %v1015_v36 = vmax.f32 %v1011_v28, 0.0  ;;  %v1032_v40 = vmax.f32 %v1028_v30, 0.0  ;;  %v1098_v43 = vunpack.c.h.bf16 %v1962_v51 }
  0x8f   : > { %v1040_v45 = vrot.slane %v1031_v35, 4  ;;  %v1101_v47 = vmul.f32 %v1915_v0, %v1097_v37  ;;  %v1556_v48 = vunpack.c.l.bf16 %v1599_v33  ;;  %v1012_v50 = vadd.f32 %v1922_v11, %v1008_v41 }
  0x90   : > { %v976_v38 = vld [vmem:[#allocation2] ss:$2 sm:$0xff]  ;;  %v978_v39 = vld [vmem:[#allocation2 + $0x1] ss:$2 sm:$0xff]  ;;  %v1042_v49 = vrot.slane %v1032_v40, 4  ;;  %v1089_v52 = vadd.f32 %v1922_v11, %v1085_v42  ;;  %v1102_v53 = vmul.f32 %v1915_v0, %v1098_v43  ;;  %v1560_v56 = vunpack.c.l.bf16 %v1600_v44 }
  0x91   : > { %1052 = vst [vmem:[#allocation2] sm:$0xff] %v1048_v34  ;;  %v980_v46 = vmax.f32 %v976_v38, %v978_v39  ;;  %v1041_v54 = vsel %vm234_vm0, %v1038_v14, %v1040_v45  ;;  %v1105_v55 = vadd.f32 %v1922_v11, %v1101_v47  ;;  %v1016_v59 = vmax.f32 %v1012_v50, 0.0 }
  0x92   : > { %v1049_v57 = vmax.f32 %v1014_v26, %v1041_v54  ;;  %v1043_v58 = vsel %vm234_vm0, %v1040_v45, %v1042_v49  ;;  %v1093_v60 = vmax.f32 %v1089_v52, 0.0  ;;  %v1106_v62 = vadd.f32 %v1922_v11, %v1102_v53 }
  0x93   : > { %v1456_v51 = vpack.c.bf16 %v980_v46, %v980_v46  ;;  %v1050_v61 = vmax.f32 %v1015_v36, %v1043_v58  ;;  %v1109_v63 = vmax.f32 %v1105_v55, 0.0  ;;  %v1086_v1 = vmul.f32 %v1915_v0, %v1556_v48  ;;  %v1160_v58 = vld [vmem:[%s1656_s18 + $0x168] sm:$0xff]  }
  0x94   : > { %1053 = vst [vmem:[#allocation2 + $0x8] sm:$0xff] %v1049_v57  ;;  %v1051_v6 = vmax.f32 %v1016_v59, %v1042_v49  ;;  %v1103_v7 = vmul.f32 %v1915_v0, %v1560_v56  ;;  %v1557_v8 = vunpack.c.h.bf16 %v1599_v33  ;;  %v1561_v9 = vunpack.c.h.bf16 %v1600_v44  ;;  %v1155_v57 = vld [vmem:[%s1656_s18 + $0x158] ss:$36 sps:$4 sm:$0xff]  }
  0x95   : > { %1417 = vst [vmem:[%s1737_s27 + $0x48] sm:$0xf] %v1456_v51  ;;  %v977_v4 = vld [vmem:[#allocation2 + $0x10] ss:$2 sm:$0x3f]  ;;  %v1110_v12 = vmax.f32 %v1106_v62, 0.0  ;;  %v1090_v14 = vadd.f32 %v1922_v11, %v1086_v1  ;;  %v1084_v18 = vunpack.c.l.bf16 %v1076_v2  ;;  %v1564_v24 = vunpack.c.l.bf16 %v2002_v3 }
  0x96   : > { %v979_v5 = vld [vmem:[#allocation2 + $0x11] ss:$2 sm:$0x3f]  ;;  %v1117_v13 = vrot.slane %v1109_v63, 4  ;;  %v1107_v15 = vadd.f32 %v1922_v11, %v1103_v7  ;;  %v1087_v16 = vmul.f32 %v1915_v0, %v1557_v8  ;;  %v1104_v17 = vmul.f32 %v1915_v0, %v1561_v9  ;;  %v1156_v63 = vld [vmem:[%s1656_s18 + $0x15c] sm:$0x3] }
  0x97   : > { %1054 = vst [vmem:[#allocation2 + $0x10] sm:$0xff] %v1050_v61  ;;  %v981_v10 = vmax.f32 %v977_v4, %v979_v5  ;;  %1055 = vst [vmem:[#allocation2 + $0x18] sm:$0xf] %v1051_v6  ;;  %v1118_v23 = vrot.slane %v1110_v12, 4  ;;  %v1094_v19 = vmax.f32 %v1090_v14, 0.0  ;;  %v1088_v28 = vmul.f32 %v1915_v0, %v1084_v18 }
  0x98   : > { %v1111_v25 = vmax.f32 %v1107_v15, 0.0  ;;  %v1091_v26 = vadd.f32 %v1922_v11, %v1087_v16  ;;  %v1108_v27 = vadd.f32 %v1922_v11, %v1104_v17  ;;  %v1568_v30 = vunpack.c.l.bf16 %v1602_v21  ;;  %v1237_v5 = vld [vmem:[%s1656_s18 + $0x178] sm:$0xc] }
  0x99   : > { %v1457_v22 = vpack.c.bf16 %v981_v10, %v981_v10  ;;  %v1119_v29 = vsel %vm234_vm0, %v1117_v13, %v1118_v23  ;;  %v1165_v31 = vmul.f32 %v1915_v0, %v1564_v24  ;;  %v1177_v32 = vunpack.c.l.bf16 %v1157_v20  ;;  %v1603_v20 = vld [vmem:[%s1656_s18 + $0x170] sm:$0xff]  }
  0x9a   : > { %v1128_v33 = vmax.f32 %v1093_v60, %v1119_v29  ;;  %v1120_v34 = vrot.slane %v1111_v25, 4  ;;  %v1095_v35 = vmax.f32 %v1091_v26, 0.0  ;;  %v1112_v36 = vmax.f32 %v1108_v27, 0.0 }
  0x9b   : > { %1418 = vst [vmem:[%s1737_s27 + $0x4c] sm:$0x7] %v1457_v22  ;;  %v1056_v37 = vld [vmem:[#allocation2] ss:$2 sm:$0xff]  ;;  %v1058_v38 = vld [vmem:[#allocation2 + $0x1] ss:$2 sm:$0xff]  ;;  %v1092_v39 = vadd.f32 %v1922_v11, %v1088_v28  ;;  %v1169_v40 = vadd.f32 %v1922_v11, %v1165_v31  ;;  %v1181_v41 = vmul.f32 %v1915_v0, %v1177_v32  ;;  %v1182_v42 = vmul.f32 %v1915_v0, %v1568_v30 }
  0x9c   : > { %1132 = vst [vmem:[#allocation2] sm:$0xff] %v1128_v33  ;;  %v1121_v43 = vsel %vm234_vm0, %v1118_v23, %v1120_v34  ;;  %v1122_v44 = vrot.slane %v1112_v36, 4  ;;  %v1060_v45 = vmax.f32 %v1056_v37, %v1058_v38  ;;  %v1565_v46 = vunpack.c.h.bf16 %v2002_v3 }
  0x9d   : > { %v1129_v49 = vmax.f32 %v1094_v19, %v1121_v43  ;;  %v1185_v50 = vadd.f32 %v1922_v11, %v1181_v41  ;;  %v1186_v52 = vadd.f32 %v1922_v11, %v1182_v42  ;;  %v1569_v53 = vunpack.c.h.bf16 %v1602_v21 }
  0x9e   : > { %v1057_v47 = vld [vmem:[#allocation2 + $0x10] ss:$2 sm:$0x3f]  ;;  %v1059_v48 = vld [vmem:[#allocation2 + $0x11] ss:$2 sm:$0x3f]  ;;  %v1123_v54 = vsel %vm234_vm0, %v1120_v34, %v1122_v44  ;;  %v1458_v55 = vpack.c.bf16 %v1060_v45, %v1060_v45  ;;  %v1166_v3 = vmul.f32 %v1915_v0, %v1565_v46  ;;  %v1163_v8 = vunpack.c.l.bf16 %v1155_v57 }
  0x9f   : > { %v1096_v51 = vmax.f32 %v1092_v39, 0.0  ;;  %v1061_v56 = vmax.f32 %v1057_v47, %v1059_v48  ;;  %1133 = vst [vmem:[#allocation2 + $0x8] sm:$0xff] %v1129_v49  ;;  %v1130_v59 = vmax.f32 %v1095_v35, %v1123_v54  ;;  %v1173_v60 = vmax.f32 %v1169_v40, 0.0  ;;  %v1604_v34 = vld [vmem:[%s1656_s18 + $0x180] sm:$0xff]  }
  0xa0   : > { %v1189_v61 = vmax.f32 %v1185_v50, 0.0  ;;  %v1190_v62 = vmax.f32 %v1186_v52, 0.0  ;;  %1421 = vst [vmem:[%s1737_s27 + $0x50] sm:$0xf] %v1458_v55  ;;  %v1183_v4 = vmul.f32 %v1915_v0, %v1569_v53  ;;  %v1180_v9 = vunpack.c.l.bf16 %v1160_v58 }
  0xa1   : > { %v1131_v1 = vmax.f32 %v1096_v51, %v1122_v44  ;;  %v1459_v2 = vpack.c.bf16 %v1061_v56, %v1061_v56  ;;  %1134 = vst [vmem:[#allocation2 + $0x10] sm:$0xff] %v1130_v59  ;;  %v1170_v10 = vadd.f32 %v1922_v11, %v1166_v3  ;;  %v1164_v13 = vunpack.c.l.bf16 %v1156_v63  ;;  %v1236_v56 = vld [vmem:[%s1656_s18 + $0x178] sm:$0x3] }
  0xa2   : > { %v1197_v6 = vrot.slane %v1189_v61, 4  ;;  %v1198_v7 = vrot.slane %v1190_v62, 4  ;;  %v1187_v12 = vadd.f32 %v1922_v11, %v1183_v4  ;;  %v1241_v14 = vunpack.c.h.bf16 %v1160_v58 }
  0xa3   : > { %1135 = vst [vmem:[#allocation2 + $0x18] sm:$0xf] %v1131_v1  ;;  %1422 = vst [vmem:[%s1737_s27 + $0x54] sm:$0x7] %v1459_v2  ;;  %v1167_v16 = vmul.f32 %v1915_v0, %v1163_v8  ;;  %v1184_v17 = vmul.f32 %v1915_v0, %v1180_v9  ;;  %v1257_v18 = vunpack.c.l.bf16 %v1237_v5  ;;  %v1174_v22 = vmax.f32 %v1170_v10, 0.0 }
  0xa4   : > { %v1199_v15 = vsel %vm234_vm0, %v1197_v6, %v1198_v7  ;;  %v1191_v23 = vmax.f32 %v1187_v12, 0.0  ;;  %v1168_v19 = vmul.f32 %v1915_v0, %v1164_v13  ;;  %v1245_v26 = vmul.f32 %v1915_v0, %v1241_v14 }
  0xa5   : > { %v1208_v21 = vmax.f32 %v1173_v60, %v1199_v15  ;;  %v1171_v24 = vadd.f32 %v1922_v11, %v1167_v16  ;;  %v1188_v25 = vadd.f32 %v1922_v11, %v1184_v17  ;;  %v1258_v27 = vunpack.c.h.bf16 %v1155_v57 }
  0xa6   : > { %v1136_v28 = vld [vmem:[#allocation2] ss:$2 sm:$0xff]  ;;  %v1138_v29 = vld [vmem:[#allocation2 + $0x1] ss:$2 sm:$0xff]  ;;  %v1200_v30 = vrot.slane %v1191_v23, 4  ;;  %v1172_v31 = vadd.f32 %v1922_v11, %v1168_v19  ;;  %v1261_v32 = vmul.f32 %v1915_v0, %v1257_v18  ;;  %v1572_v33 = vunpack.c.l.bf16 %v1603_v20 }
  0xa7   : > { %1212 = vst [vmem:[#allocation2] sm:$0xff] %v1208_v21  ;;  %v1175_v35 = vmax.f32 %v1171_v24, 0.0  ;;  %v1192_v36 = vmax.f32 %v1188_v25, 0.0  ;;  %v1140_v37 = vmax.f32 %v1136_v28, %v1138_v29  ;;  %v1249_v38 = vadd.f32 %v1922_v11, %v1245_v26 }
  0xa8   : > { %v1201_v39 = vsel %vm234_vm0, %v1198_v7, %v1200_v30  ;;  %v1176_v40 = vmax.f32 %v1172_v31, 0.0  ;;  %v1262_v41 = vmul.f32 %v1915_v0, %v1258_v27  ;;  %v1265_v42 = vadd.f32 %v1922_v11, %v1261_v32 }
  0xa9   : > { %v1209_v45 = vmax.f32 %v1174_v22, %v1201_v39  ;;  %v1460_v46 = vpack.c.bf16 %v1140_v37, %v1140_v37  ;;  %v1576_v47 = vunpack.c.l.bf16 %v1604_v34  ;;  %v1246_v48 = vmul.f32 %v1915_v0, %v1572_v33 }
  0xaa   : > { %v1137_v43 = vld [vmem:[#allocation2 + $0x10] ss:$2 sm:$0x3f]  ;;  %v1139_v44 = vld [vmem:[#allocation2 + $0x11] ss:$2 sm:$0x3f]  ;;  %v1266_v52 = vadd.f32 %v1922_v11, %v1262_v41  ;;  %v1573_v55 = vunpack.c.h.bf16 %v1603_v20  ;;  %v1577_v3 = vunpack.c.h.bf16 %v1604_v34  ;;  %v1244_v5 = vunpack.c.l.bf16 %v1236_v56 }
  0xab   : > { %v1202_v49 = vrot.slane %v1192_v36, 4  ;;  %v1141_v50 = vmax.f32 %v1137_v43, %v1139_v44  ;;  %1213 = vst [vmem:[#allocation2 + $0x8] sm:$0xff] %v1209_v45  ;;  %1425 = vst [vmem:[%s1737_s27 + $0x58] sm:$0xf] %v1460_v46  ;;  %v1269_v53 = vmax.f32 %v1265_v42, 0.0  ;;  %v1250_v54 = vadd.f32 %v1922_v11, %v1246_v48 }
  0xac   : > { %v1263_v51 = vmul.f32 %v1915_v0, %v1576_v47  ;;  %v1270_v60 = vmax.f32 %v1266_v52, 0.0  ;;  %v1253_v62 = vmax.f32 %v1249_v38, 0.0  ;;  %v1247_v4 = vmul.f32 %v1915_v0, %v1573_v55 }
  0xad   : > { %v1203_v57 = vsel %vm234_vm0, %v1200_v30, %v1202_v49  ;;  %v1211_v58 = vmax.f32 %v1176_v40, %v1202_v49  ;;  %v1461_v59 = vpack.c.bf16 %v1141_v50, %v1141_v50  ;;  %v1277_v63 = vrot.slane %v1269_v53, 4 }
  0xae   : > { %v1210_v61 = vmax.f32 %v1175_v35, %v1203_v57  ;;  %v1267_v1 = vadd.f32 %v1922_v11, %v1263_v51  ;;  %v1278_v2 = vrot.slane %v1270_v60, 4  ;;  %v1254_v8 = vmax.f32 %v1250_v54, 0.0 }
  0xaf   : > { %1215 = vst [vmem:[#allocation2 + $0x18] sm:$0xf] %v1211_v58  ;;  %1426 = vst [vmem:[%s1737_s27 + $0x5c] sm:$0x7] %v1461_v59  ;;  %v1264_v9 = vmul.f32 %v1915_v0, %v1577_v3  ;;  %v1248_v10 = vmul.f32 %v1915_v0, %v1244_v5  ;;  %v1251_v14 = vadd.f32 %v1922_v11, %v1247_v4 }
  0xb0   : > { %1214 = vst [vmem:[#allocation2 + $0x10] sm:$0xff] %v1210_v61  ;;  %v1271_v6 = vmax.f32 %v1267_v1, 0.0  ;;  %v1279_v7 = vsel %vm234_vm0, %v1277_v63, %v1278_v2 }
  0xb1   : > { %v1288_v12 = vmax.f32 %v1253_v62, %v1279_v7  ;;  %v1268_v17 = vadd.f32 %v1922_v11, %v1264_v9  ;;  %v1252_v18 = vadd.f32 %v1922_v11, %v1248_v10  ;;  %v1255_v19 = vmax.f32 %v1251_v14, 0.0 }
  0xb2   : > { %v1280_v13 = vrot.slane %v1271_v6, 4  ;;  %v1216_v15 = vld [vmem:[#allocation2] ss:$2 sm:$0xff]  ;;  %v1218_v16 = vld [vmem:[#allocation2 + $0x1] ss:$2 sm:$0xff] }
  0xb3   : > { %1292 = vst [vmem:[#allocation2] sm:$0xff] %v1288_v12  ;;  %v1220_v21 = vmax.f32 %v1216_v15, %v1218_v16  ;;  %v1272_v23 = vmax.f32 %v1268_v17, 0.0  ;;  %v1256_v0 = vmax.f32 %v1252_v18, 0.0 }
  0xb4   : > { %v1281_v20 = vsel %vm234_vm0, %v1278_v2, %v1280_v13 }
  0xb5   : > { %v1289_v22 = vmax.f32 %v1254_v8, %v1281_v20  ;;  %v1462_v24 = vpack.c.bf16 %v1220_v21, %v1220_v21  ;;  %v1282_v27 = vrot.slane %v1272_v23, 4 }
  0xb7   : > { %v1217_v25 = vld [vmem:[#allocation2 + $0x10] ss:$2 sm:$0x3f]  ;;  %v1219_v26 = vld [vmem:[#allocation2 + $0x11] ss:$2 sm:$0x3f]  ;;  %v1283_v29 = vsel %vm234_vm0, %v1280_v13, %v1282_v27  ;;  %v1291_v11 = vmax.f32 %v1256_v0, %v1282_v27 }
  0xb8   : > { %1293 = vst [vmem:[#allocation2 + $0x8] sm:$0xff] %v1289_v22  ;;  %1429 = vst [vmem:[%s1737_s27 + $0x60] sm:$0xf] %v1462_v24  ;;  %v1221_v28 = vmax.f32 %v1217_v25, %v1219_v26  ;;  %v1290_v31 = vmax.f32 %v1255_v19, %v1283_v29 }
  0xb9   : > { %1295 = vst [vmem:[#allocation2 + $0x18] sm:$0xf] %v1291_v11 }
  0xba   : > { %v1463_v30 = vpack.c.bf16 %v1221_v28, %v1221_v28  ;;  %1294 = vst [vmem:[#allocation2 + $0x10] sm:$0xff] %v1290_v31 }
  0xbc   : > { %1430 = vst [vmem:[%s1737_s27 + $0x64] sm:$0x7] %v1463_v30 }
  0xbf   : > { %v1296_v32 = vld [vmem:[#allocation2] ss:$2 sm:$0xff]  ;;  %v1298_v33 = vld [vmem:[#allocation2 + $0x1] ss:$2 sm:$0xff] }
  0xc0   : > { %v1300_v34 = vmax.f32 %v1296_v32, %v1298_v33 }
  0xc1   : > { %v1297_v36 = vld [vmem:[#allocation2 + $0x10] ss:$2 sm:$0x3f]  ;;  %v1299_v37 = vld [vmem:[#allocation2 + $0x11] ss:$2 sm:$0x3f] }
  0xc2   : > { %v1464_v35 = vpack.c.bf16 %v1300_v34, %v1300_v34  ;;  %v1301_v38 = vmax.f32 %v1297_v36, %v1299_v37 }
  0xc4   : > { %1433 = vst [vmem:[%s1737_s27 + $0x68] sm:$0xf] %v1464_v35  ;;  %v1465_v39 = vpack.c.bf16 %v1301_v38, %v1301_v38 }
  0xc6   : > { %1434 = vst [vmem:[%s1737_s27 + $0x6c] sm:$0x7] %v1465_v39 }
  0xc7 PF: > { %s13_s12 = sadd.s32 1, %s1621_s12  }
  0xc8   : > { %p10_p5 = scmp.ge.s32.totalorder %s13_s12, 4  }
  0xca   :  { %12 = sbr.rel (!%p10_p5) target bundleno = 1 (0x1), region = 78 }

// kernel: cnn_forward.7
= control target key start
LH: loop header
LB: loop body
LE: loop exit
PB: predicated region body
PF: predicated region fallthrough
CT: control target
= control target key end

     0   :  { %s2651_s15 = smov 0   ;;  %s2967_s0 = inlined_call_operand.vmem [shape: bf16[512,512], index: 0, kind: input, shape index: {}]   ;;  %s2968_s1 = inlined_call_operand.vmem [shape: bf16[512,128], index: 1, kind: input, shape index: {}]   ;;  %s2969_s2 = inlined_call_operand.vmem [shape: bf16[512,128], index: 2, kind: output, shape index: {0}]   ;;  %s2970_s3 = inlined_call_operand.vmem [shape: f32[2,1,128], index: 3, kind: output, shape index: {1}]   ;;  %s2971_s4 = inlined_call_operand.vmem [shape: f32[2,1,128], index: 4, kind: output, shape index: {2}]  }
   0x1 LB: > { %s2657_s16 = sadd.s32 4294967295, %s2624_s15   ;;  %p1898_p0 = scmp.ge.s32.totalorder %s2624_s15, 1  ;;  %s2624_s15 = sphi %s2651_s15, %s15_s15  }
   0x2   : > { %p169_p1 = scmp.lt.s32.totalorder %s2624_s15, 3 }
   0x4   : > { %p170_p2 = pnand %p1898_p0, %p169_p1 }
   0x5   : > { %v2458_v0 = vld [vmem:[%s2968_s1 + $0x40] sm:$0xff] (!%p170_p2)   ;;  %v2462_v4 = vld [vmem:[%s2968_s1 + $0x48] sm:$0xff] (!%p170_p2)   ;;  %v2466_v8 = vld [vmem:[%s2968_s1 + $0x50] sm:$0xff] (!%p170_p2)   ;;  %s1899_s25 = sshll.u32 (!%p170_p2), %s2657_s16, 5  ;;  %p215_p4 = scmp.lt.s32.totalorder (!%p170_p2), %s2657_s16, 1 }
   0x6   : > { %173 = sbr.rel (%p170_p2) target bundleno = 398 (0x18e), region = 28  ;;  %v2459_v1 = vld [vmem:[%s2968_s1 + $0xc0] sm:$0xff] (!%p170_p2)   ;;  %2194 = vmatprep.subr.bf16.mxu0 (!%p170_p2), %v2458_v0  ;;  %v2463_v5 = vld [vmem:[%s2968_s1 + $0xc8] sm:$0xff] (!%p170_p2)   ;;  %v2467_v9 = vld [vmem:[%s2968_s1 + $0xd0] sm:$0xff] (!%p170_p2)   ;;  %p203_p3 = scmp.lt.s32.totalorder (!%p170_p2), %s1899_s25, 63 }
   0x7   : > { %v2460_v2 = vld [vmem:[%s2968_s1] sm:$0xff] (!%p170_p2)   ;;  %2258 = vmatprep.subr.bf16.mxu1 (!%p170_p2), %v2459_v1  ;;  %v2464_v6 = vld [vmem:[%s2968_s1 + $0x8] sm:$0xff] (!%p170_p2)   ;;  %v2468_v10 = vld [vmem:[%s2968_s1 + $0x10] sm:$0xff] (!%p170_p2)  }
   0x8   : > { %v2461_v3 = vld [vmem:[%s2968_s1 + $0x80] sm:$0xff] (!%p170_p2)   ;;  %2195 = vmatpush3.bf16.msra.mxu0 (!%p170_p2), %v2460_v2  ;;  %v2465_v7 = vld [vmem:[%s2968_s1 + $0x88] sm:$0xff] (!%p170_p2)   ;;  %v2469_v11 = vld [vmem:[%s2968_s1 + $0x90] sm:$0xff] (!%p170_p2)  }
   0x9   : > { %2259 = vmatpush3.bf16.msra.mxu1 (!%p170_p2), %v2461_v3  ;;  %2196 = vmatprep.subr.bf16.mxu0 (!%p170_p2), %v2462_v4  ;;  %v2470_v12 = vld [vmem:[%s2968_s1 + $0x58] sm:$0xff] (!%p170_p2)   ;;  %v2474_v16 = vld [vmem:[%s2968_s1 + $0x60] sm:$0xff] (!%p170_p2)   ;;  %v2478_v20 = vld [vmem:[%s2968_s1 + $0x68] sm:$0xff] (!%p170_p2)  }
   0xa   : > { %2260 = vmatprep.subr.bf16.mxu1 (!%p170_p2), %v2463_v5  ;;  %v2471_v13 = vld [vmem:[%s2968_s1 + $0xd8] sm:$0xff] (!%p170_p2)   ;;  %v2475_v17 = vld [vmem:[%s2968_s1 + $0xe0] sm:$0xff] (!%p170_p2)   ;;  %v2479_v21 = vld [vmem:[%s2968_s1 + $0xe8] sm:$0xff] (!%p170_p2)  }
   0xb   : > { %v2472_v14 = vld [vmem:[%s2968_s1 + $0x18] sm:$0xff] (!%p170_p2)   ;;  %v2476_v18 = vld [vmem:[%s2968_s1 + $0x20] sm:$0xff] (!%p170_p2)   ;;  %v2480_v22 = vld [vmem:[%s2968_s1 + $0x28] sm:$0xff] (!%p170_p2)  }
   0xc   : > { %2197 = vmatpush3.bf16.msra.mxu0 (!%p170_p2), %v2464_v6  ;;  %v2473_v15 = vld [vmem:[%s2968_s1 + $0x98] sm:$0xff] (!%p170_p2)   ;;  %v2477_v19 = vld [vmem:[%s2968_s1 + $0xa0] sm:$0xff] (!%p170_p2)   ;;  %v2481_v23 = vld [vmem:[%s2968_s1 + $0xa8] sm:$0xff] (!%p170_p2)  }
   0xd   : > { %2261 = vmatpush3.bf16.msra.mxu1 %v2465_v7  ;;  %2198 = vmatprep.subr.bf16.mxu0 %v2466_v8  ;;  %s2973_s25 = smov (!%p203_p3, %s1899_s25), 63  ;;  %v2482_v24 = vld [vmem:[%s2968_s1 + $0x70] sm:$0xff]   ;;  %v2486_v28 = vld [vmem:[%s2968_s1 + $0x78] sm:$0xff]   ;;  %v2496_v36 = vld [vmem:[%s2968_s1 + $0x40] sm:$0xff]   ;;  %s2975_s16 = smov (!%p215_p4, %s2657_s16), 1 }
   0xe   : > { %2262 = vmatprep.subr.bf16.mxu1 %v2467_v9  ;;  %v2483_v25 = vld [vmem:[%s2968_s1 + $0xf0] sm:$0xff]   ;;  %s2066_s24 = sshll.u32 %s2973_s25, 4  ;;  %v2487_v29 = vld [vmem:[%s2968_s1 + $0xf8] sm:$0xff]   ;;  %v2497_v37 = vld [vmem:[%s2968_s1 + $0xc0] sm:$0xff]   ;;  %s1903_s11 = sshll.u32 %s2973_s25, 2 }
   0xf   : > { %v2484_v26 = vld [vmem:[%s2968_s1 + $0x30] sm:$0xff]   ;;  %s2758_s8 = scalar_lea.vmem %s2967_s0, %s2066_s24  ;;  %v2488_v30 = vld [vmem:[%s2968_s1 + $0x38] sm:$0xff]   ;;  %v2498_v38 = vld [vmem:[%s2968_s1] sm:$0xff]   ;;  %s217_s17 = scalar_lea.vmem %s2970_s3, %s2975_s16 }
  0x10   : > { %2199 = vmatpush3.bf16.msra.mxu0 %v2468_v10  ;;  %v2485_v27 = vld [vmem:[%s2968_s1 + $0xb0] sm:$0xff]   ;;  %v2489_v31 = vld [vmem:[%s2968_s1 + $0xb8] sm:$0xff]   ;;  %v2499_v39 = vld [vmem:[%s2968_s1 + $0x80] sm:$0xff]   ;;  %s220_s20 = scalar_lea.vmem %s2971_s4, %s2975_s16 }
  0x11   : > { %2263 = vmatpush3.bf16.msra.mxu1 %v2469_v11  ;;  %2200 = vmatprep.subr.bf16.mxu0 %v2470_v12  ;;  %v2490_v32 = vld [vmem:[%s2758_s8] ss:$16 sps:$4 sm:$0xff]   ;;  %v2492_v33 = vld [vmem:[%s2758_s8 + $0x4] ss:$16 sps:$4 sm:$0xff]   ;;  %v2493_v34 = vld [vmem:[%s2758_s8 + $0x8] ss:$16 sps:$4 sm:$0xff]  }
  0x12   : > { %2264 = vmatprep.subr.bf16.mxu1 %v2471_v13  ;;  %v2495_v35 = vld [vmem:[%s2758_s8 + $0xc] ss:$16 sps:$4 sm:$0xff]   ;;  %702 = vmatprep.mubr.bf16.mxu0 %v2492_v33  ;;  %v2500_v40 = vld [vmem:[%s2758_s8 + $0x24] ss:$16 sps:$4 sm:$0xff]   ;;  %v2504_v42 = vld [vmem:[%s2758_s8 + $0x20] ss:$16 sps:$4 sm:$0xff]  }
  0x13   : > { %799 = vmatprep.mubr.bf16.mxu1 %v2495_v35  ;;  %v2502_v41 = vld [vmem:[%s2758_s8 + $0x2c] ss:$16 sps:$4 sm:$0xff]   ;;  %v2505_v43 = vld [vmem:[%s2758_s8 + $0x28] ss:$16 sps:$4 sm:$0xff]   ;;  %v2510_v48 = vld [vmem:[%s2758_s8 + $0x44] ss:$16 sps:$4 sm:$0xff]  }
  0x14   : > { %2201 = vmatpush3.bf16.msra.mxu0 %v2472_v14  ;;  %v2506_v44 = vld [vmem:[%s2968_s1 + $0x48] sm:$0xff]   ;;  %v2514_v50 = vld [vmem:[%s2758_s8 + $0x40] ss:$16 sps:$4 sm:$0xff]   ;;  %v2520_v56 = vld [vmem:[%s2758_s8 + $0x64] ss:$16 sps:$4 sm:$0xff]  }
  0x15   : > { %2265 = vmatpush3.bf16.msra.mxu1 %v2473_v15  ;;  %2202 = vmatprep.subr.bf16.mxu0 %v2474_v16  ;;  %v2507_v45 = vld [vmem:[%s2968_s1 + $0xc8] sm:$0xff]   ;;  %v2516_v52 = vld [vmem:[%s2968_s1 + $0x50] sm:$0xff]   ;;  %v2526_v60 = vld [vmem:[%s2968_s1 + $0x58] sm:$0xff]  }
  0x16   : > { %2266 = vmatprep.subr.bf16.mxu1 %v2475_v17  ;;  %v2508_v46 = vld [vmem:[%s2968_s1 + $0x8] sm:$0xff]   ;;  %v2517_v53 = vld [vmem:[%s2968_s1 + $0xd0] sm:$0xff]   ;;  %v2527_v61 = vld [vmem:[%s2968_s1 + $0xd8] sm:$0xff]  }
  0x17   : > { %v2509_v47 = vld [vmem:[%s2968_s1 + $0x88] sm:$0xff]   ;;  %v2518_v54 = vld [vmem:[%s2968_s1 + $0x10] sm:$0xff]   ;;  %v2528_v62 = vld [vmem:[%s2968_s1 + $0x18] sm:$0xff]  }
  0x18   : > { %2203 = vmatpush3.bf16.msra.mxu0 %v2476_v18  ;;  %v2512_v49 = vld [vmem:[%s2758_s8 + $0x4c] ss:$16 sps:$4 sm:$0xff]   ;;  %v2515_v51 = vld [vmem:[%s2758_s8 + $0x48] ss:$16 sps:$4 sm:$0xff]   ;;  %v2519_v55 = vld [vmem:[%s2968_s1 + $0x90] sm:$0xff]  }
  0x19   : > { %2267 = vmatpush3.bf16.msra.mxu1 %v2477_v19  ;;  %2204 = vmatprep.subr.bf16.mxu0 %v2478_v20  ;;  %v2522_v57 = vld [vmem:[%s2758_s8 + $0x6c] ss:$16 sps:$4 sm:$0xff]   ;;  %v2524_v58 = vld [vmem:[%s2758_s8 + $0x60] ss:$16 sps:$4 sm:$0xff]   ;;  %v2525_v59 = vld [vmem:[%s2758_s8 + $0x68] ss:$16 sps:$4 sm:$0xff]  }
  0x1a   : > { %2268 = vmatprep.subr.bf16.mxu1 %v2479_v21  ;;  %v2529_v63 = vld [vmem:[%s2968_s1 + $0x98] sm:$0xff]   ;;  %v2530_v0 = vld [vmem:[%s2758_s8 + $0x84] ss:$16 sps:$4 sm:$0xff]   ;;  %v2534_v2 = vld [vmem:[%s2758_s8 + $0x80] ss:$16 sps:$4 sm:$0xff]  }
  0x1b   : > { %v2532_v1 = vld [vmem:[%s2758_s8 + $0x8c] ss:$16 sps:$4 sm:$0xff]   ;;  %v2536_v3 = vld [vmem:[%s2968_s1 + $0x60] sm:$0xff]   ;;  %v2535_v4 = vld [vmem:[%s2758_s8 + $0x88] ss:$16 sps:$4 sm:$0xff]  }
  0x1c   : > { %2205 = vmatpush3.bf16.msra.mxu0 %v2480_v22  ;;  %v2537_v5 = vld [vmem:[%s2968_s1 + $0xe0] sm:$0xff]   ;;  %v2542_v9 = vld [vmem:[%s2758_s8 + $0xac] ss:$16 sps:$4 sm:$0xff]   ;;  %v2545_v15 = vld [vmem:[%s2758_s8 + $0xa8] ss:$16 sps:$4 sm:$0xff]  }
  0x1d   : > { %2269 = vmatpush3.bf16.msra.mxu1 %v2481_v23  ;;  %2206 = vmatprep.subr.bf16.mxu0 %v2482_v24  ;;  %v2538_v6 = vld [vmem:[%s2968_s1 + $0x20] sm:$0xff]   ;;  %v2546_v10 = vld [vmem:[%s2968_s1 + $0x68] sm:$0xff]   ;;  %v2556_v18 = vld [vmem:[%s2968_s1 + $0x70] sm:$0xff]  }
  0x1e   : > { %2270 = vmatprep.subr.bf16.mxu1 %v2483_v25  ;;  %v2539_v7 = vld [vmem:[%s2968_s1 + $0xa0] sm:$0xff]   ;;  %v2547_v11 = vld [vmem:[%s2968_s1 + $0xe8] sm:$0xff]   ;;  %v2557_v19 = vld [vmem:[%s2968_s1 + $0xf0] sm:$0xff]  }
  0x1f   : > { %v2540_v8 = vld [vmem:[%s2758_s8 + $0xa4] ss:$16 sps:$4 sm:$0xff]   ;;  %v2544_v12 = vld [vmem:[%s2758_s8 + $0xa0] ss:$16 sps:$4 sm:$0xff]   ;;  %v2548_v13 = vld [vmem:[%s2968_s1 + $0x28] sm:$0xff]  }
  0x20   : > { %2207 = vmatpush3.bf16.msra.mxu0 %v2484_v26  ;;  %v2549_v14 = vld [vmem:[%s2968_s1 + $0xa8] sm:$0xff]   ;;  %v2550_v16 = vld [vmem:[%s2758_s8 + $0xc4] ss:$16 sps:$4 sm:$0xff]   ;;  %v2554_v22 = vld [vmem:[%s2758_s8 + $0xc0] ss:$16 sps:$4 sm:$0xff]  }
  0x21   : > { %2271 = vmatpush3.bf16.msra.mxu1 %v2485_v27  ;;  %2208 = vmatprep.subr.bf16.mxu0 %v2486_v28  ;;  %v2552_v17 = vld [vmem:[%s2758_s8 + $0xcc] ss:$16 sps:$4 sm:$0xff]   ;;  %v2558_v20 = vld [vmem:[%s2968_s1 + $0x30] sm:$0xff]   ;;  %v2555_v23 = vld [vmem:[%s2758_s8 + $0xc8] ss:$16 sps:$4 sm:$0xff]  }
  0x22   : > { %2272 = vmatprep.subr.bf16.mxu1 %v2487_v29  ;;  %v2559_v21 = vld [vmem:[%s2968_s1 + $0xb0] sm:$0xff]   ;;  %v2562_v25 = vld [vmem:[%s2758_s8 + $0xec] ss:$16 sps:$4 sm:$0xff]   ;;  %v2573_v35 = vld [vmem:[%s2758_s8 + $0x108] ss:$16 sps:$4 sm:$0xff]  }
  0x23   : > { %v2560_v24 = vld [vmem:[%s2758_s8 + $0xe4] ss:$16 sps:$4 sm:$0xff]   ;;  %v2566_v26 = vld [vmem:[%s2968_s1 + $0x78] sm:$0xff]  }
  0x24   : > { %2209 = vmatpush3.bf16.msra.mxu0 %v2488_v30  ;;  %v2567_v27 = vld [vmem:[%s2968_s1 + $0xf8] sm:$0xff]   ;;  %v2564_v30 = vld [vmem:[%s2758_s8 + $0xe0] ss:$16 sps:$4 sm:$0xff]  }
  0x25   : > { %2273 = vmatpush3.bf16.msra.mxu1 %v2489_v31  ;;  %2322 = vmatprep.subr.bf16.mxu0 %v2496_v36  ;;  %v2568_v28 = vld [vmem:[%s2968_s1 + $0x38] sm:$0xff]   ;;  %v2576_v36 = vld [vmem:[%s2758_s8 + $0x124] ss:$16 sps:$4 sm:$0xff]  }
  0x26   : > { %2386 = vmatprep.subr.bf16.mxu1 %v2497_v37  ;;  %v2569_v29 = vld [vmem:[%s2968_s1 + $0xb8] sm:$0xff]  }
  0x27   : > { %703 = vmatmul.mubr.bf16.vlgmr.msra.gmra.mrb[0].mxu0 %v2490_v32  ;;  %v2565_v31 = vld [vmem:[%s2758_s8 + $0xe8] ss:$16 sps:$4 sm:$0xff]   ;;  %v2572_v32 = vld [vmem:[%s2758_s8 + $0x104] ss:$16 sps:$4 sm:$0xff]   ;;  %v2575_v33 = vld [vmem:[%s2758_s8 + $0x10c] ss:$16 sps:$4 sm:$0xff]  }
  0x28   : > { %800 = vmatmul.mubr.bf16.vlgmr.msra.gmra.mrb[0].mxu1 %v2493_v34  ;;  %2323 = vmatpush3.bf16.msra.mxu0 %v2498_v38  ;;  %v2570_v34 = vld [vmem:[%s2758_s8 + $0x100] ss:$16 sps:$4 sm:$0xff]   ;;  %v2578_v37 = vld [vmem:[%s2758_s8 + $0x12c] ss:$16 sps:$4 sm:$0xff]  }
  0x29   : > { %2387 = vmatpush3.bf16.msra.mxu1 %v2499_v39  ;;  %710 = vmatprep.mubr.bf16.mxu0 %v2500_v40  ;;  %v2580_v38 = vld [vmem:[%s2758_s8 + $0x120] ss:$16 sps:$4 sm:$0xff]   ;;  %v2581_v39 = vld [vmem:[%s2758_s8 + $0x128] ss:$16 sps:$4 sm:$0xff]   ;;  %v2582_v40 = vld [vmem:[%s2758_s8 + $0x144] ss:$16 sps:$4 sm:$0xff]  }
  0x2a   : > { %807 = vmatprep.mubr.bf16.mxu1 %v2502_v41  ;;  %2324 = vmatprep.subr.bf16.mxu0 %v2506_v44  ;;  %v2584_v41 = vld [vmem:[%s2758_s8 + $0x14c] ss:$16 sps:$4 sm:$0xff]   ;;  %v2588_v44 = vld [vmem:[%s2758_s8 + $0x164] ss:$16 sps:$4 sm:$0xff]  }
  0x2b   : > { %2388 = vmatprep.subr.bf16.mxu1 %v2507_v45  ;;  %v2590_v45 = vld [vmem:[%s2758_s8 + $0x16c] ss:$16 sps:$4 sm:$0xff]  }
  0x2c   : > { %2325 = vmatpush3.bf16.msra.mxu0 %v2508_v46  ;;  %v2592_v46 = vld [vmem:[%s2758_s8 + $0x160] ss:$16 sps:$4 sm:$0xff]  }
  0x2d   : > { %2389 = vmatpush3.bf16.msra.mxu1 %v2509_v47  ;;  %2326 = vmatprep.subr.bf16.mxu0 %v2516_v52  ;;  %v2593_v47 = vld [vmem:[%s2758_s8 + $0x168] ss:$16 sps:$4 sm:$0xff]   ;;  %v2600_v52 = vld [vmem:[%s2758_s8 + $0x1a4] ss:$16 sps:$4 sm:$0xff]  }
  0x2e   : > { %2390 = vmatprep.subr.bf16.mxu1 %v2517_v53  ;;  %v2602_v53 = vld [vmem:[%s2758_s8 + $0x1ac] ss:$16 sps:$4 sm:$0xff]  }
  0x2f   : > { %711 = vmatmul.mubr.bf16.gmra.mrb[4].mxu0 %v2504_v42  ;;  %v2586_v42 = vld [vmem:[%s2758_s8 + $0x140] ss:$16 sps:$4 sm:$0xff]  }
  0x30   : > { %808 = vmatmul.mubr.bf16.gmra.mrb[4].mxu1 %v2505_v43  ;;  %718 = vmatprep.mubr.bf16.mxu0 %v2510_v48  ;;  %v2587_v43 = vld [vmem:[%s2758_s8 + $0x148] ss:$16 sps:$4 sm:$0xff]   ;;  %v2594_v48 = vld [vmem:[%s2758_s8 + $0x184] ss:$16 sps:$4 sm:$0xff]  }
  0x31   : > { %815 = vmatprep.mubr.bf16.mxu1 %v2512_v49  ;;  %2327 = vmatpush3.bf16.msra.mxu0 %v2518_v54  ;;  %v2596_v49 = vld [vmem:[%s2758_s8 + $0x18c] ss:$16 sps:$4 sm:$0xff]   ;;  %v2604_v54 = vld [vmem:[%s2758_s8 + $0x1a0] ss:$16 sps:$4 sm:$0xff]  }
  0x32   : > { %2391 = vmatpush3.bf16.msra.mxu1 %v2519_v55  ;;  %2328 = vmatprep.subr.bf16.mxu0 %v2526_v60  ;;  %v2605_v55 = vld [vmem:[%s2758_s8 + $0x1a8] ss:$16 sps:$4 sm:$0xff]   ;;  %v2612_v60 = vld [vmem:[%s2758_s8 + $0x1e4] ss:$16 sps:$4 sm:$0xff]  }
  0x33   : > { %2392 = vmatprep.subr.bf16.mxu1 %v2527_v61  ;;  %v2614_v61 = vld [vmem:[%s2758_s8 + $0x1ec] ss:$16 sps:$4 sm:$0xff]  }
  0x35   : > { %2329 = vmatpush3.bf16.msra.mxu0 %v2528_v62  ;;  %v2616_v62 = vld [vmem:[%s2758_s8 + $0x1e0] ss:$16 sps:$4 sm:$0xff]  }
  0x36   : > { %2393 = vmatpush3.bf16.msra.mxu1 %v2529_v63  ;;  %2330 = vmatprep.subr.bf16.mxu0 %v2536_v3  ;;  %v2617_v63 = vld [vmem:[%s2758_s8 + $0x1e8] ss:$16 sps:$4 sm:$0xff]  }
  0x37   : > { %719 = vmatmul.mubr.bf16.gmra.mrb[8].mxu0 %v2514_v50  ;;  %2394 = vmatprep.subr.bf16.mxu1 %v2537_v5  ;;  %v2598_v50 = vld [vmem:[%s2758_s8 + $0x180] ss:$16 sps:$4 sm:$0xff]  }
  0x38   : > { %816 = vmatmul.mubr.bf16.gmra.mrb[8].mxu1 %v2515_v51  ;;  %726 = vmatprep.mubr.bf16.mxu0 %v2520_v56  ;;  %v2599_v51 = vld [vmem:[%s2758_s8 + $0x188] ss:$16 sps:$4 sm:$0xff]   ;;  %v2606_v56 = vld [vmem:[%s2758_s8 + $0x1c4] ss:$16 sps:$4 sm:$0xff]  }
  0x39   : > { %823 = vmatprep.mubr.bf16.mxu1 %v2522_v57  ;;  %2331 = vmatpush3.bf16.msra.mxu0 %v2538_v6  ;;  %v2608_v57 = vld [vmem:[%s2758_s8 + $0x1cc] ss:$16 sps:$4 sm:$0xff]  }
  0x3a   : > { %2395 = vmatpush3.bf16.msra.mxu1 %v2539_v7  ;;  %2332 = vmatprep.subr.bf16.mxu0 %v2546_v10 }
  0x3b   : > { %2396 = vmatprep.subr.bf16.mxu1 %v2547_v11 }
  0x3d   : > { %2333 = vmatpush3.bf16.msra.mxu0 %v2548_v13 }
  0x3e   : > { %2397 = vmatpush3.bf16.msra.mxu1 %v2549_v14  ;;  %2334 = vmatprep.subr.bf16.mxu0 %v2556_v18 }
  0x3f   : > { %727 = vmatmul.mubr.bf16.gmra.mrb[12].mxu0 %v2524_v58  ;;  %2398 = vmatprep.subr.bf16.mxu1 %v2557_v19  ;;  %v2610_v58 = vld [vmem:[%s2758_s8 + $0x1c0] ss:$16 sps:$4 sm:$0xff]  }
  0x40   : > { %824 = vmatmul.mubr.bf16.gmra.mrb[12].mxu1 %v2525_v59  ;;  %734 = vmatprep.mubr.bf16.mxu0 %v2530_v0  ;;  %v2611_v59 = vld [vmem:[%s2758_s8 + $0x1c8] ss:$16 sps:$4 sm:$0xff]   ;;  %s2930_s8 = scalar_lea.vmem %s2969_s2, %s1903_s11 }
  0x41   : > { %831 = vmatprep.mubr.bf16.mxu1 %v2532_v1  ;;  %2335 = vmatpush3.bf16.msra.mxu0 %v2558_v20 }
  0x42   : > { %2399 = vmatpush3.bf16.msra.mxu1 %v2559_v21  ;;  %2336 = vmatprep.subr.bf16.mxu0 %v2566_v26 }
  0x43   : > { %2400 = vmatprep.subr.bf16.mxu1 %v2567_v27 }
  0x45   : > { %2337 = vmatpush3.bf16.msra.mxu0 %v2568_v28 }
  0x46   : > { %2401 = vmatpush3.bf16.msra.mxu1 %v2569_v29 }
  0x47   : > { %735 = vmatmul.mubr.bf16.gmra.mrb[16].mxu0 %v2534_v2 }
  0x48   : > { %832 = vmatmul.mubr.bf16.gmra.mrb[16].mxu1 %v2535_v4  ;;  %742 = vmatprep.mubr.bf16.mxu0 %v2540_v8 }
  0x49   : > { %839 = vmatprep.mubr.bf16.mxu1 %v2542_v9 }
  0x4f   : > { %743 = vmatmul.mubr.bf16.gmra.mrb[20].mxu0 %v2544_v12 }
  0x50   : > { %840 = vmatmul.mubr.bf16.gmra.mrb[20].mxu1 %v2545_v15  ;;  %750 = vmatprep.mubr.bf16.mxu0 %v2550_v16 }
  0x51   : > { %847 = vmatprep.mubr.bf16.mxu1 %v2552_v17 }
  0x57   : > { %751 = vmatmul.mubr.bf16.gmra.mrb[24].mxu0 %v2554_v22 }
  0x58   : > { %848 = vmatmul.mubr.bf16.gmra.mrb[24].mxu1 %v2555_v23  ;;  %758 = vmatprep.mubr.bf16.mxu0 %v2560_v24 }
  0x59   : > { %855 = vmatprep.mubr.bf16.mxu1 %v2562_v25 }
  0x5f   : > { %759 = vmatmul.mubr.bf16.gmra.mrb[28].mxu0 %v2564_v30 }
  0x60   : > { %856 = vmatmul.mubr.bf16.gmra.mrb[28].mxu1 %v2565_v31  ;;  %1484 = vmatprep.mubr.bf16.mxu0 %v2572_v32 }
  0x61   : > { %1581 = vmatprep.mubr.bf16.mxu1 %v2575_v33 }
  0x67   : > { %1485 = vmatmul.mubr.bf16.vlgmr.msra.gmra.mrb[32].mxu0 %v2570_v34 }
  0x68   : > { %1582 = vmatmul.mubr.bf16.vlgmr.msra.gmra.mrb[32].mxu1 %v2573_v35  ;;  %1492 = vmatprep.mubr.bf16.mxu0 %v2576_v36 }
  0x69   : > { %1589 = vmatprep.mubr.bf16.mxu1 %v2578_v37 }
  0x6f   : > { %1493 = vmatmul.mubr.bf16.gmra.mrb[36].mxu0 %v2580_v38 }
  0x70   : > { %1590 = vmatmul.mubr.bf16.gmra.mrb[36].mxu1 %v2581_v39  ;;  %1500 = vmatprep.mubr.bf16.mxu0 %v2582_v40 }
  0x71   : > { %1597 = vmatprep.mubr.bf16.mxu1 %v2584_v41 }
  0x77   : > { %1501 = vmatmul.mubr.bf16.gmra.mrb[40].mxu0 %v2586_v42 }
  0x78   : > { %1598 = vmatmul.mubr.bf16.gmra.mrb[40].mxu1 %v2587_v43  ;;  %1508 = vmatprep.mubr.bf16.mxu0 %v2588_v44 }
  0x79   : > { %1605 = vmatprep.mubr.bf16.mxu1 %v2590_v45 }
  0x7f   : > { %1509 = vmatmul.mubr.bf16.gmra.mrb[44].mxu0 %v2592_v46 }
  0x80   : > { %1606 = vmatmul.mubr.bf16.gmra.mrb[44].mxu1 %v2593_v47  ;;  %1516 = vmatprep.mubr.bf16.mxu0 %v2594_v48 }
  0x81   : > { %1613 = vmatprep.mubr.bf16.mxu1 %v2596_v49 }
  0x87   : > { %1517 = vmatmul.mubr.bf16.gmra.mrb[48].mxu0 %v2598_v50 }
  0x88   : > { %1614 = vmatmul.mubr.bf16.gmra.mrb[48].mxu1 %v2599_v51  ;;  %1524 = vmatprep.mubr.bf16.mxu0 %v2600_v52 }
  0x89   : > { %1621 = vmatprep.mubr.bf16.mxu1 %v2602_v53 }
  0x8f   : > { %1525 = vmatmul.mubr.bf16.gmra.mrb[52].mxu0 %v2604_v54 }
  0x90   : > { %1622 = vmatmul.mubr.bf16.gmra.mrb[52].mxu1 %v2605_v55  ;;  %1532 = vmatprep.mubr.bf16.mxu0 %v2606_v56 }
  0x91   : > { %1629 = vmatprep.mubr.bf16.mxu1 %v2608_v57 }
  0x97   : > { %1533 = vmatmul.mubr.bf16.gmra.mrb[56].mxu0 %v2610_v58 }
  0x98   : > { %1630 = vmatmul.mubr.bf16.gmra.mrb[56].mxu1 %v2611_v59  ;;  %1540 = vmatprep.mubr.bf16.mxu0 %v2612_v60 }
  0x99   : > { %1637 = vmatprep.mubr.bf16.mxu1 %v2614_v61 }
  0x9f   : > { %1541 = vmatmul.mubr.bf16.gmra.mrb[60].mxu0 %v2616_v62 }
  0xa0   : > { %1638 = vmatmul.mubr.bf16.gmra.mrb[60].mxu1 %v2617_v63 }
  0xfa   : > { %v2210_v0 = vpop.f32.mrb[0].mxu0 }
  0xfb   : > { %v2274_v1 = vpop.f32.mrb[0].mxu1  ;;  %v2211_v2 = vpop.f32.mrb[1].mxu0 }
  0xfc   : > { %v2212_v3 = vadd.f32 %v2211_v2, %v2210_v0  ;;  %v2275_v4 = vpop.f32.mrb[1].mxu1  ;;  %v2213_v5 = vpop.f32.mrb[2].mxu0 }
  0xfd   : > { %v2276_v6 = vadd.f32 %v2275_v4, %v2274_v1  ;;  %v2277_v7 = vpop.f32.mrb[2].mxu1  ;;  %v2214_v8 = vpop.f32.mrb[3].mxu0 }
  0xfe   : > { %v2215_v9 = vadd.f32 %v2214_v8, %v2213_v5  ;;  %v2278_v10 = vpop.f32.mrb[3].mxu1 }
  0xff   : > { %v802_v11 = vadd.f32 %v2276_v6, %v2212_v3  ;;  %v2279_v12 = vadd.f32 %v2278_v10, %v2277_v7 }
 0x101   : > { %v805_v13 = vadd.f32 %v2279_v12, %v2215_v9  ;;  %v966_v15 = vmul.f32 %v802_v11, %v802_v11 }
 0x102   : > { %v2216_v14 = vpop.f32.mrb[4].mxu0 }
 0x103   : > { %v2102_v16 = vpack.c.bf16 %v805_v13, %v802_v11  ;;  %v944_v17 = vadd.f32 %v805_v13, %v802_v11  ;;  %v967_v18 = vmul.f32 %v805_v13, %v805_v13  ;;  %v2280_v19 = vpop.f32.mrb[4].mxu1  ;;  %v2217_v20 = vpop.f32.mrb[5].mxu0 }
 0x104   : > { %v2218_v21 = vadd.f32 %v2217_v20, %v2216_v14  ;;  %v2281_v22 = vpop.f32.mrb[5].mxu1  ;;  %v2219_v23 = vpop.f32.mrb[6].mxu0 }
 0x105   : > { %2103 = vst [vmem:[%s2930_s8] sm:$0xff] %v2102_v16   ;;  %v982_v24 = vadd.f32 %v967_v18, %v966_v15  ;;  %v2282_v25 = vadd.f32 %v2281_v22, %v2280_v19  ;;  %v2283_v26 = vpop.f32.mrb[6].mxu1  ;;  %v2220_v27 = vpop.f32.mrb[7].mxu0 }
 0x106   : > { %v2221_v28 = vadd.f32 %v2220_v27, %v2219_v23  ;;  %v2284_v29 = vpop.f32.mrb[7].mxu1 }
 0x107   : > { %v810_v30 = vadd.f32 %v2282_v25, %v2218_v21  ;;  %v2285_v31 = vadd.f32 %v2284_v29, %v2283_v26 }
 0x109   : > { %v945_v32 = vadd.f32 %v944_v17, %v810_v30  ;;  %v968_v33 = vmul.f32 %v810_v30, %v810_v30  ;;  %v813_v34 = vadd.f32 %v2285_v31, %v2221_v28 }
 0x10a   : > { %v2222_v35 = vpop.f32.mrb[8].mxu0 }
 0x10b   : > { %v983_v36 = vadd.f32 %v982_v24, %v968_v33  ;;  %v2107_v37 = vpack.c.bf16 %v813_v34, %v810_v30  ;;  %v946_v38 = vadd.f32 %v945_v32, %v813_v34  ;;  %v969_v39 = vmul.f32 %v813_v34, %v813_v34  ;;  %v2286_v40 = vpop.f32.mrb[8].mxu1  ;;  %v2223_v41 = vpop.f32.mrb[9].mxu0 }
 0x10c   : > { %v2224_v42 = vadd.f32 %v2223_v41, %v2222_v35  ;;  %v2287_v43 = vpop.f32.mrb[9].mxu1  ;;  %v2225_v44 = vpop.f32.mrb[10].mxu0 }
 0x10d   : > { %2179 = vst [vmem:[%s2930_s8 + $0x8] sm:$0xff] %v2107_v37   ;;  %v984_v45 = vadd.f32 %v983_v36, %v969_v39  ;;  %v2288_v46 = vadd.f32 %v2287_v43, %v2286_v40  ;;  %v2289_v47 = vpop.f32.mrb[10].mxu1  ;;  %v2226_v48 = vpop.f32.mrb[11].mxu0 }
 0x10e   : > { %v2227_v49 = vadd.f32 %v2226_v48, %v2225_v44  ;;  %v2290_v50 = vpop.f32.mrb[11].mxu1 }
 0x10f   : > { %v818_v51 = vadd.f32 %v2288_v46, %v2224_v42  ;;  %v2291_v52 = vadd.f32 %v2290_v50, %v2289_v47 }
 0x111   : > { %v947_v53 = vadd.f32 %v946_v38, %v818_v51  ;;  %v970_v54 = vmul.f32 %v818_v51, %v818_v51  ;;  %v821_v55 = vadd.f32 %v2291_v52, %v2227_v49 }
 0x112   : > { %v2228_v56 = vpop.f32.mrb[12].mxu0 }
 0x113   : > { %v985_v57 = vadd.f32 %v984_v45, %v970_v54  ;;  %v2112_v58 = vpack.c.bf16 %v821_v55, %v818_v51  ;;  %v948_v59 = vadd.f32 %v947_v53, %v821_v55  ;;  %v971_v60 = vmul.f32 %v821_v55, %v821_v55  ;;  %v2292_v61 = vpop.f32.mrb[12].mxu1  ;;  %v2229_v62 = vpop.f32.mrb[13].mxu0 }
 0x114   : > { %v2230_v63 = vadd.f32 %v2229_v62, %v2228_v56  ;;  %v2293_v0 = vpop.f32.mrb[13].mxu1  ;;  %v2231_v1 = vpop.f32.mrb[14].mxu0 }
 0x115   : > { %2180 = vst [vmem:[%s2930_s8 + $0x10] sm:$0xff] %v2112_v58   ;;  %v986_v2 = vadd.f32 %v985_v57, %v971_v60  ;;  %v2294_v3 = vadd.f32 %v2293_v0, %v2292_v61  ;;  %v2295_v4 = vpop.f32.mrb[14].mxu1  ;;  %v2232_v5 = vpop.f32.mrb[15].mxu0 }
 0x116   : > { %v2233_v6 = vadd.f32 %v2232_v5, %v2231_v1  ;;  %v2296_v7 = vpop.f32.mrb[15].mxu1 }
 0x117   : > { %v826_v8 = vadd.f32 %v2294_v3, %v2230_v63  ;;  %v2297_v9 = vadd.f32 %v2296_v7, %v2295_v4 }
 0x119   : > { %v949_v10 = vadd.f32 %v948_v59, %v826_v8  ;;  %v972_v11 = vmul.f32 %v826_v8, %v826_v8  ;;  %v829_v12 = vadd.f32 %v2297_v9, %v2233_v6 }
 0x11a   : > { %v2234_v13 = vpop.f32.mrb[16].mxu0 }
 0x11b   : > { %v987_v14 = vadd.f32 %v986_v2, %v972_v11  ;;  %v2117_v15 = vpack.c.bf16 %v829_v12, %v826_v8  ;;  %v950_v16 = vadd.f32 %v949_v10, %v829_v12  ;;  %v973_v17 = vmul.f32 %v829_v12, %v829_v12  ;;  %v2298_v18 = vpop.f32.mrb[16].mxu1  ;;  %v2235_v19 = vpop.f32.mrb[17].mxu0 }
 0x11c   : > { %v2236_v20 = vadd.f32 %v2235_v19, %v2234_v13  ;;  %v2299_v21 = vpop.f32.mrb[17].mxu1  ;;  %v2237_v22 = vpop.f32.mrb[18].mxu0 }
 0x11d   : > { %2181 = vst [vmem:[%s2930_s8 + $0x18] sm:$0xff] %v2117_v15   ;;  %v988_v23 = vadd.f32 %v987_v14, %v973_v17  ;;  %v2300_v24 = vadd.f32 %v2299_v21, %v2298_v18  ;;  %v2301_v25 = vpop.f32.mrb[18].mxu1  ;;  %v2238_v26 = vpop.f32.mrb[19].mxu0 }
 0x11e   : > { %v2239_v27 = vadd.f32 %v2238_v26, %v2237_v22  ;;  %v2302_v28 = vpop.f32.mrb[19].mxu1 }
 0x11f   : > { %v834_v29 = vadd.f32 %v2300_v24, %v2236_v20  ;;  %v2303_v30 = vadd.f32 %v2302_v28, %v2301_v25 }
 0x121   : > { %v951_v31 = vadd.f32 %v950_v16, %v834_v29  ;;  %v974_v32 = vmul.f32 %v834_v29, %v834_v29  ;;  %v837_v33 = vadd.f32 %v2303_v30, %v2239_v27 }
 0x122   : > { %v2240_v34 = vpop.f32.mrb[20].mxu0 }
 0x123   : > { %v989_v35 = vadd.f32 %v988_v23, %v974_v32  ;;  %v2122_v36 = vpack.c.bf16 %v837_v33, %v834_v29  ;;  %v952_v37 = vadd.f32 %v951_v31, %v837_v33  ;;  %v975_v38 = vmul.f32 %v837_v33, %v837_v33  ;;  %v2304_v39 = vpop.f32.mrb[20].mxu1  ;;  %v2241_v40 = vpop.f32.mrb[21].mxu0 }
 0x124   : > { %v2242_v41 = vadd.f32 %v2241_v40, %v2240_v34  ;;  %v2305_v42 = vpop.f32.mrb[21].mxu1  ;;  %v2243_v43 = vpop.f32.mrb[22].mxu0 }
 0x125   : > { %2182 = vst [vmem:[%s2930_s8 + $0x20] sm:$0xff] %v2122_v36   ;;  %v990_v44 = vadd.f32 %v989_v35, %v975_v38  ;;  %v2306_v45 = vadd.f32 %v2305_v42, %v2304_v39  ;;  %v2307_v46 = vpop.f32.mrb[22].mxu1  ;;  %v2244_v47 = vpop.f32.mrb[23].mxu0 }
 0x126   : > { %v2245_v48 = vadd.f32 %v2244_v47, %v2243_v43  ;;  %v2308_v49 = vpop.f32.mrb[23].mxu1 }
 0x127   : > { %v842_v50 = vadd.f32 %v2306_v45, %v2242_v41  ;;  %v2309_v51 = vadd.f32 %v2308_v49, %v2307_v46 }
 0x129   : > { %v953_v52 = vadd.f32 %v952_v37, %v842_v50  ;;  %v976_v53 = vmul.f32 %v842_v50, %v842_v50  ;;  %v845_v54 = vadd.f32 %v2309_v51, %v2245_v48 }
 0x12a   : > { %v2246_v55 = vpop.f32.mrb[24].mxu0 }
 0x12b   : > { %v991_v56 = vadd.f32 %v990_v44, %v976_v53  ;;  %v2127_v57 = vpack.c.bf16 %v845_v54, %v842_v50  ;;  %v954_v58 = vadd.f32 %v953_v52, %v845_v54  ;;  %v977_v59 = vmul.f32 %v845_v54, %v845_v54  ;;  %v2310_v60 = vpop.f32.mrb[24].mxu1  ;;  %v2247_v61 = vpop.f32.mrb[25].mxu0 }
 0x12c   : > { %v2248_v62 = vadd.f32 %v2247_v61, %v2246_v55  ;;  %v2311_v63 = vpop.f32.mrb[25].mxu1  ;;  %v2249_v0 = vpop.f32.mrb[26].mxu0 }
 0x12d   : > { %2183 = vst [vmem:[%s2930_s8 + $0x28] sm:$0xff] %v2127_v57   ;;  %v992_v1 = vadd.f32 %v991_v56, %v977_v59  ;;  %v2312_v2 = vadd.f32 %v2311_v63, %v2310_v60  ;;  %v2313_v3 = vpop.f32.mrb[26].mxu1  ;;  %v2250_v4 = vpop.f32.mrb[27].mxu0 }
 0x12e   : > { %v2251_v5 = vadd.f32 %v2250_v4, %v2249_v0  ;;  %v2314_v6 = vpop.f32.mrb[27].mxu1 }
 0x12f   : > { %v850_v7 = vadd.f32 %v2312_v2, %v2248_v62  ;;  %v2315_v8 = vadd.f32 %v2314_v6, %v2313_v3 }
 0x131   : > { %v955_v9 = vadd.f32 %v954_v58, %v850_v7  ;;  %v978_v10 = vmul.f32 %v850_v7, %v850_v7  ;;  %v853_v11 = vadd.f32 %v2315_v8, %v2251_v5 }
 0x132   : > { %v2252_v12 = vpop.f32.mrb[28].mxu0 }
 0x133   : > { %v993_v13 = vadd.f32 %v992_v1, %v978_v10  ;;  %v2132_v14 = vpack.c.bf16 %v853_v11, %v850_v7  ;;  %v956_v15 = vadd.f32 %v955_v9, %v853_v11  ;;  %v979_v16 = vmul.f32 %v853_v11, %v853_v11  ;;  %v2316_v17 = vpop.f32.mrb[28].mxu1  ;;  %v2253_v18 = vpop.f32.mrb[29].mxu0 }
 0x134   : > { %v2254_v19 = vadd.f32 %v2253_v18, %v2252_v12  ;;  %v2317_v20 = vpop.f32.mrb[29].mxu1  ;;  %v2255_v21 = vpop.f32.mrb[30].mxu0 }
 0x135   : > { %2184 = vst [vmem:[%s2930_s8 + $0x30] sm:$0xff] %v2132_v14   ;;  %v994_v22 = vadd.f32 %v993_v13, %v979_v16  ;;  %v2318_v23 = vadd.f32 %v2317_v20, %v2316_v17  ;;  %v2319_v24 = vpop.f32.mrb[30].mxu1  ;;  %v2256_v25 = vpop.f32.mrb[31].mxu0 }
 0x136   : > { %v2257_v26 = vadd.f32 %v2256_v25, %v2255_v21  ;;  %v2320_v27 = vpop.f32.mrb[31].mxu1 }
 0x137   : > { %v858_v28 = vadd.f32 %v2318_v23, %v2254_v19  ;;  %v2321_v29 = vadd.f32 %v2320_v27, %v2319_v24 }
 0x139   : > { %v957_v30 = vadd.f32 %v956_v15, %v858_v28  ;;  %v980_v31 = vmul.f32 %v858_v28, %v858_v28  ;;  %v861_v32 = vadd.f32 %v2321_v29, %v2257_v26 }
 0x13a   : > { %v2338_v33 = vpop.f32.mrb[32].mxu0 }
 0x13b   : > { %v995_v34 = vadd.f32 %v994_v22, %v980_v31  ;;  %v2137_v35 = vpack.c.bf16 %v861_v32, %v858_v28  ;;  %v2939_v36 = vadd.f32 %v957_v30, %v861_v32  ;;  %v981_v37 = vmul.f32 %v861_v32, %v861_v32  ;;  %v2402_v38 = vpop.f32.mrb[32].mxu1  ;;  %v2339_v39 = vpop.f32.mrb[33].mxu0 }
 0x13c   : > { %v2340_v40 = vadd.f32 %v2339_v39, %v2338_v33  ;;  %v2403_v41 = vpop.f32.mrb[33].mxu1  ;;  %v2341_v42 = vpop.f32.mrb[34].mxu0 }
 0x13d   : > { %2185 = vst [vmem:[%s2930_s8 + $0x38] sm:$0xff] %v2137_v35   ;;  %v2942_v43 = vadd.f32 %v995_v34, %v981_v37  ;;  %v2404_v44 = vadd.f32 %v2403_v41, %v2402_v38  ;;  %v2405_v45 = vpop.f32.mrb[34].mxu1  ;;  %v2342_v46 = vpop.f32.mrb[35].mxu0 }
 0x13e   : > { %v2343_v47 = vadd.f32 %v2342_v46, %v2341_v42  ;;  %v2406_v48 = vpop.f32.mrb[35].mxu1 }
 0x13f   : > { %v1584_v49 = vadd.f32 %v2404_v44, %v2340_v40  ;;  %v2407_v50 = vadd.f32 %v2406_v48, %v2405_v45 }
 0x141   : > { %v1587_v51 = vadd.f32 %v2407_v50, %v2343_v47  ;;  %v1748_v57 = vmul.f32 %v1584_v49, %v1584_v49 }
 0x142   : > { %v2344_v52 = vpop.f32.mrb[36].mxu0 }
 0x143   : > { %v2142_v53 = vpack.c.bf16 %v1587_v51, %v1584_v49  ;;  %v1726_v54 = vadd.f32 %v1587_v51, %v1584_v49  ;;  %v2408_v55 = vpop.f32.mrb[36].mxu1  ;;  %v2345_v56 = vpop.f32.mrb[37].mxu0  ;;  %v1749_v58 = vmul.f32 %v1587_v51, %v1587_v51 }
 0x144   : > { %v2346_v59 = vadd.f32 %v2345_v56, %v2344_v52  ;;  %v2409_v60 = vpop.f32.mrb[37].mxu1  ;;  %v2347_v61 = vpop.f32.mrb[38].mxu0 }
 0x145   : > { %2186 = vst [vmem:[%s2930_s8 + $0x40] sm:$0xff] %v2142_v53   ;;  %v2410_v62 = vadd.f32 %v2409_v60, %v2408_v55  ;;  %v2411_v63 = vpop.f32.mrb[38].mxu1  ;;  %v2348_v0 = vpop.f32.mrb[39].mxu0  ;;  %v1764_v1 = vadd.f32 %v1749_v58, %v1748_v57 }
 0x146   : > { %v2349_v2 = vadd.f32 %v2348_v0, %v2347_v61  ;;  %v2412_v3 = vpop.f32.mrb[39].mxu1 }
 0x147   : > { %v1592_v4 = vadd.f32 %v2410_v62, %v2346_v59  ;;  %v2413_v5 = vadd.f32 %v2412_v3, %v2411_v63 }
 0x149   : > { %v1727_v6 = vadd.f32 %v1726_v54, %v1592_v4  ;;  %v1750_v7 = vmul.f32 %v1592_v4, %v1592_v4  ;;  %v1595_v8 = vadd.f32 %v2413_v5, %v2349_v2 }
 0x14a   : > { %v2350_v9 = vpop.f32.mrb[40].mxu0 }
 0x14b   : > { %v1765_v10 = vadd.f32 %v1764_v1, %v1750_v7  ;;  %v2147_v11 = vpack.c.bf16 %v1595_v8, %v1592_v4  ;;  %v1728_v12 = vadd.f32 %v1727_v6, %v1595_v8  ;;  %v1751_v13 = vmul.f32 %v1595_v8, %v1595_v8  ;;  %v2414_v14 = vpop.f32.mrb[40].mxu1  ;;  %v2351_v15 = vpop.f32.mrb[41].mxu0 }
 0x14c   : > { %v2352_v16 = vadd.f32 %v2351_v15, %v2350_v9  ;;  %v2415_v17 = vpop.f32.mrb[41].mxu1  ;;  %v2353_v18 = vpop.f32.mrb[42].mxu0 }
 0x14d   : > { %2187 = vst [vmem:[%s2930_s8 + $0x48] sm:$0xff] %v2147_v11   ;;  %v1766_v19 = vadd.f32 %v1765_v10, %v1751_v13  ;;  %v2416_v20 = vadd.f32 %v2415_v17, %v2414_v14  ;;  %v2417_v21 = vpop.f32.mrb[42].mxu1  ;;  %v2354_v22 = vpop.f32.mrb[43].mxu0 }
 0x14e   : > { %v2355_v23 = vadd.f32 %v2354_v22, %v2353_v18  ;;  %v2418_v24 = vpop.f32.mrb[43].mxu1 }
 0x14f   : > { %v1600_v25 = vadd.f32 %v2416_v20, %v2352_v16  ;;  %v2419_v26 = vadd.f32 %v2418_v24, %v2417_v21 }
 0x151   : > { %v1729_v27 = vadd.f32 %v1728_v12, %v1600_v25  ;;  %v1752_v28 = vmul.f32 %v1600_v25, %v1600_v25  ;;  %v1603_v29 = vadd.f32 %v2419_v26, %v2355_v23 }
 0x152   : > { %v2356_v30 = vpop.f32.mrb[44].mxu0 }
 0x153   : > { %v1767_v31 = vadd.f32 %v1766_v19, %v1752_v28  ;;  %v2152_v32 = vpack.c.bf16 %v1603_v29, %v1600_v25  ;;  %v1730_v33 = vadd.f32 %v1729_v27, %v1603_v29  ;;  %v1753_v34 = vmul.f32 %v1603_v29, %v1603_v29  ;;  %v2420_v35 = vpop.f32.mrb[44].mxu1  ;;  %v2357_v37 = vpop.f32.mrb[45].mxu0 }
 0x154   : > { %v2358_v38 = vadd.f32 %v2357_v37, %v2356_v30  ;;  %v2421_v39 = vpop.f32.mrb[45].mxu1  ;;  %v2359_v40 = vpop.f32.mrb[46].mxu0 }
 0x155   : > { %2188 = vst [vmem:[%s2930_s8 + $0x50] sm:$0xff] %v2152_v32   ;;  %v1768_v41 = vadd.f32 %v1767_v31, %v1753_v34  ;;  %v2422_v42 = vadd.f32 %v2421_v39, %v2420_v35  ;;  %v2423_v44 = vpop.f32.mrb[46].mxu1  ;;  %v2360_v45 = vpop.f32.mrb[47].mxu0 }
 0x156   : > { %v2361_v46 = vadd.f32 %v2360_v45, %v2359_v40  ;;  %v2424_v47 = vpop.f32.mrb[47].mxu1 }
 0x157   : > { %v1608_v48 = vadd.f32 %v2422_v42, %v2358_v38  ;;  %v2425_v49 = vadd.f32 %v2424_v47, %v2423_v44 }
 0x159   : > { %v1731_v50 = vadd.f32 %v1730_v33, %v1608_v48  ;;  %v1754_v51 = vmul.f32 %v1608_v48, %v1608_v48  ;;  %v1611_v52 = vadd.f32 %v2425_v49, %v2361_v46 }
 0x15a   : > { %v2362_v53 = vpop.f32.mrb[48].mxu0 }
 0x15b   : > { %v1769_v54 = vadd.f32 %v1768_v41, %v1754_v51  ;;  %v2157_v55 = vpack.c.bf16 %v1611_v52, %v1608_v48  ;;  %v1732_v56 = vadd.f32 %v1731_v50, %v1611_v52  ;;  %v1755_v57 = vmul.f32 %v1611_v52, %v1611_v52  ;;  %v2426_v58 = vpop.f32.mrb[48].mxu1  ;;  %v2363_v59 = vpop.f32.mrb[49].mxu0 }
 0x15c   : > { %v2364_v60 = vadd.f32 %v2363_v59, %v2362_v53  ;;  %v2427_v61 = vpop.f32.mrb[49].mxu1  ;;  %v2365_v62 = vpop.f32.mrb[50].mxu0 }
 0x15d   : > { %2189 = vst [vmem:[%s2930_s8 + $0x58] sm:$0xff] %v2157_v55   ;;  %v1770_v63 = vadd.f32 %v1769_v54, %v1755_v57  ;;  %v2428_v0 = vadd.f32 %v2427_v61, %v2426_v58  ;;  %v2429_v1 = vpop.f32.mrb[50].mxu1  ;;  %v2366_v2 = vpop.f32.mrb[51].mxu0  ;;  %v959_v54 = vrot.slane %v2939_v36, 4 }
 0x15e   : > { %v2367_v3 = vadd.f32 %v2366_v2, %v2365_v62  ;;  %v2430_v4 = vpop.f32.mrb[51].mxu1 }
 0x15f   : > { %v1616_v5 = vadd.f32 %v2428_v0, %v2364_v60  ;;  %v2431_v6 = vadd.f32 %v2430_v4, %v2429_v1  ;;  %v997_v1 = vrot.slane %v2942_v43, 4 }
 0x161   : > { %v1733_v7 = vadd.f32 %v1732_v56, %v1616_v5  ;;  %v1756_v8 = vmul.f32 %v1616_v5, %v1616_v5  ;;  %v1619_v9 = vadd.f32 %v2431_v6, %v2367_v3  ;;  %v960_v6 = vadd.f32 %v959_v54, %v2939_v36 }
 0x162   : > { %v2368_v10 = vpop.f32.mrb[52].mxu0 }
 0x163   : > { %v1771_v11 = vadd.f32 %v1770_v63, %v1756_v8  ;;  %v2162_v12 = vpack.c.bf16 %v1619_v9, %v1616_v5  ;;  %v1734_v13 = vadd.f32 %v1733_v7, %v1619_v9  ;;  %v1757_v14 = vmul.f32 %v1619_v9, %v1619_v9  ;;  %v2432_v15 = vpop.f32.mrb[52].mxu1  ;;  %v2369_v16 = vpop.f32.mrb[53].mxu0 }
 0x164   : > { %v2370_v17 = vadd.f32 %v2369_v16, %v2368_v10  ;;  %v2433_v18 = vpop.f32.mrb[53].mxu1  ;;  %v2371_v19 = vpop.f32.mrb[54].mxu0 }
 0x165   : > { %2190 = vst [vmem:[%s2930_s8 + $0x60] sm:$0xff] %v2162_v12   ;;  %v1772_v20 = vadd.f32 %v1771_v11, %v1757_v14  ;;  %v2434_v21 = vadd.f32 %v2433_v18, %v2432_v15  ;;  %v2435_v22 = vpop.f32.mrb[54].mxu1  ;;  %v2372_v23 = vpop.f32.mrb[55].mxu0  ;;  %v998_v11 = vadd.f32 %v997_v1, %v2942_v43  ;;  %v961_v15 = vrot.slane %v960_v6, 2 }
 0x166   : > { %v2373_v24 = vadd.f32 %v2372_v23, %v2371_v19  ;;  %v2436_v25 = vpop.f32.mrb[55].mxu1 }
 0x167   : > { %v1624_v26 = vadd.f32 %v2434_v21, %v2370_v17  ;;  %v2437_v27 = vadd.f32 %v2436_v25, %v2435_v22  ;;  %v962_v22 = vadd.f32 %v961_v15, %v960_v6 }
 0x169   : > { %v1735_v28 = vadd.f32 %v1734_v13, %v1624_v26  ;;  %v1758_v29 = vmul.f32 %v1624_v26, %v1624_v26  ;;  %v1627_v30 = vadd.f32 %v2437_v27, %v2373_v24  ;;  %v963_v27 = vrot.slane %v962_v22, 1 }
 0x16a   : > { %v2374_v31 = vpop.f32.mrb[56].mxu0 }
 0x16b   : > { %v1773_v32 = vadd.f32 %v1772_v20, %v1758_v29  ;;  %v2167_v33 = vpack.c.bf16 %v1627_v30, %v1624_v26  ;;  %v1736_v34 = vadd.f32 %v1735_v28, %v1627_v30  ;;  %v1759_v35 = vmul.f32 %v1627_v30, %v1627_v30  ;;  %v2438_v37 = vpop.f32.mrb[56].mxu1  ;;  %v2375_v38 = vpop.f32.mrb[57].mxu0 }
 0x16c   : > { %v2376_v39 = vadd.f32 %v2375_v38, %v2374_v31  ;;  %v2439_v40 = vpop.f32.mrb[57].mxu1  ;;  %v2377_v41 = vpop.f32.mrb[58].mxu0  ;;  %v999_v20 = vrot.slane %v998_v11, 2 }
 0x16d   : > { %2191 = vst [vmem:[%s2930_s8 + $0x68] sm:$0xff] %v2167_v33   ;;  %v1774_v42 = vadd.f32 %v1773_v32, %v1759_v35  ;;  %v2440_v44 = vadd.f32 %v2439_v40, %v2438_v37  ;;  %v2441_v45 = vpop.f32.mrb[58].mxu1  ;;  %v2378_v46 = vpop.f32.mrb[59].mxu0  ;;  %v964_v33 = vadd.f32 %v963_v27, %v962_v22 }
 0x16e   : > { %v2379_v47 = vadd.f32 %v2378_v46, %v2377_v41  ;;  %v2442_v48 = vpop.f32.mrb[59].mxu1  ;;  %v1000_v25 = vadd.f32 %v999_v20, %v998_v11 }
 0x16f   : > { %v1632_v49 = vadd.f32 %v2440_v44, %v2376_v39  ;;  %v2443_v50 = vadd.f32 %v2442_v48, %v2441_v45 }
 0x170   : > { %v1001_v30 = vrot.slane %v1000_v25, 1 }
 0x171   : > { %v1737_v51 = vadd.f32 %v1736_v34, %v1632_v49  ;;  %v1760_v52 = vmul.f32 %v1632_v49, %v1632_v49  ;;  %v1635_v53 = vadd.f32 %v2443_v50, %v2379_v47 }
 0x172   : > { %v2380_v55 = vpop.f32.mrb[60].mxu0  ;;  %v1002_v37 = vadd.f32 %v1001_v30, %v1000_v25 }
 0x173   : > { %v1775_v56 = vadd.f32 %v1774_v42, %v1760_v52  ;;  %v2172_v57 = vpack.c.bf16 %v1635_v53, %v1632_v49  ;;  %v1738_v58 = vadd.f32 %v1737_v51, %v1635_v53  ;;  %v1761_v59 = vmul.f32 %v1635_v53, %v1635_v53  ;;  %v2444_v60 = vpop.f32.mrb[60].mxu1  ;;  %v2381_v61 = vpop.f32.mrb[61].mxu0 }
 0x174   : > { %v2382_v62 = vadd.f32 %v2381_v61, %v2380_v55  ;;  %v2445_v63 = vpop.f32.mrb[61].mxu1  ;;  %v2383_v0 = vpop.f32.mrb[62].mxu0 }
 0x175   : > { %2192 = vst [vmem:[%s2930_s8 + $0x70] sm:$0xff] %v2172_v57   ;;  %v1776_v2 = vadd.f32 %v1775_v56, %v1761_v59  ;;  %v2446_v3 = vadd.f32 %v2445_v63, %v2444_v60  ;;  %v2447_v4 = vpop.f32.mrb[62].mxu1  ;;  %v2384_v5 = vpop.f32.mrb[63].mxu0 }
 0x176   : > { %v2385_v7 = vadd.f32 %v2384_v5, %v2383_v0  ;;  %v2448_v8 = vpop.f32.mrb[63].mxu1 }
 0x177   : > { %v1640_v9 = vadd.f32 %v2446_v3, %v2382_v62  ;;  %v2449_v10 = vadd.f32 %v2448_v8, %v2447_v4 }
 0x179   : > { %v1739_v12 = vadd.f32 %v1738_v58, %v1640_v9  ;;  %v1762_v13 = vmul.f32 %v1640_v9, %v1640_v9  ;;  %v1643_v14 = vadd.f32 %v2449_v10, %v2385_v7 }
 0x17b   : > { %v1777_v16 = vadd.f32 %v1776_v2, %v1762_v13  ;;  %v2177_v17 = vpack.c.bf16 %v1643_v14, %v1640_v9  ;;  %v1740_v18 = vadd.f32 %v1739_v12, %v1643_v14  ;;  %v1763_v19 = vmul.f32 %v1643_v14, %v1643_v14 }
 0x17d   : > { %2193 = vst [vmem:[%s2930_s8 + $0x78] sm:$0xff] %v2177_v17   ;;  %v1741_v21 = vrot.slane %v1740_v18, 4  ;;  %v1778_v36 = vadd.f32 %v1777_v16, %v1763_v19 }
 0x17f   : > { %v1742_v23 = vadd.f32 %v1741_v21, %v1740_v18  ;;  %v1779_v24 = vrot.slane %v1778_v36, 4 }
 0x181   : > { %v1743_v43 = vrot.slane %v1742_v23, 2  ;;  %v1780_v26 = vadd.f32 %v1779_v24, %v1778_v36 }
 0x183   : > { %v1744_v28 = vadd.f32 %v1743_v43, %v1742_v23  ;;  %v1781_v29 = vrot.slane %v1780_v26, 2 }
 0x185   : > { %v1745_v31 = vrot.slane %v1744_v28, 1  ;;  %v1782_v32 = vadd.f32 %v1781_v29, %v1780_v26 }
 0x187   : > { %v1746_v34 = vadd.f32 %v1745_v31, %v1744_v28  ;;  %v1783_v35 = vrot.slane %v1782_v32, 1 }
 0x189   : > { %v1747_v38 = vadd.f32 %v1746_v34, %v964_v33  ;;  %v1784_v39 = vadd.f32 %v1783_v35, %v1782_v32 }
 0x18b   : > { %v1785_v40 = vadd.f32 %v1784_v39, %v1002_v37  ;;  %1786 = vst [vmem:[%s217_s17] sm:$0x1] %v1747_v38 }
 0x18d   : > { %1787 = vst [vmem:[%s220_s20] sm:$0x1] %v1785_v40 }
 0x18e PF: > { %s15_s15 = sadd.s32 1, %s2624_s15  }
 0x18f   : > { %p12_p5 = scmp.ge.s32.totalorder %s15_s15, 4  }
 0x191   :  { %14 = sbr.rel (!%p12_p5) target bundleno = 1 (0x1), region = 82 }

// kernel: cnn_forward.8
= control target key start
LH: loop header
LB: loop body
LE: loop exit
PB: predicated region body
PF: predicated region fallthrough
CT: control target
= control target key end

     0   :  { %s719_s12 = smov 0   ;;  %s950_s0 = inlined_call_operand.vmem [shape: bf16[512,128], index: 0, kind: input, shape index: {}]   ;;  %s951_s1 = inlined_call_operand.vmem [shape: f32[1,128], index: 1, kind: input, shape index: {}]   ;;  %s952_s2 = inlined_call_operand.vmem [shape: f32[1,128], index: 2, kind: input, shape index: {}]   ;;  %s953_s3 = inlined_call_operand.vmem [shape: bf16[128,128], index: 3, kind: output, shape index: {}]  }
   0x1 LB: > { %s658_s13 = sadd.s32 4294967295, %s697_s12   ;;  %p662_p0 = scmp.ge.s32.totalorder %s697_s12, 1  ;;  %s697_s12 = sphi %s719_s12, %s13_s12  }
   0x2   : > { %p138_p1 = scmp.lt.s32.totalorder %s697_s12, 3 }
   0x4   : > { %p139_p2 = pnand %p662_p0, %p138_p1 }
   0x5   : > { %s663_s14 = sshll.u32 (!%p139_p2), %s658_s13, 5  ;;  %v737_v0 = vld [vmem:[%s951_s1] ss:$0 sm:$0xff] (!%p139_p2)  ;;  %vm216_vm0 = vcmask (!%p139_p2), 1041408   ;;  %s785_s23 = sshll.u32 (!%p139_p2), %s658_s13, 3  ;;  %vm233_vm1 = vcmask (!%p139_p2), 1043456  }
   0x6   : > { %142 = sbr.rel (%p139_p2) target bundleno = 101 (0x65), region = 32  ;;  %p163_p3 = scmp.lt.s32.totalorder (!%p139_p2), %s663_s14, 63  ;;  %v744_v6 = vld [vmem:[%s952_s2] ss:$0 sm:$0xff] (!%p139_p2)  ;;  %vm234_vm2 = vsmask.f32 (!%p139_p2), 3328 }
   0x7   : > { %p169_p4 = scmp.lt.s32.totalorder (!%p139_p2), %s785_s23, 15  ;;  %vm847_vm3 = vmand (!%p139_p2), %vm233_vm1, %vm234_vm2  ;;  %vm296_vm4 = vcmask (!%p139_p2), 1043459   ;;  %vm297_vm5 = vsmask.f32 (!%p139_p2), 7950  ;;  %vm354_vm6 = vcmask (!%p139_p2), 1042432   ;;  %vm417_vm10 = vcmask (!%p139_p2), 1043458  }
   0x8   : > { %vm355_vm7 = vsmask.f32 (!%p139_p2), 2304  ;;  %vm889_vm8 = vmand (!%p139_p2), %vm296_vm4, %vm297_vm5  ;;  %vm418_vm11 = vsmask.f32 (!%p139_p2), 7946  ;;  %vm476_vm13 = vsmask.f32 (!%p139_p2), 1280 }
   0x9   : > { %vm356_vm9 = vmand (!%p139_p2), %vm354_vm6, %vm355_vm7  ;;  %vm538_vm15 = vcmask (!%p139_p2), 1043457   ;;  %vm539_vm1 = vsmask.f32 (!%p139_p2), 7942  ;;  %vm596_vm2 = vcmask (!%p139_p2), 1040384  }
   0xa   : > { %vm419_vm12 = vmand (!%p139_p2), %vm417_vm10, %vm418_vm11 }
   0xb   : > { %vm477_vm14 = vmand (!%p139_p2), %vm216_vm0, %vm476_vm13 }
   0xd   : > { %s959_s14 = smov (!%p163_p3, %s663_s14), 63  ;;  %s961_s23 = smov (!%p169_p4, %s785_s23), 15 }
   0xe   : > { %s664_s15 = sshll.u32 %s959_s14, 2  ;;  %s666_s24 = sshll.u32 %s961_s23, 2 }
   0xf   : > { %s732_s18 = scalar_lea.vmem %s950_s0, %s664_s15  ;;  %s838_s27 = scalar_lea.vmem %s953_s3, %s666_s24 }
  0x10   : > { %v176_v1 = vld [vmem:[%s732_s18] ss:$8 sps:$4 sm:$0xff]   ;;  %v178_v2 = vld [vmem:[%s732_s18 + $0x4] sm:$0x8]  ;;  %v484_v13 = vld [vmem:[%s732_s18 + $0x4c] sm:$0xe] }
  0x11   : > { %v181_v3 = vunpack.c.l.bf16 %v176_v1  ;;  %v201_v4 = vunpack.c.l.bf16 %v178_v2  ;;  %v202_v5 = vunpack.c.h.bf16 %v176_v1  ;;  %v754_v14 = vld [vmem:[%s732_s18 + $0x50] sm:$0xff]   ;;  %v177_v17 = vld [vmem:[%s732_s18 + $0x4] sm:$0x7]  ;;  %v498_v19 = vunpack.c.l.bf16 %v484_v13  ;;  %v180_v21 = vld [vmem:[%s732_s18 + $0xc] sm:$0x3] }
  0x12   : > { %v499_v20 = vunpack.c.l.bf16 %v754_v14  ;;  %v182_v24 = vunpack.c.l.bf16 %v177_v17  ;;  %v203_v26 = vunpack.c.l.bf16 %v180_v21  ;;  %v239_v27 = vld [vmem:[%s732_s18 + $0xc] sm:$0xc]  ;;  %v242_v28 = vld [vmem:[%s732_s18 + $0x14] sm:$0xe]  ;;  %v763_v30 = vld [vmem:[%s732_s18 + $0x48] ss:$20 sps:$4 sm:$0xff]  }
  0x13   : > { %v189_v7 = vmul.f32 %v737_v0, %v181_v3  ;;  %v204_v8 = vmul.f32 %v737_v0, %v201_v4  ;;  %v205_v9 = vmul.f32 %v737_v0, %v202_v5  ;;  %v500_v31 = vmul.f32 %v737_v0, %v498_v19  ;;  %v240_v34 = vld [vmem:[%s732_s18 + $0x10] ss:$20 sps:$4 sm:$0xff]   ;;  %v243_v41 = vld [vmem:[%s732_s18 + $0x18] sm:$0xff]   ;;  %v241_v47 = vld [vmem:[%s732_s18 + $0x14] sm:$0x1] }
  0x14   : > { %v501_v32 = vmul.f32 %v737_v0, %v499_v20  ;;  %v190_v33 = vmul.f32 %v737_v0, %v182_v24  ;;  %v206_v35 = vmul.f32 %v737_v0, %v203_v26  ;;  %v244_v37 = vunpack.c.l.bf16 %v239_v27  ;;  %v789_v50 = vld [vmem:[%s732_s18 + $0x58] sm:$0x8]  ;;  %v305_v59 = vld [vmem:[%s732_s18 + $0x20] sm:$0x8]  ;;  %v304_v1 = vld [vmem:[%s732_s18 + $0x20] sm:$0x7] }
  0x15   : > { %v197_v10 = vadd.f32 %v744_v6, %v189_v7  ;;  %v207_v11 = vadd.f32 %v744_v6, %v204_v8  ;;  %v208_v12 = vadd.f32 %v744_v6, %v205_v9  ;;  %v256_v38 = vunpack.c.l.bf16 %v242_v28  ;;  %v307_v7 = vld [vmem:[%s732_s18 + $0x28] sm:$0x3]  ;;  %v360_v17 = vld [vmem:[%s732_s18 + $0x28] sm:$0xc]  ;;  %v820_v26 = vld [vmem:[%s732_s18 + $0x2c] ss:$20 sps:$4 sm:$0xff]  }
  0x16   : > { %v198_v36 = vadd.f32 %v744_v6, %v190_v33  ;;  %v487_v39 = vunpack.c.l.bf16 %v763_v30  ;;  %v209_v40 = vadd.f32 %v744_v6, %v206_v35  ;;  %v245_v42 = vunpack.c.l.bf16 %v240_v34 }
  0x17   : > { %v210_v15 = vmax.f32 %v207_v11, 0.0  ;;  %v211_v16 = vmax.f32 %v208_v12, 0.0  ;;  %v199_v18 = vmax.f32 %v197_v10, 0.0  ;;  %v775_v43 = vadd.f32 %v744_v6, %v500_v31 }
  0x18   : > { %v778_v44 = vadd.f32 %v744_v6, %v501_v32  ;;  %v247_v45 = vmul.f32 %v737_v0, %v244_v37  ;;  %v258_v46 = vmul.f32 %v737_v0, %v256_v38  ;;  %v212_v48 = vmax.f32 %v209_v40, 0.0  ;;  %v363_v38 = vld [vmem:[%s732_s18 + $0x30] sm:$0xe] }
  0x19   : > { %v217_v22 = vrot.slane %v210_v15, 6  ;;  %v218_v23 = vrot.slane %v211_v16, 6  ;;  %v248_v49 = vmul.f32 %v737_v0, %v245_v42  ;;  %v200_v51 = vmax.f32 %v198_v36, 0.0  ;;  %v362_v42 = vld [vmem:[%s732_s18 + $0x30] sm:$0x1] }
  0x1a   : > { %v250_v52 = vadd.f32 %v744_v6, %v247_v45  ;;  %v260_v53 = vadd.f32 %v744_v6, %v258_v46  ;;  %v257_v54 = vunpack.c.l.bf16 %v243_v41  ;;  %v794_v55 = vmul.f32 %v737_v0, %v487_v39  ;;  %v364_v39 = vld [vmem:[%s732_s18 + $0x34] sm:$0xff]  }
  0x1b   : > { %v219_v25 = vsel %vm216_vm0, %v217_v22, %v218_v23  ;;  %v220_v56 = vrot.slane %v212_v48, 6  ;;  %v251_v57 = vadd.f32 %v744_v6, %v248_v49  ;;  %v246_v58 = vunpack.c.l.bf16 %v241_v47 }
  0x1c   : > { %v224_v29 = vmax.f32 %v199_v18, %v219_v25  ;;  %v504_v60 = vmax.f32 %v775_v43, 0.0  ;;  %v505_v61 = vmax.f32 %v778_v44, 0.0  ;;  %v253_v62 = vmax.f32 %v250_v52, 0.0  ;;  %v357_v44 = vld [vmem:[%s838_s27 + $0x8] sm:$0x7] }
  0x1d   : > { %v262_v63 = vmax.f32 %v260_v53, 0.0  ;;  %v558_v2 = vunpack.c.l.bf16 %v789_v50  ;;  %v221_v3 = vsel %vm216_vm0, %v218_v23, %v220_v56  ;;  %v254_v4 = vmax.f32 %v251_v57, 0.0 }
  0x1e   : > { %226 = vst [vmem:[#allocation2] sm:$0xff] %v224_v29  ;;  %v259_v5 = vmul.f32 %v737_v0, %v257_v54  ;;  %v225_v8 = vmax.f32 %v200_v51, %v221_v3  ;;  %v249_v10 = vmul.f32 %v737_v0, %v246_v58  ;;  %v308_v11 = vunpack.c.h.bf16 %v243_v41 }
  0x1f   : > { %v266_v9 = vrot.slane %v262_v63, 6  ;;  %v316_v13 = vunpack.c.l.bf16 %v305_v59  ;;  %v317_v15 = vunpack.c.h.bf16 %v240_v34  ;;  %v309_v16 = vunpack.c.l.bf16 %v304_v1 }
  0x20   : > { %v261_v12 = vadd.f32 %v744_v6, %v259_v5  ;;  %227 = vst [vmem:[#allocation2 + $0x8] sm:$0x3f] %v225_v8  ;;  %v252_v19 = vadd.f32 %v744_v6, %v249_v10  ;;  %v310_v20 = vmul.f32 %v737_v0, %v308_v11  ;;  %v318_v21 = vunpack.c.l.bf16 %v307_v7  ;;  %v236_v8 = vld [vmem:[%s838_s27] sm:$0xf] }
  0x21   : > { %v272_v18 = vmax.f32 %v253_v62, %v266_v9  ;;  %v319_v23 = vmul.f32 %v737_v0, %v316_v13  ;;  %v320_v24 = vmul.f32 %v737_v0, %v317_v15  ;;  %v311_v25 = vmul.f32 %v737_v0, %v309_v16 }
  0x22   : > { %v263_v22 = vmax.f32 %v261_v12, 0.0  ;;  %v255_v27 = vmax.f32 %v252_v19, 0.0  ;;  %v312_v28 = vadd.f32 %v744_v6, %v310_v20  ;;  %v321_v29 = vmul.f32 %v737_v0, %v318_v21 }
  0x23   : > { %v365_v31 = vunpack.c.l.bf16 %v360_v17  ;;  %v322_v33 = vadd.f32 %v744_v6, %v319_v23  ;;  %v323_v34 = vadd.f32 %v744_v6, %v320_v24  ;;  %v313_v35 = vadd.f32 %v744_v6, %v311_v25  ;;  %v426_v17 = vld [vmem:[%s732_s18 + $0x3c] sm:$0x8]  ;;  %v428_v23 = vld [vmem:[%s732_s18 + $0x44] sm:$0x3]  ;;  %v864_v24 = vld [vmem:[%s732_s18 + $0x60] sm:$0x3] }
  0x24   : > { %v267_v32 = vrot.slane %v263_v22, 6  ;;  %v314_v36 = vmax.f32 %v312_v28, 0.0  ;;  %v324_v37 = vadd.f32 %v744_v6, %v321_v29  ;;  %v366_v40 = vunpack.c.l.bf16 %v820_v26 }
  0x25   : > { %v368_v41 = vmul.f32 %v737_v0, %v365_v31  ;;  %v325_v47 = vmax.f32 %v322_v33, 0.0  ;;  %v326_v48 = vmax.f32 %v323_v34, 0.0  ;;  %v315_v51 = vmax.f32 %v313_v35, 0.0 }
  0x26   : > { %v268_v45 = vsel %vm216_vm0, %v266_v9, %v267_v32  ;;  %v274_v46 = vmax.f32 %v255_v27, %v267_v32  ;;  %v327_v52 = vmax.f32 %v324_v37, 0.0  ;;  %v369_v53 = vmul.f32 %v737_v0, %v366_v40  ;;  %v481_v40 = vld [vmem:[%s732_s18 + $0x44] sm:$0xc] }
  0x27   : > { %v273_v49 = vmax.f32 %v254_v4, %v268_v45  ;;  %v228_v54 = vld [vmem:[#allocation2] ss:$2 sm:$0x7f]  ;;  %v230_v56 = vld [vmem:[#allocation2 + $0x1] ss:$2 sm:$0x7f]  ;;  %v842_v57 = vadd.f32 %v744_v6, %v368_v41  ;;  %v377_v58 = vunpack.c.l.bf16 %v363_v38  ;;  %v378_v59 = vunpack.c.l.bf16 %v364_v39 }
  0x28   : > { %v367_v62 = vunpack.c.l.bf16 %v362_v42  ;;  %275 = vst [vmem:[#allocation2 - $0x4] sm:$0xf0] %v272_v18  ;;  %277 = vst [vmem:[#allocation2 + $0xc] sm:$0x3] %v274_v46  ;;  %v231_v63 = vmax.f32 %v228_v54, %v230_v56  ;;  %v331_v1 = vrot.slane %v325_v47, 6  ;;  %v332_v3 = vrot.slane %v326_v48, 6 }
  0x29   : > { %276 = vst [vmem:[#allocation2 + $0x4] sm:$0xff] %v273_v49  ;;  %v334_v4 = vrot.slane %v327_v52, 6  ;;  %v559_v5 = vunpack.c.h.bf16 %v763_v30  ;;  %v372_v9 = vadd.f32 %v744_v6, %v369_v53  ;;  %v379_v10 = vmul.f32 %v737_v0, %v377_v58  ;;  %v425_v18 = vld [vmem:[%s732_s18 + $0x3c] sm:$0x7] }
  0x2a   : > { %v380_v11 = vmul.f32 %v737_v0, %v378_v59  ;;  %v232_v12 = vpack.c.bf16 %v231_v63, %v231_v63  ;;  %v333_v13 = vsel %vm216_vm0, %v331_v1, %v332_v3  ;;  %v370_v16 = vmul.f32 %v737_v0, %v367_v62  ;;  %v483_v63 = vld [vmem:[%s732_s18 + $0x4c] sm:$0x1] }
  0x2b   : > { %v335_v15 = vsel %vm216_vm0, %v332_v3, %v334_v4  ;;  %v338_v19 = vmax.f32 %v314_v36, %v333_v13  ;;  %v374_v21 = vmax.f32 %v842_v57, 0.0  ;;  %v381_v22 = vadd.f32 %v744_v6, %v379_v10 }
  0x2c   : > { %v339_v20 = vmax.f32 %v315_v51, %v335_v15  ;;  %v237_v25 = vsel %vm847_vm3, %v232_v12, %v236_v8  ;;  %v382_v27 = vadd.f32 %v744_v6, %v380_v11  ;;  %v373_v28 = vadd.f32 %v744_v6, %v370_v16  ;;  %v546_v12 = vld [vmem:[%s732_s18 + $0x58] sm:$0x7] }
  0x2d   : > { %v429_v29 = vunpack.c.h.bf16 %v364_v39  ;;  %238 = vst [vmem:[%s838_s27] sm:$0xf] %v237_v25  ;;  %v383_v31 = vmax.f32 %v381_v22, 0.0  ;;  %v437_v32 = vunpack.c.l.bf16 %v426_v17  ;;  %v438_v33 = vunpack.c.h.bf16 %v820_v26 }
  0x2e   : > { %v430_v34 = vunpack.c.l.bf16 %v425_v18  ;;  %v384_v35 = vmax.f32 %v382_v27, 0.0  ;;  %v376_v36 = vmax.f32 %v373_v28, 0.0  ;;  %v439_v38 = vunpack.c.l.bf16 %v428_v23 }
  0x2f   : > { %v431_v37 = vmul.f32 %v737_v0, %v429_v29  ;;  %v560_v41 = vunpack.c.l.bf16 %v864_v24  ;;  %v440_v46 = vmul.f32 %v737_v0, %v437_v32  ;;  %v441_v39 = vmul.f32 %v737_v0, %v438_v33 }
  0x30   : > { %v278_v42 = vld [vmem:[#allocation2] ss:$2 sm:$0x7f]  ;;  %v279_v45 = vld [vmem:[#allocation2 + $0x1] ss:$2 sm:$0x7f]  ;;  %v432_v47 = vmul.f32 %v737_v0, %v430_v34  ;;  %v442_v56 = vmul.f32 %v737_v0, %v439_v38  ;;  %v486_v62 = vunpack.c.l.bf16 %v481_v40  ;;  %v488_v18 = vunpack.c.l.bf16 %v483_v63 }
  0x31   : > { %340 = vst [vmem:[#allocation2] sm:$0xff] %v338_v19  ;;  %341 = vst [vmem:[#allocation2 + $0x8] sm:$0x3f] %v339_v20  ;;  %v375_v26 = vmax.f32 %v372_v9, 0.0  ;;  %v387_v48 = vrot.slane %v383_v31, 6  ;;  %v388_v49 = vrot.slane %v384_v35, 6  ;;  %v280_v51 = vmax.f32 %v278_v42, %v279_v45 }
  0x32   : > { %v433_v52 = vadd.f32 %v744_v6, %v431_v37  ;;  %v443_v53 = vadd.f32 %v744_v6, %v440_v46  ;;  %v444_v54 = vadd.f32 %v744_v6, %v441_v39  ;;  %v434_v59 = vadd.f32 %v744_v6, %v432_v47 }
  0x33   : > { %v389_v57 = vsel %vm216_vm0, %v387_v48, %v388_v49  ;;  %v677_v58 = vpack.c.bf16 %v280_v51, %v280_v51  ;;  %v393_v1 = vmax.f32 %v374_v21, %v387_v48  ;;  %v395_v3 = vmax.f32 %v376_v36, %v388_v49 }
  0x34   : > { %v446_v4 = vmax.f32 %v443_v53, 0.0  ;;  %v447_v7 = vmax.f32 %v444_v54, 0.0  ;;  %v394_v8 = vmax.f32 %v375_v26, %v389_v57  ;;  %v445_v11 = vadd.f32 %v744_v6, %v442_v56  ;;  %v299_v20 = vld [vmem:[%s838_s27] sm:$0x8] }
  0x35   : > { %v286_v9 = vshll.u32 %v677_v58, 16  ;;  %v289_v10 = vshrl.u32 %v677_v58, 16  ;;  %v435_v15 = vmax.f32 %v433_v52, 0.0  ;;  %v436_v22 = vmax.f32 %v434_v59, 0.0 }
  0x36   : > { %v452_v16 = vrot.slane %v446_v4, 6  ;;  %v453_v17 = vrot.slane %v447_v7, 6  ;;  %v448_v23 = vmax.f32 %v445_v11, 0.0  ;;  %v550_v24 = vunpack.c.h.bf16 %v754_v14 }
  0x37   : > { %v288_v19 = vrot.slane %v286_v9, 5  ;;  %v291_v21 = vrot.slane %v289_v10, 4  ;;  %v561_v25 = vmul.f32 %v737_v0, %v558_v2  ;;  %v489_v29 = vmul.f32 %v737_v0, %v486_v62 }
  0x38   : > { %v342_v27 = vld [vmem:[#allocation2] ss:$2 sm:$0x7f]  ;;  %v343_v28 = vld [vmem:[#allocation2 + $0x1] ss:$2 sm:$0x7f]  ;;  %v491_v34 = vmul.f32 %v737_v0, %v488_v18  ;;  %v562_v14 = vmul.f32 %v737_v0, %v559_v5  ;;  %v563_v50 = vmul.f32 %v737_v0, %v560_v41  ;;  %v454_v2 = vsel %vm216_vm0, %v452_v16, %v453_v17 }
  0x39   : > { %396 = vst [vmem:[#allocation2 - $0x4] sm:$0xf0] %v393_v1  ;;  %397 = vst [vmem:[#allocation2 + $0x4] sm:$0xff] %v394_v8  ;;  %v300_v31 = vsel %vm889_vm8, %v288_v19, %v299_v20  ;;  %v292_v32 = vor.u32 %v291_v21, %v288_v19  ;;  %v344_v33 = vmax.f32 %v342_v27, %v343_v28  ;;  %v455_v35 = vrot.slane %v448_v23, 6 }
  0x3a   : > { %398 = vst [vmem:[#allocation2 + $0xc] sm:$0x3] %v395_v3  ;;  %301 = vst [vmem:[%s838_s27] sm:$0x8] %v300_v31  ;;  %v493_v36 = vadd.f32 %v744_v6, %v794_v55  ;;  %v551_v37 = vunpack.c.l.bf16 %v546_v12  ;;  %v508_v42 = vrot.slane %v504_v60, 6  ;;  %v509_v30 = vrot.slane %v505_v61, 6 }
  0x3b   : > { %v293_v38 = vrot.slane %v292_v32, 4  ;;  %v678_v40 = vpack.c.bf16 %v344_v33, %v344_v33  ;;  %v456_v5 = vsel %vm216_vm0, %v453_v17, %v455_v35  ;;  %v492_v41 = vadd.f32 %v744_v6, %v489_v29  ;;  %v478_v33 = vld [vmem:[%s838_s27 + $0x10] sm:$0x3] }
  0x3c   : > { %v459_v46 = vmax.f32 %v435_v15, %v454_v2  ;;  %v460_v39 = vmax.f32 %v436_v22, %v456_v5  ;;  %v494_v55 = vadd.f32 %v744_v6, %v491_v34  ;;  %v564_v47 = vadd.f32 %v744_v6, %v561_v25 }
  0x3d   : > { %302 = vst [vmem:[%s838_s27 + $0x4] sm:$0x7] %v293_v38  ;;  %v349_v45 = vrot.slane %v678_v40, 5  ;;  %v565_v26 = vadd.f32 %v744_v6, %v562_v14  ;;  %v566_v43 = vadd.f32 %v744_v6, %v563_v50  ;;  %v496_v60 = vmax.f32 %v493_v36, 0.0 }
  0x3e   : > { %v510_v48 = vsel %vm216_vm0, %v508_v42, %v509_v30  ;;  %v552_v49 = vmul.f32 %v737_v0, %v550_v24  ;;  %v553_v51 = vmul.f32 %v737_v0, %v551_v37  ;;  %v495_v56 = vmax.f32 %v492_v41, 0.0 }
  0x3f   : > { %v350_v61 = vrot.slane %v349_v45, 4  ;;  %353 = vst [vmem:[%s838_s27 + $0x4] sm:$0x8] %v349_v45  ;;  %v497_v57 = vmax.f32 %v494_v55, 0.0  ;;  %v567_v59 = vmax.f32 %v564_v47, 0.0  ;;  %v568_v62 = vmax.f32 %v565_v26, 0.0 }
  0x40   : > { %v569_v63 = vmax.f32 %v566_v43, 0.0  ;;  %v515_v3 = vmax.f32 %v496_v60, %v510_v48  ;;  %v554_v4 = vadd.f32 %v744_v6, %v552_v49  ;;  %v555_v7 = vadd.f32 %v744_v6, %v553_v51  ;;  %v599_v43 = vld [vmem:[%s838_s27 + $0x18] sm:$0x1] }
  0x41   : > { %v399_v52 = vld [vmem:[#allocation2] ss:$2 sm:$0x7f]  ;;  %v400_v53 = vld [vmem:[#allocation2 + $0x1] ss:$2 sm:$0x7f]  ;;  %v358_v54 = vsel %vm356_vm9, %v350_v61, %v357_v44  ;;  %v514_v0 = vmax.f32 %v495_v56, %v508_v42  ;;  %v516_v8 = vmax.f32 %v497_v57, %v509_v30 }
  0x42   : > { %461 = vst [vmem:[#allocation2] sm:$0xff] %v459_v46  ;;  %462 = vst [vmem:[#allocation2 + $0x8] sm:$0x3f] %v460_v39  ;;  %v401_v58 = vmax.f32 %v399_v52, %v400_v53  ;;  %v573_v11 = vrot.slane %v567_v59, 6  ;;  %v574_v12 = vrot.slane %v568_v62, 6  ;;  %v576_v13 = vrot.slane %v569_v63, 6 }
  0x43   : > { %359 = vst [vmem:[%s838_s27 + $0x8] sm:$0x7] %v358_v54  ;;  %v556_v19 = vmax.f32 %v554_v4, 0.0  ;;  %v557_v20 = vmax.f32 %v555_v7, 0.0  ;;  %vm597_vm3 = vsmask.f32 256 }
  0x44   : > { %v679_v1 = vpack.c.bf16 %v401_v58, %v401_v58  ;;  %v575_v23 = vsel %vm216_vm0, %v573_v11, %v574_v12  ;;  %v577_v24 = vsel %vm216_vm0, %v574_v12, %v576_v13  ;;  %vm540_vm0 = vmand %vm538_vm15, %vm539_vm1 }
  0x45   : > { %v580_v29 = vmax.f32 %v556_v19, %v575_v23  ;;  %v581_v31 = vmax.f32 %v557_v20, %v577_v24  ;;  %vm598_vm4 = vmand %vm596_vm2, %vm597_vm3 }
  0x46   : > { %v407_v9 = vshrl.u32 %v679_v1, 16  ;;  %v410_v10 = vshll.u32 %v679_v1, 16 }
  0x48   : > { %v409_v15 = vrot.slane %v407_v9, 5  ;;  %v412_v16 = vrot.slane %v410_v10, 6 }
  0x49   : > { %v463_v17 = vld [vmem:[#allocation2] ss:$2 sm:$0x7f]  ;;  %v464_v18 = vld [vmem:[#allocation2 + $0x1] ss:$2 sm:$0x7f] }
  0x4a   : > { %518 = vst [vmem:[#allocation2 + $0x4] sm:$0xff] %v515_v3  ;;  %517 = vst [vmem:[#allocation2 - $0x4] sm:$0xf0] %v514_v0  ;;  %v413_v6 = vor.u32 %v412_v16, %v409_v15  ;;  %v420_v21 = vld [vmem:[%s838_s27 + $0x8] sm:$0xc]  ;;  %v465_v22 = vmax.f32 %v463_v17, %v464_v18 }
  0x4b   : > { %519 = vst [vmem:[#allocation2 + $0xc] sm:$0x3] %v516_v8 }
  0x4c   : > { %v421_v25 = vsel %vm419_vm12, %v413_v6, %v420_v21  ;;  %v414_v27 = vrot.slane %v413_v6, 4  ;;  %v680_v28 = vpack.c.bf16 %v465_v22, %v465_v22 }
  0x4d   : > { %422 = vst [vmem:[%s838_s27 + $0x8] sm:$0xc] %v421_v25 }
  0x4e   : > { %423 = vst [vmem:[%s838_s27 + $0xc] sm:$0x3] %v414_v27  ;;  %v470_v32 = vrot.slane %v680_v28, 6 }
  0x50   : > { %v471_v34 = vrot.slane %v470_v32, 4  ;;  %474 = vst [vmem:[%s838_s27 + $0xc] sm:$0xc] %v470_v32 }
  0x52   : > { %v520_v14 = vld [vmem:[#allocation2] ss:$2 sm:$0x7f]  ;;  %v521_v50 = vld [vmem:[#allocation2 + $0x1] ss:$2 sm:$0x7f]  ;;  %v479_v2 = vsel %vm477_vm14, %v471_v34, %v478_v33 }
  0x53   : > { %582 = vst [vmem:[#allocation2] sm:$0xff] %v580_v29  ;;  %583 = vst [vmem:[#allocation2 + $0x8] sm:$0x3f] %v581_v31  ;;  %v522_v35 = vmax.f32 %v520_v14, %v521_v50 }
  0x54   : > { %480 = vst [vmem:[%s838_s27 + $0x10] sm:$0x3] %v479_v2 }
  0x55   : > { %v681_v36 = vpack.c.bf16 %v522_v35, %v522_v35 }
  0x57   : > { %v528_v37 = vshrl.u32 %v681_v36, 16  ;;  %v531_v38 = vshll.u32 %v681_v36, 16 }
  0x59   : > { %v530_v40 = vrot.slane %v528_v37, 6  ;;  %v533_v42 = vrot.slane %v531_v38, 7 }
  0x5a   : > { %v584_v30 = vld [vmem:[#allocation2] ss:$2 sm:$0x7f]  ;;  %v585_v5 = vld [vmem:[#allocation2 + $0x1] ss:$2 sm:$0x7f] }
  0x5b   : > { %v534_v41 = vor.u32 %v533_v42, %v530_v40  ;;  %v541_v45 = vld [vmem:[%s838_s27 + $0x10] sm:$0xe]  ;;  %v586_v46 = vmax.f32 %v584_v30, %v585_v5 }
  0x5d   : > { %v542_v39 = vsel %vm540_vm0, %v534_v41, %v541_v45  ;;  %v535_v55 = vrot.slane %v534_v41, 4  ;;  %v682_v47 = vpack.c.bf16 %v586_v46, %v586_v46 }
  0x5e   : > { %543 = vst [vmem:[%s838_s27 + $0x10] sm:$0xe] %v542_v39 }
  0x5f   : > { %544 = vst [vmem:[%s838_s27 + $0x14] sm:$0x1] %v535_v55  ;;  %v591_v26 = vrot.slane %v682_v47, 7 }
  0x61   : > { %v592_v44 = vrot.slane %v591_v26, 4  ;;  %595 = vst [vmem:[%s838_s27 + $0x14] sm:$0xe] %v591_v26 }
  0x63   : > { %v600_v60 = vsel %vm598_vm4, %v592_v44, %v599_v43 }
  0x64   : > { %601 = vst [vmem:[%s838_s27 + $0x18] sm:$0x1] %v600_v60 }
  0x65 PF: > { %s13_s12 = sadd.s32 1, %s697_s12  }
  0x66   : > { %p10_p5 = scmp.ge.s32.totalorder %s13_s12, 4  }
  0x68   :  { %12 = sbr.rel (!%p10_p5) target bundleno = 1 (0x1), region = 63 }

// kernel: cnn_forward.9
= control target key start
LH: loop header
LB: loop body
LE: loop exit
PB: predicated region body
PF: predicated region fallthrough
CT: control target
= control target key end

     0   :  { %v287_v28 = vlaneseq  ;;  %v1961_v36 = vmov 1966171168   ;;  %s2412_s0 = inlined_call_operand.vmem [shape: bf16[2,2048], index: 0, kind: input, shape index: {}]   ;;  %s2413_s1 = inlined_call_operand.vmem [shape: bf16[2048,128], index: 1, kind: input, shape index: {}]   ;;  %s2414_s2 = inlined_call_operand.vmem [shape: f32[1,128], index: 2, kind: input, shape index: {}]   ;;  %s2415_s3 = inlined_call_operand.hbm [shape: f32[2,128], index: 3, kind: output, shape index: {}]  }
   0x1   :  { %v1807_v0 = vld [vmem:[%s2413_s1 + $0x40] sm:$0xff]   ;;  %v1811_v4 = vld [vmem:[%s2413_s1 + $0x48] sm:$0xff]   ;;  %v1815_v8 = vld [vmem:[%s2413_s1 + $0x50] sm:$0xff]   ;;  %v285_v37 = vunpack.c.l.s4 %v1961_v36 }
   0x2   :  { %v1808_v1 = vld [vmem:[%s2413_s1 + $0xc0] sm:$0xff]   ;;  %1629 = vmatprep.subr.bf16.mxu0 %v1807_v0  ;;  %v1812_v5 = vld [vmem:[%s2413_s1 + $0xc8] sm:$0xff]   ;;  %v1816_v9 = vld [vmem:[%s2413_s1 + $0xd0] sm:$0xff]   ;;  %v288_v33 = vshrl.u32 %v287_v28, 7 }
   0x3   :  { %v1809_v2 = vld [vmem:[%s2413_s1] sm:$0xff]   ;;  %1651 = vmatprep.subr.bf16.mxu1 %v1808_v1  ;;  %v1813_v6 = vld [vmem:[%s2413_s1 + $0x8] sm:$0xff]   ;;  %v1817_v10 = vld [vmem:[%s2413_s1 + $0x10] sm:$0xff]   ;;  %v286_v40 = vunpack.c.0.s8 %v285_v37 }
   0x4   :  { %v1810_v3 = vld [vmem:[%s2413_s1 + $0x80] sm:$0xff]   ;;  %1630 = vmatpush3.bf16.msra.mxu0 %v1809_v2  ;;  %v1814_v7 = vld [vmem:[%s2413_s1 + $0x88] sm:$0xff]   ;;  %v1818_v11 = vld [vmem:[%s2413_s1 + $0x90] sm:$0xff]  }
   0x5   :  { %1652 = vmatpush3.bf16.msra.mxu1 %v1810_v3  ;;  %1631 = vmatprep.subr.bf16.mxu0 %v1811_v4  ;;  %v1819_v12 = vld [vmem:[%s2413_s1 + $0x58] sm:$0xff]   ;;  %v1823_v16 = vld [vmem:[%s2413_s1 + $0x60] sm:$0xff]   ;;  %v1827_v20 = vld [vmem:[%s2413_s1 + $0x68] sm:$0xff]   ;;  %v2088_v41 = vsub.s32 %v286_v40, %v288_v33 }
   0x6   :  { %1653 = vmatprep.subr.bf16.mxu1 %v1812_v5  ;;  %v1820_v13 = vld [vmem:[%s2413_s1 + $0xd8] sm:$0xff]   ;;  %v1824_v17 = vld [vmem:[%s2413_s1 + $0xe0] sm:$0xff]   ;;  %v1828_v21 = vld [vmem:[%s2413_s1 + $0xe8] sm:$0xff]  }
   0x7   :  { %v1821_v14 = vld [vmem:[%s2413_s1 + $0x18] sm:$0xff]   ;;  %v1825_v18 = vld [vmem:[%s2413_s1 + $0x20] sm:$0xff]   ;;  %v1829_v22 = vld [vmem:[%s2413_s1 + $0x28] sm:$0xff]  }
   0x8   :  { %1632 = vmatpush3.bf16.msra.mxu0 %v1813_v6  ;;  %v1822_v15 = vld [vmem:[%s2413_s1 + $0x98] sm:$0xff]   ;;  %v1826_v19 = vld [vmem:[%s2413_s1 + $0xa0] sm:$0xff]   ;;  %v1830_v23 = vld [vmem:[%s2413_s1 + $0xa8] sm:$0xff]  }
   0x9   :  { %1654 = vmatpush3.bf16.msra.mxu1 %v1814_v7  ;;  %1633 = vmatprep.subr.bf16.mxu0 %v1815_v8  ;;  %v1831_v24 = vld [vmem:[%s2413_s1 + $0x70] sm:$0xff]   ;;  %v1835_v29 = vld [vmem:[%s2413_s1 + $0x78] sm:$0xff]   ;;  %v16_v34 = vld [vmem:[%s2412_s0] sm:$0xff] }
   0xa   :  { %1655 = vmatprep.subr.bf16.mxu1 %v1816_v9  ;;  %v1832_v25 = vld [vmem:[%s2413_s1 + $0xf0] sm:$0xff]   ;;  %v1836_v30 = vld [vmem:[%s2413_s1 + $0xf8] sm:$0xff]   ;;  %v1840_v35 = vld [vmem:[%s2413_s1 + $0x140] sm:$0xff]   ;;  %v283_v39 = vcombine.high %v16_v34, %v16_v34  ;;  %v290_v42 = vrot.slane %v16_v34, %v2088_v41 }
   0xb   :  { %v1833_v26 = vld [vmem:[%s2413_s1 + $0x30] sm:$0xff]   ;;  %v1837_v31 = vld [vmem:[%s2413_s1 + $0x38] sm:$0xff]   ;;  %v1841_v38 = vld [vmem:[%s2413_s1 + $0x1c0] sm:$0xff]  }
   0xc   :  { %1634 = vmatpush3.bf16.msra.mxu0 %v1817_v10  ;;  %v1834_v27 = vld [vmem:[%s2413_s1 + $0xb0] sm:$0xff]   ;;  %v1838_v32 = vld [vmem:[%s2413_s1 + $0xb8] sm:$0xff]   ;;  %v2092_v43 = vrot.slane %v283_v39, %v2088_v41  ;;  %v298_v44 = vcombine.high %v290_v42, %v290_v42  ;;  %v306_v45 = vrot.slane %v290_v42, %v2088_v41  ;;  %v1842_v48 = vld [vmem:[%s2413_s1 + $0x100] sm:$0xff]  }
   0xd   :  { %1656 = vmatpush3.bf16.msra.mxu1 %v1818_v11  ;;  %1635 = vmatprep.subr.bf16.mxu0 %v1819_v12  ;;  %v1844_v51 = vld [vmem:[%s2413_s1 + $0x148] sm:$0xff]   ;;  %v1843_v53 = vld [vmem:[%s2413_s1 + $0x180] sm:$0xff]   ;;  %v1848_v57 = vld [vmem:[%s2413_s1 + $0x150] sm:$0xff]  }
   0xe   :  { %1657 = vmatprep.subr.bf16.mxu1 %v1820_v13  ;;  %v299_v46 = vcombine.high %v2092_v43, %v2092_v43  ;;  %v320_v47 = vrot.slane %v298_v44, %v2088_v41  ;;  %v328_v50 = vcombine.high %v306_v45, %v306_v45  ;;  %v1845_v54 = vld [vmem:[%s2413_s1 + $0x1c8] sm:$0xff]   ;;  %v1849_v59 = vld [vmem:[%s2413_s1 + $0x1d0] sm:$0xff]   ;;  %v1852_v61 = vld [vmem:[%s2413_s1 + $0x158] sm:$0xff]  }
   0xf   :  { %v1846_v56 = vld [vmem:[%s2413_s1 + $0x108] sm:$0xff]   ;;  %v1850_v60 = vld [vmem:[%s2413_s1 + $0x110] sm:$0xff]   ;;  %v1853_v63 = vld [vmem:[%s2413_s1 + $0x1d8] sm:$0xff]  }
  0x10   :  { %1636 = vmatpush3.bf16.msra.mxu0 %v1821_v14  ;;  %v327_v49 = vrot.slane %v299_v46, %v2088_v41  ;;  %1197 = vmatprep.mubr.bf16.mxu0 %v320_v47  ;;  %v330_v52 = vcombine.high %v320_v47, %v320_v47  ;;  %v1847_v58 = vld [vmem:[%s2413_s1 + $0x188] sm:$0xff]   ;;  %v1851_v62 = vld [vmem:[%s2413_s1 + $0x190] sm:$0xff]   ;;  %v1854_v0 = vld [vmem:[%s2413_s1 + $0x118] sm:$0xff]  }
  0x11   :  { %1658 = vmatpush3.bf16.msra.mxu1 %v1822_v15  ;;  %1637 = vmatprep.subr.bf16.mxu0 %v1823_v16  ;;  %v1856_v1 = vld [vmem:[%s2413_s1 + $0x160] sm:$0xff]   ;;  %v1855_v2 = vld [vmem:[%s2413_s1 + $0x198] sm:$0xff]   ;;  %v1860_v5 = vld [vmem:[%s2413_s1 + $0x168] sm:$0xff]  }
  0x12   :  { %1659 = vmatprep.subr.bf16.mxu1 %v1824_v17  ;;  %v331_v55 = vcombine.high %v327_v49, %v327_v49  ;;  %1237 = vmatprep.mubr.bf16.mxu1 %v330_v52  ;;  %v1857_v3 = vld [vmem:[%s2413_s1 + $0x1e0] sm:$0xff]   ;;  %v1861_v7 = vld [vmem:[%s2413_s1 + $0x1e8] sm:$0xff]   ;;  %v1864_v9 = vld [vmem:[%s2413_s1 + $0x170] sm:$0xff]   ;;  %v313_v17 = vrot.slane %v2092_v43, %v2088_v41 }
  0x13   :  { %v1858_v4 = vld [vmem:[%s2413_s1 + $0x120] sm:$0xff]   ;;  %v1862_v8 = vld [vmem:[%s2413_s1 + $0x128] sm:$0xff]   ;;  %v1865_v11 = vld [vmem:[%s2413_s1 + $0x1f0] sm:$0xff]  }
  0x14   :  { %1638 = vmatpush3.bf16.msra.mxu0 %v1825_v18  ;;  %v1859_v6 = vld [vmem:[%s2413_s1 + $0x1a0] sm:$0xff]   ;;  %v1863_v10 = vld [vmem:[%s2413_s1 + $0x1a8] sm:$0xff]   ;;  %v1866_v12 = vld [vmem:[%s2413_s1 + $0x130] sm:$0xff]  }
  0x15   :  { %1660 = vmatpush3.bf16.msra.mxu1 %v1826_v19  ;;  %1639 = vmatprep.subr.bf16.mxu0 %v1827_v20  ;;  %v1868_v13 = vld [vmem:[%s2413_s1 + $0x178] sm:$0xff]   ;;  %v1867_v14 = vld [vmem:[%s2413_s1 + $0x1b0] sm:$0xff]   ;;  %v1872_v18 = vld [vmem:[%s2413_s1 + $0x240] sm:$0xff]  }
  0x16   :  { %1661 = vmatprep.subr.bf16.mxu1 %v1828_v21  ;;  %v1869_v15 = vld [vmem:[%s2413_s1 + $0x1f8] sm:$0xff]   ;;  %v1873_v20 = vld [vmem:[%s2413_s1 + $0x2c0] sm:$0xff]   ;;  %v1879_v28 = vld [vmem:[%s2413_s1 + $0x288] sm:$0xff]  }
  0x17   :  { %v1870_v16 = vld [vmem:[%s2413_s1 + $0x138] sm:$0xff]   ;;  %v1874_v21 = vld [vmem:[%s2413_s1 + $0x200] sm:$0xff]   ;;  %v1892_v39 = vld [vmem:[%s2413_s1 + $0x268] sm:$0xff]  }
  0x18   :  { %1640 = vmatpush3.bf16.msra.mxu0 %v1829_v22  ;;  %v1871_v19 = vld [vmem:[%s2413_s1 + $0x1b8] sm:$0xff]   ;;  %v329_v22 = vcombine.high %v313_v17, %v313_v17  ;;  %v1889_v37 = vld [vmem:[%s2413_s1 + $0x2e0] sm:$0xff]   ;;  %v1893_v42 = vld [vmem:[%s2413_s1 + $0x2e8] sm:$0xff]  }
  0x19   :  { %1662 = vmatpush3.bf16.msra.mxu1 %v1830_v23  ;;  %1641 = vmatprep.subr.bf16.mxu0 %v1831_v24  ;;  %v1876_v23 = vld [vmem:[%s2413_s1 + $0x248] sm:$0xff]   ;;  %v1875_v24 = vld [vmem:[%s2413_s1 + $0x280] sm:$0xff]   ;;  %v1885_v33 = vld [vmem:[%s2413_s1 + $0x2d8] sm:$0xff]  }
  0x1a   :  { %1663 = vmatprep.subr.bf16.mxu1 %v1832_v25  ;;  %v1877_v25 = vld [vmem:[%s2413_s1 + $0x2c8] sm:$0xff]   ;;  %v1886_v34 = vld [vmem:[%s2413_s1 + $0x218] sm:$0xff]   ;;  %v1891_v40 = vld [vmem:[%s2413_s1 + $0x2a0] sm:$0xff]  }
  0x1b   :  { %v1887_v36 = vld [vmem:[%s2413_s1 + $0x298] sm:$0xff]   ;;  %v1894_v43 = vld [vmem:[%s2413_s1 + $0x228] sm:$0xff]   ;;  %v1896_v44 = vld [vmem:[%s2413_s1 + $0x270] sm:$0xff]  }
  0x1c   :  { %1642 = vmatpush3.bf16.msra.mxu0 %v1833_v26  ;;  %v1878_v26 = vld [vmem:[%s2413_s1 + $0x208] sm:$0xff]  }
  0x1d   :  { %1664 = vmatpush3.bf16.msra.mxu1 %v1834_v27  ;;  %1643 = vmatprep.subr.bf16.mxu0 %v1835_v29  ;;  %v1880_v27 = vld [vmem:[%s2413_s1 + $0x250] sm:$0xff]   ;;  %v1895_v46 = vld [vmem:[%s2413_s1 + $0x2a8] sm:$0xff]  }
  0x1e   :  { %1665 = vmatprep.subr.bf16.mxu1 %v1836_v30  ;;  %v1881_v29 = vld [vmem:[%s2413_s1 + $0x2d0] sm:$0xff]  }
  0x1f   :  { %v1882_v30 = vld [vmem:[%s2413_s1 + $0x210] sm:$0xff]  }
  0x20   :  { %1644 = vmatpush3.bf16.msra.mxu0 %v1837_v31  ;;  %v1884_v31 = vld [vmem:[%s2413_s1 + $0x258] sm:$0xff]  }
  0x21   :  { %1666 = vmatpush3.bf16.msra.mxu1 %v1838_v32  ;;  %1673 = vmatprep.subr.bf16.mxu0 %v1840_v35  ;;  %v1883_v32 = vld [vmem:[%s2413_s1 + $0x290] sm:$0xff]   ;;  %v1888_v35 = vld [vmem:[%s2413_s1 + $0x260] sm:$0xff]  }
  0x22   :  { %1695 = vmatprep.subr.bf16.mxu1 %v1841_v38  ;;  %v1890_v38 = vld [vmem:[%s2413_s1 + $0x220] sm:$0xff]  }
  0x23   :  { %1198 = vmatmul.mubr.bf16.vlgmr.msra.gmra.mrb[0].mxu0 %v306_v45  ;;  %v17_v45 = vld [vmem:[%s2412_s0 + $0x8] sm:$0xff] }
  0x24   :  { %1674 = vmatpush3.bf16.msra.mxu0 %v1842_v48  ;;  %1238 = vmatmul.mubr.bf16.vlgmr.msra.gmra.mrb[0].mxu1 %v328_v50  ;;  %v339_v47 = vrot.slane %v17_v45, %v2088_v41  ;;  %v332_v48 = vcombine.high %v17_v45, %v17_v45  ;;  %v1898_v50 = vld [vmem:[%s2413_s1 + $0x230] sm:$0xff]  }
  0x25   :  { %1675 = vmatprep.subr.bf16.mxu0 %v1844_v51  ;;  %1696 = vmatpush3.bf16.msra.mxu1 %v1843_v53  ;;  %v1900_v53 = vld [vmem:[%s2413_s1 + $0x278] sm:$0xff]  }
  0x26   :  { %1277 = vmatprep.mubr.bf16.mxu0 %v327_v49  ;;  %1697 = vmatprep.subr.bf16.mxu1 %v1845_v54  ;;  %v1897_v49 = vld [vmem:[%s2413_s1 + $0x2f0] sm:$0xff]   ;;  %v347_v51 = vcombine.high %v339_v47, %v339_v47  ;;  %v2277_v52 = vrot.slane %v332_v48, %v2088_v41 }
  0x27   :  { %1317 = vmatprep.mubr.bf16.mxu1 %v331_v55  ;;  %v1899_v54 = vld [vmem:[%s2413_s1 + $0x2b0] sm:$0xff]  }
  0x28   :  { %1676 = vmatpush3.bf16.msra.mxu0 %v1846_v56  ;;  %v369_v55 = vrot.slane %v347_v51, %v2088_v41  ;;  %v348_v56 = vcombine.high %v2277_v52, %v2277_v52 }
  0x29   :  { %1677 = vmatprep.subr.bf16.mxu0 %v1848_v57  ;;  %1698 = vmatpush3.bf16.msra.mxu1 %v1847_v58  ;;  %v1901_v57 = vld [vmem:[%s2413_s1 + $0x2f8] sm:$0xff]  }
  0x2a   :  { %1699 = vmatprep.subr.bf16.mxu1 %v1849_v59  ;;  %v1902_v58 = vld [vmem:[%s2413_s1 + $0x238] sm:$0xff]   ;;  %v379_v59 = vcombine.high %v369_v55, %v369_v55 }
  0x2c   :  { %1678 = vmatpush3.bf16.msra.mxu0 %v1850_v60  ;;  %v355_v60 = vrot.slane %v339_v47, %v2088_v41 }
  0x2d   :  { %1679 = vmatprep.subr.bf16.mxu0 %v1852_v61  ;;  %1700 = vmatpush3.bf16.msra.mxu1 %v1851_v62  ;;  %v1904_v61 = vld [vmem:[%s2413_s1 + $0x340] sm:$0xff]   ;;  %v1903_v62 = vld [vmem:[%s2413_s1 + $0x2b8] sm:$0xff]  }
  0x2e   :  { %1701 = vmatprep.subr.bf16.mxu1 %v1853_v63  ;;  %v376_v63 = vrot.slane %v348_v56, %v2088_v41 }
  0x30   :  { %1680 = vmatpush3.bf16.msra.mxu0 %v1854_v0  ;;  %v1905_v0 = vld [vmem:[%s2413_s1 + $0x3c0] sm:$0xff]  }
  0x31   :  { %1681 = vmatprep.subr.bf16.mxu0 %v1856_v1  ;;  %1702 = vmatpush3.bf16.msra.mxu1 %v1855_v2  ;;  %v1906_v1 = vld [vmem:[%s2413_s1 + $0x300] sm:$0xff]   ;;  %v377_v2 = vcombine.high %v355_v60, %v355_v60 }
  0x32   :  { %1703 = vmatprep.subr.bf16.mxu1 %v1857_v3  ;;  %v1908_v3 = vld [vmem:[%s2413_s1 + $0x348] sm:$0xff]  }
  0x34   :  { %1682 = vmatpush3.bf16.msra.mxu0 %v1858_v4  ;;  %v1907_v4 = vld [vmem:[%s2413_s1 + $0x380] sm:$0xff]  }
  0x35   :  { %1683 = vmatprep.subr.bf16.mxu0 %v1860_v5  ;;  %1704 = vmatpush3.bf16.msra.mxu1 %v1859_v6  ;;  %v380_v5 = vcombine.high %v376_v63, %v376_v63  ;;  %v1909_v6 = vld [vmem:[%s2413_s1 + $0x3c8] sm:$0xff]  }
  0x36   :  { %1705 = vmatprep.subr.bf16.mxu1 %v1861_v7  ;;  %v1910_v7 = vld [vmem:[%s2413_s1 + $0x308] sm:$0xff]  }
  0x38   :  { %1684 = vmatpush3.bf16.msra.mxu0 %v1862_v8  ;;  %v1912_v8 = vld [vmem:[%s2413_s1 + $0x350] sm:$0xff]  }
  0x39   :  { %1685 = vmatprep.subr.bf16.mxu0 %v1864_v9  ;;  %1706 = vmatpush3.bf16.msra.mxu1 %v1863_v10  ;;  %v1911_v9 = vld [vmem:[%s2413_s1 + $0x388] sm:$0xff]   ;;  %v1913_v10 = vld [vmem:[%s2413_s1 + $0x3d0] sm:$0xff]  }
  0x3a   :  { %1707 = vmatprep.subr.bf16.mxu1 %v1865_v11  ;;  %v1914_v11 = vld [vmem:[%s2413_s1 + $0x310] sm:$0xff]  }
  0x3c   :  { %1686 = vmatpush3.bf16.msra.mxu0 %v1866_v12  ;;  %v1916_v12 = vld [vmem:[%s2413_s1 + $0x358] sm:$0xff]  }
  0x3d   :  { %1687 = vmatprep.subr.bf16.mxu0 %v1868_v13  ;;  %1708 = vmatpush3.bf16.msra.mxu1 %v1867_v14  ;;  %v1915_v13 = vld [vmem:[%s2413_s1 + $0x390] sm:$0xff]   ;;  %v1917_v14 = vld [vmem:[%s2413_s1 + $0x3d8] sm:$0xff]  }
  0x3e   :  { %1709 = vmatprep.subr.bf16.mxu1 %v1869_v15  ;;  %v1918_v15 = vld [vmem:[%s2413_s1 + $0x318] sm:$0xff]  }
  0x40   :  { %1688 = vmatpush3.bf16.msra.mxu0 %v1870_v16  ;;  %v1920_v16 = vld [vmem:[%s2413_s1 + $0x360] sm:$0xff]  }
  0x41   :  { %1717 = vmatprep.subr.bf16.mxu0 %v1872_v18  ;;  %1710 = vmatpush3.bf16.msra.mxu1 %v1871_v19  ;;  %v1921_v18 = vld [vmem:[%s2413_s1 + $0x3e0] sm:$0xff]  }
  0x42   :  { %1739 = vmatprep.subr.bf16.mxu1 %v1873_v20  ;;  %v1922_v19 = vld [vmem:[%s2413_s1 + $0x320] sm:$0xff]   ;;  %v1924_v20 = vld [vmem:[%s2413_s1 + $0x368] sm:$0xff]  }
  0x43   :  { %1278 = vmatmul.mubr.bf16.vlgmr.msra.gmra.mrb[4].mxu0 %v313_v17  ;;  %v1919_v17 = vld [vmem:[%s2413_s1 + $0x398] sm:$0xff]  }
  0x44   :  { %1718 = vmatpush3.bf16.msra.mxu0 %v1874_v21  ;;  %1318 = vmatmul.mubr.bf16.vlgmr.msra.gmra.mrb[4].mxu1 %v329_v22  ;;  %v1923_v21 = vld [vmem:[%s2413_s1 + $0x3a0] sm:$0xff]   ;;  %v1925_v22 = vld [vmem:[%s2413_s1 + $0x3e8] sm:$0xff]  }
  0x45   :  { %1719 = vmatprep.subr.bf16.mxu0 %v1876_v23  ;;  %1740 = vmatpush3.bf16.msra.mxu1 %v1875_v24  ;;  %v1926_v23 = vld [vmem:[%s2413_s1 + $0x328] sm:$0xff]   ;;  %v1928_v24 = vld [vmem:[%s2413_s1 + $0x370] sm:$0xff]  }
  0x46   :  { %1741 = vmatprep.subr.bf16.mxu1 %v1877_v25  ;;  %1357 = vmatprep.mubr.bf16.mxu0 %v369_v55 }
  0x47   :  { %1397 = vmatprep.mubr.bf16.mxu1 %v379_v59 }
  0x48   :  { %1720 = vmatpush3.bf16.msra.mxu0 %v1878_v26 }
  0x49   :  { %1721 = vmatprep.subr.bf16.mxu0 %v1880_v27  ;;  %1742 = vmatpush3.bf16.msra.mxu1 %v1879_v28 }
  0x4a   :  { %1743 = vmatprep.subr.bf16.mxu1 %v1881_v29 }
  0x4c   :  { %1722 = vmatpush3.bf16.msra.mxu0 %v1882_v30 }
  0x4d   :  { %1723 = vmatprep.subr.bf16.mxu0 %v1884_v31  ;;  %1744 = vmatpush3.bf16.msra.mxu1 %v1883_v32 }
  0x4e   :  { %1745 = vmatprep.subr.bf16.mxu1 %v1885_v33 }
  0x50   :  { %1724 = vmatpush3.bf16.msra.mxu0 %v1886_v34 }
  0x51   :  { %1725 = vmatprep.subr.bf16.mxu0 %v1888_v35  ;;  %1746 = vmatpush3.bf16.msra.mxu1 %v1887_v36 }
  0x52   :  { %1747 = vmatprep.subr.bf16.mxu1 %v1889_v37 }
  0x54   :  { %1726 = vmatpush3.bf16.msra.mxu0 %v1890_v38 }
  0x55   :  { %1727 = vmatprep.subr.bf16.mxu0 %v1892_v39  ;;  %1748 = vmatpush3.bf16.msra.mxu1 %v1891_v40 }
  0x56   :  { %1749 = vmatprep.subr.bf16.mxu1 %v1893_v42 }
  0x58   :  { %1728 = vmatpush3.bf16.msra.mxu0 %v1894_v43 }
  0x59   :  { %1729 = vmatprep.subr.bf16.mxu0 %v1896_v44  ;;  %1750 = vmatpush3.bf16.msra.mxu1 %v1895_v46 }
  0x5a   :  { %1751 = vmatprep.subr.bf16.mxu1 %v1897_v49 }
  0x5c   :  { %1730 = vmatpush3.bf16.msra.mxu0 %v1898_v50 }
  0x5d   :  { %1731 = vmatprep.subr.bf16.mxu0 %v1900_v53  ;;  %1752 = vmatpush3.bf16.msra.mxu1 %v1899_v54 }
  0x5e   :  { %1753 = vmatprep.subr.bf16.mxu1 %v1901_v57 }
  0x60   :  { %1732 = vmatpush3.bf16.msra.mxu0 %v1902_v58 }
  0x61   :  { %1761 = vmatprep.subr.bf16.mxu0 %v1904_v61  ;;  %1754 = vmatpush3.bf16.msra.mxu1 %v1903_v62 }
  0x62   :  { %1783 = vmatprep.subr.bf16.mxu1 %v1905_v0 }
  0x63   :  { %1358 = vmatmul.mubr.bf16.vlgmr.msra.gmra.mrb[8].mxu0 %v355_v60 }
  0x64   :  { %1762 = vmatpush3.bf16.msra.mxu0 %v1906_v1  ;;  %1437 = vmatprep.mubr.bf16.mxu0 %v376_v63 }
  0x65   :  { %1398 = vmatmul.mubr.bf16.vlgmr.msra.gmra.mrb[8].mxu1 %v377_v2  ;;  %1763 = vmatprep.subr.bf16.mxu0 %v1908_v3 }
  0x66   :  { %1784 = vmatpush3.bf16.msra.mxu1 %v1907_v4  ;;  %1477 = vmatprep.mubr.bf16.mxu1 %v380_v5 }
  0x67   :  { %1785 = vmatprep.subr.bf16.mxu1 %v1909_v6 }
  0x68   :  { %1764 = vmatpush3.bf16.msra.mxu0 %v1910_v7 }
  0x69   :  { %1765 = vmatprep.subr.bf16.mxu0 %v1912_v8 }
  0x6a   :  { %1786 = vmatpush3.bf16.msra.mxu1 %v1911_v9 }
  0x6b   :  { %1787 = vmatprep.subr.bf16.mxu1 %v1913_v10 }
  0x6c   :  { %1766 = vmatpush3.bf16.msra.mxu0 %v1914_v11 }
  0x6d   :  { %1767 = vmatprep.subr.bf16.mxu0 %v1916_v12 }
  0x6e   :  { %1788 = vmatpush3.bf16.msra.mxu1 %v1915_v13 }
  0x6f   :  { %1789 = vmatprep.subr.bf16.mxu1 %v1917_v14 }
  0x70   :  { %1768 = vmatpush3.bf16.msra.mxu0 %v1918_v15 }
  0x71   :  { %1769 = vmatprep.subr.bf16.mxu0 %v1920_v16 }
  0x72   :  { %1790 = vmatpush3.bf16.msra.mxu1 %v1919_v17 }
  0x73   :  { %1791 = vmatprep.subr.bf16.mxu1 %v1921_v18 }
  0x74   :  { %1770 = vmatpush3.bf16.msra.mxu0 %v1922_v19 }
  0x75   :  { %1771 = vmatprep.subr.bf16.mxu0 %v1924_v20 }
  0x76   :  { %8 = vsyncpa [#allocation3], 0  ;;  %1792 = vmatpush3.bf16.msra.mxu1 %v1923_v21  ;;  %v1927_v25 = vld [vmem:[%s2413_s1 + $0x3a8] sm:$0xff]   ;;  %v1929_v26 = vld [vmem:[%s2413_s1 + $0x3f0] sm:$0xff]   ;;  %v362_v32 = vrot.slane %v2277_v52, %v2088_v41 }
  0x77   :  { %1793 = vmatprep.subr.bf16.mxu1 %v1925_v22  ;;  %v1930_v27 = vld [vmem:[%s2413_s1 + $0x330] sm:$0xff]   ;;  %v1932_v28 = vld [vmem:[%s2413_s1 + $0x378] sm:$0xff]   ;;  %v1500_v36 = vld [vmem:[%s2414_s2] ss:$0 sm:$0xff] }
  0x78   :  { %1772 = vmatpush3.bf16.msra.mxu0 %v1926_v23  ;;  %v1931_v29 = vld [vmem:[%s2413_s1 + $0x3b0] sm:$0xff]   ;;  %v1933_v30 = vld [vmem:[%s2413_s1 + $0x3f8] sm:$0xff]   ;;  %v378_v34 = vcombine.high %v362_v32, %v362_v32 }
  0x79   :  { %1773 = vmatprep.subr.bf16.mxu0 %v1928_v24  ;;  %v1934_v31 = vld [vmem:[%s2413_s1 + $0x338] sm:$0xff]  }
  0x7a   :  { %1794 = vmatpush3.bf16.msra.mxu1 %v1927_v25  ;;  %v1935_v33 = vld [vmem:[%s2413_s1 + $0x3b8] sm:$0xff]   ;;  %s1962_s1 = smov [#allocation2]  }
  0x7b   :  { %1795 = vmatprep.subr.bf16.mxu1 %v1929_v26  ;;  %s1492_s2 = sshll.u32 %s1962_s1, 4  ;;  %s1493_s2 = int_to_ptr.vmem [resolvable:$true] %s1492_s2 }
  0x7c   :  { %1774 = vmatpush3.bf16.msra.mxu0 %v1930_v27  ;;  %s1937_s28 = scalar_lea.vmem %s1493_s2, 32  ;;  %p1942_p1 = scmp.lt.s32.totalorder %s1493_s2, %s1493_s2 }
  0x7d   :  { %1775 = vmatprep.subr.bf16.mxu0 %v1932_v28  ;;  %p1938_p0 = scmp.ne.s32.totalorder %s1493_s2, %s1937_s28  ;;  %p1943_p2 = scmp.lt.s32.totalorder %s1937_s28, %s1937_s28 }
  0x7e   :  { %1796 = vmatpush3.bf16.msra.mxu1 %v1931_v29 }
  0x7f   :  { %1797 = vmatprep.subr.bf16.mxu1 %v1933_v30  ;;  %p1944_p3 = por %p1943_p2, %p1942_p1 }
  0x80   :  { %1776 = vmatpush3.bf16.msra.mxu0 %v1934_v31 }
  0x81   :  { %p1945_p4 = pnand %p1944_p3, %p1938_p0 }
  0x82   :  { %1798 = vmatpush3.bf16.msra.mxu1 %v1935_v33 }
  0x83   :  { %1438 = vmatmul.mubr.bf16.vlgmr.msra.gmra.mrb[12].mxu0 %v362_v32 }
  0x85   :  { %1478 = vmatmul.mubr.bf16.vlgmr.msra.gmra.mrb[12].mxu1 %v378_v34 }
  0xf6   :  { %v1645_v35 = vpop.f32.mrb[0].mxu0 }
  0xf7   :  { %v1646_v37 = vpop.f32.mrb[1].mxu0  ;;  %v1667_v38 = vpop.f32.mrb[0].mxu1 }
  0xf8   :  { %v1647_v39 = vadd.f32 %v1646_v37, %v1645_v35  ;;  %v1648_v41 = vpop.f32.mrb[2].mxu0  ;;  %v1668_v40 = vpop.f32.mrb[1].mxu1 }
  0xf9   :  { %v1649_v42 = vpop.f32.mrb[3].mxu0  ;;  %v1669_v44 = vadd.f32 %v1668_v40, %v1667_v38  ;;  %v1670_v45 = vpop.f32.mrb[2].mxu1 }
  0xfa   :  { %v1200_v43 = vadd.f32 %v1647_v39, %v1500_v36  ;;  %v1671_v46 = vpop.f32.mrb[3].mxu1 }
  0xfc   :  { %v1240_v47 = vadd.f32 %v1669_v44, %v1200_v43 }
 0x116   :  { %v1689_v48 = vpop.f32.mrb[4].mxu0 }
 0x117   :  { %v1690_v49 = vpop.f32.mrb[5].mxu0  ;;  %v1711_v50 = vpop.f32.mrb[4].mxu1 }
 0x118   :  { %v1691_v51 = vadd.f32 %v1690_v49, %v1689_v48  ;;  %v1692_v52 = vpop.f32.mrb[6].mxu0  ;;  %v1712_v53 = vpop.f32.mrb[5].mxu1 }
 0x119   :  { %v1693_v54 = vpop.f32.mrb[7].mxu0  ;;  %v1713_v56 = vadd.f32 %v1712_v53, %v1711_v50  ;;  %v1714_v57 = vpop.f32.mrb[6].mxu1 }
 0x11a   :  { %v1280_v55 = vadd.f32 %v1691_v51, %v1240_v47  ;;  %v1715_v58 = vpop.f32.mrb[7].mxu1 }
 0x11c   :  { %v1320_v59 = vadd.f32 %v1713_v56, %v1280_v55 }
 0x136   :  { %v1733_v60 = vpop.f32.mrb[8].mxu0 }
 0x137   :  { %v1734_v61 = vpop.f32.mrb[9].mxu0 }
 0x138   :  { %v1755_v62 = vpop.f32.mrb[8].mxu1  ;;  %v1735_v63 = vadd.f32 %v1734_v61, %v1733_v60  ;;  %v1736_v0 = vpop.f32.mrb[10].mxu0 }
 0x139   :  { %v1756_v1 = vpop.f32.mrb[9].mxu1  ;;  %v1737_v2 = vpop.f32.mrb[11].mxu0 }
 0x13a   :  { %v1360_v3 = vadd.f32 %v1735_v63, %v1320_v59  ;;  %v1757_v4 = vadd.f32 %v1756_v1, %v1755_v62  ;;  %v1758_v5 = vpop.f32.mrb[10].mxu1 }
 0x13b   :  { %v1759_v6 = vpop.f32.mrb[11].mxu1 }
 0x13c   :  { %v1400_v7 = vadd.f32 %v1757_v4, %v1360_v3 }
 0x156   :  { %v1777_v8 = vpop.f32.mrb[12].mxu0 }
 0x157   :  { %v1778_v9 = vpop.f32.mrb[13].mxu0 }
 0x158   :  { %v1799_v10 = vpop.f32.mrb[12].mxu1  ;;  %v1779_v11 = vadd.f32 %v1778_v9, %v1777_v8  ;;  %v1780_v12 = vpop.f32.mrb[14].mxu0 }
 0x159   :  { %v1800_v13 = vpop.f32.mrb[13].mxu1  ;;  %v1781_v14 = vpop.f32.mrb[15].mxu0 }
 0x15a   :  { %v1440_v15 = vadd.f32 %v1779_v11, %v1400_v7  ;;  %v1801_v16 = vadd.f32 %v1800_v13, %v1799_v10  ;;  %v1802_v17 = vpop.f32.mrb[14].mxu1 }
 0x15b   :  { %v1803_v18 = vpop.f32.mrb[15].mxu1 }
 0x15c   :  { %v1480_v19 = vadd.f32 %v1801_v16, %v1440_v15 }
 0x15e   :  { %1485 = vst [vmem:[#allocation2] sm:$0x3] %v1480_v19 }
 0x15f   :  { %1948 = shalt.err (!%p1945_p4)
}
 0x160   :  { %s1949_s4 = scalar_lea.hbm %s2415_s3, 32 }
 0x161   :  { %p1950_p5 = scmp.ne.s32.totalorder %s2415_s3, %s1949_s4  ;;  %p1953_p6 = scmp.lt.u32.totalorder %s1949_s4, %s2415_s3 }
 0x163   :  { %p1955_p7 = pnand %p1953_p6, %p1950_p5 }
 0x165   :  { %1958 = shalt.err (!%p1955_p7)
}
 0x166   :  { %1495 = dma.vmem_to_hbm [thread:$0]  %s1493_s2, 32, %s2415_s3, [#allocation3]  }
 0x167   :  { %1959 = dma.done.wait [#allocation3], 32  }
 0x168   :  { %1960 = vsyncadd [#allocation3], 4294967264 }
 0x169   :  { %1499 = vsyncpa [#allocation3], 1 }

</bundles_post_ra>
